<compile_context>
chip_gen: v6e
topology: v6e:2x2x1
jax: 0.10.0
libtpu: 0.0.40
codegen_flags: <defaults>
</compile_context>

<pallas_src>
import math

import jax
import jax.numpy as jnp
from jax.experimental import pallas as pl
from jax.experimental.pallas import tpu as pltpu


# --------------------------------------------------------------------------- #
# In-kernel building blocks.  Activations are (C, B*L) float32 values that the
# compiler keeps in vregs / VMEM for the whole fused kernel.
# --------------------------------------------------------------------------- #

def _relu(y):
    return jnp.maximum(y, 0.0)


def _hardswish(y):
    return y * jnp.clip(y + 3.0, 0.0, 6.0) * (1.0 / 6.0)


def _conv(a, p, *, B, L, k=1, dilation=1, padding=0, causal=False, act=None):
    """Conv1d (+folded BN/bias)(+activation) on a batch-packed (Cin, B*L) value.

    p["w"]: (Cout, Cin)          for k == 1
            (Cout, k*Cin)        im2col weight (tap-major) when Cin % 8 == 0
            (k, Cout, Cin)       per-tap weight otherwise
    p["b"]: (Cout, 1) folded shift (bias and/or eval BatchNorm).
    NOTE: operands are kept f32 to match PyTorch numerics; cast w / patches to
    bf16 here for v6e/v7x MXU peak once the model is roofline-bound.
    """
    w = p["w"][...]
    b = p["b"][...]
    if k == 1:
        y = jnp.dot(w, a, preferred_element_type=jnp.float32) + b
        return y if act is None else act(y)

    cin = a.shape[0]
    pad_l = (k - 1) * dilation if causal else padding   # causal == pad-both + Chomp1d
    pad_r = (k - 1) * dilation - pad_l                   # length-preserving convs only
    # Zero-pad each batch segment in-register (replaces host-side jnp.pad; never
    # leaks data across the batch boundary inside the packed lane axis).
    segs = []
    for g in range(B):
        seg = a[:, g * L:(g + 1) * L]
        parts = []
        if pad_l:
            parts.append(jnp.zeros((cin, pad_l), a.dtype))
        parts.append(seg)
        if pad_r:
            parts.append(jnp.zeros((cin, pad_r), a.dtype))
        segs.append(jnp.concatenate(parts, axis=1) if len(parts) > 1 else seg)

    def tap(t):
        off = t * dilation
        return jnp.concatenate([s[:, off:off + L] for s in segs], axis=1)

    if w.ndim == 2:
        # im2col: all K taps stacked on the sublane axis -> ONE MXU matmul.
        patches = jnp.concatenate([tap(t) for t in range(k)], axis=0)
        y = jnp.dot(w, patches, preferred_element_type=jnp.float32)
    else:
        # Tiny-channel fallback (Cin not a multiple of 8): K-tap accumulate.
        y = None
        for t in range(k):
            part = jnp.dot(w[t], tap(t), preferred_element_type=jnp.float32)
            y = part if y is None else y + part
    y = y + b
    return y if act is None else act(y)


def _tcn(a, blocks, B, L):
    """TemporalConvNet: causal kernel-2 convs, dilation 2**i, eval dropout."""
    for i, blk in enumerate(blocks):
        d = 2 ** i
        out = _conv(a, blk["c1"], B=B, L=L, k=2, dilation=d, causal=True, act=_relu)
        out = _conv(out, blk["c2"], B=B, L=L, k=2, dilation=d, causal=True, act=_relu)
        res = _conv(a, blk["ds"], B=B, L=L) if "ds" in blk else a
        a = _relu(out + res)
    return a


def _stem(a, p, B, L):
    identity = a
    out = _conv(a, p["conv0"], B=B, L=L, act=_relu)                      # Basic k=1
    out = _conv(out, p["conv1"], B=B, L=L, k=3, padding=1, act=_relu)    # Basic k=3
    out = _hardswish(out)
    x1 = _conv(out, p["b1_0"], B=B, L=L, k=3, padding=1, act=_relu)
    x1 = _conv(x1, p["b1_1"], B=B, L=L, k=3, padding=1, act=_relu)
    x2 = _conv(out, p["b2_0"], B=B, L=L, act=_relu)
    x2 = _tcn(x2, p["b2_tcn"], B, L)
    x2 = _conv(x2, p["b2_1"], B=B, L=L, act=_relu)
    cat = jnp.concatenate([x1, x2], axis=0)                  # in-register channel concat
    y = cat * p["bn"]["scale"][...] + p["bn"]["shift"][...]  # eval BatchNorm1d
    return _hardswish(y) + identity                          # dropout = identity


def _inception(a, p, B, L):
    identity = a
    x1 = _conv(_conv(a, p["b1"][0], B=B, L=L), p["b1"][1], B=B, L=L)
    x2 = a
    for q in p["b2"]:
        x2 = _conv(x2, q, B=B, L=L, k=3, padding=1)
    x3 = _conv(_tcn(a, p["b3_tcn"], B, L), p["b3"], B=B, L=L)
    x4 = _conv(_tcn(a, p["b4_tcn"], B, L), p["b4"], B=B, L=L)
    cat = jnp.concatenate([x1, x2, x3, x4], axis=0)
    h = _conv(cat, p["c1"], B=B, L=L)
    out = _conv(h, p["c2"], B=B, L=L)        # eval BN folded into conv2
    return _hardswish(out) + identity        # dropout = identity


def _make_kernel(treedef, B, L):
    def kernel(*refs):
        x_ref, o_ref = refs[0], refs[-1]
        P = jax.tree_util.tree_unflatten(treedef, refs[1:-1])
        # Pack batch into the lane axis: (Cin, B*L).
        a = jnp.concatenate([x_ref[b].astype(jnp.float32) for b in range(B)], axis=1)
        a = _conv(a, P["conv"], B=B, L=L)              # input dropout = identity
        a = _stem(a, P["stem"], B, L)
        for p in P["inception"]:
            a = _inception(a, p, B, L)
        for b in range(B):                             # unpack lanes -> (B, C, L)
            o_ref[b] = a[:, b * L:(b + 1) * L].astype(o_ref.dtype)
    return kernel


def pssp_forward(x, kparams):
    """Whole pssp_inception forward (eval mode) as ONE fused pallas_call."""
    B, _, L = x.shape
    C = kparams["stem"]["bn"]["scale"].shape[0]
    leaves, treedef = jax.tree_util.tree_flatten(kparams)
    return pl.pallas_call(
        _make_kernel(treedef, B, L),
        out_shape=jax.ShapeDtypeStruct((B, C, L), jnp.float32),
        compiler_params=pltpu.CompilerParams(vmem_limit_bytes=32 * 1024 * 1024),
    )(x, *leaves)


# --------------------------------------------------------------------------- #
# Raw parameter init (mirrors the PyTorch module layout).
# --------------------------------------------------------------------------- #

class KeyGen:
    def __init__(self, seed):
        self.key = jax.random.PRNGKey(seed)

    def __call__(self):
        self.key, sub = jax.random.split(self.key)
        return sub


def init_conv(kg, cout, cin, k, bias=True):
    bound = 1.0 / math.sqrt(cin * k)
    w = jax.random.uniform(kg(), (cout, cin, k), jnp.float32, -bound, bound)
    b = jax.random.uniform(kg(), (cout,), jnp.float32, -bound, bound) if bias else None
    return w, b


def init_bn(c):
    return dict(gamma=jnp.ones((c,), jnp.float32), beta=jnp.zeros((c,), jnp.float32),
                mean=jnp.zeros((c,), jnp.float32), var=jnp.ones((c,), jnp.float32),
                eps=1e-5)


def init_basic(kg, cin, cout, k):
    w, _ = init_conv(kg, cout, cin, k, bias=False)
    return dict(w=w, bn=init_bn(cout))


def init_tcn(kg, cin, channel_list, k=2):
    blocks, in_c = [], cin
    for i, out_c in enumerate(channel_list):
        w1, b1 = init_conv(kg, out_c, in_c, k)
        w2, b2 = init_conv(kg, out_c, out_c, k)
        wd, bd = init_conv(kg, out_c, in_c, 1) if in_c != out_c else (None, None)
        blocks.append(dict(w1=w1, b1=b1, w2=w2, b2=b2, wd=wd, bd=bd))
        in_c = out_c
    return blocks


def init_stem(kg, c):
    return dict(
        conv0=init_basic(kg, c, c, 1),
        conv1=init_basic(kg, c, c, 3),
        b1_0=init_basic(kg, c, c // 2, 3),
        b1_1=init_basic(kg, c // 2, c // 2, 3),
        b2_0=init_basic(kg, c, c // 2, 1),
        b2_tcn=init_tcn(kg, c // 2, [c // 4, c // 8]),
        b2_1=init_basic(kg, c // 8, c // 2, 1),
        bn=init_bn(c),
    )


def init_inception(kg, c):
    return dict(
        b1=[init_conv(kg, c, c, 1), init_conv(kg, c, c, 1)],
        b2=[init_conv(kg, c, c, 3) for _ in range(3)],
        b3_tcn=init_tcn(kg, c, [c // 2, c // 4]),
        b3=init_conv(kg, c, c // 4, 1),
        b4_tcn=init_tcn(kg, c, [c // 2, c // 4, c // 8]),
        b4=init_conv(kg, c, c // 8, 1),
        c1=init_conv(kg, 128, c * 4, 1),
        c2=init_conv(kg, c, 128, 1),
        bn=init_bn(c),
    )


def init_model(seed, num_features, num_channels, depth):
    kg = KeyGen(seed)
    return dict(
        conv=init_conv(kg, num_channels, num_features, 1),
        stem=init_stem(kg, num_channels),
        inception=[init_inception(kg, num_channels) for _ in range(depth)],
    )


# --------------------------------------------------------------------------- #
# Host-side folding: bias + eval-mode BatchNorm folded into weights, weights
# reshaped for the in-kernel im2col / per-tap matmul paths.
# --------------------------------------------------------------------------- #

def _fold_conv(w, b=None, bn=None):
    w = w.astype(jnp.float32)
    cout, cin, k = w.shape
    shift = jnp.zeros((cout,), jnp.float32) if b is None else b.astype(jnp.float32)
    if bn is not None:
        s = (bn["gamma"] / jnp.sqrt(bn["var"] + bn["eps"])).astype(jnp.float32)
        w = w * s[:, None, None]
        shift = (shift - bn["mean"]) * s + bn["beta"]
    if k == 1:
        w_eff = w[:, :, 0]                                        # (Cout, Cin)
    elif cin % 8 == 0:
        w_eff = jnp.transpose(w, (0, 2, 1)).reshape(cout, k * cin)  # im2col, tap-major
    else:
        w_eff = jnp.transpose(w, (2, 0, 1))                       # (k, Cout, Cin)
    return {"w": w_eff, "b": shift.reshape(cout, 1)}


def _fold_basic(p):
    return _fold_conv(p["w"], None, p["bn"])


def _fold_bn(bn):
    s = bn["gamma"] / jnp.sqrt(bn["var"] + bn["eps"])
    return {"scale": s.reshape(-1, 1).astype(jnp.float32),
            "shift": (bn["beta"] - bn["mean"] * s).reshape(-1, 1).astype(jnp.float32)}


def _fold_tcn(blocks):
    folded = []
    for blk in blocks:
        d = {"c1": _fold_conv(blk["w1"], blk["b1"]),
             "c2": _fold_conv(blk["w2"], blk["b2"])}
        if blk["wd"] is not None:
            d["ds"] = _fold_conv(blk["wd"], blk["bd"])
        folded.append(d)
    return folded


def fold_params(raw):
    st = raw["stem"]
    kp = {
        "conv": _fold_conv(*raw["conv"]),
        "stem": {
            "conv0": _fold_basic(st["conv0"]),
            "conv1": _fold_basic(st["conv1"]),
            "b1_0": _fold_basic(st["b1_0"]),
            "b1_1": _fold_basic(st["b1_1"]),
            "b2_0": _fold_basic(st["b2_0"]),
            "b2_tcn": _fold_tcn(st["b2_tcn"]),
            "b2_1": _fold_basic(st["b2_1"]),
            "bn": _fold_bn(st["bn"]),
        },
        "inception": [],
    }
    for p in raw["inception"]:
        kp["inception"].append({
            "b1": [_fold_conv(*c) for c in p["b1"]],
            "b2": [_fold_conv(*c) for c in p["b2"]],
            "b3_tcn": _fold_tcn(p["b3_tcn"]),
            "b3": _fold_conv(*p["b3"]),
            "b4_tcn": _fold_tcn(p["b4_tcn"]),
            "b4": _fold_conv(*p["b4"]),
            "c1": _fold_conv(*p["c1"]),
            "c2": _fold_conv(p["c2"][0], p["c2"][1], p["bn"]),   # BN folded into conv2
        })
    return kp


# --------------------------------------------------------------------------- #

if __name__ == "__main__":
    num_features, num_channels, depth = 4, 16, 2
    batch, seq_len = 2, 16

    raw = init_model(seed=0, num_features=num_features,
                     num_channels=num_channels, depth=depth)
    kp = fold_params(raw)

    x = jax.random.normal(jax.random.PRNGKey(0),
                          (batch, num_features, seq_len), jnp.float32)

    fwd = jax.jit(lambda inp: pssp_forward(inp, kp))
    out = fwd(x)
    jax.block_until_ready(out)
    assert out.shape == (batch, num_channels, seq_len), out.shape
    assert bool(jnp.all(jnp.isfinite(out)))
    print("KERNEL_OK")
</pallas_src>

<mosaic_0001>
module attributes {stable_mosaic.version = 11 : i64} {
  func.func @kernel(%arg0: memref<2x4x16xf32, #tpu.memory_space<vmem>>, %arg1: memref<16x1xf32, #tpu.memory_space<vmem>>, %arg2: memref<16x4xf32, #tpu.memory_space<vmem>>, %arg3: memref<16x1xf32, #tpu.memory_space<vmem>>, %arg4: memref<16x16xf32, #tpu.memory_space<vmem>>, %arg5: memref<16x1xf32, #tpu.memory_space<vmem>>, %arg6: memref<16x16xf32, #tpu.memory_space<vmem>>, %arg7: memref<16x1xf32, #tpu.memory_space<vmem>>, %arg8: memref<16x48xf32, #tpu.memory_space<vmem>>, %arg9: memref<16x1xf32, #tpu.memory_space<vmem>>, %arg10: memref<16x48xf32, #tpu.memory_space<vmem>>, %arg11: memref<16x1xf32, #tpu.memory_space<vmem>>, %arg12: memref<16x48xf32, #tpu.memory_space<vmem>>, %arg13: memref<16x1xf32, #tpu.memory_space<vmem>>, %arg14: memref<16x4xf32, #tpu.memory_space<vmem>>, %arg15: memref<8x1xf32, #tpu.memory_space<vmem>>, %arg16: memref<8x32xf32, #tpu.memory_space<vmem>>, %arg17: memref<8x1xf32, #tpu.memory_space<vmem>>, %arg18: memref<8x16xf32, #tpu.memory_space<vmem>>, %arg19: memref<8x1xf32, #tpu.memory_space<vmem>>, %arg20: memref<8x16xf32, #tpu.memory_space<vmem>>, %arg21: memref<4x1xf32, #tpu.memory_space<vmem>>, %arg22: memref<4x16xf32, #tpu.memory_space<vmem>>, %arg23: memref<4x1xf32, #tpu.memory_space<vmem>>, %arg24: memref<2x4x4xf32, #tpu.memory_space<vmem>>, %arg25: memref<4x1xf32, #tpu.memory_space<vmem>>, %arg26: memref<4x8xf32, #tpu.memory_space<vmem>>, %arg27: memref<16x1xf32, #tpu.memory_space<vmem>>, %arg28: memref<16x2xf32, #tpu.memory_space<vmem>>, %arg29: memref<8x1xf32, #tpu.memory_space<vmem>>, %arg30: memref<8x32xf32, #tpu.memory_space<vmem>>, %arg31: memref<8x1xf32, #tpu.memory_space<vmem>>, %arg32: memref<8x16xf32, #tpu.memory_space<vmem>>, %arg33: memref<8x1xf32, #tpu.memory_space<vmem>>, %arg34: memref<8x16xf32, #tpu.memory_space<vmem>>, %arg35: memref<4x1xf32, #tpu.memory_space<vmem>>, %arg36: memref<4x16xf32, #tpu.memory_space<vmem>>, %arg37: memref<4x1xf32, #tpu.memory_space<vmem>>, %arg38: memref<2x4x4xf32, #tpu.memory_space<vmem>>, %arg39: memref<4x1xf32, #tpu.memory_space<vmem>>, %arg40: memref<4x8xf32, #tpu.memory_space<vmem>>, %arg41: memref<2x1xf32, #tpu.memory_space<vmem>>, %arg42: memref<2x2x4xf32, #tpu.memory_space<vmem>>, %arg43: memref<2x1xf32, #tpu.memory_space<vmem>>, %arg44: memref<2x2x2xf32, #tpu.memory_space<vmem>>, %arg45: memref<2x1xf32, #tpu.memory_space<vmem>>, %arg46: memref<2x4xf32, #tpu.memory_space<vmem>>, %arg47: memref<128x1xf32, #tpu.memory_space<vmem>>, %arg48: memref<128x64xf32, #tpu.memory_space<vmem>>, %arg49: memref<16x1xf32, #tpu.memory_space<vmem>>, %arg50: memref<16x128xf32, #tpu.memory_space<vmem>>, %arg51: memref<16x1xf32, #tpu.memory_space<vmem>>, %arg52: memref<16x16xf32, #tpu.memory_space<vmem>>, %arg53: memref<16x1xf32, #tpu.memory_space<vmem>>, %arg54: memref<16x16xf32, #tpu.memory_space<vmem>>, %arg55: memref<16x1xf32, #tpu.memory_space<vmem>>, %arg56: memref<16x48xf32, #tpu.memory_space<vmem>>, %arg57: memref<16x1xf32, #tpu.memory_space<vmem>>, %arg58: memref<16x48xf32, #tpu.memory_space<vmem>>, %arg59: memref<16x1xf32, #tpu.memory_space<vmem>>, %arg60: memref<16x48xf32, #tpu.memory_space<vmem>>, %arg61: memref<16x1xf32, #tpu.memory_space<vmem>>, %arg62: memref<16x4xf32, #tpu.memory_space<vmem>>, %arg63: memref<8x1xf32, #tpu.memory_space<vmem>>, %arg64: memref<8x32xf32, #tpu.memory_space<vmem>>, %arg65: memref<8x1xf32, #tpu.memory_space<vmem>>, %arg66: memref<8x16xf32, #tpu.memory_space<vmem>>, %arg67: memref<8x1xf32, #tpu.memory_space<vmem>>, %arg68: memref<8x16xf32, #tpu.memory_space<vmem>>, %arg69: memref<4x1xf32, #tpu.memory_space<vmem>>, %arg70: memref<4x16xf32, #tpu.memory_space<vmem>>, %arg71: memref<4x1xf32, #tpu.memory_space<vmem>>, %arg72: memref<2x4x4xf32, #tpu.memory_space<vmem>>, %arg73: memref<4x1xf32, #tpu.memory_space<vmem>>, %arg74: memref<4x8xf32, #tpu.memory_space<vmem>>, %arg75: memref<16x1xf32, #tpu.memory_space<vmem>>, %arg76: memref<16x2xf32, #tpu.memory_space<vmem>>, %arg77: memref<8x1xf32, #tpu.memory_space<vmem>>, %arg78: memref<8x32xf32, #tpu.memory_space<vmem>>, %arg79: memref<8x1xf32, #tpu.memory_space<vmem>>, %arg80: memref<8x16xf32, #tpu.memory_space<vmem>>, %arg81: memref<8x1xf32, #tpu.memory_space<vmem>>, %arg82: memref<8x16xf32, #tpu.memory_space<vmem>>, %arg83: memref<4x1xf32, #tpu.memory_space<vmem>>, %arg84: memref<4x16xf32, #tpu.memory_space<vmem>>, %arg85: memref<4x1xf32, #tpu.memory_space<vmem>>, %arg86: memref<2x4x4xf32, #tpu.memory_space<vmem>>, %arg87: memref<4x1xf32, #tpu.memory_space<vmem>>, %arg88: memref<4x8xf32, #tpu.memory_space<vmem>>, %arg89: memref<2x1xf32, #tpu.memory_space<vmem>>, %arg90: memref<2x2x4xf32, #tpu.memory_space<vmem>>, %arg91: memref<2x1xf32, #tpu.memory_space<vmem>>, %arg92: memref<2x2x2xf32, #tpu.memory_space<vmem>>, %arg93: memref<2x1xf32, #tpu.memory_space<vmem>>, %arg94: memref<2x4xf32, #tpu.memory_space<vmem>>, %arg95: memref<128x1xf32, #tpu.memory_space<vmem>>, %arg96: memref<128x64xf32, #tpu.memory_space<vmem>>, %arg97: memref<16x1xf32, #tpu.memory_space<vmem>>, %arg98: memref<16x128xf32, #tpu.memory_space<vmem>>, %arg99: memref<8x1xf32, #tpu.memory_space<vmem>>, %arg100: memref<8x48xf32, #tpu.memory_space<vmem>>, %arg101: memref<8x1xf32, #tpu.memory_space<vmem>>, %arg102: memref<8x24xf32, #tpu.memory_space<vmem>>, %arg103: memref<8x1xf32, #tpu.memory_space<vmem>>, %arg104: memref<8x16xf32, #tpu.memory_space<vmem>>, %arg105: memref<8x1xf32, #tpu.memory_space<vmem>>, %arg106: memref<8x2xf32, #tpu.memory_space<vmem>>, %arg107: memref<4x1xf32, #tpu.memory_space<vmem>>, %arg108: memref<4x16xf32, #tpu.memory_space<vmem>>, %arg109: memref<4x1xf32, #tpu.memory_space<vmem>>, %arg110: memref<2x4x4xf32, #tpu.memory_space<vmem>>, %arg111: memref<4x1xf32, #tpu.memory_space<vmem>>, %arg112: memref<4x8xf32, #tpu.memory_space<vmem>>, %arg113: memref<2x1xf32, #tpu.memory_space<vmem>>, %arg114: memref<2x2x4xf32, #tpu.memory_space<vmem>>, %arg115: memref<2x1xf32, #tpu.memory_space<vmem>>, %arg116: memref<2x2x2xf32, #tpu.memory_space<vmem>>, %arg117: memref<2x1xf32, #tpu.memory_space<vmem>>, %arg118: memref<2x4xf32, #tpu.memory_space<vmem>>, %arg119: memref<16x1xf32, #tpu.memory_space<vmem>>, %arg120: memref<16x1xf32, #tpu.memory_space<vmem>>, %arg121: memref<16x1xf32, #tpu.memory_space<vmem>>, %arg122: memref<16x16xf32, #tpu.memory_space<vmem>>, %arg123: memref<16x1xf32, #tpu.memory_space<vmem>>, %arg124: memref<16x48xf32, #tpu.memory_space<vmem>>, %arg125: memref<2x16x16xf32, #tpu.memory_space<vmem>>) attributes {dimension_semantics = [], scalar_prefetch = 0 : i64, scratch_operands = 0 : i64, tpu.core_type = #tpu.core_type<tc>} {
    %c0 = arith.constant 0 : index
    %c0_0 = arith.constant 0 : index
    %c0_1 = arith.constant 0 : index
    %0 = vector.load %arg0[%c0, %c0_0, %c0_1] : memref<2x4x16xf32, #tpu.memory_space<vmem>>, vector<1x4x16xf32>
    %1 = vector.shape_cast %0 : vector<1x4x16xf32> to vector<4x16xf32>
    %c1 = arith.constant 1 : index
    %c0_2 = arith.constant 0 : index
    %c0_3 = arith.constant 0 : index
    %2 = vector.load %arg0[%c1, %c0_2, %c0_3] : memref<2x4x16xf32, #tpu.memory_space<vmem>>, vector<1x4x16xf32>
    %3 = vector.shape_cast %2 : vector<1x4x16xf32> to vector<4x16xf32>
    %4 = tpu.concatenate %1, %3 in 1 : vector<4x16xf32>, vector<4x16xf32> -> vector<4x32xf32>
    %c0_4 = arith.constant 0 : index
    %c0_5 = arith.constant 0 : index
    %5 = vector.load %arg2[%c0_4, %c0_5] : memref<16x4xf32, #tpu.memory_space<vmem>>, vector<16x4xf32>
    %c0_6 = arith.constant 0 : index
    %c0_7 = arith.constant 0 : index
    %6 = vector.load %arg1[%c0_6, %c0_7] : memref<16x1xf32, #tpu.memory_space<vmem>>, vector<16x1xf32>
    %cst = arith.constant dense<0.000000e+00> : vector<16x32xf32>
    %7 = tpu.matmul %5, %4, %cst {dimension_numbers = #tpu.dot_dimension_numbers<[1], [0], [0], [1], [0, 0, 1, 1], [], []>} : vector<16x4xf32>, vector<4x32xf32>, vector<16x32xf32> -> vector<16x32xf32>
    %8 = vector.broadcast %6 : vector<16x1xf32> to vector<16x32xf32>
    %9 = arith.addf %7, %8 : vector<16x32xf32>
    %c0_8 = arith.constant 0 : index
    %c0_9 = arith.constant 0 : index
    %10 = vector.load %arg122[%c0_8, %c0_9] : memref<16x16xf32, #tpu.memory_space<vmem>>, vector<16x16xf32>
    %c0_10 = arith.constant 0 : index
    %c0_11 = arith.constant 0 : index
    %11 = vector.load %arg121[%c0_10, %c0_11] : memref<16x1xf32, #tpu.memory_space<vmem>>, vector<16x1xf32>
    %cst_12 = arith.constant dense<0.000000e+00> : vector<16x32xf32>
    %12 = tpu.matmul %10, %9, %cst_12 {dimension_numbers = #tpu.dot_dimension_numbers<[1], [0], [0], [1], [0, 0, 1, 1], [], []>} : vector<16x16xf32>, vector<16x32xf32>, vector<16x32xf32> -> vector<16x32xf32>
    %13 = vector.broadcast %11 : vector<16x1xf32> to vector<16x32xf32>
    %14 = arith.addf %12, %13 : vector<16x32xf32>
    %cst_13 = arith.constant 0.000000e+00 : f32
    %15 = vector.broadcast %cst_13 : f32 to vector<16x32xf32>
    %16 = arith.maximumf %14, %15 : vector<16x32xf32>
    %c0_14 = arith.constant 0 : index
    %c0_15 = arith.constant 0 : index
    %17 = vector.load %arg124[%c0_14, %c0_15] : memref<16x48xf32, #tpu.memory_space<vmem>>, vector<16x48xf32>
    %c0_16 = arith.constant 0 : index
    %c0_17 = arith.constant 0 : index
    %18 = vector.load %arg123[%c0_16, %c0_17] : memref<16x1xf32, #tpu.memory_space<vmem>>, vector<16x1xf32>
    %19 = vector.extract_strided_slice %16 {offsets = [0, 0], sizes = [16, 16], strides = [1, 1]} : vector<16x32xf32> to vector<16x16xf32>
    %cst_18 = arith.constant 0.000000e+00 : f32
    %20 = vector.broadcast %cst_18 : f32 to vector<16x1xf32>
    %cst_19 = arith.constant 0.000000e+00 : f32
    %21 = vector.broadcast %cst_19 : f32 to vector<16x1xf32>
    %22 = tpu.concatenate %20, %19, %21 in 1 : vector<16x1xf32>, vector<16x16xf32>, vector<16x1xf32> -> vector<16x18xf32>
    %23 = vector.extract_strided_slice %16 {offsets = [0, 16], sizes = [16, 16], strides = [1, 1]} : vector<16x32xf32> to vector<16x16xf32>
    %cst_20 = arith.constant 0.000000e+00 : f32
    %24 = vector.broadcast %cst_20 : f32 to vector<16x1xf32>
    %cst_21 = arith.constant 0.000000e+00 : f32
    %25 = vector.broadcast %cst_21 : f32 to vector<16x1xf32>
    %26 = tpu.concatenate %24, %23, %25 in 1 : vector<16x1xf32>, vector<16x16xf32>, vector<16x1xf32> -> vector<16x18xf32>
    %27 = vector.extract_strided_slice %22 {offsets = [0, 0], sizes = [16, 16], strides = [1, 1]} : vector<16x18xf32> to vector<16x16xf32>
    %28 = vector.extract_strided_slice %26 {offsets = [0, 0], sizes = [16, 16], strides = [1, 1]} : vector<16x18xf32> to vector<16x16xf32>
    %29 = tpu.concatenate %27, %28 in 1 : vector<16x16xf32>, vector<16x16xf32> -> vector<16x32xf32>
    %30 = vector.extract_strided_slice %22 {offsets = [0, 1], sizes = [16, 16], strides = [1, 1]} : vector<16x18xf32> to vector<16x16xf32>
    %31 = vector.extract_strided_slice %26 {offsets = [0, 1], sizes = [16, 16], strides = [1, 1]} : vector<16x18xf32> to vector<16x16xf32>
    %32 = tpu.concatenate %30, %31 in 1 : vector<16x16xf32>, vector<16x16xf32> -> vector<16x32xf32>
    %33 = vector.extract_strided_slice %22 {offsets = [0, 2], sizes = [16, 16], strides = [1, 1]} : vector<16x18xf32> to vector<16x16xf32>
    %34 = vector.extract_strided_slice %26 {offsets = [0, 2], sizes = [16, 16], strides = [1, 1]} : vector<16x18xf32> to vector<16x16xf32>
    %35 = tpu.concatenate %33, %34 in 1 : vector<16x16xf32>, vector<16x16xf32> -> vector<16x32xf32>
    %36 = tpu.concatenate %29, %32, %35 in 0 : vector<16x32xf32>, vector<16x32xf32>, vector<16x32xf32> -> vector<48x32xf32>
    %cst_22 = arith.constant dense<0.000000e+00> : vector<16x32xf32>
    %37 = tpu.matmul %17, %36, %cst_22 {dimension_numbers = #tpu.dot_dimension_numbers<[1], [0], [0], [1], [0, 0, 1, 1], [], []>} : vector<16x48xf32>, vector<48x32xf32>, vector<16x32xf32> -> vector<16x32xf32>
    %38 = vector.broadcast %18 : vector<16x1xf32> to vector<16x32xf32>
    %39 = arith.addf %37, %38 : vector<16x32xf32>
    %cst_23 = arith.constant 0.000000e+00 : f32
    %40 = vector.broadcast %cst_23 : f32 to vector<16x32xf32>
    %41 = arith.maximumf %39, %40 : vector<16x32xf32>
    %cst_24 = arith.constant 3.000000e+00 : f32
    %42 = vector.broadcast %cst_24 : f32 to vector<16x32xf32>
    %43 = arith.addf %41, %42 : vector<16x32xf32>
    %cst_25 = arith.constant 0.000000e+00 : f32
    %cst_26 = arith.constant 6.000000e+00 : f32
    %44 = vector.broadcast %cst_25 : f32 to vector<16x32xf32>
    %45 = arith.maximumf %44, %43 : vector<16x32xf32>
    %46 = vector.broadcast %cst_26 : f32 to vector<16x32xf32>
    %47 = arith.minimumf %46, %45 : vector<16x32xf32>
    %48 = arith.mulf %41, %47 : vector<16x32xf32>
    %cst_27 = arith.constant 0.166666672 : f32
    %49 = vector.broadcast %cst_27 : f32 to vector<16x32xf32>
    %50 = arith.mulf %48, %49 : vector<16x32xf32>
    %c0_28 = arith.constant 0 : index
    %c0_29 = arith.constant 0 : index
    %51 = vector.load %arg100[%c0_28, %c0_29] : memref<8x48xf32, #tpu.memory_space<vmem>>, vector<8x48xf32>
    %c0_30 = arith.constant 0 : index
    %c0_31 = arith.constant 0 : index
    %52 = vector.load %arg99[%c0_30, %c0_31] : memref<8x1xf32, #tpu.memory_space<vmem>>, vector<8x1xf32>
    %53 = vector.extract_strided_slice %50 {offsets = [0, 0], sizes = [16, 16], strides = [1, 1]} : vector<16x32xf32> to vector<16x16xf32>
    %cst_32 = arith.constant 0.000000e+00 : f32
    %54 = vector.broadcast %cst_32 : f32 to vector<16x1xf32>
    %cst_33 = arith.constant 0.000000e+00 : f32
    %55 = vector.broadcast %cst_33 : f32 to vector<16x1xf32>
    %56 = tpu.concatenate %54, %53, %55 in 1 : vector<16x1xf32>, vector<16x16xf32>, vector<16x1xf32> -> vector<16x18xf32>
    %57 = vector.extract_strided_slice %50 {offsets = [0, 16], sizes = [16, 16], strides = [1, 1]} : vector<16x32xf32> to vector<16x16xf32>
    %cst_34 = arith.constant 0.000000e+00 : f32
    %58 = vector.broadcast %cst_34 : f32 to vector<16x1xf32>
    %cst_35 = arith.constant 0.000000e+00 : f32
    %59 = vector.broadcast %cst_35 : f32 to vector<16x1xf32>
    %60 = tpu.concatenate %58, %57, %59 in 1 : vector<16x1xf32>, vector<16x16xf32>, vector<16x1xf32> -> vector<16x18xf32>
    %61 = vector.extract_strided_slice %56 {offsets = [0, 0], sizes = [16, 16], strides = [1, 1]} : vector<16x18xf32> to vector<16x16xf32>
    %62 = vector.extract_strided_slice %60 {offsets = [0, 0], sizes = [16, 16], strides = [1, 1]} : vector<16x18xf32> to vector<16x16xf32>
    %63 = tpu.concatenate %61, %62 in 1 : vector<16x16xf32>, vector<16x16xf32> -> vector<16x32xf32>
    %64 = vector.extract_strided_slice %56 {offsets = [0, 1], sizes = [16, 16], strides = [1, 1]} : vector<16x18xf32> to vector<16x16xf32>
    %65 = vector.extract_strided_slice %60 {offsets = [0, 1], sizes = [16, 16], strides = [1, 1]} : vector<16x18xf32> to vector<16x16xf32>
    %66 = tpu.concatenate %64, %65 in 1 : vector<16x16xf32>, vector<16x16xf32> -> vector<16x32xf32>
    %67 = vector.extract_strided_slice %56 {offsets = [0, 2], sizes = [16, 16], strides = [1, 1]} : vector<16x18xf32> to vector<16x16xf32>
    %68 = vector.extract_strided_slice %60 {offsets = [0, 2], sizes = [16, 16], strides = [1, 1]} : vector<16x18xf32> to vector<16x16xf32>
    %69 = tpu.concatenate %67, %68 in 1 : vector<16x16xf32>, vector<16x16xf32> -> vector<16x32xf32>
    %70 = tpu.concatenate %63, %66, %69 in 0 : vector<16x32xf32>, vector<16x32xf32>, vector<16x32xf32> -> vector<48x32xf32>
    %cst_36 = arith.constant dense<0.000000e+00> : vector<8x32xf32>
    %71 = tpu.matmul %51, %70, %cst_36 {dimension_numbers = #tpu.dot_dimension_numbers<[1], [0], [0], [1], [0, 0, 1, 1], [], []>} : vector<8x48xf32>, vector<48x32xf32>, vector<8x32xf32> -> vector<8x32xf32>
    %72 = vector.broadcast %52 : vector<8x1xf32> to vector<8x32xf32>
    %73 = arith.addf %71, %72 : vector<8x32xf32>
    %cst_37 = arith.constant 0.000000e+00 : f32
    %74 = vector.broadcast %cst_37 : f32 to vector<8x32xf32>
    %75 = arith.maximumf %73, %74 : vector<8x32xf32>
    %c0_38 = arith.constant 0 : index
    %c0_39 = arith.constant 0 : index
    %76 = vector.load %arg102[%c0_38, %c0_39] : memref<8x24xf32, #tpu.memory_space<vmem>>, vector<8x24xf32>
    %c0_40 = arith.constant 0 : index
    %c0_41 = arith.constant 0 : index
    %77 = vector.load %arg101[%c0_40, %c0_41] : memref<8x1xf32, #tpu.memory_space<vmem>>, vector<8x1xf32>
    %78 = vector.extract_strided_slice %75 {offsets = [0, 0], sizes = [8, 16], strides = [1, 1]} : vector<8x32xf32> to vector<8x16xf32>
    %cst_42 = arith.constant 0.000000e+00 : f32
    %79 = vector.broadcast %cst_42 : f32 to vector<8x1xf32>
    %cst_43 = arith.constant 0.000000e+00 : f32
    %80 = vector.broadcast %cst_43 : f32 to vector<8x1xf32>
    %81 = tpu.concatenate %79, %78, %80 in 1 : vector<8x1xf32>, vector<8x16xf32>, vector<8x1xf32> -> vector<8x18xf32>
    %82 = vector.extract_strided_slice %75 {offsets = [0, 16], sizes = [8, 16], strides = [1, 1]} : vector<8x32xf32> to vector<8x16xf32>
    %cst_44 = arith.constant 0.000000e+00 : f32
    %83 = vector.broadcast %cst_44 : f32 to vector<8x1xf32>
    %cst_45 = arith.constant 0.000000e+00 : f32
    %84 = vector.broadcast %cst_45 : f32 to vector<8x1xf32>
    %85 = tpu.concatenate %83, %82, %84 in 1 : vector<8x1xf32>, vector<8x16xf32>, vector<8x1xf32> -> vector<8x18xf32>
    %86 = vector.extract_strided_slice %81 {offsets = [0, 0], sizes = [8, 16], strides = [1, 1]} : vector<8x18xf32> to vector<8x16xf32>
    %87 = vector.extract_strided_slice %85 {offsets = [0, 0], sizes = [8, 16], strides = [1, 1]} : vector<8x18xf32> to vector<8x16xf32>
    %88 = tpu.concatenate %86, %87 in 1 : vector<8x16xf32>, vector<8x16xf32> -> vector<8x32xf32>
    %89 = vector.extract_strided_slice %81 {offsets = [0, 1], sizes = [8, 16], strides = [1, 1]} : vector<8x18xf32> to vector<8x16xf32>
    %90 = vector.extract_strided_slice %85 {offsets = [0, 1], sizes = [8, 16], strides = [1, 1]} : vector<8x18xf32> to vector<8x16xf32>
    %91 = tpu.concatenate %89, %90 in 1 : vector<8x16xf32>, vector<8x16xf32> -> vector<8x32xf32>
    %92 = vector.extract_strided_slice %81 {offsets = [0, 2], sizes = [8, 16], strides = [1, 1]} : vector<8x18xf32> to vector<8x16xf32>
    %93 = vector.extract_strided_slice %85 {offsets = [0, 2], sizes = [8, 16], strides = [1, 1]} : vector<8x18xf32> to vector<8x16xf32>
    %94 = tpu.concatenate %92, %93 in 1 : vector<8x16xf32>, vector<8x16xf32> -> vector<8x32xf32>
    %95 = tpu.concatenate %88, %91, %94 in 0 : vector<8x32xf32>, vector<8x32xf32>, vector<8x32xf32> -> vector<24x32xf32>
    %cst_46 = arith.constant dense<0.000000e+00> : vector<8x32xf32>
    %96 = tpu.matmul %76, %95, %cst_46 {dimension_numbers = #tpu.dot_dimension_numbers<[1], [0], [0], [1], [0, 0, 1, 1], [], []>} : vector<8x24xf32>, vector<24x32xf32>, vector<8x32xf32> -> vector<8x32xf32>
    %97 = vector.broadcast %77 : vector<8x1xf32> to vector<8x32xf32>
    %98 = arith.addf %96, %97 : vector<8x32xf32>
    %cst_47 = arith.constant 0.000000e+00 : f32
    %99 = vector.broadcast %cst_47 : f32 to vector<8x32xf32>
    %100 = arith.maximumf %98, %99 : vector<8x32xf32>
    %c0_48 = arith.constant 0 : index
    %c0_49 = arith.constant 0 : index
    %101 = vector.load %arg104[%c0_48, %c0_49] : memref<8x16xf32, #tpu.memory_space<vmem>>, vector<8x16xf32>
    %c0_50 = arith.constant 0 : index
    %c0_51 = arith.constant 0 : index
    %102 = vector.load %arg103[%c0_50, %c0_51] : memref<8x1xf32, #tpu.memory_space<vmem>>, vector<8x1xf32>
    %cst_52 = arith.constant dense<0.000000e+00> : vector<8x32xf32>
    %103 = tpu.matmul %101, %50, %cst_52 {dimension_numbers = #tpu.dot_dimension_numbers<[1], [0], [0], [1], [0, 0, 1, 1], [], []>} : vector<8x16xf32>, vector<16x32xf32>, vector<8x32xf32> -> vector<8x32xf32>
    %104 = vector.broadcast %102 : vector<8x1xf32> to vector<8x32xf32>
    %105 = arith.addf %103, %104 : vector<8x32xf32>
    %cst_53 = arith.constant 0.000000e+00 : f32
    %106 = vector.broadcast %cst_53 : f32 to vector<8x32xf32>
    %107 = arith.maximumf %105, %106 : vector<8x32xf32>
    %c0_54 = arith.constant 0 : index
    %c0_55 = arith.constant 0 : index
    %108 = vector.load %arg108[%c0_54, %c0_55] : memref<4x16xf32, #tpu.memory_space<vmem>>, vector<4x16xf32>
    %c0_56 = arith.constant 0 : index
    %c0_57 = arith.constant 0 : index
    %109 = vector.load %arg107[%c0_56, %c0_57] : memref<4x1xf32, #tpu.memory_space<vmem>>, vector<4x1xf32>
    %110 = vector.extract_strided_slice %107 {offsets = [0, 0], sizes = [8, 16], strides = [1, 1]} : vector<8x32xf32> to vector<8x16xf32>
    %cst_58 = arith.constant 0.000000e+00 : f32
    %111 = vector.broadcast %cst_58 : f32 to vector<8x1xf32>
    %112 = tpu.concatenate %111, %110 in 1 : vector<8x1xf32>, vector<8x16xf32> -> vector<8x17xf32>
    %113 = vector.extract_strided_slice %107 {offsets = [0, 16], sizes = [8, 16], strides = [1, 1]} : vector<8x32xf32> to vector<8x16xf32>
    %cst_59 = arith.constant 0.000000e+00 : f32
    %114 = vector.broadcast %cst_59 : f32 to vector<8x1xf32>
    %115 = tpu.concatenate %114, %113 in 1 : vector<8x1xf32>, vector<8x16xf32> -> vector<8x17xf32>
    %116 = vector.extract_strided_slice %112 {offsets = [0, 0], sizes = [8, 16], strides = [1, 1]} : vector<8x17xf32> to vector<8x16xf32>
    %117 = vector.extract_strided_slice %115 {offsets = [0, 0], sizes = [8, 16], strides = [1, 1]} : vector<8x17xf32> to vector<8x16xf32>
    %118 = tpu.concatenate %116, %117 in 1 : vector<8x16xf32>, vector<8x16xf32> -> vector<8x32xf32>
    %119 = vector.extract_strided_slice %112 {offsets = [0, 1], sizes = [8, 16], strides = [1, 1]} : vector<8x17xf32> to vector<8x16xf32>
    %120 = vector.extract_strided_slice %115 {offsets = [0, 1], sizes = [8, 16], strides = [1, 1]} : vector<8x17xf32> to vector<8x16xf32>
    %121 = tpu.concatenate %119, %120 in 1 : vector<8x16xf32>, vector<8x16xf32> -> vector<8x32xf32>
    %122 = tpu.concatenate %118, %121 in 0 : vector<8x32xf32>, vector<8x32xf32> -> vector<16x32xf32>
    %cst_60 = arith.constant dense<0.000000e+00> : vector<4x32xf32>
    %123 = tpu.matmul %108, %122, %cst_60 {dimension_numbers = #tpu.dot_dimension_numbers<[1], [0], [0], [1], [0, 0, 1, 1], [], []>} : vector<4x16xf32>, vector<16x32xf32>, vector<4x32xf32> -> vector<4x32xf32>
    %124 = vector.broadcast %109 : vector<4x1xf32> to vector<4x32xf32>
    %125 = arith.addf %123, %124 : vector<4x32xf32>
    %cst_61 = arith.constant 0.000000e+00 : f32
    %126 = vector.broadcast %cst_61 : f32 to vector<4x32xf32>
    %127 = arith.maximumf %125, %126 : vector<4x32xf32>
    %c0_62 = arith.constant 0 : index
    %c0_63 = arith.constant 0 : index
    %c0_64 = arith.constant 0 : index
    %128 = vector.load %arg110[%c0_62, %c0_63, %c0_64] : memref<2x4x4xf32, #tpu.memory_space<vmem>>, vector<2x4x4xf32>
    %c0_65 = arith.constant 0 : index
    %c0_66 = arith.constant 0 : index
    %129 = vector.load %arg109[%c0_65, %c0_66] : memref<4x1xf32, #tpu.memory_space<vmem>>, vector<4x1xf32>
    %130 = vector.extract_strided_slice %127 {offsets = [0, 0], sizes = [4, 16], strides = [1, 1]} : vector<4x32xf32> to vector<4x16xf32>
    %cst_67 = arith.constant 0.000000e+00 : f32
    %131 = vector.broadcast %cst_67 : f32 to vector<4x1xf32>
    %132 = tpu.concatenate %131, %130 in 1 : vector<4x1xf32>, vector<4x16xf32> -> vector<4x17xf32>
    %133 = vector.extract_strided_slice %127 {offsets = [0, 16], sizes = [4, 16], strides = [1, 1]} : vector<4x32xf32> to vector<4x16xf32>
    %cst_68 = arith.constant 0.000000e+00 : f32
    %134 = vector.broadcast %cst_68 : f32 to vector<4x1xf32>
    %135 = tpu.concatenate %134, %133 in 1 : vector<4x1xf32>, vector<4x16xf32> -> vector<4x17xf32>
    %136 = vector.extract_strided_slice %128 {offsets = [0, 0, 0], sizes = [1, 4, 4], strides = [1, 1, 1]} : vector<2x4x4xf32> to vector<1x4x4xf32>
    %137 = vector.shape_cast %136 : vector<1x4x4xf32> to vector<4x4xf32>
    %138 = vector.extract_strided_slice %132 {offsets = [0, 0], sizes = [4, 16], strides = [1, 1]} : vector<4x17xf32> to vector<4x16xf32>
    %139 = vector.extract_strided_slice %135 {offsets = [0, 0], sizes = [4, 16], strides = [1, 1]} : vector<4x17xf32> to vector<4x16xf32>
    %140 = tpu.concatenate %138, %139 in 1 : vector<4x16xf32>, vector<4x16xf32> -> vector<4x32xf32>
    %cst_69 = arith.constant dense<0.000000e+00> : vector<4x32xf32>
    %141 = tpu.matmul %137, %140, %cst_69 {dimension_numbers = #tpu.dot_dimension_numbers<[1], [0], [0], [1], [0, 0, 1, 1], [], []>} : vector<4x4xf32>, vector<4x32xf32>, vector<4x32xf32> -> vector<4x32xf32>
    %142 = vector.extract_strided_slice %128 {offsets = [1, 0, 0], sizes = [1, 4, 4], strides = [1, 1, 1]} : vector<2x4x4xf32> to vector<1x4x4xf32>
    %143 = vector.shape_cast %142 : vector<1x4x4xf32> to vector<4x4xf32>
    %144 = vector.extract_strided_slice %132 {offsets = [0, 1], sizes = [4, 16], strides = [1, 1]} : vector<4x17xf32> to vector<4x16xf32>
    %145 = vector.extract_strided_slice %135 {offsets = [0, 1], sizes = [4, 16], strides = [1, 1]} : vector<4x17xf32> to vector<4x16xf32>
    %146 = tpu.concatenate %144, %145 in 1 : vector<4x16xf32>, vector<4x16xf32> -> vector<4x32xf32>
    %cst_70 = arith.constant dense<0.000000e+00> : vector<4x32xf32>
    %147 = tpu.matmul %143, %146, %cst_70 {dimension_numbers = #tpu.dot_dimension_numbers<[1], [0], [0], [1], [0, 0, 1, 1], [], []>} : vector<4x4xf32>, vector<4x32xf32>, vector<4x32xf32> -> vector<4x32xf32>
    %148 = arith.addf %141, %147 : vector<4x32xf32>
    %149 = vector.broadcast %129 : vector<4x1xf32> to vector<4x32xf32>
    %150 = arith.addf %148, %149 : vector<4x32xf32>
    %cst_71 = arith.constant 0.000000e+00 : f32
    %151 = vector.broadcast %cst_71 : f32 to vector<4x32xf32>
    %152 = arith.maximumf %150, %151 : vector<4x32xf32>
    %c0_72 = arith.constant 0 : index
    %c0_73 = arith.constant 0 : index
    %153 = vector.load %arg112[%c0_72, %c0_73] : memref<4x8xf32, #tpu.memory_space<vmem>>, vector<4x8xf32>
    %c0_74 = arith.constant 0 : index
    %c0_75 = arith.constant 0 : index
    %154 = vector.load %arg111[%c0_74, %c0_75] : memref<4x1xf32, #tpu.memory_space<vmem>>, vector<4x1xf32>
    %cst_76 = arith.constant dense<0.000000e+00> : vector<4x32xf32>
    %155 = tpu.matmul %153, %107, %cst_76 {dimension_numbers = #tpu.dot_dimension_numbers<[1], [0], [0], [1], [0, 0, 1, 1], [], []>} : vector<4x8xf32>, vector<8x32xf32>, vector<4x32xf32> -> vector<4x32xf32>
    %156 = vector.broadcast %154 : vector<4x1xf32> to vector<4x32xf32>
    %157 = arith.addf %155, %156 : vector<4x32xf32>
    %158 = arith.addf %152, %157 : vector<4x32xf32>
    %cst_77 = arith.constant 0.000000e+00 : f32
    %159 = vector.broadcast %cst_77 : f32 to vector<4x32xf32>
    %160 = arith.maximumf %158, %159 : vector<4x32xf32>
    %c0_78 = arith.constant 0 : index
    %c0_79 = arith.constant 0 : index
    %c0_80 = arith.constant 0 : index
    %161 = vector.load %arg114[%c0_78, %c0_79, %c0_80] : memref<2x2x4xf32, #tpu.memory_space<vmem>>, vector<2x2x4xf32>
    %c0_81 = arith.constant 0 : index
    %c0_82 = arith.constant 0 : index
    %162 = vector.load %arg113[%c0_81, %c0_82] : memref<2x1xf32, #tpu.memory_space<vmem>>, vector<2x1xf32>
    %163 = vector.extract_strided_slice %160 {offsets = [0, 0], sizes = [4, 16], strides = [1, 1]} : vector<4x32xf32> to vector<4x16xf32>
    %cst_83 = arith.constant 0.000000e+00 : f32
    %164 = vector.broadcast %cst_83 : f32 to vector<4x2xf32>
    %165 = tpu.concatenate %164, %163 in 1 : vector<4x2xf32>, vector<4x16xf32> -> vector<4x18xf32>
    %166 = vector.extract_strided_slice %160 {offsets = [0, 16], sizes = [4, 16], strides = [1, 1]} : vector<4x32xf32> to vector<4x16xf32>
    %cst_84 = arith.constant 0.000000e+00 : f32
    %167 = vector.broadcast %cst_84 : f32 to vector<4x2xf32>
    %168 = tpu.concatenate %167, %166 in 1 : vector<4x2xf32>, vector<4x16xf32> -> vector<4x18xf32>
    %169 = vector.extract_strided_slice %161 {offsets = [0, 0, 0], sizes = [1, 2, 4], strides = [1, 1, 1]} : vector<2x2x4xf32> to vector<1x2x4xf32>
    %170 = vector.shape_cast %169 : vector<1x2x4xf32> to vector<2x4xf32>
    %171 = vector.extract_strided_slice %165 {offsets = [0, 0], sizes = [4, 16], strides = [1, 1]} : vector<4x18xf32> to vector<4x16xf32>
    %172 = vector.extract_strided_slice %168 {offsets = [0, 0], sizes = [4, 16], strides = [1, 1]} : vector<4x18xf32> to vector<4x16xf32>
    %173 = tpu.concatenate %171, %172 in 1 : vector<4x16xf32>, vector<4x16xf32> -> vector<4x32xf32>
    %cst_85 = arith.constant dense<0.000000e+00> : vector<2x32xf32>
    %174 = tpu.matmul %170, %173, %cst_85 {dimension_numbers = #tpu.dot_dimension_numbers<[1], [0], [0], [1], [0, 0, 1, 1], [], []>} : vector<2x4xf32>, vector<4x32xf32>, vector<2x32xf32> -> vector<2x32xf32>
    %175 = vector.extract_strided_slice %161 {offsets = [1, 0, 0], sizes = [1, 2, 4], strides = [1, 1, 1]} : vector<2x2x4xf32> to vector<1x2x4xf32>
    %176 = vector.shape_cast %175 : vector<1x2x4xf32> to vector<2x4xf32>
    %177 = vector.extract_strided_slice %165 {offsets = [0, 2], sizes = [4, 16], strides = [1, 1]} : vector<4x18xf32> to vector<4x16xf32>
    %178 = vector.extract_strided_slice %168 {offsets = [0, 2], sizes = [4, 16], strides = [1, 1]} : vector<4x18xf32> to vector<4x16xf32>
    %179 = tpu.concatenate %177, %178 in 1 : vector<4x16xf32>, vector<4x16xf32> -> vector<4x32xf32>
    %cst_86 = arith.constant dense<0.000000e+00> : vector<2x32xf32>
    %180 = tpu.matmul %176, %179, %cst_86 {dimension_numbers = #tpu.dot_dimension_numbers<[1], [0], [0], [1], [0, 0, 1, 1], [], []>} : vector<2x4xf32>, vector<4x32xf32>, vector<2x32xf32> -> vector<2x32xf32>
    %181 = arith.addf %174, %180 : vector<2x32xf32>
    %182 = vector.broadcast %162 : vector<2x1xf32> to vector<2x32xf32>
    %183 = arith.addf %181, %182 : vector<2x32xf32>
    %cst_87 = arith.constant 0.000000e+00 : f32
    %184 = vector.broadcast %cst_87 : f32 to vector<2x32xf32>
    %185 = arith.maximumf %183, %184 : vector<2x32xf32>
    %c0_88 = arith.constant 0 : index
    %c0_89 = arith.constant 0 : index
    %c0_90 = arith.constant 0 : index
    %186 = vector.load %arg116[%c0_88, %c0_89, %c0_90] : memref<2x2x2xf32, #tpu.memory_space<vmem>>, vector<2x2x2xf32>
    %c0_91 = arith.constant 0 : index
    %c0_92 = arith.constant 0 : index
    %187 = vector.load %arg115[%c0_91, %c0_92] : memref<2x1xf32, #tpu.memory_space<vmem>>, vector<2x1xf32>
    %188 = vector.extract_strided_slice %185 {offsets = [0, 0], sizes = [2, 16], strides = [1, 1]} : vector<2x32xf32> to vector<2x16xf32>
    %cst_93 = arith.constant 0.000000e+00 : f32
    %189 = vector.broadcast %cst_93 : f32 to vector<2x2xf32>
    %190 = tpu.concatenate %189, %188 in 1 : vector<2x2xf32>, vector<2x16xf32> -> vector<2x18xf32>
    %191 = vector.extract_strided_slice %185 {offsets = [0, 16], sizes = [2, 16], strides = [1, 1]} : vector<2x32xf32> to vector<2x16xf32>
    %cst_94 = arith.constant 0.000000e+00 : f32
    %192 = vector.broadcast %cst_94 : f32 to vector<2x2xf32>
    %193 = tpu.concatenate %192, %191 in 1 : vector<2x2xf32>, vector<2x16xf32> -> vector<2x18xf32>
    %194 = vector.extract_strided_slice %186 {offsets = [0, 0, 0], sizes = [1, 2, 2], strides = [1, 1, 1]} : vector<2x2x2xf32> to vector<1x2x2xf32>
    %195 = vector.shape_cast %194 : vector<1x2x2xf32> to vector<2x2xf32>
    %196 = vector.extract_strided_slice %190 {offsets = [0, 0], sizes = [2, 16], strides = [1, 1]} : vector<2x18xf32> to vector<2x16xf32>
    %197 = vector.extract_strided_slice %193 {offsets = [0, 0], sizes = [2, 16], strides = [1, 1]} : vector<2x18xf32> to vector<2x16xf32>
    %198 = tpu.concatenate %196, %197 in 1 : vector<2x16xf32>, vector<2x16xf32> -> vector<2x32xf32>
    %cst_95 = arith.constant dense<0.000000e+00> : vector<2x32xf32>
    %199 = tpu.matmul %195, %198, %cst_95 {dimension_numbers = #tpu.dot_dimension_numbers<[1], [0], [0], [1], [0, 0, 1, 1], [], []>} : vector<2x2xf32>, vector<2x32xf32>, vector<2x32xf32> -> vector<2x32xf32>
    %200 = vector.extract_strided_slice %186 {offsets = [1, 0, 0], sizes = [1, 2, 2], strides = [1, 1, 1]} : vector<2x2x2xf32> to vector<1x2x2xf32>
    %201 = vector.shape_cast %200 : vector<1x2x2xf32> to vector<2x2xf32>
    %202 = vector.extract_strided_slice %190 {offsets = [0, 2], sizes = [2, 16], strides = [1, 1]} : vector<2x18xf32> to vector<2x16xf32>
    %203 = vector.extract_strided_slice %193 {offsets = [0, 2], sizes = [2, 16], strides = [1, 1]} : vector<2x18xf32> to vector<2x16xf32>
    %204 = tpu.concatenate %202, %203 in 1 : vector<2x16xf32>, vector<2x16xf32> -> vector<2x32xf32>
    %cst_96 = arith.constant dense<0.000000e+00> : vector<2x32xf32>
    %205 = tpu.matmul %201, %204, %cst_96 {dimension_numbers = #tpu.dot_dimension_numbers<[1], [0], [0], [1], [0, 0, 1, 1], [], []>} : vector<2x2xf32>, vector<2x32xf32>, vector<2x32xf32> -> vector<2x32xf32>
    %206 = arith.addf %199, %205 : vector<2x32xf32>
    %207 = vector.broadcast %187 : vector<2x1xf32> to vector<2x32xf32>
    %208 = arith.addf %206, %207 : vector<2x32xf32>
    %cst_97 = arith.constant 0.000000e+00 : f32
    %209 = vector.broadcast %cst_97 : f32 to vector<2x32xf32>
    %210 = arith.maximumf %208, %209 : vector<2x32xf32>
    %c0_98 = arith.constant 0 : index
    %c0_99 = arith.constant 0 : index
    %211 = vector.load %arg118[%c0_98, %c0_99] : memref<2x4xf32, #tpu.memory_space<vmem>>, vector<2x4xf32>
    %c0_100 = arith.constant 0 : index
    %c0_101 = arith.constant 0 : index
    %212 = vector.load %arg117[%c0_100, %c0_101] : memref<2x1xf32, #tpu.memory_space<vmem>>, vector<2x1xf32>
    %cst_102 = arith.constant dense<0.000000e+00> : vector<2x32xf32>
    %213 = tpu.matmul %211, %160, %cst_102 {dimension_numbers = #tpu.dot_dimension_numbers<[1], [0], [0], [1], [0, 0, 1, 1], [], []>} : vector<2x4xf32>, vector<4x32xf32>, vector<2x32xf32> -> vector<2x32xf32>
    %214 = vector.broadcast %212 : vector<2x1xf32> to vector<2x32xf32>
    %215 = arith.addf %213, %214 : vector<2x32xf32>
    %216 = arith.addf %210, %215 : vector<2x32xf32>
    %cst_103 = arith.constant 0.000000e+00 : f32
    %217 = vector.broadcast %cst_103 : f32 to vector<2x32xf32>
    %218 = arith.maximumf %216, %217 : vector<2x32xf32>
    %c0_104 = arith.constant 0 : index
    %c0_105 = arith.constant 0 : index
    %219 = vector.load %arg106[%c0_104, %c0_105] : memref<8x2xf32, #tpu.memory_space<vmem>>, vector<8x2xf32>
    %c0_106 = arith.constant 0 : index
    %c0_107 = arith.constant 0 : index
    %220 = vector.load %arg105[%c0_106, %c0_107] : memref<8x1xf32, #tpu.memory_space<vmem>>, vector<8x1xf32>
    %cst_108 = arith.constant dense<0.000000e+00> : vector<8x32xf32>
    %221 = tpu.matmul %219, %218, %cst_108 {dimension_numbers = #tpu.dot_dimension_numbers<[1], [0], [0], [1], [0, 0, 1, 1], [], []>} : vector<8x2xf32>, vector<2x32xf32>, vector<8x32xf32> -> vector<8x32xf32>
    %222 = vector.broadcast %220 : vector<8x1xf32> to vector<8x32xf32>
    %223 = arith.addf %221, %222 : vector<8x32xf32>
    %cst_109 = arith.constant 0.000000e+00 : f32
    %224 = vector.broadcast %cst_109 : f32 to vector<8x32xf32>
    %225 = arith.maximumf %223, %224 : vector<8x32xf32>
    %226 = tpu.concatenate %100, %225 in 0 : vector<8x32xf32>, vector<8x32xf32> -> vector<16x32xf32>
    %c0_110 = arith.constant 0 : index
    %c0_111 = arith.constant 0 : index
    %227 = vector.load %arg119[%c0_110, %c0_111] : memref<16x1xf32, #tpu.memory_space<vmem>>, vector<16x1xf32>
    %228 = vector.broadcast %227 : vector<16x1xf32> to vector<16x32xf32>
    %229 = arith.mulf %226, %228 : vector<16x32xf32>
    %c0_112 = arith.constant 0 : index
    %c0_113 = arith.constant 0 : index
    %230 = vector.load %arg120[%c0_112, %c0_113] : memref<16x1xf32, #tpu.memory_space<vmem>>, vector<16x1xf32>
    %231 = vector.broadcast %230 : vector<16x1xf32> to vector<16x32xf32>
    %232 = arith.addf %229, %231 : vector<16x32xf32>
    %cst_114 = arith.constant 3.000000e+00 : f32
    %233 = vector.broadcast %cst_114 : f32 to vector<16x32xf32>
    %234 = arith.addf %232, %233 : vector<16x32xf32>
    %cst_115 = arith.constant 0.000000e+00 : f32
    %cst_116 = arith.constant 6.000000e+00 : f32
    %235 = vector.broadcast %cst_115 : f32 to vector<16x32xf32>
    %236 = arith.maximumf %235, %234 : vector<16x32xf32>
    %237 = vector.broadcast %cst_116 : f32 to vector<16x32xf32>
    %238 = arith.minimumf %237, %236 : vector<16x32xf32>
    %239 = arith.mulf %232, %238 : vector<16x32xf32>
    %cst_117 = arith.constant 0.166666672 : f32
    %240 = vector.broadcast %cst_117 : f32 to vector<16x32xf32>
    %241 = arith.mulf %239, %240 : vector<16x32xf32>
    %242 = arith.addf %241, %9 : vector<16x32xf32>
    %c0_118 = arith.constant 0 : index
    %c0_119 = arith.constant 0 : index
    %243 = vector.load %arg4[%c0_118, %c0_119] : memref<16x16xf32, #tpu.memory_space<vmem>>, vector<16x16xf32>
    %c0_120 = arith.constant 0 : index
    %c0_121 = arith.constant 0 : index
    %244 = vector.load %arg3[%c0_120, %c0_121] : memref<16x1xf32, #tpu.memory_space<vmem>>, vector<16x1xf32>
    %cst_122 = arith.constant dense<0.000000e+00> : vector<16x32xf32>
    %245 = tpu.matmul %243, %242, %cst_122 {dimension_numbers = #tpu.dot_dimension_numbers<[1], [0], [0], [1], [0, 0, 1, 1], [], []>} : vector<16x16xf32>, vector<16x32xf32>, vector<16x32xf32> -> vector<16x32xf32>
    %246 = vector.broadcast %244 : vector<16x1xf32> to vector<16x32xf32>
    %247 = arith.addf %245, %246 : vector<16x32xf32>
    %c0_123 = arith.constant 0 : index
    %c0_124 = arith.constant 0 : index
    %248 = vector.load %arg6[%c0_123, %c0_124] : memref<16x16xf32, #tpu.memory_space<vmem>>, vector<16x16xf32>
    %c0_125 = arith.constant 0 : index
    %c0_126 = arith.constant 0 : index
    %249 = vector.load %arg5[%c0_125, %c0_126] : memref<16x1xf32, #tpu.memory_space<vmem>>, vector<16x1xf32>
    %cst_127 = arith.constant dense<0.000000e+00> : vector<16x32xf32>
    %250 = tpu.matmul %248, %247, %cst_127 {dimension_numbers = #tpu.dot_dimension_numbers<[1], [0], [0], [1], [0, 0, 1, 1], [], []>} : vector<16x16xf32>, vector<16x32xf32>, vector<16x32xf32> -> vector<16x32xf32>
    %251 = vector.broadcast %249 : vector<16x1xf32> to vector<16x32xf32>
    %252 = arith.addf %250, %251 : vector<16x32xf32>
    %c0_128 = arith.constant 0 : index
    %c0_129 = arith.constant 0 : index
    %253 = vector.load %arg8[%c0_128, %c0_129] : memref<16x48xf32, #tpu.memory_space<vmem>>, vector<16x48xf32>
    %c0_130 = arith.constant 0 : index
    %c0_131 = arith.constant 0 : index
    %254 = vector.load %arg7[%c0_130, %c0_131] : memref<16x1xf32, #tpu.memory_space<vmem>>, vector<16x1xf32>
    %255 = vector.extract_strided_slice %242 {offsets = [0, 0], sizes = [16, 16], strides = [1, 1]} : vector<16x32xf32> to vector<16x16xf32>
    %cst_132 = arith.constant 0.000000e+00 : f32
    %256 = vector.broadcast %cst_132 : f32 to vector<16x1xf32>
    %cst_133 = arith.constant 0.000000e+00 : f32
    %257 = vector.broadcast %cst_133 : f32 to vector<16x1xf32>
    %258 = tpu.concatenate %256, %255, %257 in 1 : vector<16x1xf32>, vector<16x16xf32>, vector<16x1xf32> -> vector<16x18xf32>
    %259 = vector.extract_strided_slice %242 {offsets = [0, 16], sizes = [16, 16], strides = [1, 1]} : vector<16x32xf32> to vector<16x16xf32>
    %cst_134 = arith.constant 0.000000e+00 : f32
    %260 = vector.broadcast %cst_134 : f32 to vector<16x1xf32>
    %cst_135 = arith.constant 0.000000e+00 : f32
    %261 = vector.broadcast %cst_135 : f32 to vector<16x1xf32>
    %262 = tpu.concatenate %260, %259, %261 in 1 : vector<16x1xf32>, vector<16x16xf32>, vector<16x1xf32> -> vector<16x18xf32>
    %263 = vector.extract_strided_slice %258 {offsets = [0, 0], sizes = [16, 16], strides = [1, 1]} : vector<16x18xf32> to vector<16x16xf32>
    %264 = vector.extract_strided_slice %262 {offsets = [0, 0], sizes = [16, 16], strides = [1, 1]} : vector<16x18xf32> to vector<16x16xf32>
    %265 = tpu.concatenate %263, %264 in 1 : vector<16x16xf32>, vector<16x16xf32> -> vector<16x32xf32>
    %266 = vector.extract_strided_slice %258 {offsets = [0, 1], sizes = [16, 16], strides = [1, 1]} : vector<16x18xf32> to vector<16x16xf32>
    %267 = vector.extract_strided_slice %262 {offsets = [0, 1], sizes = [16, 16], strides = [1, 1]} : vector<16x18xf32> to vector<16x16xf32>
    %268 = tpu.concatenate %266, %267 in 1 : vector<16x16xf32>, vector<16x16xf32> -> vector<16x32xf32>
    %269 = vector.extract_strided_slice %258 {offsets = [0, 2], sizes = [16, 16], strides = [1, 1]} : vector<16x18xf32> to vector<16x16xf32>
    %270 = vector.extract_strided_slice %262 {offsets = [0, 2], sizes = [16, 16], strides = [1, 1]} : vector<16x18xf32> to vector<16x16xf32>
    %271 = tpu.concatenate %269, %270 in 1 : vector<16x16xf32>, vector<16x16xf32> -> vector<16x32xf32>
    %272 = tpu.concatenate %265, %268, %271 in 0 : vector<16x32xf32>, vector<16x32xf32>, vector<16x32xf32> -> vector<48x32xf32>
    %cst_136 = arith.constant dense<0.000000e+00> : vector<16x32xf32>
    %273 = tpu.matmul %253, %272, %cst_136 {dimension_numbers = #tpu.dot_dimension_numbers<[1], [0], [0], [1], [0, 0, 1, 1], [], []>} : vector<16x48xf32>, vector<48x32xf32>, vector<16x32xf32> -> vector<16x32xf32>
    %274 = vector.broadcast %254 : vector<16x1xf32> to vector<16x32xf32>
    %275 = arith.addf %273, %274 : vector<16x32xf32>
    %c0_137 = arith.constant 0 : index
    %c0_138 = arith.constant 0 : index
    %276 = vector.load %arg10[%c0_137, %c0_138] : memref<16x48xf32, #tpu.memory_space<vmem>>, vector<16x48xf32>
    %c0_139 = arith.constant 0 : index
    %c0_140 = arith.constant 0 : index
    %277 = vector.load %arg9[%c0_139, %c0_140] : memref<16x1xf32, #tpu.memory_space<vmem>>, vector<16x1xf32>
    %278 = vector.extract_strided_slice %275 {offsets = [0, 0], sizes = [16, 16], strides = [1, 1]} : vector<16x32xf32> to vector<16x16xf32>
    %cst_141 = arith.constant 0.000000e+00 : f32
    %279 = vector.broadcast %cst_141 : f32 to vector<16x1xf32>
    %cst_142 = arith.constant 0.000000e+00 : f32
    %280 = vector.broadcast %cst_142 : f32 to vector<16x1xf32>
    %281 = tpu.concatenate %279, %278, %280 in 1 : vector<16x1xf32>, vector<16x16xf32>, vector<16x1xf32> -> vector<16x18xf32>
    %282 = vector.extract_strided_slice %275 {offsets = [0, 16], sizes = [16, 16], strides = [1, 1]} : vector<16x32xf32> to vector<16x16xf32>
    %cst_143 = arith.constant 0.000000e+00 : f32
    %283 = vector.broadcast %cst_143 : f32 to vector<16x1xf32>
    %cst_144 = arith.constant 0.000000e+00 : f32
    %284 = vector.broadcast %cst_144 : f32 to vector<16x1xf32>
    %285 = tpu.concatenate %283, %282, %284 in 1 : vector<16x1xf32>, vector<16x16xf32>, vector<16x1xf32> -> vector<16x18xf32>
    %286 = vector.extract_strided_slice %281 {offsets = [0, 0], sizes = [16, 16], strides = [1, 1]} : vector<16x18xf32> to vector<16x16xf32>
    %287 = vector.extract_strided_slice %285 {offsets = [0, 0], sizes = [16, 16], strides = [1, 1]} : vector<16x18xf32> to vector<16x16xf32>
    %288 = tpu.concatenate %286, %287 in 1 : vector<16x16xf32>, vector<16x16xf32> -> vector<16x32xf32>
    %289 = vector.extract_strided_slice %281 {offsets = [0, 1], sizes = [16, 16], strides = [1, 1]} : vector<16x18xf32> to vector<16x16xf32>
    %290 = vector.extract_strided_slice %285 {offsets = [0, 1], sizes = [16, 16], strides = [1, 1]} : vector<16x18xf32> to vector<16x16xf32>
    %291 = tpu.concatenate %289, %290 in 1 : vector<16x16xf32>, vector<16x16xf32> -> vector<16x32xf32>
    %292 = vector.extract_strided_slice %281 {offsets = [0, 2], sizes = [16, 16], strides = [1, 1]} : vector<16x18xf32> to vector<16x16xf32>
    %293 = vector.extract_strided_slice %285 {offsets = [0, 2], sizes = [16, 16], strides = [1, 1]} : vector<16x18xf32> to vector<16x16xf32>
    %294 = tpu.concatenate %292, %293 in 1 : vector<16x16xf32>, vector<16x16xf32> -> vector<16x32xf32>
    %295 = tpu.concatenate %288, %291, %294 in 0 : vector<16x32xf32>, vector<16x32xf32>, vector<16x32xf32> -> vector<48x32xf32>
    %cst_145 = arith.constant dense<0.000000e+00> : vector<16x32xf32>
    %296 = tpu.matmul %276, %295, %cst_145 {dimension_numbers = #tpu.dot_dimension_numbers<[1], [0], [0], [1], [0, 0, 1, 1], [], []>} : vector<16x48xf32>, vector<48x32xf32>, vector<16x32xf32> -> vector<16x32xf32>
    %297 = vector.broadcast %277 : vector<16x1xf32> to vector<16x32xf32>
    %298 = arith.addf %296, %297 : vector<16x32xf32>
    %c0_146 = arith.constant 0 : index
    %c0_147 = arith.constant 0 : index
    %299 = vector.load %arg12[%c0_146, %c0_147] : memref<16x48xf32, #tpu.memory_space<vmem>>, vector<16x48xf32>
    %c0_148 = arith.constant 0 : index
    %c0_149 = arith.constant 0 : index
    %300 = vector.load %arg11[%c0_148, %c0_149] : memref<16x1xf32, #tpu.memory_space<vmem>>, vector<16x1xf32>
    %301 = vector.extract_strided_slice %298 {offsets = [0, 0], sizes = [16, 16], strides = [1, 1]} : vector<16x32xf32> to vector<16x16xf32>
    %cst_150 = arith.constant 0.000000e+00 : f32
    %302 = vector.broadcast %cst_150 : f32 to vector<16x1xf32>
    %cst_151 = arith.constant 0.000000e+00 : f32
    %303 = vector.broadcast %cst_151 : f32 to vector<16x1xf32>
    %304 = tpu.concatenate %302, %301, %303 in 1 : vector<16x1xf32>, vector<16x16xf32>, vector<16x1xf32> -> vector<16x18xf32>
    %305 = vector.extract_strided_slice %298 {offsets = [0, 16], sizes = [16, 16], strides = [1, 1]} : vector<16x32xf32> to vector<16x16xf32>
    %cst_152 = arith.constant 0.000000e+00 : f32
    %306 = vector.broadcast %cst_152 : f32 to vector<16x1xf32>
    %cst_153 = arith.constant 0.000000e+00 : f32
    %307 = vector.broadcast %cst_153 : f32 to vector<16x1xf32>
    %308 = tpu.concatenate %306, %305, %307 in 1 : vector<16x1xf32>, vector<16x16xf32>, vector<16x1xf32> -> vector<16x18xf32>
    %309 = vector.extract_strided_slice %304 {offsets = [0, 0], sizes = [16, 16], strides = [1, 1]} : vector<16x18xf32> to vector<16x16xf32>
    %310 = vector.extract_strided_slice %308 {offsets = [0, 0], sizes = [16, 16], strides = [1, 1]} : vector<16x18xf32> to vector<16x16xf32>
    %311 = tpu.concatenate %309, %310 in 1 : vector<16x16xf32>, vector<16x16xf32> -> vector<16x32xf32>
    %312 = vector.extract_strided_slice %304 {offsets = [0, 1], sizes = [16, 16], strides = [1, 1]} : vector<16x18xf32> to vector<16x16xf32>
    %313 = vector.extract_strided_slice %308 {offsets = [0, 1], sizes = [16, 16], strides = [1, 1]} : vector<16x18xf32> to vector<16x16xf32>
    %314 = tpu.concatenate %312, %313 in 1 : vector<16x16xf32>, vector<16x16xf32> -> vector<16x32xf32>
    %315 = vector.extract_strided_slice %304 {offsets = [0, 2], sizes = [16, 16], strides = [1, 1]} : vector<16x18xf32> to vector<16x16xf32>
    %316 = vector.extract_strided_slice %308 {offsets = [0, 2], sizes = [16, 16], strides = [1, 1]} : vector<16x18xf32> to vector<16x16xf32>
    %317 = tpu.concatenate %315, %316 in 1 : vector<16x16xf32>, vector<16x16xf32> -> vector<16x32xf32>
    %318 = tpu.concatenate %311, %314, %317 in 0 : vector<16x32xf32>, vector<16x32xf32>, vector<16x32xf32> -> vector<48x32xf32>
    %cst_154 = arith.constant dense<0.000000e+00> : vector<16x32xf32>
    %319 = tpu.matmul %299, %318, %cst_154 {dimension_numbers = #tpu.dot_dimension_numbers<[1], [0], [0], [1], [0, 0, 1, 1], [], []>} : vector<16x48xf32>, vector<48x32xf32>, vector<16x32xf32> -> vector<16x32xf32>
    %320 = vector.broadcast %300 : vector<16x1xf32> to vector<16x32xf32>
    %321 = arith.addf %319, %320 : vector<16x32xf32>
    %c0_155 = arith.constant 0 : index
    %c0_156 = arith.constant 0 : index
    %322 = vector.load %arg16[%c0_155, %c0_156] : memref<8x32xf32, #tpu.memory_space<vmem>>, vector<8x32xf32>
    %c0_157 = arith.constant 0 : index
    %c0_158 = arith.constant 0 : index
    %323 = vector.load %arg15[%c0_157, %c0_158] : memref<8x1xf32, #tpu.memory_space<vmem>>, vector<8x1xf32>
    %324 = vector.extract_strided_slice %242 {offsets = [0, 0], sizes = [16, 16], strides = [1, 1]} : vector<16x32xf32> to vector<16x16xf32>
    %cst_159 = arith.constant 0.000000e+00 : f32
    %325 = vector.broadcast %cst_159 : f32 to vector<16x1xf32>
    %326 = tpu.concatenate %325, %324 in 1 : vector<16x1xf32>, vector<16x16xf32> -> vector<16x17xf32>
    %327 = vector.extract_strided_slice %242 {offsets = [0, 16], sizes = [16, 16], strides = [1, 1]} : vector<16x32xf32> to vector<16x16xf32>
    %cst_160 = arith.constant 0.000000e+00 : f32
    %328 = vector.broadcast %cst_160 : f32 to vector<16x1xf32>
    %329 = tpu.concatenate %328, %327 in 1 : vector<16x1xf32>, vector<16x16xf32> -> vector<16x17xf32>
    %330 = vector.extract_strided_slice %326 {offsets = [0, 0], sizes = [16, 16], strides = [1, 1]} : vector<16x17xf32> to vector<16x16xf32>
    %331 = vector.extract_strided_slice %329 {offsets = [0, 0], sizes = [16, 16], strides = [1, 1]} : vector<16x17xf32> to vector<16x16xf32>
    %332 = tpu.concatenate %330, %331 in 1 : vector<16x16xf32>, vector<16x16xf32> -> vector<16x32xf32>
    %333 = vector.extract_strided_slice %326 {offsets = [0, 1], sizes = [16, 16], strides = [1, 1]} : vector<16x17xf32> to vector<16x16xf32>
    %334 = vector.extract_strided_slice %329 {offsets = [0, 1], sizes = [16, 16], strides = [1, 1]} : vector<16x17xf32> to vector<16x16xf32>
    %335 = tpu.concatenate %333, %334 in 1 : vector<16x16xf32>, vector<16x16xf32> -> vector<16x32xf32>
    %336 = tpu.concatenate %332, %335 in 0 : vector<16x32xf32>, vector<16x32xf32> -> vector<32x32xf32>
    %cst_161 = arith.constant dense<0.000000e+00> : vector<8x32xf32>
    %337 = tpu.matmul %322, %336, %cst_161 {dimension_numbers = #tpu.dot_dimension_numbers<[1], [0], [0], [1], [0, 0, 1, 1], [], []>} : vector<8x32xf32>, vector<32x32xf32>, vector<8x32xf32> -> vector<8x32xf32>
    %338 = vector.broadcast %323 : vector<8x1xf32> to vector<8x32xf32>
    %339 = arith.addf %337, %338 : vector<8x32xf32>
    %cst_162 = arith.constant 0.000000e+00 : f32
    %340 = vector.broadcast %cst_162 : f32 to vector<8x32xf32>
    %341 = arith.maximumf %339, %340 : vector<8x32xf32>
    %c0_163 = arith.constant 0 : index
    %c0_164 = arith.constant 0 : index
    %342 = vector.load %arg18[%c0_163, %c0_164] : memref<8x16xf32, #tpu.memory_space<vmem>>, vector<8x16xf32>
    %c0_165 = arith.constant 0 : index
    %c0_166 = arith.constant 0 : index
    %343 = vector.load %arg17[%c0_165, %c0_166] : memref<8x1xf32, #tpu.memory_space<vmem>>, vector<8x1xf32>
    %344 = vector.extract_strided_slice %341 {offsets = [0, 0], sizes = [8, 16], strides = [1, 1]} : vector<8x32xf32> to vector<8x16xf32>
    %cst_167 = arith.constant 0.000000e+00 : f32
    %345 = vector.broadcast %cst_167 : f32 to vector<8x1xf32>
    %346 = tpu.concatenate %345, %344 in 1 : vector<8x1xf32>, vector<8x16xf32> -> vector<8x17xf32>
    %347 = vector.extract_strided_slice %341 {offsets = [0, 16], sizes = [8, 16], strides = [1, 1]} : vector<8x32xf32> to vector<8x16xf32>
    %cst_168 = arith.constant 0.000000e+00 : f32
    %348 = vector.broadcast %cst_168 : f32 to vector<8x1xf32>
    %349 = tpu.concatenate %348, %347 in 1 : vector<8x1xf32>, vector<8x16xf32> -> vector<8x17xf32>
    %350 = vector.extract_strided_slice %346 {offsets = [0, 0], sizes = [8, 16], strides = [1, 1]} : vector<8x17xf32> to vector<8x16xf32>
    %351 = vector.extract_strided_slice %349 {offsets = [0, 0], sizes = [8, 16], strides = [1, 1]} : vector<8x17xf32> to vector<8x16xf32>
    %352 = tpu.concatenate %350, %351 in 1 : vector<8x16xf32>, vector<8x16xf32> -> vector<8x32xf32>
    %353 = vector.extract_strided_slice %346 {offsets = [0, 1], sizes = [8, 16], strides = [1, 1]} : vector<8x17xf32> to vector<8x16xf32>
    %354 = vector.extract_strided_slice %349 {offsets = [0, 1], sizes = [8, 16], strides = [1, 1]} : vector<8x17xf32> to vector<8x16xf32>
    %355 = tpu.concatenate %353, %354 in 1 : vector<8x16xf32>, vector<8x16xf32> -> vector<8x32xf32>
    %356 = tpu.concatenate %352, %355 in 0 : vector<8x32xf32>, vector<8x32xf32> -> vector<16x32xf32>
    %cst_169 = arith.constant dense<0.000000e+00> : vector<8x32xf32>
    %357 = tpu.matmul %342, %356, %cst_169 {dimension_numbers = #tpu.dot_dimension_numbers<[1], [0], [0], [1], [0, 0, 1, 1], [], []>} : vector<8x16xf32>, vector<16x32xf32>, vector<8x32xf32> -> vector<8x32xf32>
    %358 = vector.broadcast %343 : vector<8x1xf32> to vector<8x32xf32>
    %359 = arith.addf %357, %358 : vector<8x32xf32>
    %cst_170 = arith.constant 0.000000e+00 : f32
    %360 = vector.broadcast %cst_170 : f32 to vector<8x32xf32>
    %361 = arith.maximumf %359, %360 : vector<8x32xf32>
    %c0_171 = arith.constant 0 : index
    %c0_172 = arith.constant 0 : index
    %362 = vector.load %arg20[%c0_171, %c0_172] : memref<8x16xf32, #tpu.memory_space<vmem>>, vector<8x16xf32>
    %c0_173 = arith.constant 0 : index
    %c0_174 = arith.constant 0 : index
    %363 = vector.load %arg19[%c0_173, %c0_174] : memref<8x1xf32, #tpu.memory_space<vmem>>, vector<8x1xf32>
    %cst_175 = arith.constant dense<0.000000e+00> : vector<8x32xf32>
    %364 = tpu.matmul %362, %242, %cst_175 {dimension_numbers = #tpu.dot_dimension_numbers<[1], [0], [0], [1], [0, 0, 1, 1], [], []>} : vector<8x16xf32>, vector<16x32xf32>, vector<8x32xf32> -> vector<8x32xf32>
    %365 = vector.broadcast %363 : vector<8x1xf32> to vector<8x32xf32>
    %366 = arith.addf %364, %365 : vector<8x32xf32>
    %367 = arith.addf %361, %366 : vector<8x32xf32>
    %cst_176 = arith.constant 0.000000e+00 : f32
    %368 = vector.broadcast %cst_176 : f32 to vector<8x32xf32>
    %369 = arith.maximumf %367, %368 : vector<8x32xf32>
    %c0_177 = arith.constant 0 : index
    %c0_178 = arith.constant 0 : index
    %370 = vector.load %arg22[%c0_177, %c0_178] : memref<4x16xf32, #tpu.memory_space<vmem>>, vector<4x16xf32>
    %c0_179 = arith.constant 0 : index
    %c0_180 = arith.constant 0 : index
    %371 = vector.load %arg21[%c0_179, %c0_180] : memref<4x1xf32, #tpu.memory_space<vmem>>, vector<4x1xf32>
    %372 = vector.extract_strided_slice %369 {offsets = [0, 0], sizes = [8, 16], strides = [1, 1]} : vector<8x32xf32> to vector<8x16xf32>
    %cst_181 = arith.constant 0.000000e+00 : f32
    %373 = vector.broadcast %cst_181 : f32 to vector<8x2xf32>
    %374 = tpu.concatenate %373, %372 in 1 : vector<8x2xf32>, vector<8x16xf32> -> vector<8x18xf32>
    %375 = vector.extract_strided_slice %369 {offsets = [0, 16], sizes = [8, 16], strides = [1, 1]} : vector<8x32xf32> to vector<8x16xf32>
    %cst_182 = arith.constant 0.000000e+00 : f32
    %376 = vector.broadcast %cst_182 : f32 to vector<8x2xf32>
    %377 = tpu.concatenate %376, %375 in 1 : vector<8x2xf32>, vector<8x16xf32> -> vector<8x18xf32>
    %378 = vector.extract_strided_slice %374 {offsets = [0, 0], sizes = [8, 16], strides = [1, 1]} : vector<8x18xf32> to vector<8x16xf32>
    %379 = vector.extract_strided_slice %377 {offsets = [0, 0], sizes = [8, 16], strides = [1, 1]} : vector<8x18xf32> to vector<8x16xf32>
    %380 = tpu.concatenate %378, %379 in 1 : vector<8x16xf32>, vector<8x16xf32> -> vector<8x32xf32>
    %381 = vector.extract_strided_slice %374 {offsets = [0, 2], sizes = [8, 16], strides = [1, 1]} : vector<8x18xf32> to vector<8x16xf32>
    %382 = vector.extract_strided_slice %377 {offsets = [0, 2], sizes = [8, 16], strides = [1, 1]} : vector<8x18xf32> to vector<8x16xf32>
    %383 = tpu.concatenate %381, %382 in 1 : vector<8x16xf32>, vector<8x16xf32> -> vector<8x32xf32>
    %384 = tpu.concatenate %380, %383 in 0 : vector<8x32xf32>, vector<8x32xf32> -> vector<16x32xf32>
    %cst_183 = arith.constant dense<0.000000e+00> : vector<4x32xf32>
    %385 = tpu.matmul %370, %384, %cst_183 {dimension_numbers = #tpu.dot_dimension_numbers<[1], [0], [0], [1], [0, 0, 1, 1], [], []>} : vector<4x16xf32>, vector<16x32xf32>, vector<4x32xf32> -> vector<4x32xf32>
    %386 = vector.broadcast %371 : vector<4x1xf32> to vector<4x32xf32>
    %387 = arith.addf %385, %386 : vector<4x32xf32>
    %cst_184 = arith.constant 0.000000e+00 : f32
    %388 = vector.broadcast %cst_184 : f32 to vector<4x32xf32>
    %389 = arith.maximumf %387, %388 : vector<4x32xf32>
    %c0_185 = arith.constant 0 : index
    %c0_186 = arith.constant 0 : index
    %c0_187 = arith.constant 0 : index
    %390 = vector.load %arg24[%c0_185, %c0_186, %c0_187] : memref<2x4x4xf32, #tpu.memory_space<vmem>>, vector<2x4x4xf32>
    %c0_188 = arith.constant 0 : index
    %c0_189 = arith.constant 0 : index
    %391 = vector.load %arg23[%c0_188, %c0_189] : memref<4x1xf32, #tpu.memory_space<vmem>>, vector<4x1xf32>
    %392 = vector.extract_strided_slice %389 {offsets = [0, 0], sizes = [4, 16], strides = [1, 1]} : vector<4x32xf32> to vector<4x16xf32>
    %cst_190 = arith.constant 0.000000e+00 : f32
    %393 = vector.broadcast %cst_190 : f32 to vector<4x2xf32>
    %394 = tpu.concatenate %393, %392 in 1 : vector<4x2xf32>, vector<4x16xf32> -> vector<4x18xf32>
    %395 = vector.extract_strided_slice %389 {offsets = [0, 16], sizes = [4, 16], strides = [1, 1]} : vector<4x32xf32> to vector<4x16xf32>
    %cst_191 = arith.constant 0.000000e+00 : f32
    %396 = vector.broadcast %cst_191 : f32 to vector<4x2xf32>
    %397 = tpu.concatenate %396, %395 in 1 : vector<4x2xf32>, vector<4x16xf32> -> vector<4x18xf32>
    %398 = vector.extract_strided_slice %390 {offsets = [0, 0, 0], sizes = [1, 4, 4], strides = [1, 1, 1]} : vector<2x4x4xf32> to vector<1x4x4xf32>
    %399 = vector.shape_cast %398 : vector<1x4x4xf32> to vector<4x4xf32>
    %400 = vector.extract_strided_slice %394 {offsets = [0, 0], sizes = [4, 16], strides = [1, 1]} : vector<4x18xf32> to vector<4x16xf32>
    %401 = vector.extract_strided_slice %397 {offsets = [0, 0], sizes = [4, 16], strides = [1, 1]} : vector<4x18xf32> to vector<4x16xf32>
    %402 = tpu.concatenate %400, %401 in 1 : vector<4x16xf32>, vector<4x16xf32> -> vector<4x32xf32>
    %cst_192 = arith.constant dense<0.000000e+00> : vector<4x32xf32>
    %403 = tpu.matmul %399, %402, %cst_192 {dimension_numbers = #tpu.dot_dimension_numbers<[1], [0], [0], [1], [0, 0, 1, 1], [], []>} : vector<4x4xf32>, vector<4x32xf32>, vector<4x32xf32> -> vector<4x32xf32>
    %404 = vector.extract_strided_slice %390 {offsets = [1, 0, 0], sizes = [1, 4, 4], strides = [1, 1, 1]} : vector<2x4x4xf32> to vector<1x4x4xf32>
    %405 = vector.shape_cast %404 : vector<1x4x4xf32> to vector<4x4xf32>
    %406 = vector.extract_strided_slice %394 {offsets = [0, 2], sizes = [4, 16], strides = [1, 1]} : vector<4x18xf32> to vector<4x16xf32>
    %407 = vector.extract_strided_slice %397 {offsets = [0, 2], sizes = [4, 16], strides = [1, 1]} : vector<4x18xf32> to vector<4x16xf32>
    %408 = tpu.concatenate %406, %407 in 1 : vector<4x16xf32>, vector<4x16xf32> -> vector<4x32xf32>
    %cst_193 = arith.constant dense<0.000000e+00> : vector<4x32xf32>
    %409 = tpu.matmul %405, %408, %cst_193 {dimension_numbers = #tpu.dot_dimension_numbers<[1], [0], [0], [1], [0, 0, 1, 1], [], []>} : vector<4x4xf32>, vector<4x32xf32>, vector<4x32xf32> -> vector<4x32xf32>
    %410 = arith.addf %403, %409 : vector<4x32xf32>
    %411 = vector.broadcast %391 : vector<4x1xf32> to vector<4x32xf32>
    %412 = arith.addf %410, %411 : vector<4x32xf32>
    %cst_194 = arith.constant 0.000000e+00 : f32
    %413 = vector.broadcast %cst_194 : f32 to vector<4x32xf32>
    %414 = arith.maximumf %412, %413 : vector<4x32xf32>
    %c0_195 = arith.constant 0 : index
    %c0_196 = arith.constant 0 : index
    %415 = vector.load %arg26[%c0_195, %c0_196] : memref<4x8xf32, #tpu.memory_space<vmem>>, vector<4x8xf32>
    %c0_197 = arith.constant 0 : index
    %c0_198 = arith.constant 0 : index
    %416 = vector.load %arg25[%c0_197, %c0_198] : memref<4x1xf32, #tpu.memory_space<vmem>>, vector<4x1xf32>
    %cst_199 = arith.constant dense<0.000000e+00> : vector<4x32xf32>
    %417 = tpu.matmul %415, %369, %cst_199 {dimension_numbers = #tpu.dot_dimension_numbers<[1], [0], [0], [1], [0, 0, 1, 1], [], []>} : vector<4x8xf32>, vector<8x32xf32>, vector<4x32xf32> -> vector<4x32xf32>
    %418 = vector.broadcast %416 : vector<4x1xf32> to vector<4x32xf32>
    %419 = arith.addf %417, %418 : vector<4x32xf32>
    %420 = arith.addf %414, %419 : vector<4x32xf32>
    %cst_200 = arith.constant 0.000000e+00 : f32
    %421 = vector.broadcast %cst_200 : f32 to vector<4x32xf32>
    %422 = arith.maximumf %420, %421 : vector<4x32xf32>
    %c0_201 = arith.constant 0 : index
    %c0_202 = arith.constant 0 : index
    %423 = vector.load %arg14[%c0_201, %c0_202] : memref<16x4xf32, #tpu.memory_space<vmem>>, vector<16x4xf32>
    %c0_203 = arith.constant 0 : index
    %c0_204 = arith.constant 0 : index
    %424 = vector.load %arg13[%c0_203, %c0_204] : memref<16x1xf32, #tpu.memory_space<vmem>>, vector<16x1xf32>
    %cst_205 = arith.constant dense<0.000000e+00> : vector<16x32xf32>
    %425 = tpu.matmul %423, %422, %cst_205 {dimension_numbers = #tpu.dot_dimension_numbers<[1], [0], [0], [1], [0, 0, 1, 1], [], []>} : vector<16x4xf32>, vector<4x32xf32>, vector<16x32xf32> -> vector<16x32xf32>
    %426 = vector.broadcast %424 : vector<16x1xf32> to vector<16x32xf32>
    %427 = arith.addf %425, %426 : vector<16x32xf32>
    %c0_206 = arith.constant 0 : index
    %c0_207 = arith.constant 0 : index
    %428 = vector.load %arg30[%c0_206, %c0_207] : memref<8x32xf32, #tpu.memory_space<vmem>>, vector<8x32xf32>
    %c0_208 = arith.constant 0 : index
    %c0_209 = arith.constant 0 : index
    %429 = vector.load %arg29[%c0_208, %c0_209] : memref<8x1xf32, #tpu.memory_space<vmem>>, vector<8x1xf32>
    %430 = vector.extract_strided_slice %242 {offsets = [0, 0], sizes = [16, 16], strides = [1, 1]} : vector<16x32xf32> to vector<16x16xf32>
    %cst_210 = arith.constant 0.000000e+00 : f32
    %431 = vector.broadcast %cst_210 : f32 to vector<16x1xf32>
    %432 = tpu.concatenate %431, %430 in 1 : vector<16x1xf32>, vector<16x16xf32> -> vector<16x17xf32>
    %433 = vector.extract_strided_slice %242 {offsets = [0, 16], sizes = [16, 16], strides = [1, 1]} : vector<16x32xf32> to vector<16x16xf32>
    %cst_211 = arith.constant 0.000000e+00 : f32
    %434 = vector.broadcast %cst_211 : f32 to vector<16x1xf32>
    %435 = tpu.concatenate %434, %433 in 1 : vector<16x1xf32>, vector<16x16xf32> -> vector<16x17xf32>
    %436 = vector.extract_strided_slice %432 {offsets = [0, 0], sizes = [16, 16], strides = [1, 1]} : vector<16x17xf32> to vector<16x16xf32>
    %437 = vector.extract_strided_slice %435 {offsets = [0, 0], sizes = [16, 16], strides = [1, 1]} : vector<16x17xf32> to vector<16x16xf32>
    %438 = tpu.concatenate %436, %437 in 1 : vector<16x16xf32>, vector<16x16xf32> -> vector<16x32xf32>
    %439 = vector.extract_strided_slice %432 {offsets = [0, 1], sizes = [16, 16], strides = [1, 1]} : vector<16x17xf32> to vector<16x16xf32>
    %440 = vector.extract_strided_slice %435 {offsets = [0, 1], sizes = [16, 16], strides = [1, 1]} : vector<16x17xf32> to vector<16x16xf32>
    %441 = tpu.concatenate %439, %440 in 1 : vector<16x16xf32>, vector<16x16xf32> -> vector<16x32xf32>
    %442 = tpu.concatenate %438, %441 in 0 : vector<16x32xf32>, vector<16x32xf32> -> vector<32x32xf32>
    %cst_212 = arith.constant dense<0.000000e+00> : vector<8x32xf32>
    %443 = tpu.matmul %428, %442, %cst_212 {dimension_numbers = #tpu.dot_dimension_numbers<[1], [0], [0], [1], [0, 0, 1, 1], [], []>} : vector<8x32xf32>, vector<32x32xf32>, vector<8x32xf32> -> vector<8x32xf32>
    %444 = vector.broadcast %429 : vector<8x1xf32> to vector<8x32xf32>
    %445 = arith.addf %443, %444 : vector<8x32xf32>
    %cst_213 = arith.constant 0.000000e+00 : f32
    %446 = vector.broadcast %cst_213 : f32 to vector<8x32xf32>
    %447 = arith.maximumf %445, %446 : vector<8x32xf32>
    %c0_214 = arith.constant 0 : index
    %c0_215 = arith.constant 0 : index
    %448 = vector.load %arg32[%c0_214, %c0_215] : memref<8x16xf32, #tpu.memory_space<vmem>>, vector<8x16xf32>
    %c0_216 = arith.constant 0 : index
    %c0_217 = arith.constant 0 : index
    %449 = vector.load %arg31[%c0_216, %c0_217] : memref<8x1xf32, #tpu.memory_space<vmem>>, vector<8x1xf32>
    %450 = vector.extract_strided_slice %447 {offsets = [0, 0], sizes = [8, 16], strides = [1, 1]} : vector<8x32xf32> to vector<8x16xf32>
    %cst_218 = arith.constant 0.000000e+00 : f32
    %451 = vector.broadcast %cst_218 : f32 to vector<8x1xf32>
    %452 = tpu.concatenate %451, %450 in 1 : vector<8x1xf32>, vector<8x16xf32> -> vector<8x17xf32>
    %453 = vector.extract_strided_slice %447 {offsets = [0, 16], sizes = [8, 16], strides = [1, 1]} : vector<8x32xf32> to vector<8x16xf32>
    %cst_219 = arith.constant 0.000000e+00 : f32
    %454 = vector.broadcast %cst_219 : f32 to vector<8x1xf32>
    %455 = tpu.concatenate %454, %453 in 1 : vector<8x1xf32>, vector<8x16xf32> -> vector<8x17xf32>
    %456 = vector.extract_strided_slice %452 {offsets = [0, 0], sizes = [8, 16], strides = [1, 1]} : vector<8x17xf32> to vector<8x16xf32>
    %457 = vector.extract_strided_slice %455 {offsets = [0, 0], sizes = [8, 16], strides = [1, 1]} : vector<8x17xf32> to vector<8x16xf32>
    %458 = tpu.concatenate %456, %457 in 1 : vector<8x16xf32>, vector<8x16xf32> -> vector<8x32xf32>
    %459 = vector.extract_strided_slice %452 {offsets = [0, 1], sizes = [8, 16], strides = [1, 1]} : vector<8x17xf32> to vector<8x16xf32>
    %460 = vector.extract_strided_slice %455 {offsets = [0, 1], sizes = [8, 16], strides = [1, 1]} : vector<8x17xf32> to vector<8x16xf32>
    %461 = tpu.concatenate %459, %460 in 1 : vector<8x16xf32>, vector<8x16xf32> -> vector<8x32xf32>
    %462 = tpu.concatenate %458, %461 in 0 : vector<8x32xf32>, vector<8x32xf32> -> vector<16x32xf32>
    %cst_220 = arith.constant dense<0.000000e+00> : vector<8x32xf32>
    %463 = tpu.matmul %448, %462, %cst_220 {dimension_numbers = #tpu.dot_dimension_numbers<[1], [0], [0], [1], [0, 0, 1, 1], [], []>} : vector<8x16xf32>, vector<16x32xf32>, vector<8x32xf32> -> vector<8x32xf32>
    %464 = vector.broadcast %449 : vector<8x1xf32> to vector<8x32xf32>
    %465 = arith.addf %463, %464 : vector<8x32xf32>
    %cst_221 = arith.constant 0.000000e+00 : f32
    %466 = vector.broadcast %cst_221 : f32 to vector<8x32xf32>
    %467 = arith.maximumf %465, %466 : vector<8x32xf32>
    %c0_222 = arith.constant 0 : index
    %c0_223 = arith.constant 0 : index
    %468 = vector.load %arg34[%c0_222, %c0_223] : memref<8x16xf32, #tpu.memory_space<vmem>>, vector<8x16xf32>
    %c0_224 = arith.constant 0 : index
    %c0_225 = arith.constant 0 : index
    %469 = vector.load %arg33[%c0_224, %c0_225] : memref<8x1xf32, #tpu.memory_space<vmem>>, vector<8x1xf32>
    %cst_226 = arith.constant dense<0.000000e+00> : vector<8x32xf32>
    %470 = tpu.matmul %468, %242, %cst_226 {dimension_numbers = #tpu.dot_dimension_numbers<[1], [0], [0], [1], [0, 0, 1, 1], [], []>} : vector<8x16xf32>, vector<16x32xf32>, vector<8x32xf32> -> vector<8x32xf32>
    %471 = vector.broadcast %469 : vector<8x1xf32> to vector<8x32xf32>
    %472 = arith.addf %470, %471 : vector<8x32xf32>
    %473 = arith.addf %467, %472 : vector<8x32xf32>
    %cst_227 = arith.constant 0.000000e+00 : f32
    %474 = vector.broadcast %cst_227 : f32 to vector<8x32xf32>
    %475 = arith.maximumf %473, %474 : vector<8x32xf32>
    %c0_228 = arith.constant 0 : index
    %c0_229 = arith.constant 0 : index
    %476 = vector.load %arg36[%c0_228, %c0_229] : memref<4x16xf32, #tpu.memory_space<vmem>>, vector<4x16xf32>
    %c0_230 = arith.constant 0 : index
    %c0_231 = arith.constant 0 : index
    %477 = vector.load %arg35[%c0_230, %c0_231] : memref<4x1xf32, #tpu.memory_space<vmem>>, vector<4x1xf32>
    %478 = vector.extract_strided_slice %475 {offsets = [0, 0], sizes = [8, 16], strides = [1, 1]} : vector<8x32xf32> to vector<8x16xf32>
    %cst_232 = arith.constant 0.000000e+00 : f32
    %479 = vector.broadcast %cst_232 : f32 to vector<8x2xf32>
    %480 = tpu.concatenate %479, %478 in 1 : vector<8x2xf32>, vector<8x16xf32> -> vector<8x18xf32>
    %481 = vector.extract_strided_slice %475 {offsets = [0, 16], sizes = [8, 16], strides = [1, 1]} : vector<8x32xf32> to vector<8x16xf32>
    %cst_233 = arith.constant 0.000000e+00 : f32
    %482 = vector.broadcast %cst_233 : f32 to vector<8x2xf32>
    %483 = tpu.concatenate %482, %481 in 1 : vector<8x2xf32>, vector<8x16xf32> -> vector<8x18xf32>
    %484 = vector.extract_strided_slice %480 {offsets = [0, 0], sizes = [8, 16], strides = [1, 1]} : vector<8x18xf32> to vector<8x16xf32>
    %485 = vector.extract_strided_slice %483 {offsets = [0, 0], sizes = [8, 16], strides = [1, 1]} : vector<8x18xf32> to vector<8x16xf32>
    %486 = tpu.concatenate %484, %485 in 1 : vector<8x16xf32>, vector<8x16xf32> -> vector<8x32xf32>
    %487 = vector.extract_strided_slice %480 {offsets = [0, 2], sizes = [8, 16], strides = [1, 1]} : vector<8x18xf32> to vector<8x16xf32>
    %488 = vector.extract_strided_slice %483 {offsets = [0, 2], sizes = [8, 16], strides = [1, 1]} : vector<8x18xf32> to vector<8x16xf32>
    %489 = tpu.concatenate %487, %488 in 1 : vector<8x16xf32>, vector<8x16xf32> -> vector<8x32xf32>
    %490 = tpu.concatenate %486, %489 in 0 : vector<8x32xf32>, vector<8x32xf32> -> vector<16x32xf32>
    %cst_234 = arith.constant dense<0.000000e+00> : vector<4x32xf32>
    %491 = tpu.matmul %476, %490, %cst_234 {dimension_numbers = #tpu.dot_dimension_numbers<[1], [0], [0], [1], [0, 0, 1, 1], [], []>} : vector<4x16xf32>, vector<16x32xf32>, vector<4x32xf32> -> vector<4x32xf32>
    %492 = vector.broadcast %477 : vector<4x1xf32> to vector<4x32xf32>
    %493 = arith.addf %491, %492 : vector<4x32xf32>
    %cst_235 = arith.constant 0.000000e+00 : f32
    %494 = vector.broadcast %cst_235 : f32 to vector<4x32xf32>
    %495 = arith.maximumf %493, %494 : vector<4x32xf32>
    %c0_236 = arith.constant 0 : index
    %c0_237 = arith.constant 0 : index
    %c0_238 = arith.constant 0 : index
    %496 = vector.load %arg38[%c0_236, %c0_237, %c0_238] : memref<2x4x4xf32, #tpu.memory_space<vmem>>, vector<2x4x4xf32>
    %c0_239 = arith.constant 0 : index
    %c0_240 = arith.constant 0 : index
    %497 = vector.load %arg37[%c0_239, %c0_240] : memref<4x1xf32, #tpu.memory_space<vmem>>, vector<4x1xf32>
    %498 = vector.extract_strided_slice %495 {offsets = [0, 0], sizes = [4, 16], strides = [1, 1]} : vector<4x32xf32> to vector<4x16xf32>
    %cst_241 = arith.constant 0.000000e+00 : f32
    %499 = vector.broadcast %cst_241 : f32 to vector<4x2xf32>
    %500 = tpu.concatenate %499, %498 in 1 : vector<4x2xf32>, vector<4x16xf32> -> vector<4x18xf32>
    %501 = vector.extract_strided_slice %495 {offsets = [0, 16], sizes = [4, 16], strides = [1, 1]} : vector<4x32xf32> to vector<4x16xf32>
    %cst_242 = arith.constant 0.000000e+00 : f32
    %502 = vector.broadcast %cst_242 : f32 to vector<4x2xf32>
    %503 = tpu.concatenate %502, %501 in 1 : vector<4x2xf32>, vector<4x16xf32> -> vector<4x18xf32>
    %504 = vector.extract_strided_slice %496 {offsets = [0, 0, 0], sizes = [1, 4, 4], strides = [1, 1, 1]} : vector<2x4x4xf32> to vector<1x4x4xf32>
    %505 = vector.shape_cast %504 : vector<1x4x4xf32> to vector<4x4xf32>
    %506 = vector.extract_strided_slice %500 {offsets = [0, 0], sizes = [4, 16], strides = [1, 1]} : vector<4x18xf32> to vector<4x16xf32>
    %507 = vector.extract_strided_slice %503 {offsets = [0, 0], sizes = [4, 16], strides = [1, 1]} : vector<4x18xf32> to vector<4x16xf32>
    %508 = tpu.concatenate %506, %507 in 1 : vector<4x16xf32>, vector<4x16xf32> -> vector<4x32xf32>
    %cst_243 = arith.constant dense<0.000000e+00> : vector<4x32xf32>
    %509 = tpu.matmul %505, %508, %cst_243 {dimension_numbers = #tpu.dot_dimension_numbers<[1], [0], [0], [1], [0, 0, 1, 1], [], []>} : vector<4x4xf32>, vector<4x32xf32>, vector<4x32xf32> -> vector<4x32xf32>
    %510 = vector.extract_strided_slice %496 {offsets = [1, 0, 0], sizes = [1, 4, 4], strides = [1, 1, 1]} : vector<2x4x4xf32> to vector<1x4x4xf32>
    %511 = vector.shape_cast %510 : vector<1x4x4xf32> to vector<4x4xf32>
    %512 = vector.extract_strided_slice %500 {offsets = [0, 2], sizes = [4, 16], strides = [1, 1]} : vector<4x18xf32> to vector<4x16xf32>
    %513 = vector.extract_strided_slice %503 {offsets = [0, 2], sizes = [4, 16], strides = [1, 1]} : vector<4x18xf32> to vector<4x16xf32>
    %514 = tpu.concatenate %512, %513 in 1 : vector<4x16xf32>, vector<4x16xf32> -> vector<4x32xf32>
    %cst_244 = arith.constant dense<0.000000e+00> : vector<4x32xf32>
    %515 = tpu.matmul %511, %514, %cst_244 {dimension_numbers = #tpu.dot_dimension_numbers<[1], [0], [0], [1], [0, 0, 1, 1], [], []>} : vector<4x4xf32>, vector<4x32xf32>, vector<4x32xf32> -> vector<4x32xf32>
    %516 = arith.addf %509, %515 : vector<4x32xf32>
    %517 = vector.broadcast %497 : vector<4x1xf32> to vector<4x32xf32>
    %518 = arith.addf %516, %517 : vector<4x32xf32>
    %cst_245 = arith.constant 0.000000e+00 : f32
    %519 = vector.broadcast %cst_245 : f32 to vector<4x32xf32>
    %520 = arith.maximumf %518, %519 : vector<4x32xf32>
    %c0_246 = arith.constant 0 : index
    %c0_247 = arith.constant 0 : index
    %521 = vector.load %arg40[%c0_246, %c0_247] : memref<4x8xf32, #tpu.memory_space<vmem>>, vector<4x8xf32>
    %c0_248 = arith.constant 0 : index
    %c0_249 = arith.constant 0 : index
    %522 = vector.load %arg39[%c0_248, %c0_249] : memref<4x1xf32, #tpu.memory_space<vmem>>, vector<4x1xf32>
    %cst_250 = arith.constant dense<0.000000e+00> : vector<4x32xf32>
    %523 = tpu.matmul %521, %475, %cst_250 {dimension_numbers = #tpu.dot_dimension_numbers<[1], [0], [0], [1], [0, 0, 1, 1], [], []>} : vector<4x8xf32>, vector<8x32xf32>, vector<4x32xf32> -> vector<4x32xf32>
    %524 = vector.broadcast %522 : vector<4x1xf32> to vector<4x32xf32>
    %525 = arith.addf %523, %524 : vector<4x32xf32>
    %526 = arith.addf %520, %525 : vector<4x32xf32>
    %cst_251 = arith.constant 0.000000e+00 : f32
    %527 = vector.broadcast %cst_251 : f32 to vector<4x32xf32>
    %528 = arith.maximumf %526, %527 : vector<4x32xf32>
    %c0_252 = arith.constant 0 : index
    %c0_253 = arith.constant 0 : index
    %c0_254 = arith.constant 0 : index
    %529 = vector.load %arg42[%c0_252, %c0_253, %c0_254] : memref<2x2x4xf32, #tpu.memory_space<vmem>>, vector<2x2x4xf32>
    %c0_255 = arith.constant 0 : index
    %c0_256 = arith.constant 0 : index
    %530 = vector.load %arg41[%c0_255, %c0_256] : memref<2x1xf32, #tpu.memory_space<vmem>>, vector<2x1xf32>
    %531 = vector.extract_strided_slice %528 {offsets = [0, 0], sizes = [4, 16], strides = [1, 1]} : vector<4x32xf32> to vector<4x16xf32>
    %cst_257 = arith.constant 0.000000e+00 : f32
    %532 = vector.broadcast %cst_257 : f32 to vector<4x4xf32>
    %533 = tpu.concatenate %532, %531 in 1 : vector<4x4xf32>, vector<4x16xf32> -> vector<4x20xf32>
    %534 = vector.extract_strided_slice %528 {offsets = [0, 16], sizes = [4, 16], strides = [1, 1]} : vector<4x32xf32> to vector<4x16xf32>
    %cst_258 = arith.constant 0.000000e+00 : f32
    %535 = vector.broadcast %cst_258 : f32 to vector<4x4xf32>
    %536 = tpu.concatenate %535, %534 in 1 : vector<4x4xf32>, vector<4x16xf32> -> vector<4x20xf32>
    %537 = vector.extract_strided_slice %529 {offsets = [0, 0, 0], sizes = [1, 2, 4], strides = [1, 1, 1]} : vector<2x2x4xf32> to vector<1x2x4xf32>
    %538 = vector.shape_cast %537 : vector<1x2x4xf32> to vector<2x4xf32>
    %539 = vector.extract_strided_slice %533 {offsets = [0, 0], sizes = [4, 16], strides = [1, 1]} : vector<4x20xf32> to vector<4x16xf32>
    %540 = vector.extract_strided_slice %536 {offsets = [0, 0], sizes = [4, 16], strides = [1, 1]} : vector<4x20xf32> to vector<4x16xf32>
    %541 = tpu.concatenate %539, %540 in 1 : vector<4x16xf32>, vector<4x16xf32> -> vector<4x32xf32>
    %cst_259 = arith.constant dense<0.000000e+00> : vector<2x32xf32>
    %542 = tpu.matmul %538, %541, %cst_259 {dimension_numbers = #tpu.dot_dimension_numbers<[1], [0], [0], [1], [0, 0, 1, 1], [], []>} : vector<2x4xf32>, vector<4x32xf32>, vector<2x32xf32> -> vector<2x32xf32>
    %543 = vector.extract_strided_slice %529 {offsets = [1, 0, 0], sizes = [1, 2, 4], strides = [1, 1, 1]} : vector<2x2x4xf32> to vector<1x2x4xf32>
    %544 = vector.shape_cast %543 : vector<1x2x4xf32> to vector<2x4xf32>
    %545 = vector.extract_strided_slice %533 {offsets = [0, 4], sizes = [4, 16], strides = [1, 1]} : vector<4x20xf32> to vector<4x16xf32>
    %546 = vector.extract_strided_slice %536 {offsets = [0, 4], sizes = [4, 16], strides = [1, 1]} : vector<4x20xf32> to vector<4x16xf32>
    %547 = tpu.concatenate %545, %546 in 1 : vector<4x16xf32>, vector<4x16xf32> -> vector<4x32xf32>
    %cst_260 = arith.constant dense<0.000000e+00> : vector<2x32xf32>
    %548 = tpu.matmul %544, %547, %cst_260 {dimension_numbers = #tpu.dot_dimension_numbers<[1], [0], [0], [1], [0, 0, 1, 1], [], []>} : vector<2x4xf32>, vector<4x32xf32>, vector<2x32xf32> -> vector<2x32xf32>
    %549 = arith.addf %542, %548 : vector<2x32xf32>
    %550 = vector.broadcast %530 : vector<2x1xf32> to vector<2x32xf32>
    %551 = arith.addf %549, %550 : vector<2x32xf32>
    %cst_261 = arith.constant 0.000000e+00 : f32
    %552 = vector.broadcast %cst_261 : f32 to vector<2x32xf32>
    %553 = arith.maximumf %551, %552 : vector<2x32xf32>
    %c0_262 = arith.constant 0 : index
    %c0_263 = arith.constant 0 : index
    %c0_264 = arith.constant 0 : index
    %554 = vector.load %arg44[%c0_262, %c0_263, %c0_264] : memref<2x2x2xf32, #tpu.memory_space<vmem>>, vector<2x2x2xf32>
    %c0_265 = arith.constant 0 : index
    %c0_266 = arith.constant 0 : index
    %555 = vector.load %arg43[%c0_265, %c0_266] : memref<2x1xf32, #tpu.memory_space<vmem>>, vector<2x1xf32>
    %556 = vector.extract_strided_slice %553 {offsets = [0, 0], sizes = [2, 16], strides = [1, 1]} : vector<2x32xf32> to vector<2x16xf32>
    %cst_267 = arith.constant 0.000000e+00 : f32
    %557 = vector.broadcast %cst_267 : f32 to vector<2x4xf32>
    %558 = tpu.concatenate %557, %556 in 1 : vector<2x4xf32>, vector<2x16xf32> -> vector<2x20xf32>
    %559 = vector.extract_strided_slice %553 {offsets = [0, 16], sizes = [2, 16], strides = [1, 1]} : vector<2x32xf32> to vector<2x16xf32>
    %cst_268 = arith.constant 0.000000e+00 : f32
    %560 = vector.broadcast %cst_268 : f32 to vector<2x4xf32>
    %561 = tpu.concatenate %560, %559 in 1 : vector<2x4xf32>, vector<2x16xf32> -> vector<2x20xf32>
    %562 = vector.extract_strided_slice %554 {offsets = [0, 0, 0], sizes = [1, 2, 2], strides = [1, 1, 1]} : vector<2x2x2xf32> to vector<1x2x2xf32>
    %563 = vector.shape_cast %562 : vector<1x2x2xf32> to vector<2x2xf32>
    %564 = vector.extract_strided_slice %558 {offsets = [0, 0], sizes = [2, 16], strides = [1, 1]} : vector<2x20xf32> to vector<2x16xf32>
    %565 = vector.extract_strided_slice %561 {offsets = [0, 0], sizes = [2, 16], strides = [1, 1]} : vector<2x20xf32> to vector<2x16xf32>
    %566 = tpu.concatenate %564, %565 in 1 : vector<2x16xf32>, vector<2x16xf32> -> vector<2x32xf32>
    %cst_269 = arith.constant dense<0.000000e+00> : vector<2x32xf32>
    %567 = tpu.matmul %563, %566, %cst_269 {dimension_numbers = #tpu.dot_dimension_numbers<[1], [0], [0], [1], [0, 0, 1, 1], [], []>} : vector<2x2xf32>, vector<2x32xf32>, vector<2x32xf32> -> vector<2x32xf32>
    %568 = vector.extract_strided_slice %554 {offsets = [1, 0, 0], sizes = [1, 2, 2], strides = [1, 1, 1]} : vector<2x2x2xf32> to vector<1x2x2xf32>
    %569 = vector.shape_cast %568 : vector<1x2x2xf32> to vector<2x2xf32>
    %570 = vector.extract_strided_slice %558 {offsets = [0, 4], sizes = [2, 16], strides = [1, 1]} : vector<2x20xf32> to vector<2x16xf32>
    %571 = vector.extract_strided_slice %561 {offsets = [0, 4], sizes = [2, 16], strides = [1, 1]} : vector<2x20xf32> to vector<2x16xf32>
    %572 = tpu.concatenate %570, %571 in 1 : vector<2x16xf32>, vector<2x16xf32> -> vector<2x32xf32>
    %cst_270 = arith.constant dense<0.000000e+00> : vector<2x32xf32>
    %573 = tpu.matmul %569, %572, %cst_270 {dimension_numbers = #tpu.dot_dimension_numbers<[1], [0], [0], [1], [0, 0, 1, 1], [], []>} : vector<2x2xf32>, vector<2x32xf32>, vector<2x32xf32> -> vector<2x32xf32>
    %574 = arith.addf %567, %573 : vector<2x32xf32>
    %575 = vector.broadcast %555 : vector<2x1xf32> to vector<2x32xf32>
    %576 = arith.addf %574, %575 : vector<2x32xf32>
    %cst_271 = arith.constant 0.000000e+00 : f32
    %577 = vector.broadcast %cst_271 : f32 to vector<2x32xf32>
    %578 = arith.maximumf %576, %577 : vector<2x32xf32>
    %c0_272 = arith.constant 0 : index
    %c0_273 = arith.constant 0 : index
    %579 = vector.load %arg46[%c0_272, %c0_273] : memref<2x4xf32, #tpu.memory_space<vmem>>, vector<2x4xf32>
    %c0_274 = arith.constant 0 : index
    %c0_275 = arith.constant 0 : index
    %580 = vector.load %arg45[%c0_274, %c0_275] : memref<2x1xf32, #tpu.memory_space<vmem>>, vector<2x1xf32>
    %cst_276 = arith.constant dense<0.000000e+00> : vector<2x32xf32>
    %581 = tpu.matmul %579, %528, %cst_276 {dimension_numbers = #tpu.dot_dimension_numbers<[1], [0], [0], [1], [0, 0, 1, 1], [], []>} : vector<2x4xf32>, vector<4x32xf32>, vector<2x32xf32> -> vector<2x32xf32>
    %582 = vector.broadcast %580 : vector<2x1xf32> to vector<2x32xf32>
    %583 = arith.addf %581, %582 : vector<2x32xf32>
    %584 = arith.addf %578, %583 : vector<2x32xf32>
    %cst_277 = arith.constant 0.000000e+00 : f32
    %585 = vector.broadcast %cst_277 : f32 to vector<2x32xf32>
    %586 = arith.maximumf %584, %585 : vector<2x32xf32>
    %c0_278 = arith.constant 0 : index
    %c0_279 = arith.constant 0 : index
    %587 = vector.load %arg28[%c0_278, %c0_279] : memref<16x2xf32, #tpu.memory_space<vmem>>, vector<16x2xf32>
    %c0_280 = arith.constant 0 : index
    %c0_281 = arith.constant 0 : index
    %588 = vector.load %arg27[%c0_280, %c0_281] : memref<16x1xf32, #tpu.memory_space<vmem>>, vector<16x1xf32>
    %cst_282 = arith.constant dense<0.000000e+00> : vector<16x32xf32>
    %589 = tpu.matmul %587, %586, %cst_282 {dimension_numbers = #tpu.dot_dimension_numbers<[1], [0], [0], [1], [0, 0, 1, 1], [], []>} : vector<16x2xf32>, vector<2x32xf32>, vector<16x32xf32> -> vector<16x32xf32>
    %590 = vector.broadcast %588 : vector<16x1xf32> to vector<16x32xf32>
    %591 = arith.addf %589, %590 : vector<16x32xf32>
    %592 = tpu.concatenate %252, %321, %427, %591 in 0 : vector<16x32xf32>, vector<16x32xf32>, vector<16x32xf32>, vector<16x32xf32> -> vector<64x32xf32>
    %c0_283 = arith.constant 0 : index
    %c0_284 = arith.constant 0 : index
    %593 = vector.load %arg48[%c0_283, %c0_284] : memref<128x64xf32, #tpu.memory_space<vmem>>, vector<128x64xf32>
    %c0_285 = arith.constant 0 : index
    %c0_286 = arith.constant 0 : index
    %594 = vector.load %arg47[%c0_285, %c0_286] : memref<128x1xf32, #tpu.memory_space<vmem>>, vector<128x1xf32>
    %cst_287 = arith.constant dense<0.000000e+00> : vector<128x32xf32>
    %595 = tpu.matmul %593, %592, %cst_287 {dimension_numbers = #tpu.dot_dimension_numbers<[1], [0], [0], [1], [0, 0, 1, 1], [], []>} : vector<128x64xf32>, vector<64x32xf32>, vector<128x32xf32> -> vector<128x32xf32>
    %596 = vector.broadcast %594 : vector<128x1xf32> to vector<128x32xf32>
    %597 = arith.addf %595, %596 : vector<128x32xf32>
    %c0_288 = arith.constant 0 : index
    %c0_289 = arith.constant 0 : index
    %598 = vector.load %arg50[%c0_288, %c0_289] : memref<16x128xf32, #tpu.memory_space<vmem>>, vector<16x128xf32>
    %c0_290 = arith.constant 0 : index
    %c0_291 = arith.constant 0 : index
    %599 = vector.load %arg49[%c0_290, %c0_291] : memref<16x1xf32, #tpu.memory_space<vmem>>, vector<16x1xf32>
    %cst_292 = arith.constant dense<0.000000e+00> : vector<16x32xf32>
    %600 = tpu.matmul %598, %597, %cst_292 {dimension_numbers = #tpu.dot_dimension_numbers<[1], [0], [0], [1], [0, 0, 1, 1], [], []>} : vector<16x128xf32>, vector<128x32xf32>, vector<16x32xf32> -> vector<16x32xf32>
    %601 = vector.broadcast %599 : vector<16x1xf32> to vector<16x32xf32>
    %602 = arith.addf %600, %601 : vector<16x32xf32>
    %cst_293 = arith.constant 3.000000e+00 : f32
    %603 = vector.broadcast %cst_293 : f32 to vector<16x32xf32>
    %604 = arith.addf %602, %603 : vector<16x32xf32>
    %cst_294 = arith.constant 0.000000e+00 : f32
    %cst_295 = arith.constant 6.000000e+00 : f32
    %605 = vector.broadcast %cst_294 : f32 to vector<16x32xf32>
    %606 = arith.maximumf %605, %604 : vector<16x32xf32>
    %607 = vector.broadcast %cst_295 : f32 to vector<16x32xf32>
    %608 = arith.minimumf %607, %606 : vector<16x32xf32>
    %609 = arith.mulf %602, %608 : vector<16x32xf32>
    %cst_296 = arith.constant 0.166666672 : f32
    %610 = vector.broadcast %cst_296 : f32 to vector<16x32xf32>
    %611 = arith.mulf %609, %610 : vector<16x32xf32>
    %612 = arith.addf %611, %242 : vector<16x32xf32>
    %c0_297 = arith.constant 0 : index
    %c0_298 = arith.constant 0 : index
    %613 = vector.load %arg52[%c0_297, %c0_298] : memref<16x16xf32, #tpu.memory_space<vmem>>, vector<16x16xf32>
    %c0_299 = arith.constant 0 : index
    %c0_300 = arith.constant 0 : index
    %614 = vector.load %arg51[%c0_299, %c0_300] : memref<16x1xf32, #tpu.memory_space<vmem>>, vector<16x1xf32>
    %cst_301 = arith.constant dense<0.000000e+00> : vector<16x32xf32>
    %615 = tpu.matmul %613, %612, %cst_301 {dimension_numbers = #tpu.dot_dimension_numbers<[1], [0], [0], [1], [0, 0, 1, 1], [], []>} : vector<16x16xf32>, vector<16x32xf32>, vector<16x32xf32> -> vector<16x32xf32>
    %616 = vector.broadcast %614 : vector<16x1xf32> to vector<16x32xf32>
    %617 = arith.addf %615, %616 : vector<16x32xf32>
    %c0_302 = arith.constant 0 : index
    %c0_303 = arith.constant 0 : index
    %618 = vector.load %arg54[%c0_302, %c0_303] : memref<16x16xf32, #tpu.memory_space<vmem>>, vector<16x16xf32>
    %c0_304 = arith.constant 0 : index
    %c0_305 = arith.constant 0 : index
    %619 = vector.load %arg53[%c0_304, %c0_305] : memref<16x1xf32, #tpu.memory_space<vmem>>, vector<16x1xf32>
    %cst_306 = arith.constant dense<0.000000e+00> : vector<16x32xf32>
    %620 = tpu.matmul %618, %617, %cst_306 {dimension_numbers = #tpu.dot_dimension_numbers<[1], [0], [0], [1], [0, 0, 1, 1], [], []>} : vector<16x16xf32>, vector<16x32xf32>, vector<16x32xf32> -> vector<16x32xf32>
    %621 = vector.broadcast %619 : vector<16x1xf32> to vector<16x32xf32>
    %622 = arith.addf %620, %621 : vector<16x32xf32>
    %c0_307 = arith.constant 0 : index
    %c0_308 = arith.constant 0 : index
    %623 = vector.load %arg56[%c0_307, %c0_308] : memref<16x48xf32, #tpu.memory_space<vmem>>, vector<16x48xf32>
    %c0_309 = arith.constant 0 : index
    %c0_310 = arith.constant 0 : index
    %624 = vector.load %arg55[%c0_309, %c0_310] : memref<16x1xf32, #tpu.memory_space<vmem>>, vector<16x1xf32>
    %625 = vector.extract_strided_slice %612 {offsets = [0, 0], sizes = [16, 16], strides = [1, 1]} : vector<16x32xf32> to vector<16x16xf32>
    %cst_311 = arith.constant 0.000000e+00 : f32
    %626 = vector.broadcast %cst_311 : f32 to vector<16x1xf32>
    %cst_312 = arith.constant 0.000000e+00 : f32
    %627 = vector.broadcast %cst_312 : f32 to vector<16x1xf32>
    %628 = tpu.concatenate %626, %625, %627 in 1 : vector<16x1xf32>, vector<16x16xf32>, vector<16x1xf32> -> vector<16x18xf32>
    %629 = vector.extract_strided_slice %612 {offsets = [0, 16], sizes = [16, 16], strides = [1, 1]} : vector<16x32xf32> to vector<16x16xf32>
    %cst_313 = arith.constant 0.000000e+00 : f32
    %630 = vector.broadcast %cst_313 : f32 to vector<16x1xf32>
    %cst_314 = arith.constant 0.000000e+00 : f32
    %631 = vector.broadcast %cst_314 : f32 to vector<16x1xf32>
    %632 = tpu.concatenate %630, %629, %631 in 1 : vector<16x1xf32>, vector<16x16xf32>, vector<16x1xf32> -> vector<16x18xf32>
    %633 = vector.extract_strided_slice %628 {offsets = [0, 0], sizes = [16, 16], strides = [1, 1]} : vector<16x18xf32> to vector<16x16xf32>
    %634 = vector.extract_strided_slice %632 {offsets = [0, 0], sizes = [16, 16], strides = [1, 1]} : vector<16x18xf32> to vector<16x16xf32>
    %635 = tpu.concatenate %633, %634 in 1 : vector<16x16xf32>, vector<16x16xf32> -> vector<16x32xf32>
    %636 = vector.extract_strided_slice %628 {offsets = [0, 1], sizes = [16, 16], strides = [1, 1]} : vector<16x18xf32> to vector<16x16xf32>
    %637 = vector.extract_strided_slice %632 {offsets = [0, 1], sizes = [16, 16], strides = [1, 1]} : vector<16x18xf32> to vector<16x16xf32>
    %638 = tpu.concatenate %636, %637 in 1 : vector<16x16xf32>, vector<16x16xf32> -> vector<16x32xf32>
    %639 = vector.extract_strided_slice %628 {offsets = [0, 2], sizes = [16, 16], strides = [1, 1]} : vector<16x18xf32> to vector<16x16xf32>
    %640 = vector.extract_strided_slice %632 {offsets = [0, 2], sizes = [16, 16], strides = [1, 1]} : vector<16x18xf32> to vector<16x16xf32>
    %641 = tpu.concatenate %639, %640 in 1 : vector<16x16xf32>, vector<16x16xf32> -> vector<16x32xf32>
    %642 = tpu.concatenate %635, %638, %641 in 0 : vector<16x32xf32>, vector<16x32xf32>, vector<16x32xf32> -> vector<48x32xf32>
    %cst_315 = arith.constant dense<0.000000e+00> : vector<16x32xf32>
    %643 = tpu.matmul %623, %642, %cst_315 {dimension_numbers = #tpu.dot_dimension_numbers<[1], [0], [0], [1], [0, 0, 1, 1], [], []>} : vector<16x48xf32>, vector<48x32xf32>, vector<16x32xf32> -> vector<16x32xf32>
    %644 = vector.broadcast %624 : vector<16x1xf32> to vector<16x32xf32>
    %645 = arith.addf %643, %644 : vector<16x32xf32>
    %c0_316 = arith.constant 0 : index
    %c0_317 = arith.constant 0 : index
    %646 = vector.load %arg58[%c0_316, %c0_317] : memref<16x48xf32, #tpu.memory_space<vmem>>, vector<16x48xf32>
    %c0_318 = arith.constant 0 : index
    %c0_319 = arith.constant 0 : index
    %647 = vector.load %arg57[%c0_318, %c0_319] : memref<16x1xf32, #tpu.memory_space<vmem>>, vector<16x1xf32>
    %648 = vector.extract_strided_slice %645 {offsets = [0, 0], sizes = [16, 16], strides = [1, 1]} : vector<16x32xf32> to vector<16x16xf32>
    %cst_320 = arith.constant 0.000000e+00 : f32
    %649 = vector.broadcast %cst_320 : f32 to vector<16x1xf32>
    %cst_321 = arith.constant 0.000000e+00 : f32
    %650 = vector.broadcast %cst_321 : f32 to vector<16x1xf32>
    %651 = tpu.concatenate %649, %648, %650 in 1 : vector<16x1xf32>, vector<16x16xf32>, vector<16x1xf32> -> vector<16x18xf32>
    %652 = vector.extract_strided_slice %645 {offsets = [0, 16], sizes = [16, 16], strides = [1, 1]} : vector<16x32xf32> to vector<16x16xf32>
    %cst_322 = arith.constant 0.000000e+00 : f32
    %653 = vector.broadcast %cst_322 : f32 to vector<16x1xf32>
    %cst_323 = arith.constant 0.000000e+00 : f32
    %654 = vector.broadcast %cst_323 : f32 to vector<16x1xf32>
    %655 = tpu.concatenate %653, %652, %654 in 1 : vector<16x1xf32>, vector<16x16xf32>, vector<16x1xf32> -> vector<16x18xf32>
    %656 = vector.extract_strided_slice %651 {offsets = [0, 0], sizes = [16, 16], strides = [1, 1]} : vector<16x18xf32> to vector<16x16xf32>
    %657 = vector.extract_strided_slice %655 {offsets = [0, 0], sizes = [16, 16], strides = [1, 1]} : vector<16x18xf32> to vector<16x16xf32>
    %658 = tpu.concatenate %656, %657 in 1 : vector<16x16xf32>, vector<16x16xf32> -> vector<16x32xf32>
    %659 = vector.extract_strided_slice %651 {offsets = [0, 1], sizes = [16, 16], strides = [1, 1]} : vector<16x18xf32> to vector<16x16xf32>
    %660 = vector.extract_strided_slice %655 {offsets = [0, 1], sizes = [16, 16], strides = [1, 1]} : vector<16x18xf32> to vector<16x16xf32>
    %661 = tpu.concatenate %659, %660 in 1 : vector<16x16xf32>, vector<16x16xf32> -> vector<16x32xf32>
    %662 = vector.extract_strided_slice %651 {offsets = [0, 2], sizes = [16, 16], strides = [1, 1]} : vector<16x18xf32> to vector<16x16xf32>
    %663 = vector.extract_strided_slice %655 {offsets = [0, 2], sizes = [16, 16], strides = [1, 1]} : vector<16x18xf32> to vector<16x16xf32>
    %664 = tpu.concatenate %662, %663 in 1 : vector<16x16xf32>, vector<16x16xf32> -> vector<16x32xf32>
    %665 = tpu.concatenate %658, %661, %664 in 0 : vector<16x32xf32>, vector<16x32xf32>, vector<16x32xf32> -> vector<48x32xf32>
    %cst_324 = arith.constant dense<0.000000e+00> : vector<16x32xf32>
    %666 = tpu.matmul %646, %665, %cst_324 {dimension_numbers = #tpu.dot_dimension_numbers<[1], [0], [0], [1], [0, 0, 1, 1], [], []>} : vector<16x48xf32>, vector<48x32xf32>, vector<16x32xf32> -> vector<16x32xf32>
    %667 = vector.broadcast %647 : vector<16x1xf32> to vector<16x32xf32>
    %668 = arith.addf %666, %667 : vector<16x32xf32>
    %c0_325 = arith.constant 0 : index
    %c0_326 = arith.constant 0 : index
    %669 = vector.load %arg60[%c0_325, %c0_326] : memref<16x48xf32, #tpu.memory_space<vmem>>, vector<16x48xf32>
    %c0_327 = arith.constant 0 : index
    %c0_328 = arith.constant 0 : index
    %670 = vector.load %arg59[%c0_327, %c0_328] : memref<16x1xf32, #tpu.memory_space<vmem>>, vector<16x1xf32>
    %671 = vector.extract_strided_slice %668 {offsets = [0, 0], sizes = [16, 16], strides = [1, 1]} : vector<16x32xf32> to vector<16x16xf32>
    %cst_329 = arith.constant 0.000000e+00 : f32
    %672 = vector.broadcast %cst_329 : f32 to vector<16x1xf32>
    %cst_330 = arith.constant 0.000000e+00 : f32
    %673 = vector.broadcast %cst_330 : f32 to vector<16x1xf32>
    %674 = tpu.concatenate %672, %671, %673 in 1 : vector<16x1xf32>, vector<16x16xf32>, vector<16x1xf32> -> vector<16x18xf32>
    %675 = vector.extract_strided_slice %668 {offsets = [0, 16], sizes = [16, 16], strides = [1, 1]} : vector<16x32xf32> to vector<16x16xf32>
    %cst_331 = arith.constant 0.000000e+00 : f32
    %676 = vector.broadcast %cst_331 : f32 to vector<16x1xf32>
    %cst_332 = arith.constant 0.000000e+00 : f32
    %677 = vector.broadcast %cst_332 : f32 to vector<16x1xf32>
    %678 = tpu.concatenate %676, %675, %677 in 1 : vector<16x1xf32>, vector<16x16xf32>, vector<16x1xf32> -> vector<16x18xf32>
    %679 = vector.extract_strided_slice %674 {offsets = [0, 0], sizes = [16, 16], strides = [1, 1]} : vector<16x18xf32> to vector<16x16xf32>
    %680 = vector.extract_strided_slice %678 {offsets = [0, 0], sizes = [16, 16], strides = [1, 1]} : vector<16x18xf32> to vector<16x16xf32>
    %681 = tpu.concatenate %679, %680 in 1 : vector<16x16xf32>, vector<16x16xf32> -> vector<16x32xf32>
    %682 = vector.extract_strided_slice %674 {offsets = [0, 1], sizes = [16, 16], strides = [1, 1]} : vector<16x18xf32> to vector<16x16xf32>
    %683 = vector.extract_strided_slice %678 {offsets = [0, 1], sizes = [16, 16], strides = [1, 1]} : vector<16x18xf32> to vector<16x16xf32>
    %684 = tpu.concatenate %682, %683 in 1 : vector<16x16xf32>, vector<16x16xf32> -> vector<16x32xf32>
    %685 = vector.extract_strided_slice %674 {offsets = [0, 2], sizes = [16, 16], strides = [1, 1]} : vector<16x18xf32> to vector<16x16xf32>
    %686 = vector.extract_strided_slice %678 {offsets = [0, 2], sizes = [16, 16], strides = [1, 1]} : vector<16x18xf32> to vector<16x16xf32>
    %687 = tpu.concatenate %685, %686 in 1 : vector<16x16xf32>, vector<16x16xf32> -> vector<16x32xf32>
    %688 = tpu.concatenate %681, %684, %687 in 0 : vector<16x32xf32>, vector<16x32xf32>, vector<16x32xf32> -> vector<48x32xf32>
    %cst_333 = arith.constant dense<0.000000e+00> : vector<16x32xf32>
    %689 = tpu.matmul %669, %688, %cst_333 {dimension_numbers = #tpu.dot_dimension_numbers<[1], [0], [0], [1], [0, 0, 1, 1], [], []>} : vector<16x48xf32>, vector<48x32xf32>, vector<16x32xf32> -> vector<16x32xf32>
    %690 = vector.broadcast %670 : vector<16x1xf32> to vector<16x32xf32>
    %691 = arith.addf %689, %690 : vector<16x32xf32>
    %c0_334 = arith.constant 0 : index
    %c0_335 = arith.constant 0 : index
    %692 = vector.load %arg64[%c0_334, %c0_335] : memref<8x32xf32, #tpu.memory_space<vmem>>, vector<8x32xf32>
    %c0_336 = arith.constant 0 : index
    %c0_337 = arith.constant 0 : index
    %693 = vector.load %arg63[%c0_336, %c0_337] : memref<8x1xf32, #tpu.memory_space<vmem>>, vector<8x1xf32>
    %694 = vector.extract_strided_slice %612 {offsets = [0, 0], sizes = [16, 16], strides = [1, 1]} : vector<16x32xf32> to vector<16x16xf32>
    %cst_338 = arith.constant 0.000000e+00 : f32
    %695 = vector.broadcast %cst_338 : f32 to vector<16x1xf32>
    %696 = tpu.concatenate %695, %694 in 1 : vector<16x1xf32>, vector<16x16xf32> -> vector<16x17xf32>
    %697 = vector.extract_strided_slice %612 {offsets = [0, 16], sizes = [16, 16], strides = [1, 1]} : vector<16x32xf32> to vector<16x16xf32>
    %cst_339 = arith.constant 0.000000e+00 : f32
    %698 = vector.broadcast %cst_339 : f32 to vector<16x1xf32>
    %699 = tpu.concatenate %698, %697 in 1 : vector<16x1xf32>, vector<16x16xf32> -> vector<16x17xf32>
    %700 = vector.extract_strided_slice %696 {offsets = [0, 0], sizes = [16, 16], strides = [1, 1]} : vector<16x17xf32> to vector<16x16xf32>
    %701 = vector.extract_strided_slice %699 {offsets = [0, 0], sizes = [16, 16], strides = [1, 1]} : vector<16x17xf32> to vector<16x16xf32>
    %702 = tpu.concatenate %700, %701 in 1 : vector<16x16xf32>, vector<16x16xf32> -> vector<16x32xf32>
    %703 = vector.extract_strided_slice %696 {offsets = [0, 1], sizes = [16, 16], strides = [1, 1]} : vector<16x17xf32> to vector<16x16xf32>
    %704 = vector.extract_strided_slice %699 {offsets = [0, 1], sizes = [16, 16], strides = [1, 1]} : vector<16x17xf32> to vector<16x16xf32>
    %705 = tpu.concatenate %703, %704 in 1 : vector<16x16xf32>, vector<16x16xf32> -> vector<16x32xf32>
    %706 = tpu.concatenate %702, %705 in 0 : vector<16x32xf32>, vector<16x32xf32> -> vector<32x32xf32>
    %cst_340 = arith.constant dense<0.000000e+00> : vector<8x32xf32>
    %707 = tpu.matmul %692, %706, %cst_340 {dimension_numbers = #tpu.dot_dimension_numbers<[1], [0], [0], [1], [0, 0, 1, 1], [], []>} : vector<8x32xf32>, vector<32x32xf32>, vector<8x32xf32> -> vector<8x32xf32>
    %708 = vector.broadcast %693 : vector<8x1xf32> to vector<8x32xf32>
    %709 = arith.addf %707, %708 : vector<8x32xf32>
    %cst_341 = arith.constant 0.000000e+00 : f32
    %710 = vector.broadcast %cst_341 : f32 to vector<8x32xf32>
    %711 = arith.maximumf %709, %710 : vector<8x32xf32>
    %c0_342 = arith.constant 0 : index
    %c0_343 = arith.constant 0 : index
    %712 = vector.load %arg66[%c0_342, %c0_343] : memref<8x16xf32, #tpu.memory_space<vmem>>, vector<8x16xf32>
    %c0_344 = arith.constant 0 : index
    %c0_345 = arith.constant 0 : index
    %713 = vector.load %arg65[%c0_344, %c0_345] : memref<8x1xf32, #tpu.memory_space<vmem>>, vector<8x1xf32>
    %714 = vector.extract_strided_slice %711 {offsets = [0, 0], sizes = [8, 16], strides = [1, 1]} : vector<8x32xf32> to vector<8x16xf32>
    %cst_346 = arith.constant 0.000000e+00 : f32
    %715 = vector.broadcast %cst_346 : f32 to vector<8x1xf32>
    %716 = tpu.concatenate %715, %714 in 1 : vector<8x1xf32>, vector<8x16xf32> -> vector<8x17xf32>
    %717 = vector.extract_strided_slice %711 {offsets = [0, 16], sizes = [8, 16], strides = [1, 1]} : vector<8x32xf32> to vector<8x16xf32>
    %cst_347 = arith.constant 0.000000e+00 : f32
    %718 = vector.broadcast %cst_347 : f32 to vector<8x1xf32>
    %719 = tpu.concatenate %718, %717 in 1 : vector<8x1xf32>, vector<8x16xf32> -> vector<8x17xf32>
    %720 = vector.extract_strided_slice %716 {offsets = [0, 0], sizes = [8, 16], strides = [1, 1]} : vector<8x17xf32> to vector<8x16xf32>
    %721 = vector.extract_strided_slice %719 {offsets = [0, 0], sizes = [8, 16], strides = [1, 1]} : vector<8x17xf32> to vector<8x16xf32>
    %722 = tpu.concatenate %720, %721 in 1 : vector<8x16xf32>, vector<8x16xf32> -> vector<8x32xf32>
    %723 = vector.extract_strided_slice %716 {offsets = [0, 1], sizes = [8, 16], strides = [1, 1]} : vector<8x17xf32> to vector<8x16xf32>
    %724 = vector.extract_strided_slice %719 {offsets = [0, 1], sizes = [8, 16], strides = [1, 1]} : vector<8x17xf32> to vector<8x16xf32>
    %725 = tpu.concatenate %723, %724 in 1 : vector<8x16xf32>, vector<8x16xf32> -> vector<8x32xf32>
    %726 = tpu.concatenate %722, %725 in 0 : vector<8x32xf32>, vector<8x32xf32> -> vector<16x32xf32>
    %cst_348 = arith.constant dense<0.000000e+00> : vector<8x32xf32>
    %727 = tpu.matmul %712, %726, %cst_348 {dimension_numbers = #tpu.dot_dimension_numbers<[1], [0], [0], [1], [0, 0, 1, 1], [], []>} : vector<8x16xf32>, vector<16x32xf32>, vector<8x32xf32> -> vector<8x32xf32>
    %728 = vector.broadcast %713 : vector<8x1xf32> to vector<8x32xf32>
    %729 = arith.addf %727, %728 : vector<8x32xf32>
    %cst_349 = arith.constant 0.000000e+00 : f32
    %730 = vector.broadcast %cst_349 : f32 to vector<8x32xf32>
    %731 = arith.maximumf %729, %730 : vector<8x32xf32>
    %c0_350 = arith.constant 0 : index
    %c0_351 = arith.constant 0 : index
    %732 = vector.load %arg68[%c0_350, %c0_351] : memref<8x16xf32, #tpu.memory_space<vmem>>, vector<8x16xf32>
    %c0_352 = arith.constant 0 : index
    %c0_353 = arith.constant 0 : index
    %733 = vector.load %arg67[%c0_352, %c0_353] : memref<8x1xf32, #tpu.memory_space<vmem>>, vector<8x1xf32>
    %cst_354 = arith.constant dense<0.000000e+00> : vector<8x32xf32>
    %734 = tpu.matmul %732, %612, %cst_354 {dimension_numbers = #tpu.dot_dimension_numbers<[1], [0], [0], [1], [0, 0, 1, 1], [], []>} : vector<8x16xf32>, vector<16x32xf32>, vector<8x32xf32> -> vector<8x32xf32>
    %735 = vector.broadcast %733 : vector<8x1xf32> to vector<8x32xf32>
    %736 = arith.addf %734, %735 : vector<8x32xf32>
    %737 = arith.addf %731, %736 : vector<8x32xf32>
    %cst_355 = arith.constant 0.000000e+00 : f32
    %738 = vector.broadcast %cst_355 : f32 to vector<8x32xf32>
    %739 = arith.maximumf %737, %738 : vector<8x32xf32>
    %c0_356 = arith.constant 0 : index
    %c0_357 = arith.constant 0 : index
    %740 = vector.load %arg70[%c0_356, %c0_357] : memref<4x16xf32, #tpu.memory_space<vmem>>, vector<4x16xf32>
    %c0_358 = arith.constant 0 : index
    %c0_359 = arith.constant 0 : index
    %741 = vector.load %arg69[%c0_358, %c0_359] : memref<4x1xf32, #tpu.memory_space<vmem>>, vector<4x1xf32>
    %742 = vector.extract_strided_slice %739 {offsets = [0, 0], sizes = [8, 16], strides = [1, 1]} : vector<8x32xf32> to vector<8x16xf32>
    %cst_360 = arith.constant 0.000000e+00 : f32
    %743 = vector.broadcast %cst_360 : f32 to vector<8x2xf32>
    %744 = tpu.concatenate %743, %742 in 1 : vector<8x2xf32>, vector<8x16xf32> -> vector<8x18xf32>
    %745 = vector.extract_strided_slice %739 {offsets = [0, 16], sizes = [8, 16], strides = [1, 1]} : vector<8x32xf32> to vector<8x16xf32>
    %cst_361 = arith.constant 0.000000e+00 : f32
    %746 = vector.broadcast %cst_361 : f32 to vector<8x2xf32>
    %747 = tpu.concatenate %746, %745 in 1 : vector<8x2xf32>, vector<8x16xf32> -> vector<8x18xf32>
    %748 = vector.extract_strided_slice %744 {offsets = [0, 0], sizes = [8, 16], strides = [1, 1]} : vector<8x18xf32> to vector<8x16xf32>
    %749 = vector.extract_strided_slice %747 {offsets = [0, 0], sizes = [8, 16], strides = [1, 1]} : vector<8x18xf32> to vector<8x16xf32>
    %750 = tpu.concatenate %748, %749 in 1 : vector<8x16xf32>, vector<8x16xf32> -> vector<8x32xf32>
    %751 = vector.extract_strided_slice %744 {offsets = [0, 2], sizes = [8, 16], strides = [1, 1]} : vector<8x18xf32> to vector<8x16xf32>
    %752 = vector.extract_strided_slice %747 {offsets = [0, 2], sizes = [8, 16], strides = [1, 1]} : vector<8x18xf32> to vector<8x16xf32>
    %753 = tpu.concatenate %751, %752 in 1 : vector<8x16xf32>, vector<8x16xf32> -> vector<8x32xf32>
    %754 = tpu.concatenate %750, %753 in 0 : vector<8x32xf32>, vector<8x32xf32> -> vector<16x32xf32>
    %cst_362 = arith.constant dense<0.000000e+00> : vector<4x32xf32>
    %755 = tpu.matmul %740, %754, %cst_362 {dimension_numbers = #tpu.dot_dimension_numbers<[1], [0], [0], [1], [0, 0, 1, 1], [], []>} : vector<4x16xf32>, vector<16x32xf32>, vector<4x32xf32> -> vector<4x32xf32>
    %756 = vector.broadcast %741 : vector<4x1xf32> to vector<4x32xf32>
    %757 = arith.addf %755, %756 : vector<4x32xf32>
    %cst_363 = arith.constant 0.000000e+00 : f32
    %758 = vector.broadcast %cst_363 : f32 to vector<4x32xf32>
    %759 = arith.maximumf %757, %758 : vector<4x32xf32>
    %c0_364 = arith.constant 0 : index
    %c0_365 = arith.constant 0 : index
    %c0_366 = arith.constant 0 : index
    %760 = vector.load %arg72[%c0_364, %c0_365, %c0_366] : memref<2x4x4xf32, #tpu.memory_space<vmem>>, vector<2x4x4xf32>
    %c0_367 = arith.constant 0 : index
    %c0_368 = arith.constant 0 : index
    %761 = vector.load %arg71[%c0_367, %c0_368] : memref<4x1xf32, #tpu.memory_space<vmem>>, vector<4x1xf32>
    %762 = vector.extract_strided_slice %759 {offsets = [0, 0], sizes = [4, 16], strides = [1, 1]} : vector<4x32xf32> to vector<4x16xf32>
    %cst_369 = arith.constant 0.000000e+00 : f32
    %763 = vector.broadcast %cst_369 : f32 to vector<4x2xf32>
    %764 = tpu.concatenate %763, %762 in 1 : vector<4x2xf32>, vector<4x16xf32> -> vector<4x18xf32>
    %765 = vector.extract_strided_slice %759 {offsets = [0, 16], sizes = [4, 16], strides = [1, 1]} : vector<4x32xf32> to vector<4x16xf32>
    %cst_370 = arith.constant 0.000000e+00 : f32
    %766 = vector.broadcast %cst_370 : f32 to vector<4x2xf32>
    %767 = tpu.concatenate %766, %765 in 1 : vector<4x2xf32>, vector<4x16xf32> -> vector<4x18xf32>
    %768 = vector.extract_strided_slice %760 {offsets = [0, 0, 0], sizes = [1, 4, 4], strides = [1, 1, 1]} : vector<2x4x4xf32> to vector<1x4x4xf32>
    %769 = vector.shape_cast %768 : vector<1x4x4xf32> to vector<4x4xf32>
    %770 = vector.extract_strided_slice %764 {offsets = [0, 0], sizes = [4, 16], strides = [1, 1]} : vector<4x18xf32> to vector<4x16xf32>
    %771 = vector.extract_strided_slice %767 {offsets = [0, 0], sizes = [4, 16], strides = [1, 1]} : vector<4x18xf32> to vector<4x16xf32>
    %772 = tpu.concatenate %770, %771 in 1 : vector<4x16xf32>, vector<4x16xf32> -> vector<4x32xf32>
    %cst_371 = arith.constant dense<0.000000e+00> : vector<4x32xf32>
    %773 = tpu.matmul %769, %772, %cst_371 {dimension_numbers = #tpu.dot_dimension_numbers<[1], [0], [0], [1], [0, 0, 1, 1], [], []>} : vector<4x4xf32>, vector<4x32xf32>, vector<4x32xf32> -> vector<4x32xf32>
    %774 = vector.extract_strided_slice %760 {offsets = [1, 0, 0], sizes = [1, 4, 4], strides = [1, 1, 1]} : vector<2x4x4xf32> to vector<1x4x4xf32>
    %775 = vector.shape_cast %774 : vector<1x4x4xf32> to vector<4x4xf32>
    %776 = vector.extract_strided_slice %764 {offsets = [0, 2], sizes = [4, 16], strides = [1, 1]} : vector<4x18xf32> to vector<4x16xf32>
    %777 = vector.extract_strided_slice %767 {offsets = [0, 2], sizes = [4, 16], strides = [1, 1]} : vector<4x18xf32> to vector<4x16xf32>
    %778 = tpu.concatenate %776, %777 in 1 : vector<4x16xf32>, vector<4x16xf32> -> vector<4x32xf32>
    %cst_372 = arith.constant dense<0.000000e+00> : vector<4x32xf32>
    %779 = tpu.matmul %775, %778, %cst_372 {dimension_numbers = #tpu.dot_dimension_numbers<[1], [0], [0], [1], [0, 0, 1, 1], [], []>} : vector<4x4xf32>, vector<4x32xf32>, vector<4x32xf32> -> vector<4x32xf32>
    %780 = arith.addf %773, %779 : vector<4x32xf32>
    %781 = vector.broadcast %761 : vector<4x1xf32> to vector<4x32xf32>
    %782 = arith.addf %780, %781 : vector<4x32xf32>
    %cst_373 = arith.constant 0.000000e+00 : f32
    %783 = vector.broadcast %cst_373 : f32 to vector<4x32xf32>
    %784 = arith.maximumf %782, %783 : vector<4x32xf32>
    %c0_374 = arith.constant 0 : index
    %c0_375 = arith.constant 0 : index
    %785 = vector.load %arg74[%c0_374, %c0_375] : memref<4x8xf32, #tpu.memory_space<vmem>>, vector<4x8xf32>
    %c0_376 = arith.constant 0 : index
    %c0_377 = arith.constant 0 : index
    %786 = vector.load %arg73[%c0_376, %c0_377] : memref<4x1xf32, #tpu.memory_space<vmem>>, vector<4x1xf32>
    %cst_378 = arith.constant dense<0.000000e+00> : vector<4x32xf32>
    %787 = tpu.matmul %785, %739, %cst_378 {dimension_numbers = #tpu.dot_dimension_numbers<[1], [0], [0], [1], [0, 0, 1, 1], [], []>} : vector<4x8xf32>, vector<8x32xf32>, vector<4x32xf32> -> vector<4x32xf32>
    %788 = vector.broadcast %786 : vector<4x1xf32> to vector<4x32xf32>
    %789 = arith.addf %787, %788 : vector<4x32xf32>
    %790 = arith.addf %784, %789 : vector<4x32xf32>
    %cst_379 = arith.constant 0.000000e+00 : f32
    %791 = vector.broadcast %cst_379 : f32 to vector<4x32xf32>
    %792 = arith.maximumf %790, %791 : vector<4x32xf32>
    %c0_380 = arith.constant 0 : index
    %c0_381 = arith.constant 0 : index
    %793 = vector.load %arg62[%c0_380, %c0_381] : memref<16x4xf32, #tpu.memory_space<vmem>>, vector<16x4xf32>
    %c0_382 = arith.constant 0 : index
    %c0_383 = arith.constant 0 : index
    %794 = vector.load %arg61[%c0_382, %c0_383] : memref<16x1xf32, #tpu.memory_space<vmem>>, vector<16x1xf32>
    %cst_384 = arith.constant dense<0.000000e+00> : vector<16x32xf32>
    %795 = tpu.matmul %793, %792, %cst_384 {dimension_numbers = #tpu.dot_dimension_numbers<[1], [0], [0], [1], [0, 0, 1, 1], [], []>} : vector<16x4xf32>, vector<4x32xf32>, vector<16x32xf32> -> vector<16x32xf32>
    %796 = vector.broadcast %794 : vector<16x1xf32> to vector<16x32xf32>
    %797 = arith.addf %795, %796 : vector<16x32xf32>
    %c0_385 = arith.constant 0 : index
    %c0_386 = arith.constant 0 : index
    %798 = vector.load %arg78[%c0_385, %c0_386] : memref<8x32xf32, #tpu.memory_space<vmem>>, vector<8x32xf32>
    %c0_387 = arith.constant 0 : index
    %c0_388 = arith.constant 0 : index
    %799 = vector.load %arg77[%c0_387, %c0_388] : memref<8x1xf32, #tpu.memory_space<vmem>>, vector<8x1xf32>
    %800 = vector.extract_strided_slice %612 {offsets = [0, 0], sizes = [16, 16], strides = [1, 1]} : vector<16x32xf32> to vector<16x16xf32>
    %cst_389 = arith.constant 0.000000e+00 : f32
    %801 = vector.broadcast %cst_389 : f32 to vector<16x1xf32>
    %802 = tpu.concatenate %801, %800 in 1 : vector<16x1xf32>, vector<16x16xf32> -> vector<16x17xf32>
    %803 = vector.extract_strided_slice %612 {offsets = [0, 16], sizes = [16, 16], strides = [1, 1]} : vector<16x32xf32> to vector<16x16xf32>
    %cst_390 = arith.constant 0.000000e+00 : f32
    %804 = vector.broadcast %cst_390 : f32 to vector<16x1xf32>
    %805 = tpu.concatenate %804, %803 in 1 : vector<16x1xf32>, vector<16x16xf32> -> vector<16x17xf32>
    %806 = vector.extract_strided_slice %802 {offsets = [0, 0], sizes = [16, 16], strides = [1, 1]} : vector<16x17xf32> to vector<16x16xf32>
    %807 = vector.extract_strided_slice %805 {offsets = [0, 0], sizes = [16, 16], strides = [1, 1]} : vector<16x17xf32> to vector<16x16xf32>
    %808 = tpu.concatenate %806, %807 in 1 : vector<16x16xf32>, vector<16x16xf32> -> vector<16x32xf32>
    %809 = vector.extract_strided_slice %802 {offsets = [0, 1], sizes = [16, 16], strides = [1, 1]} : vector<16x17xf32> to vector<16x16xf32>
    %810 = vector.extract_strided_slice %805 {offsets = [0, 1], sizes = [16, 16], strides = [1, 1]} : vector<16x17xf32> to vector<16x16xf32>
    %811 = tpu.concatenate %809, %810 in 1 : vector<16x16xf32>, vector<16x16xf32> -> vector<16x32xf32>
    %812 = tpu.concatenate %808, %811 in 0 : vector<16x32xf32>, vector<16x32xf32> -> vector<32x32xf32>
    %cst_391 = arith.constant dense<0.000000e+00> : vector<8x32xf32>
    %813 = tpu.matmul %798, %812, %cst_391 {dimension_numbers = #tpu.dot_dimension_numbers<[1], [0], [0], [1], [0, 0, 1, 1], [], []>} : vector<8x32xf32>, vector<32x32xf32>, vector<8x32xf32> -> vector<8x32xf32>
    %814 = vector.broadcast %799 : vector<8x1xf32> to vector<8x32xf32>
    %815 = arith.addf %813, %814 : vector<8x32xf32>
    %cst_392 = arith.constant 0.000000e+00 : f32
    %816 = vector.broadcast %cst_392 : f32 to vector<8x32xf32>
    %817 = arith.maximumf %815, %816 : vector<8x32xf32>
    %c0_393 = arith.constant 0 : index
    %c0_394 = arith.constant 0 : index
    %818 = vector.load %arg80[%c0_393, %c0_394] : memref<8x16xf32, #tpu.memory_space<vmem>>, vector<8x16xf32>
    %c0_395 = arith.constant 0 : index
    %c0_396 = arith.constant 0 : index
    %819 = vector.load %arg79[%c0_395, %c0_396] : memref<8x1xf32, #tpu.memory_space<vmem>>, vector<8x1xf32>
    %820 = vector.extract_strided_slice %817 {offsets = [0, 0], sizes = [8, 16], strides = [1, 1]} : vector<8x32xf32> to vector<8x16xf32>
    %cst_397 = arith.constant 0.000000e+00 : f32
    %821 = vector.broadcast %cst_397 : f32 to vector<8x1xf32>
    %822 = tpu.concatenate %821, %820 in 1 : vector<8x1xf32>, vector<8x16xf32> -> vector<8x17xf32>
    %823 = vector.extract_strided_slice %817 {offsets = [0, 16], sizes = [8, 16], strides = [1, 1]} : vector<8x32xf32> to vector<8x16xf32>
    %cst_398 = arith.constant 0.000000e+00 : f32
    %824 = vector.broadcast %cst_398 : f32 to vector<8x1xf32>
    %825 = tpu.concatenate %824, %823 in 1 : vector<8x1xf32>, vector<8x16xf32> -> vector<8x17xf32>
    %826 = vector.extract_strided_slice %822 {offsets = [0, 0], sizes = [8, 16], strides = [1, 1]} : vector<8x17xf32> to vector<8x16xf32>
    %827 = vector.extract_strided_slice %825 {offsets = [0, 0], sizes = [8, 16], strides = [1, 1]} : vector<8x17xf32> to vector<8x16xf32>
    %828 = tpu.concatenate %826, %827 in 1 : vector<8x16xf32>, vector<8x16xf32> -> vector<8x32xf32>
    %829 = vector.extract_strided_slice %822 {offsets = [0, 1], sizes = [8, 16], strides = [1, 1]} : vector<8x17xf32> to vector<8x16xf32>
    %830 = vector.extract_strided_slice %825 {offsets = [0, 1], sizes = [8, 16], strides = [1, 1]} : vector<8x17xf32> to vector<8x16xf32>
    %831 = tpu.concatenate %829, %830 in 1 : vector<8x16xf32>, vector<8x16xf32> -> vector<8x32xf32>
    %832 = tpu.concatenate %828, %831 in 0 : vector<8x32xf32>, vector<8x32xf32> -> vector<16x32xf32>
    %cst_399 = arith.constant dense<0.000000e+00> : vector<8x32xf32>
    %833 = tpu.matmul %818, %832, %cst_399 {dimension_numbers = #tpu.dot_dimension_numbers<[1], [0], [0], [1], [0, 0, 1, 1], [], []>} : vector<8x16xf32>, vector<16x32xf32>, vector<8x32xf32> -> vector<8x32xf32>
    %834 = vector.broadcast %819 : vector<8x1xf32> to vector<8x32xf32>
    %835 = arith.addf %833, %834 : vector<8x32xf32>
    %cst_400 = arith.constant 0.000000e+00 : f32
    %836 = vector.broadcast %cst_400 : f32 to vector<8x32xf32>
    %837 = arith.maximumf %835, %836 : vector<8x32xf32>
    %c0_401 = arith.constant 0 : index
    %c0_402 = arith.constant 0 : index
    %838 = vector.load %arg82[%c0_401, %c0_402] : memref<8x16xf32, #tpu.memory_space<vmem>>, vector<8x16xf32>
    %c0_403 = arith.constant 0 : index
    %c0_404 = arith.constant 0 : index
    %839 = vector.load %arg81[%c0_403, %c0_404] : memref<8x1xf32, #tpu.memory_space<vmem>>, vector<8x1xf32>
    %cst_405 = arith.constant dense<0.000000e+00> : vector<8x32xf32>
    %840 = tpu.matmul %838, %612, %cst_405 {dimension_numbers = #tpu.dot_dimension_numbers<[1], [0], [0], [1], [0, 0, 1, 1], [], []>} : vector<8x16xf32>, vector<16x32xf32>, vector<8x32xf32> -> vector<8x32xf32>
    %841 = vector.broadcast %839 : vector<8x1xf32> to vector<8x32xf32>
    %842 = arith.addf %840, %841 : vector<8x32xf32>
    %843 = arith.addf %837, %842 : vector<8x32xf32>
    %cst_406 = arith.constant 0.000000e+00 : f32
    %844 = vector.broadcast %cst_406 : f32 to vector<8x32xf32>
    %845 = arith.maximumf %843, %844 : vector<8x32xf32>
    %c0_407 = arith.constant 0 : index
    %c0_408 = arith.constant 0 : index
    %846 = vector.load %arg84[%c0_407, %c0_408] : memref<4x16xf32, #tpu.memory_space<vmem>>, vector<4x16xf32>
    %c0_409 = arith.constant 0 : index
    %c0_410 = arith.constant 0 : index
    %847 = vector.load %arg83[%c0_409, %c0_410] : memref<4x1xf32, #tpu.memory_space<vmem>>, vector<4x1xf32>
    %848 = vector.extract_strided_slice %845 {offsets = [0, 0], sizes = [8, 16], strides = [1, 1]} : vector<8x32xf32> to vector<8x16xf32>
    %cst_411 = arith.constant 0.000000e+00 : f32
    %849 = vector.broadcast %cst_411 : f32 to vector<8x2xf32>
    %850 = tpu.concatenate %849, %848 in 1 : vector<8x2xf32>, vector<8x16xf32> -> vector<8x18xf32>
    %851 = vector.extract_strided_slice %845 {offsets = [0, 16], sizes = [8, 16], strides = [1, 1]} : vector<8x32xf32> to vector<8x16xf32>
    %cst_412 = arith.constant 0.000000e+00 : f32
    %852 = vector.broadcast %cst_412 : f32 to vector<8x2xf32>
    %853 = tpu.concatenate %852, %851 in 1 : vector<8x2xf32>, vector<8x16xf32> -> vector<8x18xf32>
    %854 = vector.extract_strided_slice %850 {offsets = [0, 0], sizes = [8, 16], strides = [1, 1]} : vector<8x18xf32> to vector<8x16xf32>
    %855 = vector.extract_strided_slice %853 {offsets = [0, 0], sizes = [8, 16], strides = [1, 1]} : vector<8x18xf32> to vector<8x16xf32>
    %856 = tpu.concatenate %854, %855 in 1 : vector<8x16xf32>, vector<8x16xf32> -> vector<8x32xf32>
    %857 = vector.extract_strided_slice %850 {offsets = [0, 2], sizes = [8, 16], strides = [1, 1]} : vector<8x18xf32> to vector<8x16xf32>
    %858 = vector.extract_strided_slice %853 {offsets = [0, 2], sizes = [8, 16], strides = [1, 1]} : vector<8x18xf32> to vector<8x16xf32>
    %859 = tpu.concatenate %857, %858 in 1 : vector<8x16xf32>, vector<8x16xf32> -> vector<8x32xf32>
    %860 = tpu.concatenate %856, %859 in 0 : vector<8x32xf32>, vector<8x32xf32> -> vector<16x32xf32>
    %cst_413 = arith.constant dense<0.000000e+00> : vector<4x32xf32>
    %861 = tpu.matmul %846, %860, %cst_413 {dimension_numbers = #tpu.dot_dimension_numbers<[1], [0], [0], [1], [0, 0, 1, 1], [], []>} : vector<4x16xf32>, vector<16x32xf32>, vector<4x32xf32> -> vector<4x32xf32>
    %862 = vector.broadcast %847 : vector<4x1xf32> to vector<4x32xf32>
    %863 = arith.addf %861, %862 : vector<4x32xf32>
    %cst_414 = arith.constant 0.000000e+00 : f32
    %864 = vector.broadcast %cst_414 : f32 to vector<4x32xf32>
    %865 = arith.maximumf %863, %864 : vector<4x32xf32>
    %c0_415 = arith.constant 0 : index
    %c0_416 = arith.constant 0 : index
    %c0_417 = arith.constant 0 : index
    %866 = vector.load %arg86[%c0_415, %c0_416, %c0_417] : memref<2x4x4xf32, #tpu.memory_space<vmem>>, vector<2x4x4xf32>
    %c0_418 = arith.constant 0 : index
    %c0_419 = arith.constant 0 : index
    %867 = vector.load %arg85[%c0_418, %c0_419] : memref<4x1xf32, #tpu.memory_space<vmem>>, vector<4x1xf32>
    %868 = vector.extract_strided_slice %865 {offsets = [0, 0], sizes = [4, 16], strides = [1, 1]} : vector<4x32xf32> to vector<4x16xf32>
    %cst_420 = arith.constant 0.000000e+00 : f32
    %869 = vector.broadcast %cst_420 : f32 to vector<4x2xf32>
    %870 = tpu.concatenate %869, %868 in 1 : vector<4x2xf32>, vector<4x16xf32> -> vector<4x18xf32>
    %871 = vector.extract_strided_slice %865 {offsets = [0, 16], sizes = [4, 16], strides = [1, 1]} : vector<4x32xf32> to vector<4x16xf32>
    %cst_421 = arith.constant 0.000000e+00 : f32
    %872 = vector.broadcast %cst_421 : f32 to vector<4x2xf32>
    %873 = tpu.concatenate %872, %871 in 1 : vector<4x2xf32>, vector<4x16xf32> -> vector<4x18xf32>
    %874 = vector.extract_strided_slice %866 {offsets = [0, 0, 0], sizes = [1, 4, 4], strides = [1, 1, 1]} : vector<2x4x4xf32> to vector<1x4x4xf32>
    %875 = vector.shape_cast %874 : vector<1x4x4xf32> to vector<4x4xf32>
    %876 = vector.extract_strided_slice %870 {offsets = [0, 0], sizes = [4, 16], strides = [1, 1]} : vector<4x18xf32> to vector<4x16xf32>
    %877 = vector.extract_strided_slice %873 {offsets = [0, 0], sizes = [4, 16], strides = [1, 1]} : vector<4x18xf32> to vector<4x16xf32>
    %878 = tpu.concatenate %876, %877 in 1 : vector<4x16xf32>, vector<4x16xf32> -> vector<4x32xf32>
    %cst_422 = arith.constant dense<0.000000e+00> : vector<4x32xf32>
    %879 = tpu.matmul %875, %878, %cst_422 {dimension_numbers = #tpu.dot_dimension_numbers<[1], [0], [0], [1], [0, 0, 1, 1], [], []>} : vector<4x4xf32>, vector<4x32xf32>, vector<4x32xf32> -> vector<4x32xf32>
    %880 = vector.extract_strided_slice %866 {offsets = [1, 0, 0], sizes = [1, 4, 4], strides = [1, 1, 1]} : vector<2x4x4xf32> to vector<1x4x4xf32>
    %881 = vector.shape_cast %880 : vector<1x4x4xf32> to vector<4x4xf32>
    %882 = vector.extract_strided_slice %870 {offsets = [0, 2], sizes = [4, 16], strides = [1, 1]} : vector<4x18xf32> to vector<4x16xf32>
    %883 = vector.extract_strided_slice %873 {offsets = [0, 2], sizes = [4, 16], strides = [1, 1]} : vector<4x18xf32> to vector<4x16xf32>
    %884 = tpu.concatenate %882, %883 in 1 : vector<4x16xf32>, vector<4x16xf32> -> vector<4x32xf32>
    %cst_423 = arith.constant dense<0.000000e+00> : vector<4x32xf32>
    %885 = tpu.matmul %881, %884, %cst_423 {dimension_numbers = #tpu.dot_dimension_numbers<[1], [0], [0], [1], [0, 0, 1, 1], [], []>} : vector<4x4xf32>, vector<4x32xf32>, vector<4x32xf32> -> vector<4x32xf32>
    %886 = arith.addf %879, %885 : vector<4x32xf32>
    %887 = vector.broadcast %867 : vector<4x1xf32> to vector<4x32xf32>
    %888 = arith.addf %886, %887 : vector<4x32xf32>
    %cst_424 = arith.constant 0.000000e+00 : f32
    %889 = vector.broadcast %cst_424 : f32 to vector<4x32xf32>
    %890 = arith.maximumf %888, %889 : vector<4x32xf32>
    %c0_425 = arith.constant 0 : index
    %c0_426 = arith.constant 0 : index
    %891 = vector.load %arg88[%c0_425, %c0_426] : memref<4x8xf32, #tpu.memory_space<vmem>>, vector<4x8xf32>
    %c0_427 = arith.constant 0 : index
    %c0_428 = arith.constant 0 : index
    %892 = vector.load %arg87[%c0_427, %c0_428] : memref<4x1xf32, #tpu.memory_space<vmem>>, vector<4x1xf32>
    %cst_429 = arith.constant dense<0.000000e+00> : vector<4x32xf32>
    %893 = tpu.matmul %891, %845, %cst_429 {dimension_numbers = #tpu.dot_dimension_numbers<[1], [0], [0], [1], [0, 0, 1, 1], [], []>} : vector<4x8xf32>, vector<8x32xf32>, vector<4x32xf32> -> vector<4x32xf32>
    %894 = vector.broadcast %892 : vector<4x1xf32> to vector<4x32xf32>
    %895 = arith.addf %893, %894 : vector<4x32xf32>
    %896 = arith.addf %890, %895 : vector<4x32xf32>
    %cst_430 = arith.constant 0.000000e+00 : f32
    %897 = vector.broadcast %cst_430 : f32 to vector<4x32xf32>
    %898 = arith.maximumf %896, %897 : vector<4x32xf32>
    %c0_431 = arith.constant 0 : index
    %c0_432 = arith.constant 0 : index
    %c0_433 = arith.constant 0 : index
    %899 = vector.load %arg90[%c0_431, %c0_432, %c0_433] : memref<2x2x4xf32, #tpu.memory_space<vmem>>, vector<2x2x4xf32>
    %c0_434 = arith.constant 0 : index
    %c0_435 = arith.constant 0 : index
    %900 = vector.load %arg89[%c0_434, %c0_435] : memref<2x1xf32, #tpu.memory_space<vmem>>, vector<2x1xf32>
    %901 = vector.extract_strided_slice %898 {offsets = [0, 0], sizes = [4, 16], strides = [1, 1]} : vector<4x32xf32> to vector<4x16xf32>
    %cst_436 = arith.constant 0.000000e+00 : f32
    %902 = vector.broadcast %cst_436 : f32 to vector<4x4xf32>
    %903 = tpu.concatenate %902, %901 in 1 : vector<4x4xf32>, vector<4x16xf32> -> vector<4x20xf32>
    %904 = vector.extract_strided_slice %898 {offsets = [0, 16], sizes = [4, 16], strides = [1, 1]} : vector<4x32xf32> to vector<4x16xf32>
    %cst_437 = arith.constant 0.000000e+00 : f32
    %905 = vector.broadcast %cst_437 : f32 to vector<4x4xf32>
    %906 = tpu.concatenate %905, %904 in 1 : vector<4x4xf32>, vector<4x16xf32> -> vector<4x20xf32>
    %907 = vector.extract_strided_slice %899 {offsets = [0, 0, 0], sizes = [1, 2, 4], strides = [1, 1, 1]} : vector<2x2x4xf32> to vector<1x2x4xf32>
    %908 = vector.shape_cast %907 : vector<1x2x4xf32> to vector<2x4xf32>
    %909 = vector.extract_strided_slice %903 {offsets = [0, 0], sizes = [4, 16], strides = [1, 1]} : vector<4x20xf32> to vector<4x16xf32>
    %910 = vector.extract_strided_slice %906 {offsets = [0, 0], sizes = [4, 16], strides = [1, 1]} : vector<4x20xf32> to vector<4x16xf32>
    %911 = tpu.concatenate %909, %910 in 1 : vector<4x16xf32>, vector<4x16xf32> -> vector<4x32xf32>
    %cst_438 = arith.constant dense<0.000000e+00> : vector<2x32xf32>
    %912 = tpu.matmul %908, %911, %cst_438 {dimension_numbers = #tpu.dot_dimension_numbers<[1], [0], [0], [1], [0, 0, 1, 1], [], []>} : vector<2x4xf32>, vector<4x32xf32>, vector<2x32xf32> -> vector<2x32xf32>
    %913 = vector.extract_strided_slice %899 {offsets = [1, 0, 0], sizes = [1, 2, 4], strides = [1, 1, 1]} : vector<2x2x4xf32> to vector<1x2x4xf32>
    %914 = vector.shape_cast %913 : vector<1x2x4xf32> to vector<2x4xf32>
    %915 = vector.extract_strided_slice %903 {offsets = [0, 4], sizes = [4, 16], strides = [1, 1]} : vector<4x20xf32> to vector<4x16xf32>
    %916 = vector.extract_strided_slice %906 {offsets = [0, 4], sizes = [4, 16], strides = [1, 1]} : vector<4x20xf32> to vector<4x16xf32>
    %917 = tpu.concatenate %915, %916 in 1 : vector<4x16xf32>, vector<4x16xf32> -> vector<4x32xf32>
    %cst_439 = arith.constant dense<0.000000e+00> : vector<2x32xf32>
    %918 = tpu.matmul %914, %917, %cst_439 {dimension_numbers = #tpu.dot_dimension_numbers<[1], [0], [0], [1], [0, 0, 1, 1], [], []>} : vector<2x4xf32>, vector<4x32xf32>, vector<2x32xf32> -> vector<2x32xf32>
    %919 = arith.addf %912, %918 : vector<2x32xf32>
    %920 = vector.broadcast %900 : vector<2x1xf32> to vector<2x32xf32>
    %921 = arith.addf %919, %920 : vector<2x32xf32>
    %cst_440 = arith.constant 0.000000e+00 : f32
    %922 = vector.broadcast %cst_440 : f32 to vector<2x32xf32>
    %923 = arith.maximumf %921, %922 : vector<2x32xf32>
    %c0_441 = arith.constant 0 : index
    %c0_442 = arith.constant 0 : index
    %c0_443 = arith.constant 0 : index
    %924 = vector.load %arg92[%c0_441, %c0_442, %c0_443] : memref<2x2x2xf32, #tpu.memory_space<vmem>>, vector<2x2x2xf32>
    %c0_444 = arith.constant 0 : index
    %c0_445 = arith.constant 0 : index
    %925 = vector.load %arg91[%c0_444, %c0_445] : memref<2x1xf32, #tpu.memory_space<vmem>>, vector<2x1xf32>
    %926 = vector.extract_strided_slice %923 {offsets = [0, 0], sizes = [2, 16], strides = [1, 1]} : vector<2x32xf32> to vector<2x16xf32>
    %cst_446 = arith.constant 0.000000e+00 : f32
    %927 = vector.broadcast %cst_446 : f32 to vector<2x4xf32>
    %928 = tpu.concatenate %927, %926 in 1 : vector<2x4xf32>, vector<2x16xf32> -> vector<2x20xf32>
    %929 = vector.extract_strided_slice %923 {offsets = [0, 16], sizes = [2, 16], strides = [1, 1]} : vector<2x32xf32> to vector<2x16xf32>
    %cst_447 = arith.constant 0.000000e+00 : f32
    %930 = vector.broadcast %cst_447 : f32 to vector<2x4xf32>
    %931 = tpu.concatenate %930, %929 in 1 : vector<2x4xf32>, vector<2x16xf32> -> vector<2x20xf32>
    %932 = vector.extract_strided_slice %924 {offsets = [0, 0, 0], sizes = [1, 2, 2], strides = [1, 1, 1]} : vector<2x2x2xf32> to vector<1x2x2xf32>
    %933 = vector.shape_cast %932 : vector<1x2x2xf32> to vector<2x2xf32>
    %934 = vector.extract_strided_slice %928 {offsets = [0, 0], sizes = [2, 16], strides = [1, 1]} : vector<2x20xf32> to vector<2x16xf32>
    %935 = vector.extract_strided_slice %931 {offsets = [0, 0], sizes = [2, 16], strides = [1, 1]} : vector<2x20xf32> to vector<2x16xf32>
    %936 = tpu.concatenate %934, %935 in 1 : vector<2x16xf32>, vector<2x16xf32> -> vector<2x32xf32>
    %cst_448 = arith.constant dense<0.000000e+00> : vector<2x32xf32>
    %937 = tpu.matmul %933, %936, %cst_448 {dimension_numbers = #tpu.dot_dimension_numbers<[1], [0], [0], [1], [0, 0, 1, 1], [], []>} : vector<2x2xf32>, vector<2x32xf32>, vector<2x32xf32> -> vector<2x32xf32>
    %938 = vector.extract_strided_slice %924 {offsets = [1, 0, 0], sizes = [1, 2, 2], strides = [1, 1, 1]} : vector<2x2x2xf32> to vector<1x2x2xf32>
    %939 = vector.shape_cast %938 : vector<1x2x2xf32> to vector<2x2xf32>
    %940 = vector.extract_strided_slice %928 {offsets = [0, 4], sizes = [2, 16], strides = [1, 1]} : vector<2x20xf32> to vector<2x16xf32>
    %941 = vector.extract_strided_slice %931 {offsets = [0, 4], sizes = [2, 16], strides = [1, 1]} : vector<2x20xf32> to vector<2x16xf32>
    %942 = tpu.concatenate %940, %941 in 1 : vector<2x16xf32>, vector<2x16xf32> -> vector<2x32xf32>
    %cst_449 = arith.constant dense<0.000000e+00> : vector<2x32xf32>
    %943 = tpu.matmul %939, %942, %cst_449 {dimension_numbers = #tpu.dot_dimension_numbers<[1], [0], [0], [1], [0, 0, 1, 1], [], []>} : vector<2x2xf32>, vector<2x32xf32>, vector<2x32xf32> -> vector<2x32xf32>
    %944 = arith.addf %937, %943 : vector<2x32xf32>
    %945 = vector.broadcast %925 : vector<2x1xf32> to vector<2x32xf32>
    %946 = arith.addf %944, %945 : vector<2x32xf32>
    %cst_450 = arith.constant 0.000000e+00 : f32
    %947 = vector.broadcast %cst_450 : f32 to vector<2x32xf32>
    %948 = arith.maximumf %946, %947 : vector<2x32xf32>
    %c0_451 = arith.constant 0 : index
    %c0_452 = arith.constant 0 : index
    %949 = vector.load %arg94[%c0_451, %c0_452] : memref<2x4xf32, #tpu.memory_space<vmem>>, vector<2x4xf32>
    %c0_453 = arith.constant 0 : index
    %c0_454 = arith.constant 0 : index
    %950 = vector.load %arg93[%c0_453, %c0_454] : memref<2x1xf32, #tpu.memory_space<vmem>>, vector<2x1xf32>
    %cst_455 = arith.constant dense<0.000000e+00> : vector<2x32xf32>
    %951 = tpu.matmul %949, %898, %cst_455 {dimension_numbers = #tpu.dot_dimension_numbers<[1], [0], [0], [1], [0, 0, 1, 1], [], []>} : vector<2x4xf32>, vector<4x32xf32>, vector<2x32xf32> -> vector<2x32xf32>
    %952 = vector.broadcast %950 : vector<2x1xf32> to vector<2x32xf32>
    %953 = arith.addf %951, %952 : vector<2x32xf32>
    %954 = arith.addf %948, %953 : vector<2x32xf32>
    %cst_456 = arith.constant 0.000000e+00 : f32
    %955 = vector.broadcast %cst_456 : f32 to vector<2x32xf32>
    %956 = arith.maximumf %954, %955 : vector<2x32xf32>
    %c0_457 = arith.constant 0 : index
    %c0_458 = arith.constant 0 : index
    %957 = vector.load %arg76[%c0_457, %c0_458] : memref<16x2xf32, #tpu.memory_space<vmem>>, vector<16x2xf32>
    %c0_459 = arith.constant 0 : index
    %c0_460 = arith.constant 0 : index
    %958 = vector.load %arg75[%c0_459, %c0_460] : memref<16x1xf32, #tpu.memory_space<vmem>>, vector<16x1xf32>
    %cst_461 = arith.constant dense<0.000000e+00> : vector<16x32xf32>
    %959 = tpu.matmul %957, %956, %cst_461 {dimension_numbers = #tpu.dot_dimension_numbers<[1], [0], [0], [1], [0, 0, 1, 1], [], []>} : vector<16x2xf32>, vector<2x32xf32>, vector<16x32xf32> -> vector<16x32xf32>
    %960 = vector.broadcast %958 : vector<16x1xf32> to vector<16x32xf32>
    %961 = arith.addf %959, %960 : vector<16x32xf32>
    %962 = tpu.concatenate %622, %691, %797, %961 in 0 : vector<16x32xf32>, vector<16x32xf32>, vector<16x32xf32>, vector<16x32xf32> -> vector<64x32xf32>
    %c0_462 = arith.constant 0 : index
    %c0_463 = arith.constant 0 : index
    %963 = vector.load %arg96[%c0_462, %c0_463] : memref<128x64xf32, #tpu.memory_space<vmem>>, vector<128x64xf32>
    %c0_464 = arith.constant 0 : index
    %c0_465 = arith.constant 0 : index
    %964 = vector.load %arg95[%c0_464, %c0_465] : memref<128x1xf32, #tpu.memory_space<vmem>>, vector<128x1xf32>
    %cst_466 = arith.constant dense<0.000000e+00> : vector<128x32xf32>
    %965 = tpu.matmul %963, %962, %cst_466 {dimension_numbers = #tpu.dot_dimension_numbers<[1], [0], [0], [1], [0, 0, 1, 1], [], []>} : vector<128x64xf32>, vector<64x32xf32>, vector<128x32xf32> -> vector<128x32xf32>
    %966 = vector.broadcast %964 : vector<128x1xf32> to vector<128x32xf32>
    %967 = arith.addf %965, %966 : vector<128x32xf32>
    %c0_467 = arith.constant 0 : index
    %c0_468 = arith.constant 0 : index
    %968 = vector.load %arg98[%c0_467, %c0_468] : memref<16x128xf32, #tpu.memory_space<vmem>>, vector<16x128xf32>
    %c0_469 = arith.constant 0 : index
    %c0_470 = arith.constant 0 : index
    %969 = vector.load %arg97[%c0_469, %c0_470] : memref<16x1xf32, #tpu.memory_space<vmem>>, vector<16x1xf32>
    %cst_471 = arith.constant dense<0.000000e+00> : vector<16x32xf32>
    %970 = tpu.matmul %968, %967, %cst_471 {dimension_numbers = #tpu.dot_dimension_numbers<[1], [0], [0], [1], [0, 0, 1, 1], [], []>} : vector<16x128xf32>, vector<128x32xf32>, vector<16x32xf32> -> vector<16x32xf32>
    %971 = vector.broadcast %969 : vector<16x1xf32> to vector<16x32xf32>
    %972 = arith.addf %970, %971 : vector<16x32xf32>
    %cst_472 = arith.constant 3.000000e+00 : f32
    %973 = vector.broadcast %cst_472 : f32 to vector<16x32xf32>
    %974 = arith.addf %972, %973 : vector<16x32xf32>
    %cst_473 = arith.constant 0.000000e+00 : f32
    %cst_474 = arith.constant 6.000000e+00 : f32
    %975 = vector.broadcast %cst_473 : f32 to vector<16x32xf32>
    %976 = arith.maximumf %975, %974 : vector<16x32xf32>
    %977 = vector.broadcast %cst_474 : f32 to vector<16x32xf32>
    %978 = arith.minimumf %977, %976 : vector<16x32xf32>
    %979 = arith.mulf %972, %978 : vector<16x32xf32>
    %cst_475 = arith.constant 0.166666672 : f32
    %980 = vector.broadcast %cst_475 : f32 to vector<16x32xf32>
    %981 = arith.mulf %979, %980 : vector<16x32xf32>
    %982 = arith.addf %981, %612 : vector<16x32xf32>
    %983 = vector.extract_strided_slice %982 {offsets = [0, 0], sizes = [16, 16], strides = [1, 1]} : vector<16x32xf32> to vector<16x16xf32>
    %c0_476 = arith.constant 0 : index
    %c0_477 = arith.constant 0 : index
    %c0_478 = arith.constant 0 : index
    %984 = vector.load %arg125[%c0_476, %c0_477, %c0_478] : memref<2x16x16xf32, #tpu.memory_space<vmem>>, vector<1x16x16xf32>
    %985 = vector.shape_cast %984 : vector<1x16x16xf32> to vector<16x16xf32>
    %986 = vector.shape_cast %983 : vector<16x16xf32> to vector<1x16x16xf32>
    tpu.vector_store %arg125[%c0_476, %c0_477, %c0_478], %986 {strides = array<i32>} : memref<2x16x16xf32, #tpu.memory_space<vmem>>, vector<1x16x16xf32>,
    %987 = vector.extract_strided_slice %982 {offsets = [0, 16], sizes = [16, 16], strides = [1, 1]} : vector<16x32xf32> to vector<16x16xf32>
    %c1_479 = arith.constant 1 : index
    %c0_480 = arith.constant 0 : index
    %c0_481 = arith.constant 0 : index
    %988 = vector.load %arg125[%c1_479, %c0_480, %c0_481] : memref<2x16x16xf32, #tpu.memory_space<vmem>>, vector<1x16x16xf32>
    %989 = vector.shape_cast %988 : vector<1x16x16xf32> to vector<16x16xf32>
    %990 = vector.shape_cast %987 : vector<16x16xf32> to vector<1x16x16xf32>
    tpu.vector_store %arg125[%c1_479, %c0_480, %c0_481], %990 {strides = array<i32>} : memref<2x16x16xf32, #tpu.memory_space<vmem>>, vector<1x16x16xf32>,
    return
  }
}

</mosaic_0001>

<bundles_post_ra>
// kernel: _lambda_.1
= control target key start
LH: loop header
LB: loop body
LE: loop exit
PB: predicated region body
PF: predicated region fallthrough
CT: control target
= control target key end

     0   :  { %s13169_s6 = smov 1   ;;  %s13170_s10 = smov 2   ;;  %s15343_s0 = inlined_call_operand.smem [shape: u32[126], index: -1, kind: input, shape index: {}] }
   0x1   :  { %s13426_s5 = sld [smem:[%s15343_s0]]   ;;  %s13171_s14 = smov 3  }
   0x2   :  { %s13431_s9 = sld [smem:[%s15343_s0 + %s13169_s6]]   ;;  %s13172_s18 = smov 4  }
   0x3   :  { %s13436_s13 = sld [smem:[%s15343_s0 + %s13170_s10]]   ;;  %s13173_s22 = smov 5  }
   0x4   :  { %s13441_s17 = sld [smem:[%s15343_s0 + %s13171_s14]]   ;;  %s13174_s26 = smov 6  }
   0x5   :  { %s13446_s21 = sld [smem:[%s15343_s0 + %s13172_s18]]   ;;  %s13175_s30 = smov 7  }
   0x6   :  { %s13451_s25 = sld [smem:[%s15343_s0 + %s13173_s22]]   ;;  %s13176_s4 = smov 8  }
   0x7   :  { %s13456_s29 = sld [smem:[%s15343_s0 + %s13174_s26]]   ;;  %s13177_s10 = smov 9  }
   0x8   :  { %s13461_s3 = sld [smem:[%s15343_s0 + %s13175_s30]]   ;;  %s13178_s15 = smov 10  }
   0x9   :  { %s13466_s8 = sld [smem:[%s15343_s0 + %s13176_s4]]   ;;  %s13179_s20 = smov 11  }
   0xa   :  { %s13471_s14 = sld [smem:[%s15343_s0 + %s13177_s10]]   ;;  %s13180_s26 = smov 12  }
   0xb   :  { %s13476_s19 = sld [smem:[%s15343_s0 + %s13178_s15]]   ;;  %s13181_s1 = smov 13  }
   0xc   :  { %s13481_s24 = sld [smem:[%s15343_s0 + %s13179_s20]]   ;;  %s13182_s7 = smov 14  }
   0xd   :  { %15354 = sst [smem:[#allocation210_spill]] %s13456_s29  ;;  %s13183_s15 = smov 15  }
   0xe   :  { %s13486_s30 = sld [smem:[%s15343_s0 + %s13180_s26]]   ;;  %s13184_s22 = smov 16  }
   0xf   :  { %15355 = sst [smem:[#allocation211_spill]] %s13466_s8  ;;  %s13185_s28 = smov 17  }
  0x10   :  { %s13491_s6 = sld [smem:[%s15343_s0 + %s13181_s1]]  }
  0x11   :  { %15356 = sst [smem:[#allocation212_spill]] %s13476_s19 }
  0x12   :  { %s13496_s12 = sld [smem:[%s15343_s0 + %s13182_s7]]   ;;  %s13186_s7 = smov 18  }
  0x13   :  { %s13501_s20 = sld [smem:[%s15343_s0 + %s13183_s15]]   ;;  %s13187_s15 = smov 19  }
  0x14   :  { %15357 = sst [smem:[#allocation213_spill]] %s13486_s30 }
  0x15   :  { %s13506_s27 = sld [smem:[%s15343_s0 + %s13184_s22]]   ;;  %s13188_s22 = smov 20  }
  0x16   :  { %s13511_s4 = sld [smem:[%s15343_s0 + %s13185_s28]]   ;;  %s13189_s28 = smov 21  }
  0x17   :  { %s13521_s30 = sld [smem:[%s15343_s0 + %s13187_s15]]   ;;  %s13191_s15 = smov 23  }
  0x18   :  { %15358 = sst [smem:[#allocation214_spill]] %s13496_s12 }
  0x19   :  { %s13516_s12 = sld [smem:[%s15343_s0 + %s13186_s7]]   ;;  %s13190_s7 = smov 22  }
  0x1a   :  { %s13531_s19 = sld [smem:[%s15343_s0 + %s13189_s28]]   ;;  %s13193_s28 = smov 25  }
  0x1b   :  { %15359 = sst [smem:[#allocation215_spill]] %s13506_s27 }
  0x1c   :  { %s13526_s27 = sld [smem:[%s15343_s0 + %s13188_s22]]   ;;  %s13192_s22 = smov 24  }
  0x1d   :  { %s13541_s8 = sld [smem:[%s15343_s0 + %s13191_s15]]   ;;  %s13195_s15 = smov 27  }
  0x1e   :  { %s13551_s29 = sld [smem:[%s15343_s0 + %s13193_s28]]   ;;  %s13197_s28 = smov 29  }
  0x1f   :  { %15360 = sst [smem:[#allocation216_spill]] %s13516_s12 }
  0x20   :  { %s13536_s12 = sld [smem:[%s15343_s0 + %s13190_s7]]   ;;  %s13194_s7 = smov 26  }
  0x22   :  { %15361 = sst [smem:[#allocation217_spill]] %s13526_s27 }
  0x23   :  { %15363 = sst [smem:[#allocation219_spill]] %s13541_s8 }
  0x24   :  { %s13546_s27 = sld [smem:[%s15343_s0 + %s13192_s22]]   ;;  %s13196_s22 = smov 28  }
  0x25   :  { %15365 = sst [smem:[#allocation221_spill]] %s13551_s29 }
  0x26   :  { %15362 = sst [smem:[#allocation218_spill]] %s13536_s12 }
  0x27   :  { %s13556_s12 = sld [smem:[%s15343_s0 + %s13194_s7]]   ;;  %s13198_s7 = smov 30  }
  0x28   :  { %s13561_s8 = sld [smem:[%s15343_s0 + %s13195_s15]]   ;;  %s13199_s15 = smov 31  }
  0x29   :  { %s13571_s29 = sld [smem:[%s15343_s0 + %s13197_s28]]   ;;  %s13201_s28 = smov 33  }
  0x2a   :  { %15364 = sst [smem:[#allocation220_spill]] %s13546_s27 }
  0x2b   :  { %s13566_s27 = sld [smem:[%s15343_s0 + %s13196_s22]]   ;;  %s13200_s22 = smov 32  }
  0x2d   :  { %15366 = sst [smem:[#allocation222_spill]] %s13556_s12 }
  0x2e   :  { %15367 = sst [smem:[#allocation223_spill]] %s13561_s8 }
  0x2f   :  { %15369 = sst [smem:[#allocation225_spill]] %s13571_s29 }
  0x30   :  { %s13576_s12 = sld [smem:[%s15343_s0 + %s13198_s7]]   ;;  %s13202_s7 = smov 34  }
  0x31   :  { %15368 = sst [smem:[#allocation224_spill]] %s13566_s27 }
  0x32   :  { %s13581_s8 = sld [smem:[%s15343_s0 + %s13199_s15]]   ;;  %s13203_s15 = smov 35  }
  0x33   :  { %s13586_s27 = sld [smem:[%s15343_s0 + %s13200_s22]]   ;;  %s13204_s22 = smov 36  }
  0x34   :  { %s13591_s29 = sld [smem:[%s15343_s0 + %s13201_s28]]   ;;  %s13205_s28 = smov 37  }
  0x36   :  { %15370 = sst [smem:[#allocation226_spill]] %s13576_s12 }
  0x37   :  { %s13596_s12 = sld [smem:[%s15343_s0 + %s13202_s7]]   ;;  %s13206_s7 = smov 38  }
  0x38   :  { %15371 = sst [smem:[#allocation227_spill]] %s13581_s8 }
  0x39   :  { %15372 = sst [smem:[#allocation228_spill]] %s13586_s27 }
  0x3a   :  { %15373 = sst [smem:[#allocation229_spill]] %s13591_s29 }
  0x3b   :  { %s13601_s8 = sld [smem:[%s15343_s0 + %s13203_s15]]   ;;  %s13207_s15 = smov 39  }
  0x3c   :  { %s13606_s27 = sld [smem:[%s15343_s0 + %s13204_s22]]   ;;  %s13208_s22 = smov 40  }
  0x3d   :  { %15374 = sst [smem:[#allocation230_spill]] %s13596_s12 }
  0x3e   :  { %s13611_s29 = sld [smem:[%s15343_s0 + %s13205_s28]]   ;;  %s13209_s28 = smov 41  }
  0x3f   :  { %s13616_s12 = sld [smem:[%s15343_s0 + %s13206_s7]]   ;;  %s13210_s7 = smov 42  }
  0x41   :  { %15375 = sst [smem:[#allocation231_spill]] %s13601_s8 }
  0x42   :  { %15376 = sst [smem:[#allocation232_spill]] %s13606_s27 }
  0x43   :  { %s13621_s8 = sld [smem:[%s15343_s0 + %s13207_s15]]   ;;  %s13211_s15 = smov 43  }
  0x44   :  { %15377 = sst [smem:[#allocation233_spill]] %s13611_s29 }
  0x45   :  { %15378 = sst [smem:[#allocation234_spill]] %s13616_s12 }
  0x46   :  { %s13626_s27 = sld [smem:[%s15343_s0 + %s13208_s22]]   ;;  %s13212_s22 = smov 44  }
  0x47   :  { %s13631_s29 = sld [smem:[%s15343_s0 + %s13209_s28]]   ;;  %s13213_s28 = smov 45  }
  0x48   :  { %s13636_s12 = sld [smem:[%s15343_s0 + %s13210_s7]]   ;;  %s13214_s7 = smov 46  }
  0x49   :  { %15379 = sst [smem:[#allocation235_spill]] %s13621_s8 }
  0x4a   :  { %s13641_s8 = sld [smem:[%s15343_s0 + %s13211_s15]]   ;;  %s13215_s15 = smov 47  }
  0x4c   :  { %15380 = sst [smem:[#allocation236_spill]] %s13626_s27 }
  0x4d   :  { %15381 = sst [smem:[#allocation237_spill]] %s13631_s29 }
  0x4e   :  { %15382 = sst [smem:[#allocation238_spill]] %s13636_s12 }
  0x4f   :  { %s13646_s27 = sld [smem:[%s15343_s0 + %s13212_s22]]   ;;  %s13216_s22 = smov 48  }
  0x50   :  { %15383 = sst [smem:[#allocation239_spill]] %s13641_s8 }
  0x51   :  { %s13651_s29 = sld [smem:[%s15343_s0 + %s13213_s28]]   ;;  %s13217_s28 = smov 49  }
  0x52   :  { %s13656_s12 = sld [smem:[%s15343_s0 + %s13214_s7]]   ;;  %s13218_s7 = smov 50  }
  0x53   :  { %s13661_s8 = sld [smem:[%s15343_s0 + %s13215_s15]]   ;;  %s13219_s15 = smov 51  }
  0x55   :  { %15384 = sst [smem:[#allocation240_spill]] %s13646_s27 }
  0x56   :  { %s13666_s27 = sld [smem:[%s15343_s0 + %s13216_s22]]   ;;  %s13220_s22 = smov 52  }
  0x57   :  { %15385 = sst [smem:[#allocation241_spill]] %s13651_s29 }
  0x58   :  { %15386 = sst [smem:[#allocation242_spill]] %s13656_s12 }
  0x59   :  { %15387 = sst [smem:[#allocation243_spill]] %s13661_s8 }
  0x5a   :  { %s13671_s29 = sld [smem:[%s15343_s0 + %s13217_s28]]   ;;  %s13221_s28 = smov 53  }
  0x5b   :  { %s13676_s12 = sld [smem:[%s15343_s0 + %s13218_s7]]   ;;  %s13222_s7 = smov 54  }
  0x5c   :  { %15388 = sst [smem:[#allocation244_spill]] %s13666_s27 }
  0x5d   :  { %s13681_s8 = sld [smem:[%s15343_s0 + %s13219_s15]]   ;;  %s13223_s15 = smov 55  }
  0x5e   :  { %s13686_s27 = sld [smem:[%s15343_s0 + %s13220_s22]]   ;;  %s13224_s22 = smov 56  }
  0x60   :  { %15389 = sst [smem:[#allocation245_spill]] %s13671_s29 }
  0x61   :  { %15390 = sst [smem:[#allocation246_spill]] %s13676_s12 }
  0x62   :  { %s13691_s29 = sld [smem:[%s15343_s0 + %s13221_s28]]   ;;  %s13225_s28 = smov 57  }
  0x63   :  { %15391 = sst [smem:[#allocation247_spill]] %s13681_s8 }
  0x64   :  { %15392 = sst [smem:[#allocation248_spill]] %s13686_s27 }
  0x65   :  { %s13696_s12 = sld [smem:[%s15343_s0 + %s13222_s7]]   ;;  %s13226_s7 = smov 58  }
  0x66   :  { %s13701_s8 = sld [smem:[%s15343_s0 + %s13223_s15]]   ;;  %s13227_s15 = smov 59  }
  0x67   :  { %s13706_s27 = sld [smem:[%s15343_s0 + %s13224_s22]]   ;;  %s13228_s22 = smov 60  }
  0x68   :  { %15393 = sst [smem:[#allocation249_spill]] %s13691_s29 }
  0x69   :  { %s13711_s29 = sld [smem:[%s15343_s0 + %s13225_s28]]   ;;  %s13229_s28 = smov 61  }
  0x6b   :  { %15394 = sst [smem:[#allocation250_spill]] %s13696_s12 }
  0x6c   :  { %15395 = sst [smem:[#allocation251_spill]] %s13701_s8 }
  0x6d   :  { %15396 = sst [smem:[#allocation252_spill]] %s13706_s27 }
  0x6e   :  { %s13716_s12 = sld [smem:[%s15343_s0 + %s13226_s7]]   ;;  %s13230_s7 = smov 62  }
  0x6f   :  { %15397 = sst [smem:[#allocation253_spill]] %s13711_s29 }
  0x70   :  { %s13721_s8 = sld [smem:[%s15343_s0 + %s13227_s15]]   ;;  %s13231_s15 = smov 63  }
  0x71   :  { %s13726_s27 = sld [smem:[%s15343_s0 + %s13228_s22]]   ;;  %s13232_s22 = smov 64  }
  0x72   :  { %s13731_s29 = sld [smem:[%s15343_s0 + %s13229_s28]]   ;;  %s13233_s28 = smov 65  }
  0x74   :  { %15398 = sst [smem:[#allocation254_spill]] %s13716_s12 }
  0x75   :  { %s13736_s12 = sld [smem:[%s15343_s0 + %s13230_s7]]   ;;  %s13234_s7 = smov 66  }
  0x76   :  { %15399 = sst [smem:[#allocation255_spill]] %s13721_s8 }
  0x77   :  { %15400 = sst [smem:[#allocation256_spill]] %s13726_s27 }
  0x78   :  { %15401 = sst [smem:[#allocation257_spill]] %s13731_s29 }
  0x79   :  { %s13741_s8 = sld [smem:[%s15343_s0 + %s13231_s15]]   ;;  %s13235_s15 = smov 67  }
  0x7a   :  { %s13746_s27 = sld [smem:[%s15343_s0 + %s13232_s22]]   ;;  %s13236_s22 = smov 68  }
  0x7b   :  { %15402 = sst [smem:[#allocation258_spill]] %s13736_s12 }
  0x7c   :  { %s13751_s29 = sld [smem:[%s15343_s0 + %s13233_s28]]   ;;  %s13237_s28 = smov 69  }
  0x7d   :  { %s13756_s12 = sld [smem:[%s15343_s0 + %s13234_s7]]   ;;  %s13238_s7 = smov 70  }
  0x7f   :  { %15403 = sst [smem:[#allocation259_spill]] %s13741_s8 }
  0x80   :  { %15404 = sst [smem:[#allocation260_spill]] %s13746_s27 }
  0x81   :  { %s13761_s8 = sld [smem:[%s15343_s0 + %s13235_s15]]   ;;  %s13239_s15 = smov 71  }
  0x82   :  { %15405 = sst [smem:[#allocation261_spill]] %s13751_s29 }
  0x83   :  { %15406 = sst [smem:[#allocation262_spill]] %s13756_s12 }
  0x84   :  { %s13766_s27 = sld [smem:[%s15343_s0 + %s13236_s22]]   ;;  %s13240_s22 = smov 72  }
  0x85   :  { %s13771_s29 = sld [smem:[%s15343_s0 + %s13237_s28]]   ;;  %s13241_s28 = smov 73  }
  0x86   :  { %s13776_s12 = sld [smem:[%s15343_s0 + %s13238_s7]]   ;;  %s13242_s7 = smov 74  }
  0x87   :  { %15407 = sst [smem:[#allocation263_spill]] %s13761_s8 }
  0x88   :  { %s13781_s8 = sld [smem:[%s15343_s0 + %s13239_s15]]   ;;  %s13243_s15 = smov 75  }
  0x8a   :  { %15408 = sst [smem:[#allocation264_spill]] %s13766_s27 }
  0x8b   :  { %15409 = sst [smem:[#allocation265_spill]] %s13771_s29 }
  0x8c   :  { %15410 = sst [smem:[#allocation266_spill]] %s13776_s12 }
  0x8d   :  { %s13786_s27 = sld [smem:[%s15343_s0 + %s13240_s22]]   ;;  %s13244_s22 = smov 76  }
  0x8e   :  { %15411 = sst [smem:[#allocation267_spill]] %s13781_s8 }
  0x8f   :  { %s13791_s29 = sld [smem:[%s15343_s0 + %s13241_s28]]   ;;  %s13245_s28 = smov 77  }
  0x90   :  { %s13796_s12 = sld [smem:[%s15343_s0 + %s13242_s7]]   ;;  %s13246_s7 = smov 78  }
  0x91   :  { %s13801_s8 = sld [smem:[%s15343_s0 + %s13243_s15]]   ;;  %s13247_s15 = smov 79  }
  0x93   :  { %15412 = sst [smem:[#allocation268_spill]] %s13786_s27 }
  0x94   :  { %s13806_s27 = sld [smem:[%s15343_s0 + %s13244_s22]]   ;;  %s13248_s22 = smov 80  }
  0x95   :  { %15413 = sst [smem:[#allocation269_spill]] %s13791_s29 }
  0x96   :  { %15414 = sst [smem:[#allocation270_spill]] %s13796_s12 }
  0x97   :  { %15415 = sst [smem:[#allocation271_spill]] %s13801_s8 }
  0x98   :  { %s13811_s29 = sld [smem:[%s15343_s0 + %s13245_s28]]   ;;  %s13249_s28 = smov 81  }
  0x99   :  { %s13816_s12 = sld [smem:[%s15343_s0 + %s13246_s7]]   ;;  %s13250_s7 = smov 82  }
  0x9a   :  { %15416 = sst [smem:[#allocation272_spill]] %s13806_s27 }
  0x9b   :  { %s13821_s8 = sld [smem:[%s15343_s0 + %s13247_s15]]   ;;  %s13251_s15 = smov 83  }
  0x9c   :  { %s13826_s27 = sld [smem:[%s15343_s0 + %s13248_s22]]   ;;  %s13252_s22 = smov 84  }
  0x9e   :  { %15417 = sst [smem:[#allocation273_spill]] %s13811_s29 }
  0x9f   :  { %15418 = sst [smem:[#allocation274_spill]] %s13816_s12 }
  0xa0   :  { %s13831_s29 = sld [smem:[%s15343_s0 + %s13249_s28]]   ;;  %s13253_s28 = smov 85  }
  0xa1   :  { %15419 = sst [smem:[#allocation275_spill]] %s13821_s8 }
  0xa2   :  { %15420 = sst [smem:[#allocation276_spill]] %s13826_s27 }
  0xa3   :  { %s13836_s12 = sld [smem:[%s15343_s0 + %s13250_s7]]   ;;  %s13254_s7 = smov 86  }
  0xa4   :  { %s13841_s8 = sld [smem:[%s15343_s0 + %s13251_s15]]   ;;  %s13255_s15 = smov 87  }
  0xa5   :  { %s13846_s27 = sld [smem:[%s15343_s0 + %s13252_s22]]   ;;  %s13256_s22 = smov 88  }
  0xa6   :  { %15421 = sst [smem:[#allocation277_spill]] %s13831_s29 }
  0xa7   :  { %s13851_s29 = sld [smem:[%s15343_s0 + %s13253_s28]]   ;;  %s13257_s28 = smov 89  }
  0xa9   :  { %15422 = sst [smem:[#allocation278_spill]] %s13836_s12 }
  0xaa   :  { %15423 = sst [smem:[#allocation279_spill]] %s13841_s8 }
  0xab   :  { %15424 = sst [smem:[#allocation280_spill]] %s13846_s27 }
  0xac   :  { %s13856_s12 = sld [smem:[%s15343_s0 + %s13254_s7]]   ;;  %s13258_s7 = smov 90  }
  0xad   :  { %15425 = sst [smem:[#allocation281_spill]] %s13851_s29 }
  0xae   :  { %s13861_s8 = sld [smem:[%s15343_s0 + %s13255_s15]]   ;;  %s13259_s15 = smov 91  }
  0xaf   :  { %s13866_s27 = sld [smem:[%s15343_s0 + %s13256_s22]]   ;;  %s13260_s22 = smov 92  }
  0xb0   :  { %s13871_s29 = sld [smem:[%s15343_s0 + %s13257_s28]]   ;;  %s13261_s28 = smov 93  }
  0xb2   :  { %15426 = sst [smem:[#allocation282_spill]] %s13856_s12 }
  0xb3   :  { %s13876_s12 = sld [smem:[%s15343_s0 + %s13258_s7]]   ;;  %s13262_s7 = smov 94  }
  0xb4   :  { %15427 = sst [smem:[#allocation283_spill]] %s13861_s8 }
  0xb5   :  { %15428 = sst [smem:[#allocation284_spill]] %s13866_s27 }
  0xb6   :  { %15429 = sst [smem:[#allocation285_spill]] %s13871_s29 }
  0xb7   :  { %s13881_s8 = sld [smem:[%s15343_s0 + %s13259_s15]]   ;;  %s13263_s15 = smov 95  }
  0xb8   :  { %s13886_s27 = sld [smem:[%s15343_s0 + %s13260_s22]]   ;;  %s13264_s22 = smov 96  }
  0xb9   :  { %15430 = sst [smem:[#allocation286_spill]] %s13876_s12 }
  0xba   :  { %s13891_s29 = sld [smem:[%s15343_s0 + %s13261_s28]]   ;;  %s13265_s28 = smov 97  }
  0xbb   :  { %s13896_s12 = sld [smem:[%s15343_s0 + %s13262_s7]]   ;;  %s13266_s7 = smov 98  }
  0xbd   :  { %15431 = sst [smem:[#allocation287_spill]] %s13881_s8 }
  0xbe   :  { %15432 = sst [smem:[#allocation288_spill]] %s13886_s27 }
  0xbf   :  { %s13901_s8 = sld [smem:[%s15343_s0 + %s13263_s15]]   ;;  %s13267_s15 = smov 99  }
  0xc0   :  { %15433 = sst [smem:[#allocation289_spill]] %s13891_s29 }
  0xc1   :  { %15434 = sst [smem:[#allocation290_spill]] %s13896_s12 }
  0xc2   :  { %s13906_s27 = sld [smem:[%s15343_s0 + %s13264_s22]]   ;;  %s13268_s22 = smov 100  }
  0xc3   :  { %s13911_s29 = sld [smem:[%s15343_s0 + %s13265_s28]]   ;;  %s13269_s28 = smov 101  }
  0xc4   :  { %s13916_s12 = sld [smem:[%s15343_s0 + %s13266_s7]]   ;;  %s13270_s7 = smov 102  }
  0xc5   :  { %15435 = sst [smem:[#allocation291_spill]] %s13901_s8 }
  0xc6   :  { %s13921_s8 = sld [smem:[%s15343_s0 + %s13267_s15]]   ;;  %s13271_s15 = smov 103  }
  0xc8   :  { %15436 = sst [smem:[#allocation292_spill]] %s13906_s27 }
  0xc9   :  { %15437 = sst [smem:[#allocation293_spill]] %s13911_s29 }
  0xca   :  { %15438 = sst [smem:[#allocation294_spill]] %s13916_s12 }
  0xcb   :  { %s13926_s27 = sld [smem:[%s15343_s0 + %s13268_s22]]   ;;  %s13272_s22 = smov 104  }
  0xcc   :  { %15439 = sst [smem:[#allocation295_spill]] %s13921_s8 }
  0xcd   :  { %s13931_s29 = sld [smem:[%s15343_s0 + %s13269_s28]]   ;;  %s13273_s28 = smov 105  }
  0xce   :  { %s13936_s12 = sld [smem:[%s15343_s0 + %s13270_s7]]   ;;  %s13274_s7 = smov 106  }
  0xcf   :  { %s13941_s8 = sld [smem:[%s15343_s0 + %s13271_s15]]   ;;  %s13275_s15 = smov 107  }
  0xd1   :  { %15440 = sst [smem:[#allocation296_spill]] %s13926_s27 }
  0xd2   :  { %s13946_s27 = sld [smem:[%s15343_s0 + %s13272_s22]]   ;;  %s13276_s22 = smov 108  }
  0xd3   :  { %15441 = sst [smem:[#allocation297_spill]] %s13931_s29 }
  0xd4   :  { %15442 = sst [smem:[#allocation298_spill]] %s13936_s12 }
  0xd5   :  { %15443 = sst [smem:[#allocation299_spill]] %s13941_s8 }
  0xd6   :  { %s13951_s29 = sld [smem:[%s15343_s0 + %s13273_s28]]   ;;  %s13277_s28 = smov 109  }
  0xd7   :  { %s13956_s12 = sld [smem:[%s15343_s0 + %s13274_s7]]   ;;  %s13278_s7 = smov 110  }
  0xd8   :  { %15444 = sst [smem:[#allocation300_spill]] %s13946_s27 }
  0xd9   :  { %s13961_s8 = sld [smem:[%s15343_s0 + %s13275_s15]]   ;;  %s13279_s15 = smov 111  }
  0xda   :  { %s13966_s27 = sld [smem:[%s15343_s0 + %s13276_s22]]   ;;  %s13280_s22 = smov 112  }
  0xdc   :  { %15445 = sst [smem:[#allocation301_spill]] %s13951_s29 }
  0xdd   :  { %15446 = sst [smem:[#allocation302_spill]] %s13956_s12 }
  0xde   :  { %s13971_s29 = sld [smem:[%s15343_s0 + %s13277_s28]]   ;;  %s13281_s28 = smov 113  }
  0xdf   :  { %15447 = sst [smem:[#allocation303_spill]] %s13961_s8 }
  0xe0   :  { %15448 = sst [smem:[#allocation304_spill]] %s13966_s27 }
  0xe1   :  { %s13976_s12 = sld [smem:[%s15343_s0 + %s13278_s7]]   ;;  %s13282_s7 = smov 114  }
  0xe2   :  { %s13981_s8 = sld [smem:[%s15343_s0 + %s13279_s15]]   ;;  %s13283_s15 = smov 115  }
  0xe3   :  { %s13986_s27 = sld [smem:[%s15343_s0 + %s13280_s22]]   ;;  %s13284_s22 = smov 116  }
  0xe4   :  { %15449 = sst [smem:[#allocation305_spill]] %s13971_s29 }
  0xe5   :  { %s13991_s29 = sld [smem:[%s15343_s0 + %s13281_s28]]   ;;  %s13285_s28 = smov 117  }
  0xe7   :  { %15450 = sst [smem:[#allocation306_spill]] %s13976_s12 }
  0xe8   :  { %15451 = sst [smem:[#allocation307_spill]] %s13981_s8 }
  0xe9   :  { %15452 = sst [smem:[#allocation308_spill]] %s13986_s27 }
  0xea   :  { %s13996_s12 = sld [smem:[%s15343_s0 + %s13282_s7]]   ;;  %s13286_s7 = smov 118  }
  0xeb   :  { %15453 = sst [smem:[#allocation309_spill]] %s13991_s29 }
  0xec   :  { %s14001_s8 = sld [smem:[%s15343_s0 + %s13283_s15]]   ;;  %s13287_s15 = smov 119  }
  0xed   :  { %s14006_s27 = sld [smem:[%s15343_s0 + %s13284_s22]]   ;;  %s13288_s22 = smov 120  }
  0xee   :  { %s14011_s29 = sld [smem:[%s15343_s0 + %s13285_s28]]   ;;  %s13289_s28 = smov 121  }
  0xf0   :  { %15454 = sst [smem:[#allocation310_spill]] %s13996_s12 }
  0xf1   :  { %s14016_s12 = sld [smem:[%s15343_s0 + %s13286_s7]]   ;;  %s13290_s7 = smov 122  }
  0xf2   :  { %15455 = sst [smem:[#allocation311_spill]] %s14001_s8 }
  0xf3   :  { %15456 = sst [smem:[#allocation312_spill]] %s14006_s27 }
  0xf4   :  { %15457 = sst [smem:[#allocation313_spill]] %s14011_s29 }
  0xf5   :  { %s14021_s8 = sld [smem:[%s15343_s0 + %s13287_s15]]   ;;  %s13291_s15 = smov 123  }
  0xf6   :  { %s14026_s27 = sld [smem:[%s15343_s0 + %s13288_s22]]   ;;  %s13292_s22 = smov 124  }
  0xf7   :  { %15458 = sst [smem:[#allocation314_spill]] %s14016_s12 }
  0xf8   :  { %s14031_s29 = sld [smem:[%s15343_s0 + %s13289_s28]]   ;;  %s13293_s28 = smov 125  }
  0xf9   :  { %s14036_s12 = sld [smem:[%s15343_s0 + %s13290_s7]]  }
  0xfb   :  { %15459 = sst [smem:[#allocation315_spill]] %s14021_s8 }
  0xfc   :  { %15460 = sst [smem:[#allocation316_spill]] %s14026_s27 }
  0xfd   :  { %s14041_s8 = sld [smem:[%s15343_s0 + %s13291_s15]]  }
  0xfe   :  { %15461 = sst [smem:[#allocation317_spill]] %s14031_s29 }
  0xff   :  { %s14046_s27 = sld [smem:[%s15343_s0 + %s13292_s22]]  }
 0x100   :  { %s14051_s29 = sld [smem:[%s15343_s0 + %s13293_s28]]  }
 0x101   :  { %256 = vsyncpa [#allocation3], 0 }
 0x102   :  { %257 = vsyncpa [#allocation6], 0 }
 0x103   :  { %258 = vsyncpa [#allocation9], 0 }
 0x104   :  { %259 = vsyncpa [#allocation12], 0 }
 0x105   :  { %260 = vsyncpa [#allocation15], 0 }
 0x106   :  { %261 = vsyncpa [#allocation18], 0 }
 0x107   :  { %262 = vsyncpa [#allocation21], 0 }
 0x108   :  { %263 = vsyncpa [#allocation24], 0 }
 0x109   :  { %264 = vsyncpa [#allocation27], 0 }
 0x10a   :  { %265 = vsyncpa [#allocation30], 0 }
 0x10b   :  { %266 = vsyncpa [#allocation33], 0 }
 0x10c   :  { %267 = vsyncpa [#allocation36], 0 }
 0x10d   :  { %268 = vsyncpa [#allocation39], 0 }
 0x10e   :  { %269 = vsyncpa [#allocation42], 0 }
 0x10f   :  { %270 = vsyncpa [#allocation45], 0 }
 0x110   :  { %271 = vsyncpa [#allocation48], 0 }
 0x111   :  { %272 = vsyncpa [#allocation51], 0 }
 0x112   :  { %273 = vsyncpa [#allocation54], 0 }
 0x113   :  { %274 = vsyncpa [#allocation57], 0 }
 0x114   :  { %275 = vsyncpa [#allocation60], 0 }
 0x115   :  { %276 = vsyncpa [#allocation63], 0 }
 0x116   :  { %277 = vsyncpa [#allocation66], 0 }
 0x117   :  { %278 = vsyncpa [#allocation69], 0 }
 0x118   :  { %279 = vsyncpa [#allocation72], 0 }
 0x119   :  { %280 = vsyncpa [#allocation75], 0 }
 0x11a   :  { %281 = vsyncpa [#allocation78], 0 }
 0x11b   :  { %282 = vsyncpa [#allocation81], 0 }
 0x11c   :  { %283 = vsyncpa [#allocation84], 0 }
 0x11d   :  { %284 = vsyncpa [#allocation87], 0 }
 0x11e   :  { %285 = vsyncpa [#allocation90], 0 }
 0x11f   :  { %286 = vsyncpa [#allocation93], 0 }
 0x120   :  { %287 = vsyncpa [#allocation96], 0 }
 0x121   :  { %288 = vsyncpa [#allocation99], 0 }
 0x122   :  { %289 = vsyncpa [#allocation102], 0 }
 0x123   :  { %290 = vsyncpa [#allocation105], 0 }
 0x124   :  { %291 = vsyncpa [#allocation108], 0 }
 0x125   :  { %292 = vsyncpa [#allocation111], 0 }
 0x126   :  { %293 = vsyncpa [#allocation114], 0 }
 0x127   :  { %294 = vsyncpa [#allocation117], 0 }
 0x128   :  { %295 = vsyncpa [#allocation120], 0 }
 0x129   :  { %296 = vsyncpa [#allocation123], 0 }
 0x12a   :  { %297 = vsyncpa [#allocation126], 0 }
 0x12b   :  { %298 = vsyncpa [#allocation129], 0 }
 0x12c   :  { %299 = vsyncpa [#allocation132], 0 }
 0x12d   :  { %300 = vsyncpa [#allocation135], 0 }
 0x12e   :  { %301 = vsyncpa [#allocation138], 0 }
 0x12f   :  { %302 = vsyncpa [#allocation141], 0 }
 0x130   :  { %303 = vsyncpa [#allocation144], 0 }
 0x131   :  { %304 = vsyncpa [#allocation147], 0 }
 0x132   :  { %305 = vsyncpa [#allocation150], 0 }
 0x133   :  { %306 = vsyncpa [#allocation4], 0  ;;  %s13294_s0 = smov [#allocation5]  }
 0x134   :  { %s324_s7 = sshll.u32 %s13294_s0, 4  ;;  %s325_s7 = int_to_ptr.vmem [resolvable:$true] %s324_s7 }
 0x135   :  { %s11009_s10 = scalar_lea.vmem %s325_s7, 256  ;;  %p11014_p1 = scmp.lt.s32.totalorder %s325_s7, %s325_s7 }
 0x136   :  { %p11010_p0 = scmp.ne.s32.totalorder %s325_s7, %s11009_s10  ;;  %p11015_p2 = scmp.lt.s32.totalorder %s11009_s10, %s11009_s10 }
 0x138   :  { %p11016_p3 = por %p11015_p2, %p11014_p1 }
 0x13a   :  { %p11017_p4 = pnand %p11016_p3, %p11010_p0 }
 0x13c   :  { %11020 = shalt.err (!%p11017_p4)
}
 0x13d   :  { %s13295_s11 = smov 128   ;;  %s13296_s15 = smov 8  }
 0x13e   :  { %330 = dma.hbm_to_vmem [thread:$0]  %s13431_s9, 256, %s325_s7, [#allocation6], %s13295_s11, %s13295_s11, %s13296_s15  }
 0x13f   :  { %s13297_s16 = smov [#allocation8]   ;;  %s13298_s22 = smov [#allocation2]  }
 0x140   :  { %s348_s18 = sshll.u32 %s13297_s16, 4  ;;  %s312_s23 = sshll.u32 %s13298_s22, 4  ;;  %s349_s18 = int_to_ptr.vmem [resolvable:$true] %s348_s18  ;;  %s313_s23 = int_to_ptr.vmem [resolvable:$true] %s312_s23 }
 0x141   :  { %s11029_s26 = scalar_lea.vmem %s349_s18, 256  ;;  %p11034_p6 = scmp.lt.s32.totalorder %s349_s18, %s349_s18 }
 0x142   :  { %p11030_p5 = scmp.ne.s32.totalorder %s349_s18, %s11029_s26  ;;  %p11035_p7 = scmp.lt.s32.totalorder %s11029_s26, %s11029_s26 }
 0x144   :  { %p11036_p8 = por %p11035_p7, %p11034_p6 }
 0x146   :  { %p11037_p9 = pnand %p11036_p8, %p11030_p5 }
 0x148   :  { %11040 = shalt.err (!%p11037_p9)
}
 0x149   :  { %354 = dma.hbm_to_vmem [thread:$0]  %s13441_s17, 256, %s349_s18, [#allocation9], %s13295_s11, %s13295_s11, %s13296_s15  }
 0x14a   :  { %s11049_s28 = scalar_lea.vmem %s313_s23, 128  ;;  %p11054_p11 = scmp.lt.s32.totalorder %s313_s23, %s313_s23 }
 0x14b   :  { %p11050_p10 = scmp.ne.s32.totalorder %s313_s23, %s11049_s28  ;;  %p11055_p12 = scmp.lt.s32.totalorder %s11049_s28, %s11049_s28 }
 0x14d   :  { %p11056_p13 = por %p11055_p12, %p11054_p11 }
 0x14f   :  { %p11057_p0 = pnand %p11056_p13, %p11050_p10 }
 0x151   :  { %11060 = shalt.err (!%p11057_p0)
}
 0x152   :  { %s13299_s9 = smov 64   ;;  %s13300_s1 = smov 4  }
 0x153   :  { %318 = dma.hbm_to_vmem [thread:$0]  %s13426_s5, 128, %s313_s23, [#allocation3], %s13299_s9, %s13299_s9, %s13300_s1  }
 0x154   :  { %s13301_s2 = smov [#allocation7]   ;;  %s13302_s7 = smov [#allocation10]  }
 0x155   :  { %s336_s0 = sshll.u32 %s13301_s2, 4  ;;  %s360_s17 = sshll.u32 %s13302_s7, 4  ;;  %s337_s0 = int_to_ptr.vmem [resolvable:$true] %s336_s0  ;;  %s361_s17 = int_to_ptr.vmem [resolvable:$true] %s360_s17 }
 0x156   :  { %s11069_s10 = scalar_lea.vmem %s337_s0, 256  ;;  %p11074_p2 = scmp.lt.s32.totalorder %s337_s0, %s337_s0 }
 0x157   :  { %p11070_p1 = scmp.ne.s32.totalorder %s337_s0, %s11069_s10  ;;  %p11075_p3 = scmp.lt.s32.totalorder %s11069_s10, %s11069_s10 }
 0x159   :  { %p11076_p4 = por %p11075_p3, %p11074_p2 }
 0x15b   :  { %p11077_p5 = pnand %p11076_p4, %p11070_p1 }
 0x15d   :  { %11080 = shalt.err (!%p11077_p5)
}
 0x15e   :  { %342 = dma.hbm_to_vmem [thread:$0]  %s13436_s13, 256, %s337_s0, [#allocation6], %s13295_s11, %s13295_s11, %s13296_s15  }
 0x15f   :  { %s11089_s16 = scalar_lea.vmem %s361_s17, 256  ;;  %p11094_p7 = scmp.lt.s32.totalorder %s361_s17, %s361_s17 }
 0x160   :  { %p11090_p6 = scmp.ne.s32.totalorder %s361_s17, %s11089_s16  ;;  %p11095_p8 = scmp.lt.s32.totalorder %s11089_s16, %s11089_s16 }
 0x162   :  { %p11096_p9 = por %p11095_p8, %p11094_p7 }
 0x164   :  { %p11097_p10 = pnand %p11096_p9, %p11090_p6 }
 0x166   :  { %11100 = shalt.err (!%p11097_p10)
}
 0x167   :  { %366 = dma.hbm_to_vmem [thread:$0]  %s13446_s21, 256, %s361_s17, [#allocation9], %s13295_s11, %s13295_s11, %s13296_s15  }
 0x168   :  { %s13303_s5 = smov [#allocation11]   ;;  %s13304_s22 = smov [#allocation14]  }
 0x169   :  { %s372_s18 = sshll.u32 %s13303_s5, 4  ;;  %s396_s23 = sshll.u32 %s13304_s22, 4  ;;  %s373_s18 = int_to_ptr.vmem [resolvable:$true] %s372_s18  ;;  %s397_s23 = int_to_ptr.vmem [resolvable:$true] %s396_s23 }
 0x16a   :  { %s11109_s26 = scalar_lea.vmem %s373_s18, 256  ;;  %p11114_p12 = scmp.lt.s32.totalorder %s373_s18, %s373_s18 }
 0x16b   :  { %p11110_p11 = scmp.ne.s32.totalorder %s373_s18, %s11109_s26  ;;  %p11115_p13 = scmp.lt.s32.totalorder %s11109_s26, %s11109_s26 }
 0x16d   :  { %p11116_p0 = por %p11115_p13, %p11114_p12 }
 0x16f   :  { %p11117_p1 = pnand %p11116_p0, %p11110_p11 }
 0x171   :  { %11120 = shalt.err (!%p11117_p1)
}
 0x172   :  { %378 = dma.hbm_to_vmem [thread:$0]  %s13451_s25, 256, %s373_s18, [#allocation12], %s13295_s11, %s13295_s11, %s13296_s15  }
 0x173   :  { %s11129_s13 = scalar_lea.vmem %s397_s23, 256  ;;  %p11134_p3 = scmp.lt.s32.totalorder %s397_s23, %s397_s23 }
 0x174   :  { %p11130_p2 = scmp.ne.s32.totalorder %s397_s23, %s11129_s13  ;;  %p11135_p4 = scmp.lt.s32.totalorder %s11129_s13, %s11129_s13 }
 0x176   :  { %p11136_p5 = por %p11135_p4, %p11134_p3 }
 0x178   :  { %p11137_p6 = pnand %p11136_p5, %p11130_p2 }
 0x17a   :  { %11140 = shalt.err (!%p11137_p6)
}
 0x17b   :  { %402 = dma.hbm_to_vmem [thread:$0]  %s13461_s3, 256, %s397_s23, [#allocation15], %s13295_s11, %s13295_s11, %s13296_s15  }
 0x17c   :  { %s13305_s21 = smov [#allocation17]   ;;  %s13306_s2 = smov [#allocation20]  }
 0x17d   :  { %s420_s28 = sshll.u32 %s13305_s21, 4  ;;  %s444_s0 = sshll.u32 %s13306_s2, 4  ;;  %s421_s28 = int_to_ptr.vmem [resolvable:$true] %s420_s28  ;;  %s445_s0 = int_to_ptr.vmem [resolvable:$true] %s444_s0 }
 0x17e   :  { %s11149_s7 = scalar_lea.vmem %s421_s28, 256  ;;  %p11154_p8 = scmp.lt.s32.totalorder %s421_s28, %s421_s28 }
 0x17f   :  { %p11150_p7 = scmp.ne.s32.totalorder %s421_s28, %s11149_s7  ;;  %p11155_p9 = scmp.lt.s32.totalorder %s11149_s7, %s11149_s7 }
 0x181   :  { %p11156_p10 = por %p11155_p9, %p11154_p8 }
 0x183   :  { %p11157_p11 = pnand %p11156_p10, %p11150_p7 }
 0x185   :  { %11160 = shalt.err (!%p11157_p11)
}
 0x186   :  { %426 = dma.hbm_to_vmem [thread:$0]  %s13471_s14, 256, %s421_s28, [#allocation18], %s13295_s11, %s13295_s11, %s13296_s15  }
 0x187   :  { %s11169_s25 = scalar_lea.vmem %s445_s0, 256  ;;  %p11174_p13 = scmp.lt.s32.totalorder %s445_s0, %s445_s0 }
 0x188   :  { %p11170_p12 = scmp.ne.s32.totalorder %s445_s0, %s11169_s25  ;;  %p11175_p0 = scmp.lt.s32.totalorder %s11169_s25, %s11169_s25 }
 0x18a   :  { %p11176_p1 = por %p11175_p0, %p11174_p13 }
 0x18c   :  { %p11177_p2 = pnand %p11176_p1, %p11170_p12 }
 0x18e   :  { %11180 = shalt.err (!%p11177_p2)
}
 0x18f   :  { %450 = dma.hbm_to_vmem [thread:$0]  %s13481_s24, 256, %s445_s0, [#allocation21], %s13295_s11, %s13295_s11, %s13296_s15  }
 0x190   :  { %s13307_s3 = smov [#allocation23]   ;;  %s13308_s10 = smov [#allocation26]  }
 0x191   :  { %s468_s17 = sshll.u32 %s13307_s3, 4  ;;  %s493_s16 = sshll.u32 %s13308_s10, 4  ;;  %s469_s17 = int_to_ptr.vmem [resolvable:$true] %s468_s17  ;;  %s494_s16 = int_to_ptr.vmem [resolvable:$true] %s493_s16 }
 0x192   :  { %s11189_s5 = scalar_lea.vmem %s469_s17, 256  ;;  %p11194_p4 = scmp.lt.s32.totalorder %s469_s17, %s469_s17 }
 0x193   :  { %p11190_p3 = scmp.ne.s32.totalorder %s469_s17, %s11189_s5  ;;  %p11195_p5 = scmp.lt.s32.totalorder %s11189_s5, %s11189_s5 }
 0x195   :  { %p11196_p6 = por %p11195_p5, %p11194_p4 }
 0x197   :  { %p11197_p7 = pnand %p11196_p6, %p11190_p3 }
 0x199   :  { %11200 = shalt.err (!%p11197_p7)
}
 0x19a   :  { %474 = dma.hbm_to_vmem [thread:$0]  %s13491_s6, 256, %s469_s17, [#allocation24], %s13295_s11, %s13295_s11, %s13296_s15  }
 0x19b   :  { %s11209_s14 = scalar_lea.vmem %s494_s16, 128  ;;  %p11214_p9 = scmp.lt.s32.totalorder %s494_s16, %s494_s16 }
 0x19c   :  { %p11210_p8 = scmp.ne.s32.totalorder %s494_s16, %s11209_s14  ;;  %p11215_p10 = scmp.lt.s32.totalorder %s11209_s14, %s11209_s14 }
 0x19e   :  { %p11216_p11 = por %p11215_p10, %p11214_p9 }
 0x1a0   :  { %p11217_p12 = pnand %p11216_p11, %p11210_p8 }
 0x1a2   :  { %11220 = shalt.err (!%p11217_p12)
}
 0x1a3   :  { %496 = dma.hbm_to_vmem [thread:$0]  %s13501_s20, 128, %s494_s16, [#allocation27]  }
 0x1a4   :  { %s13309_s24 = smov [#allocation29]   ;;  %s13310_s22 = smov [#allocation32]  }
 0x1a5   :  { %s513_s18 = sshll.u32 %s13309_s24, 4  ;;  %s533_s23 = sshll.u32 %s13310_s22, 4  ;;  %s514_s18 = int_to_ptr.vmem [resolvable:$true] %s513_s18  ;;  %s534_s23 = int_to_ptr.vmem [resolvable:$true] %s533_s23 }
 0x1a6   :  { %s11229_s26 = scalar_lea.vmem %s514_s18, 128  ;;  %p11234_p0 = scmp.lt.s32.totalorder %s514_s18, %s514_s18 }
 0x1a7   :  { %p11230_p13 = scmp.ne.s32.totalorder %s514_s18, %s11229_s26  ;;  %p11235_p1 = scmp.lt.s32.totalorder %s11229_s26, %s11229_s26 }
 0x1a9   :  { %p11236_p2 = por %p11235_p1, %p11234_p0 }
 0x1ab   :  { %p11237_p3 = pnand %p11236_p2, %p11230_p13 }
 0x1ad   :  { %11240 = shalt.err (!%p11237_p3)
}
 0x1ae   :  { %516 = dma.hbm_to_vmem [thread:$0]  %s13511_s4, 128, %s514_s18, [#allocation30]  }
 0x1af   :  { %s11249_s6 = scalar_lea.vmem %s534_s23, 128  ;;  %p11254_p5 = scmp.lt.s32.totalorder %s534_s23, %s534_s23 }
 0x1b0   :  { %p11250_p4 = scmp.ne.s32.totalorder %s534_s23, %s11249_s6  ;;  %p11255_p6 = scmp.lt.s32.totalorder %s11249_s6, %s11249_s6 }
 0x1b2   :  { %p11256_p7 = por %p11255_p6, %p11254_p5 }
 0x1b4   :  { %p11257_p8 = pnand %p11256_p7, %p11250_p4 }
 0x1b6   :  { %11260 = shalt.err (!%p11257_p8)
}
 0x1b7   :  { %536 = dma.hbm_to_vmem [thread:$0]  %s13521_s30, 128, %s534_s23, [#allocation33]  }
 0x1b8   :  { %s13311_s20 = smov [#allocation35]   ;;  %s13312_s21 = smov [#allocation38]  }
 0x1b9   :  { %s553_s13 = sshll.u32 %s13311_s20, 4  ;;  %s573_s28 = sshll.u32 %s13312_s21, 4  ;;  %s554_s13 = int_to_ptr.vmem [resolvable:$true] %s553_s13  ;;  %s574_s28 = int_to_ptr.vmem [resolvable:$true] %s573_s28 }
 0x1ba   :  { %s11269_s2 = scalar_lea.vmem %s554_s13, 64  ;;  %p11274_p10 = scmp.lt.s32.totalorder %s554_s13, %s554_s13 }
 0x1bb   :  { %p11270_p9 = scmp.ne.s32.totalorder %s554_s13, %s11269_s2  ;;  %p11275_p11 = scmp.lt.s32.totalorder %s11269_s2, %s11269_s2 }
 0x1bd   :  { %p11276_p12 = por %p11275_p11, %p11274_p10 }
 0x1bf   :  { %p11277_p13 = pnand %p11276_p12, %p11270_p9 }
 0x1c1   :  { %11280 = shalt.err (!%p11277_p13)
}
 0x1c2   :  { %556 = dma.hbm_to_vmem [thread:$0]  %s13531_s19, 64, %s554_s13, [#allocation36]  }
 0x1c3   :  { %s11289_s4 = scalar_lea.vmem %s574_s28, 64  ;;  %p11294_p1 = scmp.lt.s32.totalorder %s574_s28, %s574_s28 }
 0x1c4   :  { %p11290_p0 = scmp.ne.s32.totalorder %s574_s28, %s11289_s4  ;;  %p11295_p2 = scmp.lt.s32.totalorder %s11289_s4, %s11289_s4 }
 0x1c6   :  { %p11296_p3 = por %p11295_p2, %p11294_p1 }
 0x1c8   :  { %p11297_p4 = pnand %p11296_p3, %p11290_p0 }
 0x1ca   :  { %11300 = shalt.err (!%p11297_p4)
}
 0x1cb   :  { %s15462_s30 = sld [smem:[#allocation219_spill]]  ;;  %s13313_s0 = smov [#allocation41]  }
 0x1cc   :  { %s595_s7 = sshll.u32 %s13313_s0, 4  ;;  %s13314_s25 = smov [#allocation44]   ;;  %s596_s7 = int_to_ptr.vmem [resolvable:$true] %s595_s7 }
 0x1cd   :  { %s614_s3 = sshll.u32 %s13314_s25, 4  ;;  %s11309_s17 = scalar_lea.vmem %s596_s7, 64  ;;  %s615_s3 = int_to_ptr.vmem [resolvable:$true] %s614_s3 }
 0x1ce   :  { %p11310_p5 = scmp.ne.s32.totalorder %s596_s7, %s11309_s17  ;;  %p11314_p6 = scmp.lt.s32.totalorder %s596_s7, %s596_s7 }
 0x1cf   :  { %p11315_p7 = scmp.lt.s32.totalorder %s11309_s17, %s11309_s17 }
 0x1d1   :  { %576 = dma.hbm_to_vmem [thread:$0]  %s15462_s30, 64, %s574_s28, [#allocation39]  }
 0x1d2   :  { %p11316_p8 = por %p11315_p7, %p11314_p6 }
 0x1d4   :  { %p11317_p9 = pnand %p11316_p8, %p11310_p5 }
 0x1d6   :  { %11320 = shalt.err (!%p11317_p9)
}
 0x1d7   :  { %s15463_s19 = sld [smem:[#allocation221_spill]]  ;;  %s11329_s10 = scalar_lea.vmem %s615_s3, 256 }
 0x1d8   :  { %p11330_p10 = scmp.ne.s32.totalorder %s615_s3, %s11329_s10  ;;  %p11334_p11 = scmp.lt.s32.totalorder %s615_s3, %s615_s3 }
 0x1d9   :  { %p11335_p12 = scmp.lt.s32.totalorder %s11329_s10, %s11329_s10 }
 0x1db   :  { %p11336_p13 = por %p11335_p12, %p11334_p11 }
 0x1dd   :  { %598 = dma.hbm_to_vmem [thread:$0]  %s15463_s19, 64, %s596_s7, [#allocation42]  }
 0x1de   :  { %p11337_p0 = pnand %p11336_p13, %p11330_p10 }
 0x1e0   :  { %11340 = shalt.err (!%p11337_p0)
}
 0x1e1   :  { %s15464_s16 = sld [smem:[#allocation223_spill]]  ;;  %s13315_s5 = smov [#allocation47]  }
 0x1e2   :  { %s639_s14 = sshll.u32 %s13315_s5, 4  ;;  %s13316_s24 = smov [#allocation50]   ;;  %s640_s14 = int_to_ptr.vmem [resolvable:$true] %s639_s14 }
 0x1e3   :  { %s659_s18 = sshll.u32 %s13316_s24, 4  ;;  %s11349_s22 = scalar_lea.vmem %s640_s14, 128  ;;  %s660_s18 = int_to_ptr.vmem [resolvable:$true] %s659_s18 }
 0x1e4   :  { %p11350_p1 = scmp.ne.s32.totalorder %s640_s14, %s11349_s22  ;;  %p11354_p2 = scmp.lt.s32.totalorder %s640_s14, %s640_s14 }
 0x1e5   :  { %p11355_p3 = scmp.lt.s32.totalorder %s11349_s22, %s11349_s22 }
 0x1e7   :  { %620 = dma.hbm_to_vmem [thread:$0]  %s15464_s16, 256, %s615_s3, [#allocation45], %s13295_s11, %s13295_s11, %s13296_s15  }
 0x1e8   :  { %p11356_p4 = por %p11355_p3, %p11354_p2 }
 0x1ea   :  { %p11357_p5 = pnand %p11356_p4, %p11350_p1 }
 0x1ec   :  { %11360 = shalt.err (!%p11357_p5)
}
 0x1ed   :  { %s15465_s23 = sld [smem:[#allocation225_spill]]  ;;  %s11369_s26 = scalar_lea.vmem %s660_s18, 128 }
 0x1ee   :  { %p11370_p6 = scmp.ne.s32.totalorder %s660_s18, %s11369_s26  ;;  %p11374_p7 = scmp.lt.s32.totalorder %s660_s18, %s660_s18 }
 0x1ef   :  { %p11375_p8 = scmp.lt.s32.totalorder %s11369_s26, %s11369_s26 }
 0x1f1   :  { %p11376_p9 = por %p11375_p8, %p11374_p7 }
 0x1f3   :  { %642 = dma.hbm_to_vmem [thread:$0]  %s15465_s23, 128, %s640_s14, [#allocation48]  }
 0x1f4   :  { %p11377_p10 = pnand %p11376_p9, %p11370_p6 }
 0x1f6   :  { %11380 = shalt.err (!%p11377_p10)
}
 0x1f7   :  { %s15466_s6 = sld [smem:[#allocation227_spill]]  ;;  %s13317_s20 = smov [#allocation53]  }
 0x1f8   :  { %s679_s13 = sshll.u32 %s13317_s20, 4  ;;  %s13318_s21 = smov [#allocation56]   ;;  %s680_s13 = int_to_ptr.vmem [resolvable:$true] %s679_s13 }
 0x1f9   :  { %s699_s28 = sshll.u32 %s13318_s21, 4  ;;  %s11389_s2 = scalar_lea.vmem %s680_s13, 128  ;;  %s700_s28 = int_to_ptr.vmem [resolvable:$true] %s699_s28 }
 0x1fa   :  { %p11390_p11 = scmp.ne.s32.totalorder %s680_s13, %s11389_s2  ;;  %p11394_p12 = scmp.lt.s32.totalorder %s680_s13, %s680_s13 }
 0x1fb   :  { %p11395_p13 = scmp.lt.s32.totalorder %s11389_s2, %s11389_s2 }
 0x1fd   :  { %662 = dma.hbm_to_vmem [thread:$0]  %s15466_s6, 128, %s660_s18, [#allocation51]  }
 0x1fe   :  { %p11396_p0 = por %p11395_p13, %p11394_p12 }
 0x200   :  { %p11397_p1 = pnand %p11396_p0, %p11390_p11 }
 0x202   :  { %11400 = shalt.err (!%p11397_p1)
}
 0x203   :  { %s15467_s4 = sld [smem:[#allocation229_spill]]  ;;  %s11409_s30 = scalar_lea.vmem %s700_s28, 64 }
 0x204   :  { %p11410_p2 = scmp.ne.s32.totalorder %s700_s28, %s11409_s30  ;;  %p11414_p3 = scmp.lt.s32.totalorder %s700_s28, %s700_s28 }
 0x205   :  { %p11415_p4 = scmp.lt.s32.totalorder %s11409_s30, %s11409_s30 }
 0x207   :  { %p11416_p5 = por %p11415_p4, %p11414_p3 }
 0x209   :  { %682 = dma.hbm_to_vmem [thread:$0]  %s15467_s4, 128, %s680_s13, [#allocation54]  }
 0x20a   :  { %p11417_p6 = pnand %p11416_p5, %p11410_p2 }
 0x20c   :  { %11420 = shalt.err (!%p11417_p6)
}
 0x20d   :  { %s15468_s0 = sld [smem:[#allocation231_spill]]  ;;  %s13319_s7 = smov [#allocation59]  }
 0x20e   :  { %s719_s25 = sshll.u32 %s13319_s7, 4  ;;  %s13320_s3 = smov [#allocation62]   ;;  %s720_s25 = int_to_ptr.vmem [resolvable:$true] %s719_s25 }
 0x20f   :  { %s741_s17 = sshll.u32 %s13320_s3, 4  ;;  %s11429_s19 = scalar_lea.vmem %s720_s25, 64  ;;  %s742_s17 = int_to_ptr.vmem [resolvable:$true] %s741_s17 }
 0x210   :  { %p11430_p7 = scmp.ne.s32.totalorder %s720_s25, %s11429_s19  ;;  %p11434_p8 = scmp.lt.s32.totalorder %s720_s25, %s720_s25 }
 0x211   :  { %p11435_p9 = scmp.lt.s32.totalorder %s11429_s19, %s11429_s19 }
 0x213   :  { %702 = dma.hbm_to_vmem [thread:$0]  %s15468_s0, 64, %s700_s28, [#allocation57]  }
 0x214   :  { %p11436_p10 = por %p11435_p9, %p11434_p8 }
 0x216   :  { %p11437_p11 = pnand %p11436_p10, %p11430_p7 }
 0x218   :  { %11440 = shalt.err (!%p11437_p11)
}
 0x219   :  { %s15469_s10 = sld [smem:[#allocation233_spill]]  ;;  %s11449_s16 = scalar_lea.vmem %s742_s17, 64 }
 0x21a   :  { %p11450_p12 = scmp.ne.s32.totalorder %s742_s17, %s11449_s16  ;;  %p11454_p13 = scmp.lt.s32.totalorder %s742_s17, %s742_s17 }
 0x21b   :  { %p11455_p0 = scmp.lt.s32.totalorder %s11449_s16, %s11449_s16 }
 0x21d   :  { %p11456_p1 = por %p11455_p0, %p11454_p13 }
 0x21f   :  { %722 = dma.hbm_to_vmem [thread:$0]  %s15469_s10, 64, %s720_s25, [#allocation60]  }
 0x220   :  { %p11457_p2 = pnand %p11456_p1, %p11450_p12 }
 0x222   :  { %11460 = shalt.err (!%p11457_p2)
}
 0x223   :  { %s15470_s5 = sld [smem:[#allocation235_spill]]  ;;  %s13321_s14 = smov [#allocation65]  }
 0x224   :  { %s761_s24 = sshll.u32 %s13321_s14, 4  ;;  %s13322_s18 = smov [#allocation68]   ;;  %s762_s24 = int_to_ptr.vmem [resolvable:$true] %s761_s24 }
 0x225   :  { %s783_s22 = sshll.u32 %s13322_s18, 4  ;;  %s11469_s23 = scalar_lea.vmem %s762_s24, 32  ;;  %s784_s22 = int_to_ptr.vmem [resolvable:$true] %s783_s22 }
 0x226   :  { %p11470_p3 = scmp.ne.s32.totalorder %s762_s24, %s11469_s23  ;;  %p11474_p4 = scmp.lt.s32.totalorder %s762_s24, %s762_s24 }
 0x227   :  { %p11475_p5 = scmp.lt.s32.totalorder %s11469_s23, %s11469_s23 }
 0x229   :  { %744 = dma.hbm_to_vmem [thread:$0]  %s15470_s5, 64, %s742_s17, [#allocation63]  }
 0x22a   :  { %p11476_p6 = por %p11475_p5, %p11474_p4 }
 0x22c   :  { %p11477_p7 = pnand %p11476_p6, %p11470_p3 }
 0x22e   :  { %11480 = shalt.err (!%p11477_p7)
}
 0x22f   :  { %s15471_s26 = sld [smem:[#allocation237_spill]]  ;;  %s11489_s6 = scalar_lea.vmem %s784_s22, 32 }
 0x230   :  { %p11490_p8 = scmp.ne.s32.totalorder %s784_s22, %s11489_s6  ;;  %p11494_p9 = scmp.lt.s32.totalorder %s784_s22, %s784_s22 }
 0x231   :  { %p11495_p10 = scmp.lt.s32.totalorder %s11489_s6, %s11489_s6 }
 0x233   :  { %p11496_p11 = por %p11495_p10, %p11494_p9 }
 0x235   :  { %764 = dma.hbm_to_vmem [thread:$0]  %s15471_s26, 32, %s762_s24, [#allocation66]  }
 0x236   :  { %p11497_p12 = pnand %p11496_p11, %p11490_p8 }
 0x238   :  { %11500 = shalt.err (!%p11497_p12)
}
 0x239   :  { %s15472_s20 = sld [smem:[#allocation239_spill]]  ;;  %s13323_s13 = smov [#allocation71]  }
 0x23a   :  { %s805_s21 = sshll.u32 %s13323_s13, 4  ;;  %s13324_s28 = smov [#allocation74]   ;;  %s806_s21 = int_to_ptr.vmem [resolvable:$true] %s805_s21 }
 0x23b   :  { %s824_s2 = sshll.u32 %s13324_s28, 4  ;;  %s11509_s4 = scalar_lea.vmem %s806_s21, 32  ;;  %s825_s2 = int_to_ptr.vmem [resolvable:$true] %s824_s2 }
 0x23c   :  { %p11510_p13 = scmp.ne.s32.totalorder %s806_s21, %s11509_s4  ;;  %p11514_p0 = scmp.lt.s32.totalorder %s806_s21, %s806_s21 }
 0x23d   :  { %p11515_p1 = scmp.lt.s32.totalorder %s11509_s4, %s11509_s4 }
 0x23f   :  { %786 = dma.hbm_to_vmem [thread:$0]  %s15472_s20, 32, %s784_s22, [#allocation69]  }
 0x240   :  { %p11516_p2 = por %p11515_p1, %p11514_p0 }
 0x242   :  { %p11517_p3 = pnand %p11516_p2, %p11510_p13 }
 0x244   :  { %11520 = shalt.err (!%p11517_p3)
}
 0x245   :  { %s15473_s30 = sld [smem:[#allocation241_spill]]  ;;  %s11529_s0 = scalar_lea.vmem %s825_s2, 2048 }
 0x246   :  { %p11530_p4 = scmp.ne.s32.totalorder %s825_s2, %s11529_s0  ;;  %p11534_p5 = scmp.lt.s32.totalorder %s825_s2, %s825_s2 }
 0x247   :  { %p11535_p6 = scmp.lt.s32.totalorder %s11529_s0, %s11529_s0 }
 0x249   :  { %p11536_p7 = por %p11535_p6, %p11534_p5 }
 0x24b   :  { %808 = dma.hbm_to_vmem [thread:$0]  %s15473_s30, 32, %s806_s21, [#allocation72]  }
 0x24c   :  { %p11537_p8 = pnand %p11536_p7, %p11530_p4 }
 0x24e   :  { %11540 = shalt.err (!%p11537_p8)
}
 0x24f   :  { %s15474_s7 = sld [smem:[#allocation243_spill]]  ;;  %s13325_s25 = smov [#allocation77]  }
 0x250   :  { %s848_s3 = sshll.u32 %s13325_s25, 4  ;;  %s13326_s17 = smov [#allocation80]   ;;  %s849_s3 = int_to_ptr.vmem [resolvable:$true] %s848_s3 }
 0x251   :  { %s872_s19 = sshll.u32 %s13326_s17, 4  ;;  %s11549_s10 = scalar_lea.vmem %s849_s3, 256  ;;  %s873_s19 = int_to_ptr.vmem [resolvable:$true] %s872_s19 }
 0x252   :  { %p11550_p9 = scmp.ne.s32.totalorder %s849_s3, %s11549_s10  ;;  %p11554_p10 = scmp.lt.s32.totalorder %s849_s3, %s849_s3 }
 0x253   :  { %p11555_p11 = scmp.lt.s32.totalorder %s11549_s10, %s11549_s10 }
 0x255   :  { %830 = dma.hbm_to_vmem [thread:$0]  %s15474_s7, 2048, %s825_s2, [#allocation75], %s13295_s11, %s13295_s11, %s13296_s15  }
 0x256   :  { %p11556_p12 = por %p11555_p11, %p11554_p10 }
 0x258   :  { %p11557_p13 = pnand %p11556_p12, %p11550_p9 }
 0x25a   :  { %11560 = shalt.err (!%p11557_p13)
}
 0x25b   :  { %s15475_s16 = sld [smem:[#allocation245_spill]]  ;;  %s11569_s5 = scalar_lea.vmem %s873_s19, 256 }
 0x25c   :  { %p11570_p0 = scmp.ne.s32.totalorder %s873_s19, %s11569_s5  ;;  %p11574_p1 = scmp.lt.s32.totalorder %s873_s19, %s873_s19 }
 0x25d   :  { %p11575_p2 = scmp.lt.s32.totalorder %s11569_s5, %s11569_s5 }
 0x25f   :  { %p11576_p3 = por %p11575_p2, %p11574_p1 }
 0x261   :  { %854 = dma.hbm_to_vmem [thread:$0]  %s15475_s16, 256, %s849_s3, [#allocation78], %s13295_s11, %s13295_s11, %s13296_s15  }
 0x262   :  { %p11577_p4 = pnand %p11576_p3, %p11570_p0 }
 0x264   :  { %11580 = shalt.err (!%p11577_p4)
}
 0x265   :  { %s15476_s14 = sld [smem:[#allocation247_spill]]  ;;  %s13327_s24 = smov [#allocation83]  }
 0x266   :  { %s896_s18 = sshll.u32 %s13327_s24, 4  ;;  %s13328_s22 = smov [#allocation86]   ;;  %s897_s18 = int_to_ptr.vmem [resolvable:$true] %s896_s18 }
 0x267   :  { %s920_s23 = sshll.u32 %s13328_s22, 4  ;;  %s11589_s26 = scalar_lea.vmem %s897_s18, 256  ;;  %s921_s23 = int_to_ptr.vmem [resolvable:$true] %s920_s23 }
 0x268   :  { %p11590_p5 = scmp.ne.s32.totalorder %s897_s18, %s11589_s26  ;;  %p11594_p6 = scmp.lt.s32.totalorder %s897_s18, %s897_s18 }
 0x269   :  { %p11595_p7 = scmp.lt.s32.totalorder %s11589_s26, %s11589_s26 }
 0x26b   :  { %878 = dma.hbm_to_vmem [thread:$0]  %s15476_s14, 256, %s873_s19, [#allocation81], %s13295_s11, %s13295_s11, %s13296_s15  }
 0x26c   :  { %p11596_p8 = por %p11595_p7, %p11594_p6 }
 0x26e   :  { %p11597_p9 = pnand %p11596_p8, %p11590_p5 }
 0x270   :  { %11600 = shalt.err (!%p11597_p9)
}
 0x271   :  { %s15477_s6 = sld [smem:[#allocation249_spill]]  ;;  %s11609_s20 = scalar_lea.vmem %s921_s23, 256 }
 0x272   :  { %p11610_p10 = scmp.ne.s32.totalorder %s921_s23, %s11609_s20  ;;  %p11614_p11 = scmp.lt.s32.totalorder %s921_s23, %s921_s23 }
 0x273   :  { %p11615_p12 = scmp.lt.s32.totalorder %s11609_s20, %s11609_s20 }
 0x275   :  { %p11616_p13 = por %p11615_p12, %p11614_p11 }
 0x277   :  { %902 = dma.hbm_to_vmem [thread:$0]  %s15477_s6, 256, %s897_s18, [#allocation84], %s13295_s11, %s13295_s11, %s13296_s15  }
 0x278   :  { %p11617_p0 = pnand %p11616_p13, %p11610_p10 }
 0x27a   :  { %11620 = shalt.err (!%p11617_p0)
}
 0x27b   :  { %s15478_s13 = sld [smem:[#allocation251_spill]]  ;;  %s13329_s21 = smov [#allocation89]  }
 0x27c   :  { %s944_s28 = sshll.u32 %s13329_s21, 4  ;;  %s13330_s2 = smov [#allocation92]   ;;  %s945_s28 = int_to_ptr.vmem [resolvable:$true] %s944_s28 }
 0x27d   :  { %s968_s4 = sshll.u32 %s13330_s2, 4  ;;  %s11629_s30 = scalar_lea.vmem %s945_s28, 256  ;;  %s969_s4 = int_to_ptr.vmem [resolvable:$true] %s968_s4 }
 0x27e   :  { %p11630_p1 = scmp.ne.s32.totalorder %s945_s28, %s11629_s30  ;;  %p11634_p2 = scmp.lt.s32.totalorder %s945_s28, %s945_s28 }
 0x27f   :  { %p11635_p3 = scmp.lt.s32.totalorder %s11629_s30, %s11629_s30 }
 0x281   :  { %926 = dma.hbm_to_vmem [thread:$0]  %s15478_s13, 256, %s921_s23, [#allocation87], %s13295_s11, %s13295_s11, %s13296_s15  }
 0x282   :  { %p11636_p4 = por %p11635_p3, %p11634_p2 }
 0x284   :  { %p11637_p5 = pnand %p11636_p4, %p11630_p1 }
 0x286   :  { %11640 = shalt.err (!%p11637_p5)
}
 0x287   :  { %s15479_s0 = sld [smem:[#allocation253_spill]]  ;;  %s11649_s7 = scalar_lea.vmem %s969_s4, 256 }
 0x288   :  { %p11650_p6 = scmp.ne.s32.totalorder %s969_s4, %s11649_s7  ;;  %p11654_p7 = scmp.lt.s32.totalorder %s969_s4, %s969_s4 }
 0x289   :  { %p11655_p8 = scmp.lt.s32.totalorder %s11649_s7, %s11649_s7 }
 0x28b   :  { %p11656_p9 = por %p11655_p8, %p11654_p7 }
 0x28d   :  { %950 = dma.hbm_to_vmem [thread:$0]  %s15479_s0, 256, %s945_s28, [#allocation90], %s13295_s11, %s13295_s11, %s13296_s15  }
 0x28e   :  { %p11657_p10 = pnand %p11656_p9, %p11650_p6 }
 0x290   :  { %11660 = shalt.err (!%p11657_p10)
}
 0x291   :  { %s15480_s25 = sld [smem:[#allocation255_spill]]  ;;  %s13331_s3 = smov [#allocation95]  }
 0x292   :  { %s992_s17 = sshll.u32 %s13331_s3, 4  ;;  %s13332_s19 = smov [#allocation98]   ;;  %s993_s17 = int_to_ptr.vmem [resolvable:$true] %s992_s17 }
 0x293   :  { %s1017_s10 = sshll.u32 %s13332_s19, 4  ;;  %s11669_s16 = scalar_lea.vmem %s993_s17, 256  ;;  %s1018_s10 = int_to_ptr.vmem [resolvable:$true] %s1017_s10 }
 0x294   :  { %p11670_p11 = scmp.ne.s32.totalorder %s993_s17, %s11669_s16  ;;  %p11674_p12 = scmp.lt.s32.totalorder %s993_s17, %s993_s17 }
 0x295   :  { %p11675_p13 = scmp.lt.s32.totalorder %s11669_s16, %s11669_s16 }
 0x297   :  { %974 = dma.hbm_to_vmem [thread:$0]  %s15480_s25, 256, %s969_s4, [#allocation93], %s13295_s11, %s13295_s11, %s13296_s15  }
 0x298   :  { %p11676_p0 = por %p11675_p13, %p11674_p12 }
 0x29a   :  { %p11677_p1 = pnand %p11676_p0, %p11670_p11 }
 0x29c   :  { %11680 = shalt.err (!%p11677_p1)
}
 0x29d   :  { %s15481_s5 = sld [smem:[#allocation257_spill]]  ;;  %s11689_s14 = scalar_lea.vmem %s1018_s10, 128 }
 0x29e   :  { %p11690_p2 = scmp.ne.s32.totalorder %s1018_s10, %s11689_s14  ;;  %p11694_p3 = scmp.lt.s32.totalorder %s1018_s10, %s1018_s10 }
 0x29f   :  { %p11695_p4 = scmp.lt.s32.totalorder %s11689_s14, %s11689_s14 }
 0x2a1   :  { %p11696_p5 = por %p11695_p4, %p11694_p3 }
 0x2a3   :  { %998 = dma.hbm_to_vmem [thread:$0]  %s15481_s5, 256, %s993_s17, [#allocation96], %s13295_s11, %s13295_s11, %s13296_s15  }
 0x2a4   :  { %p11697_p6 = pnand %p11696_p5, %p11690_p2 }
 0x2a6   :  { %11700 = shalt.err (!%p11697_p6)
}
 0x2a7   :  { %s15482_s24 = sld [smem:[#allocation259_spill]]  ;;  %s13333_s18 = smov [#allocation101]  }
 0x2a8   :  { %s1037_s22 = sshll.u32 %s13333_s18, 4  ;;  %s13334_s23 = smov [#allocation104]   ;;  %s1038_s22 = int_to_ptr.vmem [resolvable:$true] %s1037_s22 }
 0x2a9   :  { %s1057_s26 = sshll.u32 %s13334_s23, 4  ;;  %s11709_s6 = scalar_lea.vmem %s1038_s22, 128  ;;  %s1058_s26 = int_to_ptr.vmem [resolvable:$true] %s1057_s26 }
 0x2aa   :  { %p11710_p7 = scmp.ne.s32.totalorder %s1038_s22, %s11709_s6  ;;  %p11714_p8 = scmp.lt.s32.totalorder %s1038_s22, %s1038_s22 }
 0x2ab   :  { %p11715_p9 = scmp.lt.s32.totalorder %s11709_s6, %s11709_s6 }
 0x2ad   :  { %1020 = dma.hbm_to_vmem [thread:$0]  %s15482_s24, 128, %s1018_s10, [#allocation99]  }
 0x2ae   :  { %p11716_p10 = por %p11715_p9, %p11714_p8 }
 0x2b0   :  { %p11717_p11 = pnand %p11716_p10, %p11710_p7 }
 0x2b2   :  { %11720 = shalt.err (!%p11717_p11)
}
 0x2b3   :  { %s15483_s20 = sld [smem:[#allocation261_spill]]  ;;  %s11729_s13 = scalar_lea.vmem %s1058_s26, 128 }
 0x2b4   :  { %p11730_p12 = scmp.ne.s32.totalorder %s1058_s26, %s11729_s13  ;;  %p11734_p13 = scmp.lt.s32.totalorder %s1058_s26, %s1058_s26 }
 0x2b5   :  { %p11735_p0 = scmp.lt.s32.totalorder %s11729_s13, %s11729_s13 }
 0x2b7   :  { %p11736_p1 = por %p11735_p0, %p11734_p13 }
 0x2b9   :  { %1040 = dma.hbm_to_vmem [thread:$0]  %s15483_s20, 128, %s1038_s22, [#allocation102]  }
 0x2ba   :  { %p11737_p2 = pnand %p11736_p1, %p11730_p12 }
 0x2bc   :  { %11740 = shalt.err (!%p11737_p2)
}
 0x2bd   :  { %s15484_s21 = sld [smem:[#allocation263_spill]]  ;;  %s13335_s28 = smov [#allocation107]  }
 0x2be   :  { %s1077_s2 = sshll.u32 %s13335_s28, 4  ;;  %s13336_s4 = smov [#allocation110]   ;;  %s1078_s2 = int_to_ptr.vmem [resolvable:$true] %s1077_s2 }
 0x2bf   :  { %s1097_s30 = sshll.u32 %s13336_s4, 4  ;;  %s11749_s0 = scalar_lea.vmem %s1078_s2, 64  ;;  %s1098_s30 = int_to_ptr.vmem [resolvable:$true] %s1097_s30 }
 0x2c0   :  { %p11750_p3 = scmp.ne.s32.totalorder %s1078_s2, %s11749_s0  ;;  %p11754_p4 = scmp.lt.s32.totalorder %s1078_s2, %s1078_s2 }
 0x2c1   :  { %p11755_p5 = scmp.lt.s32.totalorder %s11749_s0, %s11749_s0 }
 0x2c3   :  { %1060 = dma.hbm_to_vmem [thread:$0]  %s15484_s21, 128, %s1058_s26, [#allocation105]  }
 0x2c4   :  { %p11756_p6 = por %p11755_p5, %p11754_p4 }
 0x2c6   :  { %p11757_p7 = pnand %p11756_p6, %p11750_p3 }
 0x2c8   :  { %11760 = shalt.err (!%p11757_p7)
}
 0x2c9   :  { %s15485_s7 = sld [smem:[#allocation265_spill]]  ;;  %s11769_s25 = scalar_lea.vmem %s1098_s30, 64 }
 0x2ca   :  { %p11770_p8 = scmp.ne.s32.totalorder %s1098_s30, %s11769_s25  ;;  %p11774_p9 = scmp.lt.s32.totalorder %s1098_s30, %s1098_s30 }
 0x2cb   :  { %p11775_p10 = scmp.lt.s32.totalorder %s11769_s25, %s11769_s25 }
 0x2cd   :  { %p11776_p11 = por %p11775_p10, %p11774_p9 }
 0x2cf   :  { %1080 = dma.hbm_to_vmem [thread:$0]  %s15485_s7, 64, %s1078_s2, [#allocation108]  }
 0x2d0   :  { %p11777_p12 = pnand %p11776_p11, %p11770_p8 }
 0x2d2   :  { %11780 = shalt.err (!%p11777_p12)
}
 0x2d3   :  { %s15486_s3 = sld [smem:[#allocation267_spill]]  ;;  %s13337_s17 = smov [#allocation113]  }
 0x2d4   :  { %s1119_s19 = sshll.u32 %s13337_s17, 4  ;;  %s13338_s10 = smov [#allocation116]   ;;  %s1120_s19 = int_to_ptr.vmem [resolvable:$true] %s1119_s19 }
 0x2d5   :  { %s1138_s16 = sshll.u32 %s13338_s10, 4  ;;  %s11789_s5 = scalar_lea.vmem %s1120_s19, 64  ;;  %s1139_s16 = int_to_ptr.vmem [resolvable:$true] %s1138_s16 }
 0x2d6   :  { %p11790_p13 = scmp.ne.s32.totalorder %s1120_s19, %s11789_s5  ;;  %p11794_p0 = scmp.lt.s32.totalorder %s1120_s19, %s1120_s19 }
 0x2d7   :  { %p11795_p1 = scmp.lt.s32.totalorder %s11789_s5, %s11789_s5 }
 0x2d9   :  { %1100 = dma.hbm_to_vmem [thread:$0]  %s15486_s3, 64, %s1098_s30, [#allocation111]  }
 0x2da   :  { %p11796_p2 = por %p11795_p1, %p11794_p0 }
 0x2dc   :  { %p11797_p3 = pnand %p11796_p2, %p11790_p13 }
 0x2de   :  { %11800 = shalt.err (!%p11797_p3)
}
 0x2df   :  { %s15487_s14 = sld [smem:[#allocation269_spill]]  ;;  %s11809_s24 = scalar_lea.vmem %s1139_s16, 256 }
 0x2e0   :  { %p11810_p4 = scmp.ne.s32.totalorder %s1139_s16, %s11809_s24  ;;  %p11814_p5 = scmp.lt.s32.totalorder %s1139_s16, %s1139_s16 }
 0x2e1   :  { %p11815_p6 = scmp.lt.s32.totalorder %s11809_s24, %s11809_s24 }
 0x2e3   :  { %p11816_p7 = por %p11815_p6, %p11814_p5 }
 0x2e5   :  { %1122 = dma.hbm_to_vmem [thread:$0]  %s15487_s14, 64, %s1120_s19, [#allocation114]  }
 0x2e6   :  { %p11817_p8 = pnand %p11816_p7, %p11810_p4 }
 0x2e8   :  { %11820 = shalt.err (!%p11817_p8)
}
 0x2e9   :  { %s15488_s18 = sld [smem:[#allocation271_spill]]  ;;  %s13339_s22 = smov [#allocation119]  }
 0x2ea   :  { %s1163_s23 = sshll.u32 %s13339_s22, 4  ;;  %s13340_s26 = smov [#allocation122]   ;;  %s1164_s23 = int_to_ptr.vmem [resolvable:$true] %s1163_s23 }
 0x2eb   :  { %s1183_s6 = sshll.u32 %s13340_s26, 4  ;;  %s11829_s20 = scalar_lea.vmem %s1164_s23, 128  ;;  %s1184_s6 = int_to_ptr.vmem [resolvable:$true] %s1183_s6 }
 0x2ec   :  { %p11830_p9 = scmp.ne.s32.totalorder %s1164_s23, %s11829_s20  ;;  %p11834_p10 = scmp.lt.s32.totalorder %s1164_s23, %s1164_s23 }
 0x2ed   :  { %p11835_p11 = scmp.lt.s32.totalorder %s11829_s20, %s11829_s20 }
 0x2ef   :  { %1144 = dma.hbm_to_vmem [thread:$0]  %s15488_s18, 256, %s1139_s16, [#allocation117], %s13295_s11, %s13295_s11, %s13296_s15  }
 0x2f0   :  { %p11836_p12 = por %p11835_p11, %p11834_p10 }
 0x2f2   :  { %p11837_p13 = pnand %p11836_p12, %p11830_p9 }
 0x2f4   :  { %11840 = shalt.err (!%p11837_p13)
}
 0x2f5   :  { %s15489_s13 = sld [smem:[#allocation274_spill]]  ;;  %s11849_s21 = scalar_lea.vmem %s1184_s6, 128 }
 0x2f6   :  { %p11850_p0 = scmp.ne.s32.totalorder %s1184_s6, %s11849_s21  ;;  %p11854_p1 = scmp.lt.s32.totalorder %s1184_s6, %s1184_s6 }
 0x2f7   :  { %p11855_p2 = scmp.lt.s32.totalorder %s11849_s21, %s11849_s21 }
 0x2f9   :  { %p11856_p3 = por %p11855_p2, %p11854_p1 }
 0x2fb   :  { %1166 = dma.hbm_to_vmem [thread:$0]  %s15489_s13, 128, %s1164_s23, [#allocation120]  }
 0x2fc   :  { %p11857_p4 = pnand %p11856_p3, %p11850_p0 }
 0x2fe   :  { %11860 = shalt.err (!%p11857_p4)
}
 0x2ff   :  { %s15490_s28 = sld [smem:[#allocation276_spill]]  ;;  %s13341_s2 = smov [#allocation125]  }
 0x300   :  { %s1203_s4 = sshll.u32 %s13341_s2, 4  ;;  %s13342_s30 = smov [#allocation128]   ;;  %s1204_s4 = int_to_ptr.vmem [resolvable:$true] %s1203_s4 }
 0x301   :  { %s1223_s0 = sshll.u32 %s13342_s30, 4  ;;  %s11869_s7 = scalar_lea.vmem %s1204_s4, 128  ;;  %s1224_s0 = int_to_ptr.vmem [resolvable:$true] %s1223_s0 }
 0x302   :  { %p11870_p5 = scmp.ne.s32.totalorder %s1204_s4, %s11869_s7  ;;  %p11874_p6 = scmp.lt.s32.totalorder %s1204_s4, %s1204_s4 }
 0x303   :  { %p11875_p7 = scmp.lt.s32.totalorder %s11869_s7, %s11869_s7 }
 0x305   :  { %1186 = dma.hbm_to_vmem [thread:$0]  %s15490_s28, 128, %s1184_s6, [#allocation123]  }
 0x306   :  { %p11876_p8 = por %p11875_p7, %p11874_p6 }
 0x308   :  { %p11877_p9 = pnand %p11876_p8, %p11870_p5 }
 0x30a   :  { %11880 = shalt.err (!%p11877_p9)
}
 0x30b   :  { %s15491_s25 = sld [smem:[#allocation278_spill]]  ;;  %s11889_s3 = scalar_lea.vmem %s1224_s0, 64 }
 0x30c   :  { %p11890_p10 = scmp.ne.s32.totalorder %s1224_s0, %s11889_s3  ;;  %p11894_p11 = scmp.lt.s32.totalorder %s1224_s0, %s1224_s0 }
 0x30d   :  { %p11895_p12 = scmp.lt.s32.totalorder %s11889_s3, %s11889_s3 }
 0x30f   :  { %p11896_p13 = por %p11895_p12, %p11894_p11 }
 0x311   :  { %1206 = dma.hbm_to_vmem [thread:$0]  %s15491_s25, 128, %s1204_s4, [#allocation126]  }
 0x312   :  { %p11897_p0 = pnand %p11896_p13, %p11890_p10 }
 0x314   :  { %11900 = shalt.err (!%p11897_p0)
}
 0x315   :  { %s15492_s17 = sld [smem:[#allocation280_spill]]  ;;  %s13343_s19 = smov [#allocation131]  }
 0x316   :  { %s1242_s10 = sshll.u32 %s13343_s19, 4  ;;  %s13344_s16 = smov [#allocation134]   ;;  %s1243_s10 = int_to_ptr.vmem [resolvable:$true] %s1242_s10 }
 0x317   :  { %s1265_s5 = sshll.u32 %s13344_s16, 4  ;;  %s11909_s14 = scalar_lea.vmem %s1243_s10, 128  ;;  %s1266_s5 = int_to_ptr.vmem [resolvable:$true] %s1265_s5 }
 0x318   :  { %p11910_p1 = scmp.ne.s32.totalorder %s1243_s10, %s11909_s14  ;;  %p11914_p2 = scmp.lt.s32.totalorder %s1243_s10, %s1243_s10 }
 0x319   :  { %p11915_p3 = scmp.lt.s32.totalorder %s11909_s14, %s11909_s14 }
 0x31b   :  { %1226 = dma.hbm_to_vmem [thread:$0]  %s15492_s17, 64, %s1224_s0, [#allocation129]  }
 0x31c   :  { %p11916_p4 = por %p11915_p3, %p11914_p2 }
 0x31e   :  { %p11917_p5 = pnand %p11916_p4, %p11910_p1 }
 0x320   :  { %11920 = shalt.err (!%p11917_p5)
}
 0x321   :  { %s15493_s24 = sld [smem:[#allocation282_spill]]  ;;  %s11929_s18 = scalar_lea.vmem %s1266_s5, 64 }
 0x322   :  { %p11930_p6 = scmp.ne.s32.totalorder %s1266_s5, %s11929_s18  ;;  %p11934_p7 = scmp.lt.s32.totalorder %s1266_s5, %s1266_s5 }
 0x323   :  { %p11935_p8 = scmp.lt.s32.totalorder %s11929_s18, %s11929_s18 }
 0x325   :  { %p11936_p9 = por %p11935_p8, %p11934_p7 }
 0x327   :  { %1248 = dma.hbm_to_vmem [thread:$0]  %s15493_s24, 128, %s1243_s10, [#allocation132], %s13299_s9, %s13299_s9, %s13300_s1  }
 0x328   :  { %p11937_p10 = pnand %p11936_p9, %p11930_p6 }
 0x32a   :  { %11940 = shalt.err (!%p11937_p10)
}
 0x32b   :  { %s15494_s22 = sld [smem:[#allocation284_spill]]  ;;  %s13345_s23 = smov [#allocation137]  }
 0x32c   :  { %s1284_s26 = sshll.u32 %s13345_s23, 4  ;;  %s13346_s6 = smov [#allocation140]   ;;  %s1285_s26 = int_to_ptr.vmem [resolvable:$true] %s1284_s26 }
 0x32d   :  { %s1306_s20 = sshll.u32 %s13346_s6, 4  ;;  %s11949_s13 = scalar_lea.vmem %s1285_s26, 64  ;;  %s1307_s20 = int_to_ptr.vmem [resolvable:$true] %s1306_s20 }
 0x32e   :  { %p11950_p11 = scmp.ne.s32.totalorder %s1285_s26, %s11949_s13  ;;  %p11954_p12 = scmp.lt.s32.totalorder %s1285_s26, %s1285_s26 }
 0x32f   :  { %p11955_p13 = scmp.lt.s32.totalorder %s11949_s13, %s11949_s13 }
 0x331   :  { %1268 = dma.hbm_to_vmem [thread:$0]  %s15494_s22, 64, %s1266_s5, [#allocation135]  }
 0x332   :  { %p11956_p0 = por %p11955_p13, %p11954_p12 }
 0x334   :  { %p11957_p1 = pnand %p11956_p0, %p11950_p11 }
 0x336   :  { %11960 = shalt.err (!%p11957_p1)
}
 0x337   :  { %s13347_s21 = smov 32   ;;  %s15495_s28 = sld [smem:[#allocation286_spill]] }
 0x338   :  { %s13348_s2 = smov 2   ;;  %s11969_s4 = scalar_lea.vmem %s1307_s20, 64 }
 0x339   :  { %p11970_p2 = scmp.ne.s32.totalorder %s1307_s20, %s11969_s4  ;;  %p11974_p3 = scmp.lt.s32.totalorder %s1307_s20, %s1307_s20 }
 0x33a   :  { %p11975_p4 = scmp.lt.s32.totalorder %s11969_s4, %s11969_s4 }
 0x33c   :  { %p11976_p5 = por %p11975_p4, %p11974_p3 }
 0x33d   :  { %1290 = dma.hbm_to_vmem [thread:$0]  %s15495_s28, 64, %s1285_s26, [#allocation138], %s13347_s21, %s13347_s21, %s13348_s2  }
 0x33e   :  { %p11977_p6 = pnand %p11976_p5, %p11970_p2 }
 0x340   :  { %11980 = shalt.err (!%p11977_p6)
}
 0x341   :  { %s15496_s30 = sld [smem:[#allocation288_spill]]  ;;  %s13349_s0 = smov [#allocation143]  }
 0x342   :  { %s1329_s7 = sshll.u32 %s13349_s0, 4  ;;  %s13350_s25 = smov [#allocation146]   ;;  %s1330_s7 = int_to_ptr.vmem [resolvable:$true] %s1329_s7 }
 0x343   :  { %s1359_s3 = sshll.u32 %s13350_s25, 4  ;;  %s11989_s17 = scalar_lea.vmem %s1330_s7, 32  ;;  %s1360_s3 = int_to_ptr.vmem [resolvable:$true] %s1359_s3 }
 0x344   :  { %p11990_p7 = scmp.ne.s32.totalorder %s1330_s7, %s11989_s17  ;;  %p11994_p8 = scmp.lt.s32.totalorder %s1330_s7, %s1330_s7 }
 0x345   :  { %p11995_p9 = scmp.lt.s32.totalorder %s11989_s17, %s11989_s17 }
 0x347   :  { %1312 = dma.hbm_to_vmem [thread:$0]  %s15496_s30, 64, %s1307_s20, [#allocation141], %s13347_s21, %s13347_s21, %s13348_s2  }
 0x348   :  { %p11996_p10 = por %p11995_p9, %p11994_p8 }
 0x34a   :  { %p11997_p11 = pnand %p11996_p10, %p11990_p7 }
 0x34c   :  { %12000 = shalt.err (!%p11997_p11)
}
 0x34d   :  { %s15497_s19 = sld [smem:[#allocation290_spill]]  ;;  %s12009_s10 = scalar_lea.vmem %s1360_s3, 128 }
 0x34e   :  { %p12010_p12 = scmp.ne.s32.totalorder %s1360_s3, %s12009_s10  ;;  %p12014_p13 = scmp.lt.s32.totalorder %s1360_s3, %s1360_s3 }
 0x34f   :  { %p12015_p0 = scmp.lt.s32.totalorder %s12009_s10, %s12009_s10 }
 0x351   :  { %p12016_p1 = por %p12015_p0, %p12014_p13 }
 0x353   :  { %1332 = dma.hbm_to_vmem [thread:$0]  %s15497_s19, 32, %s1330_s7, [#allocation144]  }
 0x354   :  { %p12017_p2 = pnand %p12016_p1, %p12010_p12 }
 0x356   :  { %12020 = shalt.err (!%p12017_p2)
}
 0x357   :  { %s15498_s16 = sld [smem:[#allocation296_spill]]  ;;  %s13351_s5 = smov [#allocation149]  }
 0x358   :  { %s1383_s14 = sshll.u32 %s13351_s5, 4  ;;  %s13352_s24 = smov [#allocation13]   ;;  %s1384_s14 = int_to_ptr.vmem [resolvable:$true] %s1383_s14 }
 0x359   :  { %s384_s18 = sshll.u32 %s13352_s24, 4  ;;  %s12029_s22 = scalar_lea.vmem %s1384_s14, 128  ;;  %s385_s18 = int_to_ptr.vmem [resolvable:$true] %s384_s18 }
 0x35a   :  { %p12030_p3 = scmp.ne.s32.totalorder %s1384_s14, %s12029_s22  ;;  %p12034_p4 = scmp.lt.s32.totalorder %s1384_s14, %s1384_s14 }
 0x35b   :  { %p12035_p5 = scmp.lt.s32.totalorder %s12029_s22, %s12029_s22 }
 0x35d   :  { %1362 = dma.hbm_to_vmem [thread:$0]  %s15498_s16, 128, %s1360_s3, [#allocation147]  }
 0x35e   :  { %p12036_p6 = por %p12035_p5, %p12034_p4 }
 0x360   :  { %p12037_p7 = pnand %p12036_p6, %p12030_p3 }
 0x362   :  { %12040 = shalt.err (!%p12037_p7)
}
 0x363   :  { %s15499_s23 = sld [smem:[#allocation300_spill]]  ;;  %s12049_s26 = scalar_lea.vmem %s385_s18, 256 }
 0x364   :  { %p12050_p8 = scmp.ne.s32.totalorder %s385_s18, %s12049_s26  ;;  %p12054_p9 = scmp.lt.s32.totalorder %s385_s18, %s385_s18 }
 0x365   :  { %p12055_p10 = scmp.lt.s32.totalorder %s12049_s26, %s12049_s26 }
 0x367   :  { %p12056_p11 = por %p12055_p10, %p12054_p9 }
 0x369   :  { %1386 = dma.hbm_to_vmem [thread:$0]  %s15499_s23, 128, %s1384_s14, [#allocation150]  }
 0x36a   :  { %p12057_p12 = pnand %p12056_p11, %p12050_p8 }
 0x36c   :  { %12060 = shalt.err (!%p12057_p12)
}
 0x36d   :  { %s15500_s6 = sld [smem:[#allocation210_spill]]  ;;  %s13353_s20 = smov [#allocation16]  }
 0x36e   :  { %s408_s13 = sshll.u32 %s13353_s20, 4  ;;  %s13354_s28 = smov [#allocation19]   ;;  %s409_s13 = int_to_ptr.vmem [resolvable:$true] %s408_s13 }
 0x36f   :  { %s432_s4 = sshll.u32 %s13354_s28, 4  ;;  %s12069_s30 = scalar_lea.vmem %s409_s13, 256  ;;  %s433_s4 = int_to_ptr.vmem [resolvable:$true] %s432_s4 }
 0x370   :  { %p12070_p13 = scmp.ne.s32.totalorder %s409_s13, %s12069_s30  ;;  %p12074_p0 = scmp.lt.s32.totalorder %s409_s13, %s409_s13 }
 0x371   :  { %p12075_p1 = scmp.lt.s32.totalorder %s12069_s30, %s12069_s30 }
 0x373   :  { %390 = dma.hbm_to_vmem [thread:$0]  %s15500_s6, 256, %s385_s18, [#allocation12], %s13295_s11, %s13295_s11, %s13296_s15  }
 0x374   :  { %p12076_p2 = por %p12075_p1, %p12074_p0 }
 0x376   :  { %p12077_p3 = pnand %p12076_p2, %p12070_p13 }
 0x378   :  { %12080 = shalt.err (!%p12077_p3)
}
 0x379   :  { %s15501_s0 = sld [smem:[#allocation211_spill]]  ;;  %s12089_s7 = scalar_lea.vmem %s433_s4, 256 }
 0x37a   :  { %p12090_p4 = scmp.ne.s32.totalorder %s433_s4, %s12089_s7  ;;  %p12094_p5 = scmp.lt.s32.totalorder %s433_s4, %s433_s4 }
 0x37b   :  { %p12095_p6 = scmp.lt.s32.totalorder %s12089_s7, %s12089_s7 }
 0x37d   :  { %p12096_p7 = por %p12095_p6, %p12094_p5 }
 0x37f   :  { %414 = dma.hbm_to_vmem [thread:$0]  %s15501_s0, 256, %s409_s13, [#allocation15], %s13295_s11, %s13295_s11, %s13296_s15  }
 0x380   :  { %p12097_p8 = pnand %p12096_p7, %p12090_p4 }
 0x382   :  { %12100 = shalt.err (!%p12097_p8)
}
 0x383   :  { %s15502_s25 = sld [smem:[#allocation212_spill]]  ;;  %s13355_s3 = smov [#allocation22]  }
 0x384   :  { %s456_s17 = sshll.u32 %s13355_s3, 4  ;;  %s13356_s19 = smov [#allocation25]   ;;  %s457_s17 = int_to_ptr.vmem [resolvable:$true] %s456_s17 }
 0x385   :  { %s480_s10 = sshll.u32 %s13356_s19, 4  ;;  %s12109_s16 = scalar_lea.vmem %s457_s17, 256  ;;  %s481_s10 = int_to_ptr.vmem [resolvable:$true] %s480_s10 }
 0x386   :  { %p12110_p9 = scmp.ne.s32.totalorder %s457_s17, %s12109_s16  ;;  %p12114_p10 = scmp.lt.s32.totalorder %s457_s17, %s457_s17 }
 0x387   :  { %p12115_p11 = scmp.lt.s32.totalorder %s12109_s16, %s12109_s16 }
 0x389   :  { %438 = dma.hbm_to_vmem [thread:$0]  %s15502_s25, 256, %s433_s4, [#allocation18], %s13295_s11, %s13295_s11, %s13296_s15  }
 0x38a   :  { %p12116_p12 = por %p12115_p11, %p12114_p10 }
 0x38c   :  { %p12117_p13 = pnand %p12116_p12, %p12110_p9 }
 0x38e   :  { %12120 = shalt.err (!%p12117_p13)
}
 0x38f   :  { %s15503_s5 = sld [smem:[#allocation213_spill]]  ;;  %s12129_s14 = scalar_lea.vmem %s481_s10, 256 }
 0x390   :  { %p12130_p0 = scmp.ne.s32.totalorder %s481_s10, %s12129_s14  ;;  %p12134_p1 = scmp.lt.s32.totalorder %s481_s10, %s481_s10 }
 0x391   :  { %p12135_p2 = scmp.lt.s32.totalorder %s12129_s14, %s12129_s14 }
 0x393   :  { %p12136_p3 = por %p12135_p2, %p12134_p1 }
 0x395   :  { %462 = dma.hbm_to_vmem [thread:$0]  %s15503_s5, 256, %s457_s17, [#allocation21], %s13295_s11, %s13295_s11, %s13296_s15  }
 0x396   :  { %p12137_p4 = pnand %p12136_p3, %p12130_p0 }
 0x398   :  { %12140 = shalt.err (!%p12137_p4)
}
 0x399   :  { %s15504_s24 = sld [smem:[#allocation214_spill]]  ;;  %s13357_s18 = smov [#allocation28]  }
 0x39a   :  { %s503_s22 = sshll.u32 %s13357_s18, 4  ;;  %s13358_s23 = smov [#allocation31]   ;;  %s504_s22 = int_to_ptr.vmem [resolvable:$true] %s503_s22 }
 0x39b   :  { %s523_s26 = sshll.u32 %s13358_s23, 4  ;;  %s12149_s6 = scalar_lea.vmem %s504_s22, 128  ;;  %s524_s26 = int_to_ptr.vmem [resolvable:$true] %s523_s26 }
 0x39c   :  { %p12150_p5 = scmp.ne.s32.totalorder %s504_s22, %s12149_s6  ;;  %p12154_p6 = scmp.lt.s32.totalorder %s504_s22, %s504_s22 }
 0x39d   :  { %p12155_p7 = scmp.lt.s32.totalorder %s12149_s6, %s12149_s6 }
 0x39f   :  { %486 = dma.hbm_to_vmem [thread:$0]  %s15504_s24, 256, %s481_s10, [#allocation24], %s13295_s11, %s13295_s11, %s13296_s15  }
 0x3a0   :  { %p12156_p8 = por %p12155_p7, %p12154_p6 }
 0x3a2   :  { %p12157_p9 = pnand %p12156_p8, %p12150_p5 }
 0x3a4   :  { %12160 = shalt.err (!%p12157_p9)
}
 0x3a5   :  { %s15505_s20 = sld [smem:[#allocation215_spill]]  ;;  %s12169_s13 = scalar_lea.vmem %s524_s26, 128 }
 0x3a6   :  { %p12170_p10 = scmp.ne.s32.totalorder %s524_s26, %s12169_s13  ;;  %p12174_p11 = scmp.lt.s32.totalorder %s524_s26, %s524_s26 }
 0x3a7   :  { %p12175_p12 = scmp.lt.s32.totalorder %s12169_s13, %s12169_s13 }
 0x3a9   :  { %p12176_p13 = por %p12175_p12, %p12174_p11 }
 0x3ab   :  { %506 = dma.hbm_to_vmem [thread:$0]  %s15505_s20, 128, %s504_s22, [#allocation27]  }
 0x3ac   :  { %p12177_p0 = pnand %p12176_p13, %p12170_p10 }
 0x3ae   :  { %12180 = shalt.err (!%p12177_p0)
}
 0x3af   :  { %s15506_s28 = sld [smem:[#allocation216_spill]]  ;;  %s13359_s4 = smov [#allocation34]  }
 0x3b0   :  { %s543_s30 = sshll.u32 %s13359_s4, 4  ;;  %s13360_s0 = smov [#allocation37]   ;;  %s544_s30 = int_to_ptr.vmem [resolvable:$true] %s543_s30 }
 0x3b1   :  { %s563_s7 = sshll.u32 %s13360_s0, 4  ;;  %s12189_s25 = scalar_lea.vmem %s544_s30, 128  ;;  %s564_s7 = int_to_ptr.vmem [resolvable:$true] %s563_s7 }
 0x3b2   :  { %p12190_p1 = scmp.ne.s32.totalorder %s544_s30, %s12189_s25  ;;  %p12194_p2 = scmp.lt.s32.totalorder %s544_s30, %s544_s30 }
 0x3b3   :  { %p12195_p3 = scmp.lt.s32.totalorder %s12189_s25, %s12189_s25 }
 0x3b5   :  { %526 = dma.hbm_to_vmem [thread:$0]  %s15506_s28, 128, %s524_s26, [#allocation30]  }
 0x3b6   :  { %p12196_p4 = por %p12195_p3, %p12194_p2 }
 0x3b8   :  { %p12197_p5 = pnand %p12196_p4, %p12190_p1 }
 0x3ba   :  { %12200 = shalt.err (!%p12197_p5)
}
 0x3bb   :  { %s15507_s3 = sld [smem:[#allocation217_spill]]  ;;  %s12209_s17 = scalar_lea.vmem %s564_s7, 64 }
 0x3bc   :  { %p12210_p6 = scmp.ne.s32.totalorder %s564_s7, %s12209_s17  ;;  %p12214_p7 = scmp.lt.s32.totalorder %s564_s7, %s564_s7 }
 0x3bd   :  { %p12215_p8 = scmp.lt.s32.totalorder %s12209_s17, %s12209_s17 }
 0x3bf   :  { %p12216_p9 = por %p12215_p8, %p12214_p7 }
 0x3c1   :  { %546 = dma.hbm_to_vmem [thread:$0]  %s15507_s3, 128, %s544_s30, [#allocation33]  }
 0x3c2   :  { %p12217_p10 = pnand %p12216_p9, %p12210_p6 }
 0x3c4   :  { %12220 = shalt.err (!%p12217_p10)
}
 0x3c5   :  { %s15508_s19 = sld [smem:[#allocation218_spill]]  ;;  %s13361_s10 = smov [#allocation40]  }
 0x3c6   :  { %s582_s16 = sshll.u32 %s13361_s10, 4  ;;  %s13362_s5 = smov [#allocation43]   ;;  %s583_s16 = int_to_ptr.vmem [resolvable:$true] %s582_s16 }
 0x3c7   :  { %s605_s14 = sshll.u32 %s13362_s5, 4  ;;  %s12229_s24 = scalar_lea.vmem %s583_s16, 128  ;;  %s606_s14 = int_to_ptr.vmem [resolvable:$true] %s605_s14 }
 0x3c8   :  { %p12230_p11 = scmp.ne.s32.totalorder %s583_s16, %s12229_s24  ;;  %p12234_p12 = scmp.lt.s32.totalorder %s583_s16, %s583_s16 }
 0x3c9   :  { %p12235_p13 = scmp.lt.s32.totalorder %s12229_s24, %s12229_s24 }
 0x3cb   :  { %566 = dma.hbm_to_vmem [thread:$0]  %s15508_s19, 64, %s564_s7, [#allocation36]  }
 0x3cc   :  { %p12236_p0 = por %p12235_p13, %p12234_p12 }
 0x3ce   :  { %p12237_p1 = pnand %p12236_p0, %p12230_p11 }
 0x3d0   :  { %12240 = shalt.err (!%p12237_p1)
}
 0x3d1   :  { %s15509_s18 = sld [smem:[#allocation220_spill]]  ;;  %s12249_s22 = scalar_lea.vmem %s606_s14, 64 }
 0x3d2   :  { %p12250_p2 = scmp.ne.s32.totalorder %s606_s14, %s12249_s22  ;;  %p12254_p3 = scmp.lt.s32.totalorder %s606_s14, %s606_s14 }
 0x3d3   :  { %p12255_p4 = scmp.lt.s32.totalorder %s12249_s22, %s12249_s22 }
 0x3d5   :  { %p12256_p5 = por %p12255_p4, %p12254_p3 }
 0x3d7   :  { %588 = dma.hbm_to_vmem [thread:$0]  %s15509_s18, 128, %s583_s16, [#allocation39], %s13299_s9, %s13299_s9, %s13300_s1  }
 0x3d8   :  { %p12257_p6 = pnand %p12256_p5, %p12250_p2 }
 0x3da   :  { %12260 = shalt.err (!%p12257_p6)
}
 0x3db   :  { %s15510_s23 = sld [smem:[#allocation222_spill]]  ;;  %s13363_s26 = smov [#allocation46]  }
 0x3dc   :  { %s626_s6 = sshll.u32 %s13363_s26, 4  ;;  %s13364_s20 = smov [#allocation49]   ;;  %s627_s6 = int_to_ptr.vmem [resolvable:$true] %s626_s6 }
 0x3dd   :  { %s649_s13 = sshll.u32 %s13364_s20, 4  ;;  %s12269_s28 = scalar_lea.vmem %s627_s6, 256  ;;  %s650_s13 = int_to_ptr.vmem [resolvable:$true] %s649_s13 }
 0x3de   :  { %p12270_p7 = scmp.ne.s32.totalorder %s627_s6, %s12269_s28  ;;  %p12274_p8 = scmp.lt.s32.totalorder %s627_s6, %s627_s6 }
 0x3df   :  { %p12275_p9 = scmp.lt.s32.totalorder %s12269_s28, %s12269_s28 }
 0x3e1   :  { %608 = dma.hbm_to_vmem [thread:$0]  %s15510_s23, 64, %s606_s14, [#allocation42]  }
 0x3e2   :  { %p12276_p10 = por %p12275_p9, %p12274_p8 }
 0x3e4   :  { %p12277_p11 = pnand %p12276_p10, %p12270_p7 }
 0x3e6   :  { %12280 = shalt.err (!%p12277_p11)
}
 0x3e7   :  { %s15511_s4 = sld [smem:[#allocation224_spill]]  ;;  %s12289_s30 = scalar_lea.vmem %s650_s13, 128 }
 0x3e8   :  { %p12290_p12 = scmp.ne.s32.totalorder %s650_s13, %s12289_s30  ;;  %p12294_p13 = scmp.lt.s32.totalorder %s650_s13, %s650_s13 }
 0x3e9   :  { %p12295_p0 = scmp.lt.s32.totalorder %s12289_s30, %s12289_s30 }
 0x3eb   :  { %p12296_p1 = por %p12295_p0, %p12294_p13 }
 0x3ed   :  { %632 = dma.hbm_to_vmem [thread:$0]  %s15511_s4, 256, %s627_s6, [#allocation45], %s13295_s11, %s13295_s11, %s13296_s15  }
 0x3ee   :  { %p12297_p2 = pnand %p12296_p1, %p12290_p12 }
 0x3f0   :  { %12300 = shalt.err (!%p12297_p2)
}
 0x3f1   :  { %s15512_s0 = sld [smem:[#allocation226_spill]]  ;;  %s13365_s7 = smov [#allocation52]  }
 0x3f2   :  { %s669_s25 = sshll.u32 %s13365_s7, 4  ;;  %s13366_s3 = smov [#allocation55]   ;;  %s670_s25 = int_to_ptr.vmem [resolvable:$true] %s669_s25 }
 0x3f3   :  { %s689_s17 = sshll.u32 %s13366_s3, 4  ;;  %s12309_s19 = scalar_lea.vmem %s670_s25, 128  ;;  %s690_s17 = int_to_ptr.vmem [resolvable:$true] %s689_s17 }
 0x3f4   :  { %p12310_p3 = scmp.ne.s32.totalorder %s670_s25, %s12309_s19  ;;  %p12314_p4 = scmp.lt.s32.totalorder %s670_s25, %s670_s25 }
 0x3f5   :  { %p12315_p5 = scmp.lt.s32.totalorder %s12309_s19, %s12309_s19 }
 0x3f7   :  { %652 = dma.hbm_to_vmem [thread:$0]  %s15512_s0, 128, %s650_s13, [#allocation48]  }
 0x3f8   :  { %p12316_p6 = por %p12315_p5, %p12314_p4 }
 0x3fa   :  { %p12317_p7 = pnand %p12316_p6, %p12310_p3 }
 0x3fc   :  { %12320 = shalt.err (!%p12317_p7)
}
 0x3fd   :  { %s15513_s10 = sld [smem:[#allocation228_spill]]  ;;  %s12329_s16 = scalar_lea.vmem %s690_s17, 128 }
 0x3fe   :  { %p12330_p8 = scmp.ne.s32.totalorder %s690_s17, %s12329_s16  ;;  %p12334_p9 = scmp.lt.s32.totalorder %s690_s17, %s690_s17 }
 0x3ff   :  { %p12335_p10 = scmp.lt.s32.totalorder %s12329_s16, %s12329_s16 }
 0x401   :  { %p12336_p11 = por %p12335_p10, %p12334_p9 }
 0x403   :  { %672 = dma.hbm_to_vmem [thread:$0]  %s15513_s10, 128, %s670_s25, [#allocation51]  }
 0x404   :  { %p12337_p12 = pnand %p12336_p11, %p12330_p8 }
 0x406   :  { %12340 = shalt.err (!%p12337_p12)
}
 0x407   :  { %s15514_s5 = sld [smem:[#allocation230_spill]]  ;;  %s13367_s14 = smov [#allocation58]  }
 0x408   :  { %s709_s24 = sshll.u32 %s13367_s14, 4  ;;  %s13368_s18 = smov [#allocation61]   ;;  %s710_s24 = int_to_ptr.vmem [resolvable:$true] %s709_s24 }
 0x409   :  { %s728_s22 = sshll.u32 %s13368_s18, 4  ;;  %s12349_s23 = scalar_lea.vmem %s710_s24, 64  ;;  %s729_s22 = int_to_ptr.vmem [resolvable:$true] %s728_s22 }
 0x40a   :  { %p12350_p13 = scmp.ne.s32.totalorder %s710_s24, %s12349_s23  ;;  %p12354_p0 = scmp.lt.s32.totalorder %s710_s24, %s710_s24 }
 0x40b   :  { %p12355_p1 = scmp.lt.s32.totalorder %s12349_s23, %s12349_s23 }
 0x40d   :  { %692 = dma.hbm_to_vmem [thread:$0]  %s15514_s5, 128, %s690_s17, [#allocation54]  }
 0x40e   :  { %p12356_p2 = por %p12355_p1, %p12354_p0 }
 0x410   :  { %p12357_p3 = pnand %p12356_p2, %p12350_p13 }
 0x412   :  { %12360 = shalt.err (!%p12357_p3)
}
 0x413   :  { %s15515_s26 = sld [smem:[#allocation232_spill]]  ;;  %s12369_s6 = scalar_lea.vmem %s729_s22, 128 }
 0x414   :  { %p12370_p4 = scmp.ne.s32.totalorder %s729_s22, %s12369_s6  ;;  %p12374_p5 = scmp.lt.s32.totalorder %s729_s22, %s729_s22 }
 0x415   :  { %p12375_p6 = scmp.lt.s32.totalorder %s12369_s6, %s12369_s6 }
 0x417   :  { %p12376_p7 = por %p12375_p6, %p12374_p5 }
 0x419   :  { %712 = dma.hbm_to_vmem [thread:$0]  %s15515_s26, 64, %s710_s24, [#allocation57]  }
 0x41a   :  { %p12377_p8 = pnand %p12376_p7, %p12370_p4 }
 0x41c   :  { %12380 = shalt.err (!%p12377_p8)
}
 0x41d   :  { %s15516_s20 = sld [smem:[#allocation234_spill]]  ;;  %s13369_s13 = smov [#allocation64]  }
 0x41e   :  { %s751_s28 = sshll.u32 %s13369_s13, 4  ;;  %s13370_s4 = smov [#allocation67]   ;;  %s752_s28 = int_to_ptr.vmem [resolvable:$true] %s751_s28 }
 0x41f   :  { %s770_s30 = sshll.u32 %s13370_s4, 4  ;;  %s12389_s0 = scalar_lea.vmem %s752_s28, 64  ;;  %s771_s30 = int_to_ptr.vmem [resolvable:$true] %s770_s30 }
 0x420   :  { %p12390_p9 = scmp.ne.s32.totalorder %s752_s28, %s12389_s0  ;;  %p12394_p10 = scmp.lt.s32.totalorder %s752_s28, %s752_s28 }
 0x421   :  { %p12395_p11 = scmp.lt.s32.totalorder %s12389_s0, %s12389_s0 }
 0x423   :  { %734 = dma.hbm_to_vmem [thread:$0]  %s15516_s20, 128, %s729_s22, [#allocation60], %s13299_s9, %s13299_s9, %s13300_s1  }
 0x424   :  { %p12396_p12 = por %p12395_p11, %p12394_p10 }
 0x426   :  { %p12397_p13 = pnand %p12396_p12, %p12390_p9 }
 0x428   :  { %12400 = shalt.err (!%p12397_p13)
}
 0x429   :  { %s15517_s7 = sld [smem:[#allocation236_spill]]  ;;  %s12409_s25 = scalar_lea.vmem %s771_s30, 64 }
 0x42a   :  { %p12410_p0 = scmp.ne.s32.totalorder %s771_s30, %s12409_s25  ;;  %p12414_p1 = scmp.lt.s32.totalorder %s771_s30, %s771_s30 }
 0x42b   :  { %p12415_p2 = scmp.lt.s32.totalorder %s12409_s25, %s12409_s25 }
 0x42d   :  { %p12416_p3 = por %p12415_p2, %p12414_p1 }
 0x42f   :  { %754 = dma.hbm_to_vmem [thread:$0]  %s15517_s7, 64, %s752_s28, [#allocation63]  }
 0x430   :  { %p12417_p4 = pnand %p12416_p3, %p12410_p0 }
 0x432   :  { %12420 = shalt.err (!%p12417_p4)
}
 0x433   :  { %s15518_s3 = sld [smem:[#allocation238_spill]]  ;;  %s13371_s17 = smov [#allocation70]  }
 0x434   :  { %s792_s19 = sshll.u32 %s13371_s17, 4  ;;  %s13372_s10 = smov [#allocation73]   ;;  %s793_s19 = int_to_ptr.vmem [resolvable:$true] %s792_s19 }
 0x435   :  { %s815_s16 = sshll.u32 %s13372_s10, 4  ;;  %s12429_s5 = scalar_lea.vmem %s793_s19, 64  ;;  %s816_s16 = int_to_ptr.vmem [resolvable:$true] %s815_s16 }
 0x436   :  { %p12430_p5 = scmp.ne.s32.totalorder %s793_s19, %s12429_s5  ;;  %p12434_p6 = scmp.lt.s32.totalorder %s793_s19, %s793_s19 }
 0x437   :  { %p12435_p7 = scmp.lt.s32.totalorder %s12429_s5, %s12429_s5 }
 0x439   :  { %776 = dma.hbm_to_vmem [thread:$0]  %s15518_s3, 64, %s771_s30, [#allocation66], %s13347_s21, %s13347_s21, %s13348_s2  }
 0x43a   :  { %p12436_p8 = por %p12435_p7, %p12434_p6 }
 0x43c   :  { %p12437_p9 = pnand %p12436_p8, %p12430_p5 }
 0x43e   :  { %12440 = shalt.err (!%p12437_p9)
}
 0x43f   :  { %s15519_s14 = sld [smem:[#allocation240_spill]]  ;;  %s12449_s24 = scalar_lea.vmem %s816_s16, 32 }
 0x440   :  { %p12450_p10 = scmp.ne.s32.totalorder %s816_s16, %s12449_s24  ;;  %p12454_p11 = scmp.lt.s32.totalorder %s816_s16, %s816_s16 }
 0x441   :  { %p12455_p12 = scmp.lt.s32.totalorder %s12449_s24, %s12449_s24 }
 0x443   :  { %p12456_p13 = por %p12455_p12, %p12454_p11 }
 0x445   :  { %798 = dma.hbm_to_vmem [thread:$0]  %s15519_s14, 64, %s793_s19, [#allocation69], %s13347_s21, %s13347_s21, %s13348_s2  }
 0x446   :  { %p12457_p0 = pnand %p12456_p13, %p12450_p10 }
 0x448   :  { %12460 = shalt.err (!%p12457_p0)
}
 0x449   :  { %s15520_s18 = sld [smem:[#allocation242_spill]]  ;;  %s13373_s22 = smov [#allocation76]  }
 0x44a   :  { %s836_s23 = sshll.u32 %s13373_s22, 4  ;;  %s13374_s26 = smov [#allocation79]   ;;  %s837_s23 = int_to_ptr.vmem [resolvable:$true] %s836_s23 }
 0x44b   :  { %s860_s6 = sshll.u32 %s13374_s26, 4  ;;  %s12469_s20 = scalar_lea.vmem %s837_s23, 2048  ;;  %s861_s6 = int_to_ptr.vmem [resolvable:$true] %s860_s6 }
 0x44c   :  { %p12470_p1 = scmp.ne.s32.totalorder %s837_s23, %s12469_s20  ;;  %p12474_p2 = scmp.lt.s32.totalorder %s837_s23, %s837_s23 }
 0x44d   :  { %p12475_p3 = scmp.lt.s32.totalorder %s12469_s20, %s12469_s20 }
 0x44f   :  { %818 = dma.hbm_to_vmem [thread:$0]  %s15520_s18, 32, %s816_s16, [#allocation72]  }
 0x450   :  { %p12476_p4 = por %p12475_p3, %p12474_p2 }
 0x452   :  { %p12477_p5 = pnand %p12476_p4, %p12470_p1 }
 0x454   :  { %12480 = shalt.err (!%p12477_p5)
}
 0x455   :  { %s15521_s21 = sld [smem:[#allocation244_spill]]  ;;  %s12489_s13 = scalar_lea.vmem %s861_s6, 256 }
 0x456   :  { %p12490_p6 = scmp.ne.s32.totalorder %s861_s6, %s12489_s13  ;;  %p12494_p7 = scmp.lt.s32.totalorder %s861_s6, %s861_s6 }
 0x457   :  { %p12495_p8 = scmp.lt.s32.totalorder %s12489_s13, %s12489_s13 }
 0x459   :  { %p12496_p9 = por %p12495_p8, %p12494_p7 }
 0x45b   :  { %842 = dma.hbm_to_vmem [thread:$0]  %s15521_s21, 2048, %s837_s23, [#allocation75], %s13295_s11, %s13295_s11, %s13296_s15  }
 0x45c   :  { %p12497_p10 = pnand %p12496_p9, %p12490_p6 }
 0x45e   :  { %12500 = shalt.err (!%p12497_p10)
}
 0x45f   :  { %s15522_s28 = sld [smem:[#allocation246_spill]]  ;;  %s13375_s4 = smov [#allocation82]  }
 0x460   :  { %s884_s30 = sshll.u32 %s13375_s4, 4  ;;  %s13376_s0 = smov [#allocation85]   ;;  %s885_s30 = int_to_ptr.vmem [resolvable:$true] %s884_s30 }
 0x461   :  { %s908_s7 = sshll.u32 %s13376_s0, 4  ;;  %s12509_s25 = scalar_lea.vmem %s885_s30, 256  ;;  %s909_s7 = int_to_ptr.vmem [resolvable:$true] %s908_s7 }
 0x462   :  { %p12510_p11 = scmp.ne.s32.totalorder %s885_s30, %s12509_s25  ;;  %p12514_p12 = scmp.lt.s32.totalorder %s885_s30, %s885_s30 }
 0x463   :  { %p12515_p13 = scmp.lt.s32.totalorder %s12509_s25, %s12509_s25 }
 0x465   :  { %866 = dma.hbm_to_vmem [thread:$0]  %s15522_s28, 256, %s861_s6, [#allocation78], %s13295_s11, %s13295_s11, %s13296_s15  }
 0x466   :  { %p12516_p0 = por %p12515_p13, %p12514_p12 }
 0x468   :  { %p12517_p1 = pnand %p12516_p0, %p12510_p11 }
 0x46a   :  { %12520 = shalt.err (!%p12517_p1)
}
 0x46b   :  { %s15523_s3 = sld [smem:[#allocation248_spill]]  ;;  %s12529_s17 = scalar_lea.vmem %s909_s7, 256 }
 0x46c   :  { %p12530_p2 = scmp.ne.s32.totalorder %s909_s7, %s12529_s17  ;;  %p12534_p3 = scmp.lt.s32.totalorder %s909_s7, %s909_s7 }
 0x46d   :  { %p12535_p4 = scmp.lt.s32.totalorder %s12529_s17, %s12529_s17 }
 0x46f   :  { %p12536_p5 = por %p12535_p4, %p12534_p3 }
 0x471   :  { %890 = dma.hbm_to_vmem [thread:$0]  %s15523_s3, 256, %s885_s30, [#allocation81], %s13295_s11, %s13295_s11, %s13296_s15  }
 0x472   :  { %p12537_p6 = pnand %p12536_p5, %p12530_p2 }
 0x474   :  { %12540 = shalt.err (!%p12537_p6)
}
 0x475   :  { %s15524_s19 = sld [smem:[#allocation250_spill]]  ;;  %s13377_s10 = smov [#allocation88]  }
 0x476   :  { %s932_s16 = sshll.u32 %s13377_s10, 4  ;;  %s13378_s5 = smov [#allocation91]   ;;  %s933_s16 = int_to_ptr.vmem [resolvable:$true] %s932_s16 }
 0x477   :  { %s956_s14 = sshll.u32 %s13378_s5, 4  ;;  %s12549_s24 = scalar_lea.vmem %s933_s16, 256  ;;  %s957_s14 = int_to_ptr.vmem [resolvable:$true] %s956_s14 }
 0x478   :  { %p12550_p7 = scmp.ne.s32.totalorder %s933_s16, %s12549_s24  ;;  %p12554_p8 = scmp.lt.s32.totalorder %s933_s16, %s933_s16 }
 0x479   :  { %p12555_p9 = scmp.lt.s32.totalorder %s12549_s24, %s12549_s24 }
 0x47b   :  { %914 = dma.hbm_to_vmem [thread:$0]  %s15524_s19, 256, %s909_s7, [#allocation84], %s13295_s11, %s13295_s11, %s13296_s15  }
 0x47c   :  { %p12556_p10 = por %p12555_p9, %p12554_p8 }
 0x47e   :  { %p12557_p11 = pnand %p12556_p10, %p12550_p7 }
 0x480   :  { %12560 = shalt.err (!%p12557_p11)
}
 0x481   :  { %s15525_s18 = sld [smem:[#allocation252_spill]]  ;;  %s12569_s22 = scalar_lea.vmem %s957_s14, 256 }
 0x482   :  { %p12570_p12 = scmp.ne.s32.totalorder %s957_s14, %s12569_s22  ;;  %p12574_p13 = scmp.lt.s32.totalorder %s957_s14, %s957_s14 }
 0x483   :  { %p12575_p0 = scmp.lt.s32.totalorder %s12569_s22, %s12569_s22 }
 0x485   :  { %p12576_p1 = por %p12575_p0, %p12574_p13 }
 0x487   :  { %938 = dma.hbm_to_vmem [thread:$0]  %s15525_s18, 256, %s933_s16, [#allocation87], %s13295_s11, %s13295_s11, %s13296_s15  }
 0x488   :  { %p12577_p2 = pnand %p12576_p1, %p12570_p12 }
 0x48a   :  { %12580 = shalt.err (!%p12577_p2)
}
 0x48b   :  { %s15526_s23 = sld [smem:[#allocation254_spill]]  ;;  %s13379_s26 = smov [#allocation94]  }
 0x48c   :  { %s980_s6 = sshll.u32 %s13379_s26, 4  ;;  %s13380_s20 = smov [#allocation97]   ;;  %s981_s6 = int_to_ptr.vmem [resolvable:$true] %s980_s6 }
 0x48d   :  { %s1004_s21 = sshll.u32 %s13380_s20, 4  ;;  %s12589_s13 = scalar_lea.vmem %s981_s6, 256  ;;  %s1005_s21 = int_to_ptr.vmem [resolvable:$true] %s1004_s21 }
 0x48e   :  { %p12590_p3 = scmp.ne.s32.totalorder %s981_s6, %s12589_s13  ;;  %p12594_p4 = scmp.lt.s32.totalorder %s981_s6, %s981_s6 }
 0x48f   :  { %p12595_p5 = scmp.lt.s32.totalorder %s12589_s13, %s12589_s13 }
 0x491   :  { %962 = dma.hbm_to_vmem [thread:$0]  %s15526_s23, 256, %s957_s14, [#allocation90], %s13295_s11, %s13295_s11, %s13296_s15  }
 0x492   :  { %p12596_p6 = por %p12595_p5, %p12594_p4 }
 0x494   :  { %p12597_p7 = pnand %p12596_p6, %p12590_p3 }
 0x496   :  { %12600 = shalt.err (!%p12597_p7)
}
 0x497   :  { %s15527_s28 = sld [smem:[#allocation256_spill]]  ;;  %s12609_s4 = scalar_lea.vmem %s1005_s21, 256 }
 0x498   :  { %p12610_p8 = scmp.ne.s32.totalorder %s1005_s21, %s12609_s4  ;;  %p12614_p9 = scmp.lt.s32.totalorder %s1005_s21, %s1005_s21 }
 0x499   :  { %p12615_p10 = scmp.lt.s32.totalorder %s12609_s4, %s12609_s4 }
 0x49b   :  { %p12616_p11 = por %p12615_p10, %p12614_p9 }
 0x49d   :  { %986 = dma.hbm_to_vmem [thread:$0]  %s15527_s28, 256, %s981_s6, [#allocation93], %s13295_s11, %s13295_s11, %s13296_s15  }
 0x49e   :  { %p12617_p12 = pnand %p12616_p11, %p12610_p8 }
 0x4a0   :  { %12620 = shalt.err (!%p12617_p12)
}
 0x4a1   :  { %s15528_s30 = sld [smem:[#allocation258_spill]]  ;;  %s13381_s0 = smov [#allocation100]  }
 0x4a2   :  { %s1027_s7 = sshll.u32 %s13381_s0, 4  ;;  %s13382_s25 = smov [#allocation103]   ;;  %s1028_s7 = int_to_ptr.vmem [resolvable:$true] %s1027_s7 }
 0x4a3   :  { %s1047_s3 = sshll.u32 %s13382_s25, 4  ;;  %s12629_s17 = scalar_lea.vmem %s1028_s7, 128  ;;  %s1048_s3 = int_to_ptr.vmem [resolvable:$true] %s1047_s3 }
 0x4a4   :  { %p12630_p13 = scmp.ne.s32.totalorder %s1028_s7, %s12629_s17  ;;  %p12634_p0 = scmp.lt.s32.totalorder %s1028_s7, %s1028_s7 }
 0x4a5   :  { %p12635_p1 = scmp.lt.s32.totalorder %s12629_s17, %s12629_s17 }
 0x4a7   :  { %1010 = dma.hbm_to_vmem [thread:$0]  %s15528_s30, 256, %s1005_s21, [#allocation96], %s13295_s11, %s13295_s11, %s13296_s15  }
 0x4a8   :  { %p12636_p2 = por %p12635_p1, %p12634_p0 }
 0x4aa   :  { %p12637_p3 = pnand %p12636_p2, %p12630_p13 }
 0x4ac   :  { %12640 = shalt.err (!%p12637_p3)
}
 0x4ad   :  { %s15529_s19 = sld [smem:[#allocation260_spill]]  ;;  %s12649_s10 = scalar_lea.vmem %s1048_s3, 128 }
 0x4ae   :  { %p12650_p4 = scmp.ne.s32.totalorder %s1048_s3, %s12649_s10  ;;  %p12654_p5 = scmp.lt.s32.totalorder %s1048_s3, %s1048_s3 }
 0x4af   :  { %p12655_p6 = scmp.lt.s32.totalorder %s12649_s10, %s12649_s10 }
 0x4b1   :  { %p12656_p7 = por %p12655_p6, %p12654_p5 }
 0x4b3   :  { %1030 = dma.hbm_to_vmem [thread:$0]  %s15529_s19, 128, %s1028_s7, [#allocation99]  }
 0x4b4   :  { %p12657_p8 = pnand %p12656_p7, %p12650_p4 }
 0x4b6   :  { %12660 = shalt.err (!%p12657_p8)
}
 0x4b7   :  { %s15530_s16 = sld [smem:[#allocation262_spill]]  ;;  %s13383_s5 = smov [#allocation106]  }
 0x4b8   :  { %s1067_s14 = sshll.u32 %s13383_s5, 4  ;;  %s13384_s24 = smov [#allocation109]   ;;  %s1068_s14 = int_to_ptr.vmem [resolvable:$true] %s1067_s14 }
 0x4b9   :  { %s1087_s18 = sshll.u32 %s13384_s24, 4  ;;  %s12669_s22 = scalar_lea.vmem %s1068_s14, 128  ;;  %s1088_s18 = int_to_ptr.vmem [resolvable:$true] %s1087_s18 }
 0x4ba   :  { %p12670_p9 = scmp.ne.s32.totalorder %s1068_s14, %s12669_s22  ;;  %p12674_p10 = scmp.lt.s32.totalorder %s1068_s14, %s1068_s14 }
 0x4bb   :  { %p12675_p11 = scmp.lt.s32.totalorder %s12669_s22, %s12669_s22 }
 0x4bd   :  { %1050 = dma.hbm_to_vmem [thread:$0]  %s15530_s16, 128, %s1048_s3, [#allocation102]  }
 0x4be   :  { %p12676_p12 = por %p12675_p11, %p12674_p10 }
 0x4c0   :  { %p12677_p13 = pnand %p12676_p12, %p12670_p9 }
 0x4c2   :  { %12680 = shalt.err (!%p12677_p13)
}
 0x4c3   :  { %s15531_s23 = sld [smem:[#allocation264_spill]]  ;;  %s12689_s26 = scalar_lea.vmem %s1088_s18, 64 }
 0x4c4   :  { %p12690_p0 = scmp.ne.s32.totalorder %s1088_s18, %s12689_s26  ;;  %p12694_p1 = scmp.lt.s32.totalorder %s1088_s18, %s1088_s18 }
 0x4c5   :  { %p12695_p2 = scmp.lt.s32.totalorder %s12689_s26, %s12689_s26 }
 0x4c7   :  { %p12696_p3 = por %p12695_p2, %p12694_p1 }
 0x4c9   :  { %1070 = dma.hbm_to_vmem [thread:$0]  %s15531_s23, 128, %s1068_s14, [#allocation105]  }
 0x4ca   :  { %p12697_p4 = pnand %p12696_p3, %p12690_p0 }
 0x4cc   :  { %12700 = shalt.err (!%p12697_p4)
}
 0x4cd   :  { %s15532_s6 = sld [smem:[#allocation266_spill]]  ;;  %s13385_s20 = smov [#allocation112]  }
 0x4ce   :  { %s1106_s21 = sshll.u32 %s13385_s20, 4  ;;  %s13386_s13 = smov [#allocation115]   ;;  %s1107_s21 = int_to_ptr.vmem [resolvable:$true] %s1106_s21 }
 0x4cf   :  { %s1129_s28 = sshll.u32 %s13386_s13, 4  ;;  %s12709_s4 = scalar_lea.vmem %s1107_s21, 128  ;;  %s1130_s28 = int_to_ptr.vmem [resolvable:$true] %s1129_s28 }
 0x4d0   :  { %p12710_p5 = scmp.ne.s32.totalorder %s1107_s21, %s12709_s4  ;;  %p12714_p6 = scmp.lt.s32.totalorder %s1107_s21, %s1107_s21 }
 0x4d1   :  { %p12715_p7 = scmp.lt.s32.totalorder %s12709_s4, %s12709_s4 }
 0x4d3   :  { %1090 = dma.hbm_to_vmem [thread:$0]  %s15532_s6, 64, %s1088_s18, [#allocation108]  }
 0x4d4   :  { %p12716_p8 = por %p12715_p7, %p12714_p6 }
 0x4d6   :  { %p12717_p9 = pnand %p12716_p8, %p12710_p5 }
 0x4d8   :  { %12720 = shalt.err (!%p12717_p9)
}
 0x4d9   :  { %s15533_s30 = sld [smem:[#allocation268_spill]]  ;;  %s12729_s0 = scalar_lea.vmem %s1130_s28, 64 }
 0x4da   :  { %p12730_p10 = scmp.ne.s32.totalorder %s1130_s28, %s12729_s0  ;;  %p12734_p11 = scmp.lt.s32.totalorder %s1130_s28, %s1130_s28 }
 0x4db   :  { %p12735_p12 = scmp.lt.s32.totalorder %s12729_s0, %s12729_s0 }
 0x4dd   :  { %p12736_p13 = por %p12735_p12, %p12734_p11 }
 0x4df   :  { %1112 = dma.hbm_to_vmem [thread:$0]  %s15533_s30, 128, %s1107_s21, [#allocation111], %s13299_s9, %s13299_s9, %s13300_s1  }
 0x4e0   :  { %p12737_p0 = pnand %p12736_p13, %p12730_p10 }
 0x4e2   :  { %12740 = shalt.err (!%p12737_p0)
}
 0x4e3   :  { %s15534_s7 = sld [smem:[#allocation270_spill]]  ;;  %s13387_s25 = smov [#allocation118]  }
 0x4e4   :  { %s1153_s3 = sshll.u32 %s13387_s25, 4  ;;  %s13388_s17 = smov [#allocation121]   ;;  %s1154_s3 = int_to_ptr.vmem [resolvable:$true] %s1153_s3 }
 0x4e5   :  { %s1173_s19 = sshll.u32 %s13388_s17, 4  ;;  %s12749_s10 = scalar_lea.vmem %s1154_s3, 128  ;;  %s1174_s19 = int_to_ptr.vmem [resolvable:$true] %s1173_s19 }
 0x4e6   :  { %p12750_p1 = scmp.ne.s32.totalorder %s1154_s3, %s12749_s10  ;;  %p12754_p2 = scmp.lt.s32.totalorder %s1154_s3, %s1154_s3 }
 0x4e7   :  { %p12755_p3 = scmp.lt.s32.totalorder %s12749_s10, %s12749_s10 }
 0x4e9   :  { %1132 = dma.hbm_to_vmem [thread:$0]  %s15534_s7, 64, %s1130_s28, [#allocation114]  }
 0x4ea   :  { %p12756_p4 = por %p12755_p3, %p12754_p2 }
 0x4ec   :  { %p12757_p5 = pnand %p12756_p4, %p12750_p1 }
 0x4ee   :  { %12760 = shalt.err (!%p12757_p5)
}
 0x4ef   :  { %s15535_s9 = sld [smem:[#allocation273_spill]]  ;;  %s12769_s16 = scalar_lea.vmem %s1174_s19, 128 }
 0x4f0   :  { %p12770_p6 = scmp.ne.s32.totalorder %s1174_s19, %s12769_s16  ;;  %p12774_p7 = scmp.lt.s32.totalorder %s1174_s19, %s1174_s19 }
 0x4f1   :  { %p12775_p8 = scmp.lt.s32.totalorder %s12769_s16, %s12769_s16 }
 0x4f3   :  { %p12776_p9 = por %p12775_p8, %p12774_p7 }
 0x4f5   :  { %1156 = dma.hbm_to_vmem [thread:$0]  %s15535_s9, 128, %s1154_s3, [#allocation117]  }
 0x4f6   :  { %p12777_p10 = pnand %p12776_p9, %p12770_p6 }
 0x4f8   :  { %12780 = shalt.err (!%p12777_p10)
}
 0x4f9   :  { %s15536_s5 = sld [smem:[#allocation275_spill]]  ;;  %s13389_s14 = smov [#allocation124]  }
 0x4fa   :  { %s1193_s24 = sshll.u32 %s13389_s14, 4  ;;  %s13390_s18 = smov [#allocation127]   ;;  %s1194_s24 = int_to_ptr.vmem [resolvable:$true] %s1193_s24 }
 0x4fb   :  { %s1213_s22 = sshll.u32 %s13390_s18, 4  ;;  %s12789_s23 = scalar_lea.vmem %s1194_s24, 128  ;;  %s1214_s22 = int_to_ptr.vmem [resolvable:$true] %s1213_s22 }
 0x4fc   :  { %p12790_p11 = scmp.ne.s32.totalorder %s1194_s24, %s12789_s23  ;;  %p12794_p12 = scmp.lt.s32.totalorder %s1194_s24, %s1194_s24 }
 0x4fd   :  { %p12795_p13 = scmp.lt.s32.totalorder %s12789_s23, %s12789_s23 }
 0x4ff   :  { %1176 = dma.hbm_to_vmem [thread:$0]  %s15536_s5, 128, %s1174_s19, [#allocation120]  }
 0x500   :  { %p12796_p0 = por %p12795_p13, %p12794_p12 }
 0x502   :  { %p12797_p1 = pnand %p12796_p0, %p12790_p11 }
 0x504   :  { %12800 = shalt.err (!%p12797_p1)
}
 0x505   :  { %s15537_s26 = sld [smem:[#allocation277_spill]]  ;;  %s12809_s6 = scalar_lea.vmem %s1214_s22, 64 }
 0x506   :  { %p12810_p2 = scmp.ne.s32.totalorder %s1214_s22, %s12809_s6  ;;  %p12814_p3 = scmp.lt.s32.totalorder %s1214_s22, %s1214_s22 }
 0x507   :  { %p12815_p4 = scmp.lt.s32.totalorder %s12809_s6, %s12809_s6 }
 0x509   :  { %p12816_p5 = por %p12815_p4, %p12814_p3 }
 0x50b   :  { %1196 = dma.hbm_to_vmem [thread:$0]  %s15537_s26, 128, %s1194_s24, [#allocation123]  }
 0x50c   :  { %p12817_p6 = pnand %p12816_p5, %p12810_p2 }
 0x50e   :  { %12820 = shalt.err (!%p12817_p6)
}
 0x50f   :  { %s15538_s20 = sld [smem:[#allocation279_spill]]  ;;  %s13391_s21 = smov [#allocation130]  }
 0x510   :  { %s1233_s13 = sshll.u32 %s13391_s21, 4  ;;  %s13392_s28 = smov [#allocation133]   ;;  %s1234_s13 = int_to_ptr.vmem [resolvable:$true] %s1233_s13 }
 0x511   :  { %s1255_s4 = sshll.u32 %s13392_s28, 4  ;;  %s12829_s30 = scalar_lea.vmem %s1234_s13, 64  ;;  %s1256_s4 = int_to_ptr.vmem [resolvable:$true] %s1255_s4 }
 0x512   :  { %p12830_p7 = scmp.ne.s32.totalorder %s1234_s13, %s12829_s30  ;;  %p12834_p8 = scmp.lt.s32.totalorder %s1234_s13, %s1234_s13 }
 0x513   :  { %p12835_p9 = scmp.lt.s32.totalorder %s12829_s30, %s12829_s30 }
 0x515   :  { %1216 = dma.hbm_to_vmem [thread:$0]  %s15538_s20, 64, %s1214_s22, [#allocation126]  }
 0x516   :  { %p12836_p10 = por %p12835_p9, %p12834_p8 }
 0x518   :  { %p12837_p11 = pnand %p12836_p10, %p12830_p7 }
 0x51a   :  { %12840 = shalt.err (!%p12837_p11)
}
 0x51b   :  { %s15539_s0 = sld [smem:[#allocation281_spill]]  ;;  %s12849_s7 = scalar_lea.vmem %s1256_s4, 64 }
 0x51c   :  { %p12850_p12 = scmp.ne.s32.totalorder %s1256_s4, %s12849_s7  ;;  %p12854_p13 = scmp.lt.s32.totalorder %s1256_s4, %s1256_s4 }
 0x51d   :  { %p12855_p0 = scmp.lt.s32.totalorder %s12849_s7, %s12849_s7 }
 0x51f   :  { %p12856_p1 = por %p12855_p0, %p12854_p13 }
 0x521   :  { %1236 = dma.hbm_to_vmem [thread:$0]  %s15539_s0, 64, %s1234_s13, [#allocation129]  }
 0x522   :  { %p12857_p2 = pnand %p12856_p1, %p12850_p12 }
 0x524   :  { %12860 = shalt.err (!%p12857_p2)
}
 0x525   :  { %s15540_s25 = sld [smem:[#allocation283_spill]]  ;;  %s13393_s3 = smov [#allocation136]  }
 0x526   :  { %s1275_s17 = sshll.u32 %s13393_s3, 4  ;;  %s13394_s19 = smov [#allocation139]   ;;  %s1276_s17 = int_to_ptr.vmem [resolvable:$true] %s1275_s17 }
 0x527   :  { %s1297_s10 = sshll.u32 %s13394_s19, 4  ;;  %s12869_s9 = scalar_lea.vmem %s1276_s17, 32  ;;  %s1298_s10 = int_to_ptr.vmem [resolvable:$true] %s1297_s10 }
 0x528   :  { %p12870_p3 = scmp.ne.s32.totalorder %s1276_s17, %s12869_s9  ;;  %p12874_p4 = scmp.lt.s32.totalorder %s1276_s17, %s1276_s17 }
 0x529   :  { %p12875_p5 = scmp.lt.s32.totalorder %s12869_s9, %s12869_s9 }
 0x52b   :  { %1258 = dma.hbm_to_vmem [thread:$0]  %s15540_s25, 64, %s1256_s4, [#allocation132]  }
 0x52c   :  { %p12876_p6 = por %p12875_p5, %p12874_p4 }
 0x52e   :  { %p12877_p7 = pnand %p12876_p6, %p12870_p3 }
 0x530   :  { %12880 = shalt.err (!%p12877_p7)
}
 0x531   :  { %s15541_s16 = sld [smem:[#allocation285_spill]]  ;;  %s12889_s5 = scalar_lea.vmem %s1298_s10, 32 }
 0x532   :  { %p12890_p8 = scmp.ne.s32.totalorder %s1298_s10, %s12889_s5  ;;  %p12894_p9 = scmp.lt.s32.totalorder %s1298_s10, %s1298_s10 }
 0x533   :  { %p12895_p10 = scmp.lt.s32.totalorder %s12889_s5, %s12889_s5 }
 0x535   :  { %p12896_p11 = por %p12895_p10, %p12894_p9 }
 0x537   :  { %1278 = dma.hbm_to_vmem [thread:$0]  %s15541_s16, 32, %s1276_s17, [#allocation135]  }
 0x538   :  { %p12897_p12 = pnand %p12896_p11, %p12890_p8 }
 0x53a   :  { %12900 = shalt.err (!%p12897_p12)
}
 0x53b   :  { %s15542_s14 = sld [smem:[#allocation287_spill]]  ;;  %s13395_s24 = smov [#allocation142]  }
 0x53c   :  { %s1319_s18 = sshll.u32 %s13395_s24, 4  ;;  %s13396_s22 = smov [#allocation145]   ;;  %s1320_s18 = int_to_ptr.vmem [resolvable:$true] %s1319_s18 }
 0x53d   :  { %s1338_s23 = sshll.u32 %s13396_s22, 4  ;;  %s12909_s26 = scalar_lea.vmem %s1320_s18, 32  ;;  %s1339_s23 = int_to_ptr.vmem [resolvable:$true] %s1338_s23 }
 0x53e   :  { %p12910_p13 = scmp.ne.s32.totalorder %s1320_s18, %s12909_s26  ;;  %p12914_p0 = scmp.lt.s32.totalorder %s1320_s18, %s1320_s18 }
 0x53f   :  { %p12915_p1 = scmp.lt.s32.totalorder %s12909_s26, %s12909_s26 }
 0x541   :  { %1300 = dma.hbm_to_vmem [thread:$0]  %s15542_s14, 32, %s1298_s10, [#allocation138]  }
 0x542   :  { %p12916_p2 = por %p12915_p1, %p12914_p0 }
 0x544   :  { %p12917_p3 = pnand %p12916_p2, %p12910_p13 }
 0x546   :  { %12920 = shalt.err (!%p12917_p3)
}
 0x547   :  { %s15543_s6 = sld [smem:[#allocation289_spill]]  ;;  %s12929_s20 = scalar_lea.vmem %s1339_s23, 2048 }
 0x548   :  { %p12930_p4 = scmp.ne.s32.totalorder %s1339_s23, %s12929_s20  ;;  %p12934_p5 = scmp.lt.s32.totalorder %s1339_s23, %s1339_s23 }
 0x549   :  { %p12935_p6 = scmp.lt.s32.totalorder %s12929_s20, %s12929_s20 }
 0x54b   :  { %p12936_p7 = por %p12935_p6, %p12934_p5 }
 0x54d   :  { %1322 = dma.hbm_to_vmem [thread:$0]  %s15543_s6, 32, %s1320_s18, [#allocation141]  }
 0x54e   :  { %p12937_p8 = pnand %p12936_p7, %p12930_p4 }
 0x550   :  { %12940 = shalt.err (!%p12937_p8)
}
 0x551   :  { %s15544_s21 = sld [smem:[#allocation291_spill]]  ;;  %s13397_s13 = smov [#allocation148]  }
 0x552   :  { %s1371_s28 = sshll.u32 %s13397_s13, 4  ;;  %s13398_s4 = smov [#allocation151]   ;;  %s1372_s28 = int_to_ptr.vmem [resolvable:$true] %s1371_s28 }
 0x553   :  { %s1397_s30 = sshll.u32 %s13398_s4, 4  ;;  %s12949_s0 = scalar_lea.vmem %s1372_s28, 128  ;;  %s1398_s30 = int_to_ptr.vmem [resolvable:$true] %s1397_s30 }
 0x554   :  { %p12950_p9 = scmp.ne.s32.totalorder %s1372_s28, %s12949_s0  ;;  %p12954_p10 = scmp.lt.s32.totalorder %s1372_s28, %s1372_s28 }
 0x555   :  { %p12955_p11 = scmp.lt.s32.totalorder %s12949_s0, %s12949_s0 }
 0x557   :  { %1344 = dma.hbm_to_vmem [thread:$0]  %s15544_s21, 2048, %s1339_s23, [#allocation144], %s13295_s11, %s13295_s11, %s13296_s15  }
 0x558   :  { %p12956_p12 = por %p12955_p11, %p12954_p10 }
 0x55a   :  { %p12957_p13 = pnand %p12956_p12, %p12950_p9 }
 0x55c   :  { %12960 = shalt.err (!%p12957_p13)
}
 0x55d   :  { %s15545_s7 = sld [smem:[#allocation298_spill]]  ;;  %s12969_s25 = scalar_lea.vmem %s1398_s30, 64 }
 0x55e   :  { %p12970_p0 = scmp.ne.s32.totalorder %s1398_s30, %s12969_s25  ;;  %p12974_p1 = scmp.lt.s32.totalorder %s1398_s30, %s1398_s30 }
 0x55f   :  { %p12975_p2 = scmp.lt.s32.totalorder %s12969_s25, %s12969_s25 }
 0x561   :  { %p12976_p3 = por %p12975_p2, %p12974_p1 }
 0x563   :  { %1374 = dma.hbm_to_vmem [thread:$0]  %s15545_s7, 128, %s1372_s28, [#allocation147]  }
 0x564   :  { %p12977_p4 = pnand %p12976_p3, %p12970_p0 }
 0x566   :  { %12980 = shalt.err (!%p12977_p4)
}
 0x567   :  { %s15546_s3 = sld [smem:[#allocation303_spill]]  ;;  %s13399_s17 = smov [#allocation152]  }
 0x568   :  { %s1407_s19 = sshll.u32 %s13399_s17, 4  ;;  %s13400_s10 = smov [#allocation153]   ;;  %s1408_s19 = int_to_ptr.vmem [resolvable:$true] %s1407_s19 }
 0x569   :  { %s1417_s9 = sshll.u32 %s13400_s10, 4  ;;  %s12989_s16 = scalar_lea.vmem %s1408_s19, 64  ;;  %s1418_s9 = int_to_ptr.vmem [resolvable:$true] %s1417_s9 }
 0x56a   :  { %p12990_p5 = scmp.ne.s32.totalorder %s1408_s19, %s12989_s16  ;;  %p12994_p6 = scmp.lt.s32.totalorder %s1408_s19, %s1408_s19 }
 0x56b   :  { %p12995_p7 = scmp.lt.s32.totalorder %s12989_s16, %s12989_s16 }
 0x56d   :  { %1400 = dma.hbm_to_vmem [thread:$0]  %s15546_s3, 64, %s1398_s30, [#allocation150]  }
 0x56e   :  { %p12996_p8 = por %p12995_p7, %p12994_p6 }
 0x570   :  { %p12997_p9 = pnand %p12996_p8, %p12990_p5 }
 0x572   :  { %13000 = shalt.err (!%p12997_p9)
}
 0x573   :  { %s15547_s5 = sld [smem:[#allocation304_spill]]  ;;  %s13009_s14 = scalar_lea.vmem %s1418_s9, 64 }
 0x574   :  { %p13010_p10 = scmp.ne.s32.totalorder %s1418_s9, %s13009_s14  ;;  %p13014_p11 = scmp.lt.s32.totalorder %s1418_s9, %s1418_s9 }
 0x575   :  { %p13015_p12 = scmp.lt.s32.totalorder %s13009_s14, %s13009_s14 }
 0x577   :  { %p13016_p13 = por %p13015_p12, %p13014_p11 }
 0x579   :  { %1410 = dma.hbm_to_vmem [thread:$0]  %s15547_s5, 64, %s1408_s19, [#allocation3]  }
 0x57a   :  { %p13017_p0 = pnand %p13016_p13, %p13010_p10 }
 0x57c   :  { %13020 = shalt.err (!%p13017_p0)
}
 0x57d   :  { %s15548_s24 = sld [smem:[#allocation305_spill]]  ;;  %s13401_s18 = smov [#allocation154]  }
 0x57e   :  { %s1433_s22 = sshll.u32 %s13401_s18, 4  ;;  %s1434_s22 = int_to_ptr.vmem [resolvable:$true] %s1433_s22 }
 0x57f   :  { %s13029_s23 = scalar_lea.vmem %s1434_s22, 32  ;;  %p13034_p2 = scmp.lt.s32.totalorder %s1434_s22, %s1434_s22 }
 0x580   :  { %p13030_p1 = scmp.ne.s32.totalorder %s1434_s22, %s13029_s23  ;;  %p13035_p3 = scmp.lt.s32.totalorder %s13029_s23, %s13029_s23 }
 0x582   :  { %p13036_p4 = por %p13035_p3, %p13034_p2 }
 0x583   :  { %1420 = dma.hbm_to_vmem [thread:$0]  %s15548_s24, 64, %s1418_s9, [#allocation6]  }
 0x584   :  { %p13037_p5 = pnand %p13036_p4, %p13030_p1 }
 0x586   :  { %13040 = shalt.err (!%p13037_p5)
}
 0x587   :  { %s15549_s26 = sld [smem:[#allocation309_spill]] }
 0x58d   :  { %1436 = dma.hbm_to_vmem [thread:$0]  %s15549_s26, 32, %s1434_s22, [#allocation9]  }
 0x58e   :  { %13061 = dma.done.wait [#allocation3], 128  }
 0x58f   :  { %13062 = vsyncadd [#allocation3], 4294967168 }
 0x590   :  { %13063 = dma.done.wait [#allocation6], 512  }
 0x591   :  { %13064 = vsyncadd [#allocation6], 4294966784 }
 0x592   :  { %13065 = dma.done.wait [#allocation9], 512  }
 0x593   :  { %13066 = vsyncadd [#allocation9], 4294966784 }
 0x594   :  { %13067 = dma.done.wait [#allocation12], 512  }
 0x595   :  { %13068 = vsyncadd [#allocation12], 4294966784 }
 0x596   :  { %13069 = dma.done.wait [#allocation15], 512  }
 0x597   :  { %13070 = vsyncadd [#allocation15], 4294966784 }
 0x598   :  { %13071 = dma.done.wait [#allocation18], 512  }
 0x599   :  { %13072 = vsyncadd [#allocation18], 4294966784 }
 0x59a   :  { %13073 = dma.done.wait [#allocation21], 512  }
 0x59b   :  { %13074 = vsyncadd [#allocation21], 4294966784 }
 0x59c   :  { %13075 = dma.done.wait [#allocation24], 512  }
 0x59d   :  { %13076 = vsyncadd [#allocation24], 4294966784 }
 0x59e   :  { %13077 = dma.done.wait [#allocation27], 256  }
 0x59f   :  { %13078 = vsyncadd [#allocation27], 4294967040 }
 0x5a0   :  { %13079 = dma.done.wait [#allocation30], 256  }
 0x5a1   :  { %13080 = vsyncadd [#allocation30], 4294967040 }
 0x5a2   :  { %13081 = dma.done.wait [#allocation33], 256  }
 0x5a3   :  { %13082 = vsyncadd [#allocation33], 4294967040 }
 0x5a4   :  { %13083 = dma.done.wait [#allocation36], 128  }
 0x5a5   :  { %13084 = vsyncadd [#allocation36], 4294967168 }
 0x5a6   :  { %13085 = dma.done.wait [#allocation39], 192  }
 0x5a7   :  { %13086 = vsyncadd [#allocation39], 4294967104 }
 0x5a8   :  { %13087 = dma.done.wait [#allocation42], 128  }
 0x5a9   :  { %13088 = vsyncadd [#allocation42], 4294967168 }
 0x5aa   :  { %13089 = dma.done.wait [#allocation45], 512  }
 0x5ab   :  { %13090 = vsyncadd [#allocation45], 4294966784 }
 0x5ac   :  { %13091 = dma.done.wait [#allocation48], 256  }
 0x5ad   :  { %13092 = vsyncadd [#allocation48], 4294967040 }
 0x5ae   :  { %13093 = dma.done.wait [#allocation51], 256  }
 0x5af   :  { %13094 = vsyncadd [#allocation51], 4294967040 }
 0x5b0   :  { %13095 = dma.done.wait [#allocation54], 256  }
 0x5b1   :  { %13096 = vsyncadd [#allocation54], 4294967040 }
 0x5b2   :  { %13097 = dma.done.wait [#allocation57], 128  }
 0x5b3   :  { %13098 = vsyncadd [#allocation57], 4294967168 }
 0x5b4   :  { %13099 = dma.done.wait [#allocation60], 192  }
 0x5b5   :  { %13100 = vsyncadd [#allocation60], 4294967104 }
 0x5b6   :  { %13101 = dma.done.wait [#allocation63], 128  }
 0x5b7   :  { %13102 = vsyncadd [#allocation63], 4294967168 }
 0x5b8   :  { %13103 = dma.done.wait [#allocation66], 96  }
 0x5b9   :  { %13104 = vsyncadd [#allocation66], 4294967200 }
 0x5ba   :  { %13105 = dma.done.wait [#allocation69], 96  }
 0x5bb   :  { %13106 = vsyncadd [#allocation69], 4294967200 }
 0x5bc   :  { %13107 = dma.done.wait [#allocation72], 64  }
 0x5bd   :  { %13108 = vsyncadd [#allocation72], 4294967232 }
 0x5be   :  { %13109 = dma.done.wait [#allocation75], 4096  }
 0x5bf   :  { %13110 = vsyncadd [#allocation75], 4294963200 }
 0x5c0   :  { %13111 = dma.done.wait [#allocation78], 512  }
 0x5c1   :  { %13112 = vsyncadd [#allocation78], 4294966784 }
 0x5c2   :  { %13113 = dma.done.wait [#allocation81], 512  }
 0x5c3   :  { %13114 = vsyncadd [#allocation81], 4294966784 }
 0x5c4   :  { %13115 = dma.done.wait [#allocation84], 512  }
 0x5c5   :  { %13116 = vsyncadd [#allocation84], 4294966784 }
 0x5c6   :  { %13117 = dma.done.wait [#allocation87], 512  }
 0x5c7   :  { %13118 = vsyncadd [#allocation87], 4294966784 }
 0x5c8   :  { %13119 = dma.done.wait [#allocation90], 512  }
 0x5c9   :  { %13120 = vsyncadd [#allocation90], 4294966784 }
 0x5ca   :  { %13121 = dma.done.wait [#allocation93], 512  }
 0x5cb   :  { %13122 = vsyncadd [#allocation93], 4294966784 }
 0x5cc   :  { %13123 = dma.done.wait [#allocation96], 512  }
 0x5cd   :  { %13124 = vsyncadd [#allocation96], 4294966784 }
 0x5ce   :  { %13125 = dma.done.wait [#allocation99], 256  }
 0x5cf   :  { %13126 = vsyncadd [#allocation99], 4294967040 }
 0x5d0   :  { %13127 = dma.done.wait [#allocation102], 256  }
 0x5d1   :  { %13128 = vsyncadd [#allocation102], 4294967040 }
 0x5d2   :  { %13129 = dma.done.wait [#allocation105], 256  }
 0x5d3   :  { %13130 = vsyncadd [#allocation105], 4294967040 }
 0x5d4   :  { %13131 = dma.done.wait [#allocation108], 128  }
 0x5d5   :  { %13132 = vsyncadd [#allocation108], 4294967168 }
 0x5d6   :  { %13133 = dma.done.wait [#allocation111], 192  }
 0x5d7   :  { %13134 = vsyncadd [#allocation111], 4294967104 }
 0x5d8   :  { %13135 = dma.done.wait [#allocation114], 128  }
 0x5d9   :  { %13136 = vsyncadd [#allocation114], 4294967168 }
 0x5da   :  { %13137 = dma.done.wait [#allocation117], 384  }
 0x5db   :  { %13138 = vsyncadd [#allocation117], 4294966912 }
 0x5dc   :  { %13139 = dma.done.wait [#allocation120], 256  }
 0x5dd   :  { %13140 = vsyncadd [#allocation120], 4294967040 }
 0x5de   :  { %13141 = dma.done.wait [#allocation123], 256  }
 0x5df   :  { %13142 = vsyncadd [#allocation123], 4294967040 }
 0x5e0   :  { %13143 = dma.done.wait [#allocation126], 192  }
 0x5e1   :  { %13144 = vsyncadd [#allocation126], 4294967104 }
 0x5e2   :  { %13145 = dma.done.wait [#allocation129], 128  }
 0x5e3   :  { %13146 = vsyncadd [#allocation129], 4294967168 }
 0x5e4   :  { %13147 = dma.done.wait [#allocation132], 192  }
 0x5e5   :  { %13148 = vsyncadd [#allocation132], 4294967104 }
 0x5e6   :  { %13149 = dma.done.wait [#allocation135], 96  }
 0x5e7   :  { %13150 = vsyncadd [#allocation135], 4294967200 }
 0x5e8   :  { %13151 = dma.done.wait [#allocation138], 96  }
 0x5e9   :  { %13152 = vsyncadd [#allocation138], 4294967200 }
 0x5ea   :  { %13153 = dma.done.wait [#allocation141], 96  }
 0x5eb   :  { %13154 = vsyncadd [#allocation141], 4294967200 }
 0x5ec   :  { %13155 = dma.done.wait [#allocation144], 2080  }
 0x5ed   :  { %13156 = vsyncadd [#allocation144], 4294965216 }
 0x5ee   :  { %13157 = dma.done.wait [#allocation147], 256  }
 0x5ef   :  { %13158 = vsyncadd [#allocation147], 4294967040 }
 0x5f0   :  { %13159 = dma.done.wait [#allocation150], 192  }
 0x5f1   :  { %13160 = vsyncadd [#allocation150], 4294967104 }
 0x5f2   :  { %13161 = dma.done.wait [#allocation3], 64  }
 0x5f3   :  { %13162 = vsyncadd [#allocation3], 4294967232 }
 0x5f4   :  { %13163 = dma.done.wait [#allocation6], 64  }
 0x5f5   :  { %13164 = vsyncadd [#allocation6], 4294967232 }
 0x5f6   :  { %13165 = dma.done.wait [#allocation9], 32  }
 0x5f7   :  { %13166 = vsyncadd [#allocation9], 4294967264  ;;  %s15550_s6 = sld [smem:[#allocation317_spill]]  ;;  %v13402_v0 = vmov 0   ;;  %vm1788_vm0 = vcmask 31744   ;;  %v1774_v2 = vld [vmem:[#allocation7] sm:$0xff] }
 0x5f8   :  { %11000 = vset.pattern.permute.xlu1 %v13402_v0  ;;  %10999 = vset.pattern.permute.xlu0 %v13402_v0  ;;  %v1767_v1 = vld [vmem:[#allocation2 + $0x4] sm:$0xf]  ;;  %s13403_s20 = smov 16   ;;  %v1776_v3 = vld [vmem:[#allocation5] sm:$0xff]  ;;  %v1777_v4 = vld [vmem:[#allocation5 + $0x8] sm:$0xff]  ;;  %vm1772_vm1 = vcmask 130048  }
 0x5f9   :  { %1769 = vrot.lane.b32.xlu0 %v1767_v1, %s13403_s20  ;;  %10116 = vmatprep.mubr.msk.f32.mxu0 %vm1788_vm0, %v1774_v2  ;;  %v1765_v7 = vld [vmem:[#allocation2] sm:$0xf]  ;;  %vm1795_vm2 = vcmask 1043456   ;;  %v1875_v18 = vld [vmem:[%s14036_s12 + $0x8] sm:$0xff]  ;;  %s13404_s21 = smov 113   ;;  %s13405_s13 = smov 1  }
 0x5fa   :  { %1780 = vperm.xlu1 %11000, %v1776_v3   ;;  %v1775_v10 = vld [vmem:[#allocation7 + $0x8] sm:$0xff]  ;;  %vm1983_vm3 = vcmask 7168   ;;  %vm1986_vm4 = vcmask 138240   ;;  %s13407_s28 = smov 126   ;;  %s13408_s4 = smov 15   ;;  %vm2049_vm5 = vcmask 392192  }
 0x5fb   :  { %v1874_v11 = vld [vmem:[%s14036_s12] sm:$0xff]  ;;  %s13406_s12 = smov 14   ;;  %s13409_s30 = smov 127   ;;  %v1974_v41 = vld [vmem:[%s14041_s8 + $0x8] sm:$0xff]  ;;  %vm13411_vm6 = vmmov 0   ;;  %vm2324_vm7 = vcmask 195584  }
 0x5fc   :  { %v1971_v37 = vld [vmem:[%s14046_s27] sm:$0xff]  ;;  %v1972_v58 = vld [vmem:[%s14046_s27 + $0x8] sm:$0xff]  ;;  %s15552_s27 = sld [smem:[#allocation295_spill]]  ;;  %vm2774_vm8 = vcmask 64512   ;;  %s13412_s17 = smov 114   ;;  %vm2857_vm9 = vcmask 15360  }
 0x5fd   :  { %v1877_v5 = vld [vmem:[%s15550_s6 + $0x8] sm:$0xff]  ;;  %1785 = vperm.xlu0 %10999, %v1777_v4   ;;  %v1876_v6 = vld [vmem:[%s15550_s6] sm:$0xff]  ;;  %s15553_s0 = sld [smem:[#allocation307_spill]]  ;;  %vm3063_vm10 = vcmask 1041408   ;;  %vm4122_vm11 = vcmask 261120   ;;  %s13413_s23 = smov 116  }
 0x5fe   :  { %1885 = vperm.xlu1 %11000, %v1877_v5   ;;  %v1973_v40 = vld [vmem:[%s14041_s8] sm:$0xff]  ;;  %s15551_s8 = sld [smem:[#allocation299_spill]]  ;;  %s13414_s26 = smov 124   ;;  %vm6146_vm12 = vcmask 523264  }
 0x5ff   :  { %s15554_s7 = sld [smem:[#allocation306_spill]]  ;;  %s13415_s6 = smov 12  }
 0x600   :  { %s15555_s25 = sld [smem:[#allocation308_spill]] }
 0x601   :  { %s15556_s3 = sld [smem:[#allocation310_spill]] }
 0x602   :  { %1880 = vperm.xlu1 %11000, %v1876_v6   ;;  %s15557_s19 = sld [smem:[#allocation311_spill]] }
 0x603   :  { %s15558_s10 = sld [smem:[#allocation313_spill]] }
 0x604   :  { %s15559_s9 = sld [smem:[#allocation301_spill]] }
 0x605   :  { %s15560_s16 = sld [smem:[#allocation297_spill]] }
 0x606   :  { %s15561_s5 = sld [smem:[#allocation315_spill]] }
 0x607   :  { %s15562_s14 = sld [smem:[#allocation316_spill]] }
 0x608   :  { %s15563_s24 = sld [smem:[#allocation312_spill]] }
 0x609   :  { %s15564_s18 = sld [smem:[#allocation314_spill]] }
 0x60a   :  { %s15565_s22 = sld [smem:[#allocation302_spill]] }
 0x66b   :  { %v1770_v8 = vpop.permute.xlu0 %1769 }
 0x66c   :  { %v1773_v9 = vsel %vm1772_vm1, %v1765_v7, %v1770_v8 }
 0x66d   :  { %10114 = vmatprep.subr.msk.mxu0 %vm1795_vm2, %v1773_v9 }
 0x66e   :  { %10115 = vmatpush3.msk.msra.mxu0 %vm1795_vm2, %v1773_v9 }
 0x66f   :  { %10117 = vmatmul.mubr.msk.f32.vlgmr.msra.gmra.mxu0 %vm1788_vm0, %v1775_v10 }
 0x670   :  { %10123 = vmatprep.mubr.msk.f32.mxu0 %vm1772_vm1, %v1874_v11 }
 0x675   :  { %v1781_v15 = vpop.permute.xlu1 %1780 }
 0x678   :  { %v1786_v12 = vpop.permute.xlu0 %1785 }
 0x679   :  { %v1886_v19 = vpop.permute.xlu1 %1885 }
 0x67d   :  { %v1881_v22 = vpop.permute.xlu1 %1880 }
 0x72f   :  { %v10118_v13 = vpop.f32.mrf.mxu0 }
 0x730   :  { %v14294_v14 = vadd.f32 %v10118_v13, %v1786_v12  ;;  %v13410_v13 = vmov 0.0  }
 0x731   :  { %v1865_v16 = vpop.f32.mrf.mxu0  ;;  %10141 = vmatprep.subr.mxu1 %v13410_v13  ;;  %10153 = vmatprep.mubr.msk.f32.mxu1 %vm13411_vm6, %v13410_v13 }
 0x732   :  { %v14296_v17 = vadd.f32 %v1865_v16, %v1781_v15  ;;  %10119 = vmatprep.subr.mxu0 %v14294_v14 }
 0x733   :  { %10120 = vmatpush3.msra.mxu0 %v14294_v14 }
 0x734   :  { %10121 = vmatprep.subr.mxu0 %v14296_v17 }
 0x735   :  { %10122 = vmatpush3.msra.mxu0 %v14296_v17 }
 0x736   :  { %10124 = vmatmul.mubr.msk.f32.vlgmr.msra.gmra.mxu0 %vm1772_vm1, %v1875_v18 }
 0x737   :  { %10138 = vmatprep.mubr.msk.f32.mxu0 %vm2049_vm5, %v1971_v37 }
 0x7f6   :  { %v10125_v20 = vpop.f32.mrf.mxu0 }
 0x7f7   :  { %v1966_v21 = vadd.f32 %v10125_v20, %v1886_v19 }
 0x7f8   :  { %v1960_v23 = vpop.f32.mrf.mxu0 }
 0x7f9   :  { %v1970_v24 = vmax.f32 %v1966_v21, 0.0  ;;  %v1961_v25 = vadd.f32 %v1960_v23, %v1881_v22 }
 0x7fb   :  { %1991 = vrot.lane.b32.xlu1 %v1970_v24, %s13404_s21  ;;  %1979 = vrot.lane.b32.xlu0 %v1970_v24, %s13405_s13  ;;  %v1969_v26 = vmax.f32 %v1961_v25, 0.0 }
 0x7ff   :  { %1989 = vrot.lane.b32.xlu1 %v1969_v26, %s13404_s21  ;;  %1977 = vrot.lane.b32.xlu0 %v1969_v26, %s13405_s13 }
 0x86d   :  { %v1992_v27 = vpop.permute.xlu1 %1991  ;;  %v1980_v28 = vpop.permute.xlu0 %1979 }
 0x86e   :  { %v1996_v29 = vsel %vm1983_vm3, 0.0, %v1992_v27  ;;  %v1985_v30 = vsel %vm1983_vm3, 0.0, %v1980_v28  ;;  %v2400_v28 = vld [vmem:[%s15551_s8] sm:$0xff] }
 0x86f   :  { %v1998_v31 = vsel %vm1986_vm4, %v1996_v29, 0.0  ;;  %v1988_v32 = vsel %vm1986_vm4, %v1985_v30, 0.0  ;;  %v2144_v29 = vld [vmem:[%s15552_s27] sm:$0xff] }
 0x870   :  { %2033 = vrot.lane.b32.xlu1 %v1998_v31, %s13406_s12  ;;  %2027 = vrot.lane.b32.xlu0 %v1988_v32, %s13407_s28 }
 0x871   :  { %v1990_v33 = vpop.permute.xlu1 %1989  ;;  %v1978_v34 = vpop.permute.xlu0 %1977 }
 0x872   :  { %v1995_v35 = vsel %vm1983_vm3, 0.0, %v1990_v33  ;;  %v1984_v36 = vsel %vm1983_vm3, 0.0, %v1978_v34 }
 0x873   :  { %v1997_v38 = vsel %vm1986_vm4, %v1995_v35, 0.0  ;;  %v1987_v39 = vsel %vm1986_vm4, %v1984_v36, 0.0 }
 0x874   :  { %2019 = vrot.lane.b32.xlu1 %v1998_v31, %s13408_s4  ;;  %2013 = vrot.lane.b32.xlu0 %v1988_v32, %s13409_s30 }
 0x878   :  { %2031 = vrot.lane.b32.xlu1 %v1997_v38, %s13406_s12  ;;  %2025 = vrot.lane.b32.xlu0 %v1987_v39, %s13407_s28 }
 0x87c   :  { %2017 = vrot.lane.b32.xlu1 %v1997_v38, %s13408_s4  ;;  %2011 = vrot.lane.b32.xlu0 %v1987_v39, %s13409_s30 }
 0x880   :  { %2001 = vrot.lane.b32.xlu1 %v1997_v38, %s13403_s20  ;;  %2003 = vrot.lane.b32.xlu0 %v1998_v31, %s13403_s20 }
 0x884   :  { %2041 = vperm.xlu1 %11000, %v1973_v40   ;;  %2046 = vperm.xlu0 %10999, %v1974_v41  }
 0x8e2   :  { %v2034_v42 = vpop.permute.xlu1 %2033  ;;  %v2028_v43 = vpop.permute.xlu0 %2027 }
 0x8e3   :  { %v2038_v44 = vsel %vm1772_vm1, %v2028_v43, %v2034_v42 }
 0x8e4   :  { %10126 = vmatprep.subr.mxu0 %v2038_v44 }
 0x8e5   :  { %10127 = vmatpush3.msra.mxu0 %v2038_v44 }
 0x8e6   :  { %v2020_v45 = vpop.permute.xlu1 %2019  ;;  %v2014_v46 = vpop.permute.xlu0 %2013 }
 0x8e7   :  { %v2024_v50 = vsel %vm1772_vm1, %v2014_v46, %v2020_v45  ;;  %v2143_v45 = vld [vmem:[#allocation146] sm:$0xff] }
 0x8ea   :  { %v2032_v47 = vpop.permute.xlu1 %2031  ;;  %v2026_v48 = vpop.permute.xlu0 %2025 }
 0x8eb   :  { %v2037_v49 = vsel %vm1772_vm1, %v2026_v48, %v2032_v47  ;;  %v2399_v47 = vld [vmem:[#allocation149] sm:$0xff] }
 0x8ec   :  { %10128 = vmatprep.subr.mxu0 %v2037_v49 }
 0x8ed   :  { %10129 = vmatpush3.msra.mxu0 %v2037_v49 }
 0x8ee   :  { %v2018_v51 = vpop.permute.xlu1 %2017  ;;  %10130 = vmatprep.subr.mxu0 %v2024_v50  ;;  %v2012_v52 = vpop.permute.xlu0 %2011 }
 0x8ef   :  { %10131 = vmatpush3.msra.mxu0 %v2024_v50  ;;  %v2023_v53 = vsel %vm1772_vm1, %v2012_v52, %v2018_v51 }
 0x8f0   :  { %10132 = vmatprep.subr.mxu0 %v2023_v53 }
 0x8f1   :  { %10133 = vmatpush3.msra.mxu0 %v2023_v53 }
 0x8f2   :  { %v2002_v54 = vpop.permute.xlu1 %2001  ;;  %v2004_v55 = vpop.permute.xlu0 %2003 }
 0x8f3   :  { %v2008_v56 = vsel %vm1772_vm1, %v1988_v32, %v2004_v55  ;;  %v2007_v57 = vsel %vm1772_vm1, %v1987_v39, %v2002_v54 }
 0x8f4   :  { %10134 = vmatprep.subr.mxu0 %v2008_v56 }
 0x8f5   :  { %10135 = vmatpush3.msra.mxu0 %v2008_v56 }
 0x8f6   :  { %10136 = vmatprep.subr.mxu0 %v2007_v57 }
 0x8f7   :  { %10137 = vmatpush3.msra.mxu0 %v2007_v57 }
 0x8f8   :  { %10139 = vmatmul.mubr.msk.f32.vlgmr.msra.gmra.mxu0 %vm2049_vm5, %v1972_v58  ;;  %10156 = vmatprep.subr.mxu0 %v13410_v13 }
 0x8f9   :  { %10162 = vmatprep.mubr.msk.f32.mxu0 %vm13411_vm6, %v13410_v13 }
 0x8ff   :  { %v2047_v59 = vpop.permute.xlu0 %2046  ;;  %v2042_v62 = vpop.permute.xlu1 %2041 }
 0x9b8   :  { %v10140_v60 = vpop.f32.mrf.mxu0 }
 0x9b9   :  { %v2128_v61 = vadd.f32 %v10140_v60, %v2047_v59 }
 0x9ba   :  { %v2122_v63 = vpop.f32.mrf.mxu0 }
 0x9bb   :  { %v2132_v0 = vmax.f32 %v2128_v61, 0.0  ;;  %v2123_v1 = vadd.f32 %v2122_v63, %v2042_v62 }
 0x9bd   :  { %v2134_v2 = vadd.f32 3.0, %v2132_v0  ;;  %v2131_v3 = vmax.f32 %v2123_v1, 0.0 }
 0x9bf   :  { %v2136_v4 = vmax.f32 %v2134_v2, 0.0  ;;  %v2133_v5 = vadd.f32 3.0, %v2131_v3 }
 0x9c1   :  { %v2138_v6 = vmin.f32 %v2136_v4, 6.0  ;;  %v2135_v7 = vmax.f32 %v2133_v5, 0.0  ;;  %v2481_v4 = vld [vmem:[#allocation151] sm:$0xf] }
 0x9c3   :  { %v2140_v8 = vmul.f32 %v2138_v6, %v2132_v0  ;;  %v2137_v9 = vmin.f32 %v2135_v7, 6.0 }
 0x9c5   :  { %v14338_v10 = vmul.f32 0.16666667, %v2140_v8  ;;  %v2139_v11 = vmul.f32 %v2137_v9, %v2131_v3 }
 0x9c7   :  { %2159 = vrot.lane.b32.xlu1 %v14338_v10, %s13404_s21  ;;  %2149 = vrot.lane.b32.xlu0 %v14338_v10, %s13405_s13  ;;  %v14344_v12 = vmul.f32 0.16666667, %v2139_v11 }
 0x9cb   :  { %2157 = vrot.lane.b32.xlu1 %v14344_v12, %s13404_s21  ;;  %2147 = vrot.lane.b32.xlu0 %v14344_v12, %s13405_s13 }
 0xa39   :  { %v2160_v15 = vpop.permute.xlu1 %2159  ;;  %v2150_v16 = vpop.permute.xlu0 %2149 }
 0xa3a   :  { %v2164_v18 = vsel %vm1983_vm3, 0.0, %v2160_v15  ;;  %v2154_v19 = vsel %vm1983_vm3, 0.0, %v2150_v16  ;;  %v2286_v15 = vld [vmem:[#allocation148] sm:$0xff] }
 0xa3b   :  { %v2166_v20 = vsel %vm1986_vm4, %v2164_v18, 0.0  ;;  %v2156_v21 = vsel %vm1986_vm4, %v2154_v19, 0.0 }
 0xa3c   :  { %2201 = vrot.lane.b32.xlu1 %v2166_v20, %s13406_s12  ;;  %2195 = vrot.lane.b32.xlu0 %v2156_v21, %s13407_s28 }
 0xa3d   :  { %v2158_v22 = vpop.permute.xlu1 %2157  ;;  %v2148_v23 = vpop.permute.xlu0 %2147 }
 0xa3e   :  { %v2163_v24 = vsel %vm1983_vm3, 0.0, %v2158_v22  ;;  %v2153_v25 = vsel %vm1983_vm3, 0.0, %v2148_v23 }
 0xa3f   :  { %v2165_v26 = vsel %vm1986_vm4, %v2163_v24, 0.0  ;;  %v2155_v27 = vsel %vm1986_vm4, %v2153_v25, 0.0 }
 0xa40   :  { %2187 = vrot.lane.b32.xlu1 %v2166_v20, %s13408_s4  ;;  %2181 = vrot.lane.b32.xlu0 %v2156_v21, %s13409_s30 }
 0xa44   :  { %2199 = vrot.lane.b32.xlu1 %v2165_v26, %s13406_s12  ;;  %2193 = vrot.lane.b32.xlu0 %v2155_v27, %s13407_s28 }
 0xa48   :  { %2185 = vrot.lane.b32.xlu1 %v2165_v26, %s13408_s4  ;;  %2179 = vrot.lane.b32.xlu0 %v2155_v27, %s13409_s30 }
 0xa4c   :  { %2169 = vrot.lane.b32.xlu1 %v2165_v26, %s13403_s20  ;;  %2171 = vrot.lane.b32.xlu0 %v2166_v20, %s13403_s20 }
 0xa50   :  { %2403 = vperm.xlu1 %11000, %v2400_v28   ;;  %2209 = vperm.xlu0 %10999, %v2144_v29  }
 0xaae   :  { %v2202_v30 = vpop.permute.xlu1 %2201  ;;  %v2196_v31 = vpop.permute.xlu0 %2195 }
 0xaaf   :  { %v2206_v32 = vsel %vm1772_vm1, %v2196_v31, %v2202_v30 }
 0xab0   :  { %10142 = vmatpush3.msra.mxu1 %v2206_v32 }
 0xab1   :  { %10143 = vmatprep.subr.mxu1 %v13410_v13 }
 0xab2   :  { %v2188_v33 = vpop.permute.xlu1 %2187  ;;  %v2182_v34 = vpop.permute.xlu0 %2181 }
 0xab3   :  { %v2192_v38 = vsel %vm1772_vm1, %v2182_v34, %v2188_v33  ;;  %v2585_v34 = vld [vmem:[#allocation153] sm:$0xf] }
 0xab6   :  { %v2200_v35 = vpop.permute.xlu1 %2199  ;;  %v2194_v36 = vpop.permute.xlu0 %2193 }
 0xab7   :  { %v2205_v37 = vsel %vm1772_vm1, %v2194_v36, %v2200_v35  ;;  %v2768_v35 = vld [vmem:[%s15553_s0] sm:$0xf] }
 0xab8   :  { %10144 = vmatpush3.msra.mxu1 %v2205_v37  ;;  %v2583_v37 = vld [vmem:[%s15554_s7] sm:$0xf] }
 0xab9   :  { %10145 = vmatprep.subr.mxu1 %v13410_v13 }
 0xaba   :  { %v2186_v39 = vpop.permute.xlu1 %2185  ;;  %10146 = vmatpush3.msra.mxu1 %v2192_v38  ;;  %v2180_v40 = vpop.permute.xlu0 %2179 }
 0xabb   :  { %10147 = vmatprep.subr.mxu1 %v13410_v13  ;;  %v2191_v41 = vsel %vm1772_vm1, %v2180_v40, %v2186_v39 }
 0xabc   :  { %10148 = vmatpush3.msra.mxu1 %v2191_v41  ;;  %v2584_v41 = vld [vmem:[%s15554_s7 + $0x4] sm:$0xf] }
 0xabd   :  { %10149 = vmatprep.subr.mxu1 %v13410_v13 }
 0xabe   :  { %v2170_v42 = vpop.permute.xlu1 %2169  ;;  %v2172_v43 = vpop.permute.xlu0 %2171 }
 0xabf   :  { %v2176_v44 = vsel %vm1772_vm1, %v2156_v21, %v2172_v43  ;;  %v2175_v46 = vsel %vm1772_vm1, %v2155_v27, %v2170_v42  ;;  %v2480_v21 = vld [vmem:[#allocation152] sm:$0xf]  ;;  %v2767_v43 = vld [vmem:[%s15555_s25] sm:$0xf] }
 0xac0   :  { %10150 = vmatpush3.msra.mxu1 %v2176_v44 }
 0xac1   :  { %10151 = vmatprep.subr.mxu1 %v13410_v13 }
 0xac2   :  { %10152 = vmatpush3.msra.mxu1 %v2175_v46 }
 0xac3   :  { %10154 = vmatmul.mubr.msk.f32.vlgmr.msra.gmra.mxu1 %vm2049_vm5, %v2143_v45  ;;  %10165 = vmatprep.subr.mxu1 %v13410_v13 }
 0xac4   :  { %10166 = vmatpush3.msra.mxu1 %v14338_v10  ;;  %10169 = vmatprep.mubr.msk.f32.mxu1 %vm13411_vm6, %v13410_v13 }
 0xac5   :  { %10167 = vmatprep.subr.mxu1 %v13410_v13 }
 0xac6   :  { %10168 = vmatpush3.msra.mxu1 %v14344_v12 }
 0xac7   :  { %10170 = vmatmul.mubr.msk.f32.vlgmr.msra.gmra.mxu1 %vm1772_vm1, %v2399_v47  ;;  %10179 = vmatprep.subr.mxu1 %v13410_v13 }
 0xac8   :  { %10181 = vmatprep.mubr.msk.f32.mxu1 %vm13411_vm6, %v13410_v13 }
 0xacb   :  { %v2210_v48 = vpop.permute.xlu0 %2209  ;;  %v2404_v53 = vpop.permute.xlu1 %2403 }
 0xb83   :  { %v2281_v49 = vpop.f32.mrf.mxu1 }
 0xb84   :  { %v2282_v50 = vadd.f32 %v2281_v49, %v2210_v48 }
 0xb85   :  { %v10155_v51 = vpop.f32.mrf.mxu1 }
 0xb86   :  { %v2285_v52 = vmax.f32 %v2282_v50, 0.0 }
 0xb87   :  { %v2475_v54 = vpop.f32.mrf.mxu1 }
 0xb88   :  { %v2476_v55 = vadd.f32 %v2475_v54, %v2404_v53  ;;  %2294 = vrot.lane.b32.xlu1 %v2285_v52, %s13404_s21  ;;  %2289 = vrot.lane.b32.xlu0 %v2285_v52, %s13405_s13 }
 0xb89   :  { %v10171_v56 = vpop.f32.mrf.mxu1 }
 0xb8a   :  { %v14400_v57 = vmax.f32 %v2476_v55, 0.0 }
 0xb8c   :  { %2487 = vrot.lane.b32.xlu1 %v14400_v57, %s13404_s21  ;;  %2483 = vrot.lane.b32.xlu0 %v14400_v57, %s13405_s13 }
 0xbfa   :  { %v2295_v58 = vpop.permute.xlu1 %2294  ;;  %v2290_v59 = vpop.permute.xlu0 %2289 }
 0xbfb   :  { %v2297_v60 = vsel %vm1983_vm3, 0.0, %v2295_v58  ;;  %v2292_v61 = vsel %vm1983_vm3, 0.0, %v2290_v59 }
 0xbfc   :  { %v2298_v62 = vsel %vm1986_vm4, %v2297_v60, 0.0  ;;  %v2293_v63 = vsel %vm1986_vm4, %v2292_v61, 0.0 }
 0xbfd   :  { %2315 = vrot.lane.b32.xlu1 %v2298_v62, %s13406_s12  ;;  %2312 = vrot.lane.b32.xlu0 %v2293_v63, %s13407_s28 }
 0xbfe   :  { %v2484_v0 = vpop.permute.xlu0 %2483  ;;  %v2488_v2 = vpop.permute.xlu1 %2487 }
 0xbff   :  { %v2486_v1 = vsel %vm1983_vm3, 0.0, %v2484_v0  ;;  %v2490_v3 = vsel %vm1983_vm3, 0.0, %v2488_v2  ;;  %v2850_v0 = vld [vmem:[%s15556_s3] sm:$0x3] }
 0xc01   :  { %2308 = vrot.lane.b32.xlu1 %v2298_v62, %s13408_s4  ;;  %2305 = vrot.lane.b32.xlu0 %v2293_v63, %s13409_s30 }
 0xc05   :  { %2300 = vrot.lane.b32.xlu0 %v2298_v62, %s13403_s20  ;;  %2497 = vrot.lane.b32.xlu1 %v2486_v1, %s13409_s30  ;;  %v2852_v62 = vld [vmem:[#allocation154] sm:$0x3] }
 0xc09   :  { %2500 = vrot.lane.b32.xlu0 %v2490_v3, %s13408_s4  ;;  %2492 = vrot.lane.b32.xlu1 %v2490_v3, %s13403_s20 }
 0xc0d   :  { %2506 = vperm.xlu0 %10999, %v2481_v4   ;;  %v2851_v4 = vld [vmem:[%s15556_s3 + $0x2] sm:$0x3] }
 0xc6f   :  { %v2316_v5 = vpop.permute.xlu1 %2315  ;;  %v2313_v6 = vpop.permute.xlu0 %2312 }
 0xc70   :  { %v2318_v7 = vsel %vm1772_vm1, %v2313_v6, %v2316_v5 }
 0xc71   :  { %10157 = vmatpush3.msra.mxu0 %v2318_v7 }
 0xc72   :  { %10158 = vmatprep.subr.mxu0 %v13410_v13 }
 0xc73   :  { %v2309_v8 = vpop.permute.xlu1 %2308  ;;  %v2306_v9 = vpop.permute.xlu0 %2305 }
 0xc74   :  { %v2311_v10 = vsel %vm1772_vm1, %v2306_v9, %v2309_v8 }
 0xc75   :  { %10159 = vmatpush3.msra.mxu0 %v2311_v10 }
 0xc76   :  { %10160 = vmatprep.subr.mxu0 %v13410_v13 }
 0xc77   :  { %v2498_v11 = vpop.permute.xlu1 %2497  ;;  %v2301_v12 = vpop.permute.xlu0 %2300 }
 0xc78   :  { %v2303_v16 = vsel %vm1772_vm1, %v2293_v63, %v2301_v12 }
 0xc79   :  { %10161 = vmatpush3.msra.mxu0 %v2303_v16 }
 0xc7a   :  { %10163 = vmatmul.mubr.msk.f32.vlgmr.msra.gmra.mxu0 %vm2324_vm7, %v2286_v15  ;;  %10172 = vmatprep.subr.mxu0 %v13410_v13 }
 0xc7b   :  { %v2493_v18 = vpop.permute.xlu1 %2492  ;;  %v2501_v19 = vpop.permute.xlu0 %2500  ;;  %10176 = vmatprep.mubr.msk.f32.mxu0 %vm13411_vm6, %v13410_v13 }
 0xc7c   :  { %v2503_v20 = vsel %vm1772_vm1, %v2498_v11, %v2501_v19  ;;  %v2495_v22 = vsel %vm1772_vm1, %v2486_v1, %v2493_v18 }
 0xc7d   :  { %10173 = vmatpush3.msra.mxu0 %v2503_v20 }
 0xc7e   :  { %10174 = vmatprep.subr.mxu0 %v13410_v13 }
 0xc7f   :  { %10175 = vmatpush3.msra.mxu0 %v2495_v22  ;;  %v3221_v22 = vld [vmem:[%s15558_s10] sm:$0x3] }
 0xc80   :  { %10177 = vmatmul.mubr.msk.f32.vlgmr.msra.gmra.mxu0 %vm1772_vm1, %v2480_v21  ;;  %10184 = vmatprep.subr.mxu0 %v13410_v13  ;;  %v3037_v21 = vld [vmem:[%s15557_s19] sm:$0x3] }
 0xc81   :  { %10186 = vmatprep.mubr.msk.f32.mxu0 %vm13411_vm6, %v13410_v13 }
 0xc88   :  { %v2507_v25 = vpop.permute.xlu0 %2506 }
 0xd3a   :  { %v14435_v23 = vpop.f32.mrf.mxu0 }
 0xd3c   :  { %v10164_v24 = vpop.f32.mrf.mxu0 }
 0xd3d   :  { %v3305_v24 = vld [vmem:[%s15559_s9] sm:$0xff] }
 0xd40   :  { %v2578_v26 = vpop.f32.mrf.mxu0 }
 0xd41   :  { %v2579_v27 = vadd.f32 %v2578_v26, %v2507_v25  ;;  %v2287_v25 = vld [vmem:[%s15560_s16] sm:$0xff]  ;;  %v3389_v26 = vld [vmem:[%s15561_s5 + $0x8] sm:$0xff] }
 0xd42   :  { %v10178_v28 = vpop.f32.mrf.mxu0 }
 0xd43   :  { %v2582_v29 = vmax.f32 %v2579_v27, 0.0  ;;  %v3388_v27 = vld [vmem:[%s15561_s5] sm:$0xff]  ;;  %v3403_v28 = vld [vmem:[%s15562_s14 + $0x8] sm:$0xff] }
 0xd45   :  { %2591 = vrot.lane.b32.xlu0 %v2582_v29, %s13404_s21  ;;  %2587 = vrot.lane.b32.xlu1 %v2582_v29, %s13405_s13  ;;  %v3402_v29 = vld [vmem:[%s15562_s14] sm:$0xff] }
 0xdb7   :  { %v2592_v30 = vpop.permute.xlu0 %2591  ;;  %v2588_v31 = vpop.permute.xlu1 %2587 }
 0xdb8   :  { %v2594_v32 = vsel %vm1983_vm3, 0.0, %v2592_v30  ;;  %v2590_v33 = vsel %vm1983_vm3, 0.0, %v2588_v31  ;;  %v3035_v31 = vld [vmem:[%s15563_s24] sm:$0x3] }
 0xdb9   :  { %2596 = vrot.lane.b32.xlu1 %v2594_v32, %s13403_s20  ;;  %2601 = vrot.lane.b32.xlu0 %v2590_v33, %s13409_s30 }
 0xdbd   :  { %2604 = vrot.lane.b32.xlu1 %v2594_v32, %s13408_s4  ;;  %2762 = vperm.xlu0 %10999, %v2585_v34  }
 0xdc1   :  { %2771 = vperm.xlu1 %11000, %v2768_v35   ;;  %v3036_v35 = vld [vmem:[%s15563_s24 + $0x2] sm:$0x3] }
 0xe2b   :  { %v2597_v36 = vpop.permute.xlu1 %2596  ;;  %v2602_v39 = vpop.permute.xlu0 %2601 }
 0xe2c   :  { %v2599_v38 = vsel %vm1772_vm1, %v2590_v33, %v2597_v36 }
 0xe2d   :  { %10185 = vmatpush3.msk.msra.mxu0 %vm1795_vm2, %v2599_v38 }
 0xe2e   :  { %10187 = vmatmul.mubr.msk.f32.vlgmr.msra.gmra.mxu0 %vm1788_vm0, %v2583_v37  ;;  %10194 = vmatprep.subr.mxu0 %v13410_v13  ;;  %v3220_v37 = vld [vmem:[%s15564_s18] sm:$0x3] }
 0xe2f   :  { %v2605_v40 = vpop.permute.xlu1 %2604  ;;  %10196 = vmatprep.mubr.msk.f32.mxu0 %vm13411_vm6, %v13410_v13 }
 0xe30   :  { %v2607_v42 = vsel %vm1772_vm1, %v2602_v39, %v2605_v40 }
 0xe31   :  { %10180 = vmatpush3.msk.msra.mxu1 %vm1795_vm2, %v2607_v42 }
 0xe32   :  { %10182 = vmatmul.mubr.msk.f32.vlgmr.msra.gmra.mxu1 %vm1788_vm0, %v2584_v41  ;;  %10189 = vmatprep.subr.mxu1 %v13410_v13 }
 0xe33   :  { %10190 = vmatpush3.msra.mxu1 %v14400_v57  ;;  %10191 = vmatprep.mubr.msk.f32.mxu1 %vm13411_vm6, %v13410_v13 }
 0xe34   :  { %10199 = vmatprep.subr.mxu1 %v13410_v13 }
 0xe36   :  { %10192 = vmatmul.mubr.msk.f32.vlgmr.msra.gmra.mxu1 %vm2774_vm8, %v2767_v43 }
 0xe37   :  { %10201 = vmatprep.mubr.msk.f32.mxu1 %vm13411_vm6, %v13410_v13 }
 0xe38   :  { %v2763_v48 = vpop.permute.xlu0 %2762 }
 0xe3c   :  { %v2772_v51 = vpop.permute.xlu1 %2771 }
 0xeee   :  { %v2756_v44 = vpop.f32.mrf.mxu0 }
 0xef0   :  { %v10188_v45 = vpop.f32.mrf.mxu0 }
 0xef2   :  { %v2680_v46 = vpop.f32.mrf.mxu1 }
 0xef3   :  { %v2757_v47 = vadd.f32 %v2756_v44, %v2680_v46 }
 0xef4   :  { %v10183_v49 = vpop.f32.mrf.mxu1 }
 0xef5   :  { %v2765_v50 = vadd.f32 %v2763_v48, %v2757_v47 }
 0xef6   :  { %v2844_v52 = vpop.f32.mrf.mxu1 }
 0xef7   :  { %v2766_v53 = vmax.f32 %v2765_v50, 0.0  ;;  %v2845_v54 = vadd.f32 %v2844_v52, %v2772_v51  ;;  %v3304_v52 = vld [vmem:[%s15565_s22] sm:$0xff] }
 0xef8   :  { %v10193_v55 = vpop.f32.mrf.mxu1 }
 0xef9   :  { %v2848_v56 = vadd.f32 %v2845_v54, %v2766_v53 }
 0xefb   :  { %v14465_v57 = vmax.f32 %v2848_v56, 0.0 }
 0xefd   :  { %2859 = vrot.lane.b32.xlu1 %v14465_v57, %s13412_s17  ;;  %2854 = vrot.lane.b32.xlu0 %v14465_v57, %s13348_s2 }
 0xf6f   :  { %v2860_v58 = vpop.permute.xlu1 %2859  ;;  %v2855_v59 = vpop.permute.xlu0 %2854 }
 0xf70   :  { %v2862_v60 = vsel %vm2857_vm9, 0.0, %v2860_v58  ;;  %v2858_v61 = vsel %vm2857_vm9, 0.0, %v2855_v59 }
 0xf71   :  { %2864 = vrot.lane.b32.xlu0 %v2862_v60, %s13403_s20  ;;  %2869 = vrot.lane.b32.xlu1 %v2858_v61, %s13407_s28 }
 0xf75   :  { %2872 = vrot.lane.b32.xlu0 %v2862_v60, %s13406_s12  ;;  %3030 = vperm.xlu1 %11000, %v2852_v62  }
 0xfe3   :  { %v2865_v63 = vpop.permute.xlu0 %2864  ;;  %v2870_v2 = vpop.permute.xlu1 %2869 }
 0xfe4   :  { %v2867_v1 = vsel %vm1772_vm1, %v2858_v61, %v2865_v63 }
 0xfe5   :  { %10200 = vmatpush3.msk.msra.mxu1 %vm1795_vm2, %v2867_v1 }
 0xfe6   :  { %10202 = vmatmul.mubr.msk.f32.vlgmr.msra.gmra.mxu1 %vm1788_vm0, %v2850_v0  ;;  %10209 = vmatprep.subr.mxu1 %v13410_v13 }
 0xfe7   :  { %v2873_v3 = vpop.permute.xlu0 %2872  ;;  %10211 = vmatprep.mubr.msk.f32.mxu1 %vm13411_vm6, %v13410_v13 }
 0xfe8   :  { %v2875_v5 = vsel %vm1772_vm1, %v2870_v2, %v2873_v3 }
 0xfe9   :  { %10195 = vmatpush3.msk.msra.mxu0 %vm1795_vm2, %v2875_v5 }
 0xfea   :  { %10197 = vmatmul.mubr.msk.f32.vlgmr.msra.gmra.mxu0 %vm1788_vm0, %v2851_v4  ;;  %10204 = vmatprep.subr.mxu0 %v13410_v13 }
 0xfeb   :  { %10206 = vmatprep.mubr.msk.f32.mxu0 %vm13411_vm6, %v13410_v13 }
 0xff0   :  { %v3031_v10 = vpop.permute.xlu1 %3030 }
0x10a6   :  { %v3024_v6 = vpop.f32.mrf.mxu1 }
0x10a8   :  { %v10203_v7 = vpop.f32.mrf.mxu1 }
0x10aa   :  { %v2948_v8 = vpop.f32.mrf.mxu0 }
0x10ab   :  { %v3025_v9 = vadd.f32 %v3024_v6, %v2948_v8 }
0x10ac   :  { %v10198_v11 = vpop.f32.mrf.mxu0 }
0x10ad   :  { %v3033_v12 = vadd.f32 %v3031_v10, %v3025_v9 }
0x10af   :  { %v3034_v15 = vmax.f32 %v3033_v12, 0.0 }
0x10b1   :  { %3043 = vrot.lane.b32.xlu1 %v3034_v15, %s13412_s17  ;;  %3039 = vrot.lane.b32.xlu0 %v3034_v15, %s13348_s2 }
0x1123   :  { %v3044_v16 = vpop.permute.xlu1 %3043  ;;  %v3040_v18 = vpop.permute.xlu0 %3039 }
0x1124   :  { %v3046_v19 = vsel %vm2857_vm9, 0.0, %v3044_v16  ;;  %v3042_v20 = vsel %vm2857_vm9, 0.0, %v3040_v18 }
0x1125   :  { %3048 = vrot.lane.b32.xlu0 %v3046_v19, %s13403_s20  ;;  %3053 = vrot.lane.b32.xlu1 %v3042_v20, %s13407_s28 }
0x1129   :  { %3056 = vrot.lane.b32.xlu0 %v3046_v19, %s13406_s12  ;;  %3215 = vperm.xlu1 %11000, %v3037_v21  }
0x112d   :  { %3224 = vperm.xlu0 %10999, %v3221_v22   ;;  %3308 = vperm.xlu1 %11000, %v3305_v24  }
0x1131   :  { %2321 = vperm.xlu0 %10999, %v2287_v25   ;;  %3397 = vperm.xlu1 %11000, %v3389_v26  }
0x1135   :  { %3392 = vperm.xlu0 %10999, %v3388_v27   ;;  %3411 = vperm.xlu1 %11000, %v3403_v28  }
0x1139   :  { %3406 = vperm.xlu0 %10999, %v3402_v29  }
0x1197   :  { %v3049_v30 = vpop.permute.xlu0 %3048  ;;  %v3054_v33 = vpop.permute.xlu1 %3053 }
0x1198   :  { %v3051_v32 = vsel %vm1772_vm1, %v3042_v20, %v3049_v30  ;;  %v3429_v20 = vld [vmem:[#allocation10 + $0x8] sm:$0xff] }
0x1199   :  { %10210 = vmatpush3.msk.msra.mxu1 %vm3063_vm10, %v3051_v32 }
0x119a   :  { %10212 = vmatmul.mubr.msk.f32.vlgmr.msra.gmra.mxu1 %vm2857_vm9, %v3035_v31  ;;  %10219 = vmatprep.subr.mxu1 %v13410_v13  ;;  %v3618_v31 = vld [vmem:[#allocation16] sm:$0xff] }
0x119b   :  { %v3057_v34 = vpop.permute.xlu0 %3056  ;;  %10221 = vmatprep.mubr.msk.f32.mxu1 %vm13411_vm6, %v13410_v13 }
0x119c   :  { %v3059_v36 = vsel %vm1772_vm1, %v3054_v33, %v3057_v34  ;;  %v3620_v33 = vld [vmem:[#allocation14] sm:$0xff]  ;;  %v3621_v34 = vld [vmem:[#allocation14 + $0x8] sm:$0xff] }
0x119d   :  { %10205 = vmatpush3.msk.msra.mxu0 %vm3063_vm10, %v3059_v36 }
0x119e   :  { %10207 = vmatmul.mubr.msk.f32.vlgmr.msra.gmra.mxu0 %vm2857_vm9, %v3036_v35  ;;  %10214 = vmatprep.subr.mxu0 %v13410_v13 }
0x119f   :  { %10215 = vmatpush3.msk.msra.mxu0 %vm1795_vm2, %v14465_v57  ;;  %10216 = vmatprep.mubr.msk.f32.mxu0 %vm13411_vm6, %v13410_v13 }
0x11a2   :  { %10217 = vmatmul.mubr.msk.f32.vlgmr.msra.gmra.mxu0 %vm1788_vm0, %v3220_v37 }
0x11a4   :  { %v3216_v42 = vpop.permute.xlu1 %3215 }
0x11a8   :  { %v3225_v45 = vpop.permute.xlu0 %3224  ;;  %v3309_v57 = vpop.permute.xlu1 %3308 }
0x11ac   :  { %v2322_v53 = vpop.permute.xlu0 %2321  ;;  %v3398_v61 = vpop.permute.xlu1 %3397 }
0x11ad   :  { %v2395_v54 = vadd.f32 %v14435_v23, %v2322_v53 }
0x11af   :  { %v2398_v56 = vmax.f32 %v2395_v54, 0.0 }
0x11b0   :  { %v3393_v55 = vpop.permute.xlu0 %3392  ;;  %v3412_v4 = vpop.permute.xlu1 %3411 }
0x11b1   :  { %v3400_v59 = vmul.f32 %v3393_v55, %v2398_v56 }
0x11b4   :  { %v3407_v58 = vpop.permute.xlu0 %3406 }
0x11b5   :  { %v3414_v60 = vadd.f32 %v3407_v58, %v3400_v59 }
0x11b7   :  { %v3416_v0 = vadd.f32 3.0, %v3414_v60 }
0x11b9   :  { %v3418_v5 = vmax.f32 %v3416_v0, 0.0 }
0x11bb   :  { %v3420_v8 = vmin.f32 %v3418_v5, 6.0 }
0x11bd   :  { %v3422_v10 = vmul.f32 %v3420_v8, %v3414_v60  ;;  %v3430_v60 = vld [vmem:[#allocation8] sm:$0xff] }
0x11bf   :  { %v3424_v15 = vmul.f32 0.16666667, %v3422_v10 }
0x11c1   :  { %v14535_v18 = vadd.f32 %v3424_v15, %v14296_v17 }
0x125a   :  { %v3209_v38 = vpop.f32.mrf.mxu1 }
0x125c   :  { %v10213_v39 = vpop.f32.mrf.mxu1 }
0x125e   :  { %v3133_v40 = vpop.f32.mrf.mxu0 }
0x125f   :  { %v3210_v41 = vadd.f32 %v3209_v38, %v3133_v40 }
0x1260   :  { %v10208_v43 = vpop.f32.mrf.mxu0 }
0x1261   :  { %v3218_v44 = vadd.f32 %v3216_v42, %v3210_v41 }
0x1262   :  { %v3298_v46 = vpop.f32.mrf.mxu0 }
0x1263   :  { %v3219_v47 = vmax.f32 %v3218_v44, 0.0  ;;  %v3299_v48 = vadd.f32 %v3298_v46, %v3225_v45 }
0x1264   :  { %v10218_v49 = vpop.f32.mrf.mxu0 }
0x1265   :  { %v3302_v50 = vadd.f32 %v3299_v48, %v3219_v47 }
0x1267   :  { %v3303_v51 = vmax.f32 %v3302_v50, 0.0 }
0x1269   :  { %10220 = vmatpush3.msk.msra.mxu1 %vm3063_vm10, %v3303_v51  ;;  %v3619_v51 = vld [vmem:[#allocation16 + $0x8] sm:$0xff] }
0x126a   :  { %10222 = vmatmul.mubr.msk.f32.vlgmr.msra.gmra.mxu1 %vm2857_vm9, %v3304_v52 }
0x132a   :  { %v3383_v62 = vpop.f32.mrf.mxu1 }
0x132b   :  { %v3384_v63 = vadd.f32 %v3383_v62, %v3309_v57  ;;  %v3523_v62 = vld [vmem:[#allocation13] sm:$0xff] }
0x132c   :  { %v10223_v1 = vpop.f32.mrf.mxu1  ;;  %10235 = vmatprep.mubr.msk.f32.mxu1 %vm1772_vm1, %v3523_v62 }
0x132d   :  { %v3387_v2 = vmax.f32 %v3384_v63, 0.0 }
0x132f   :  { %v3401_v3 = vmul.f32 %v3398_v61, %v3387_v2  ;;  %v3431_v61 = vld [vmem:[#allocation8 + $0x8] sm:$0xff] }
0x1331   :  { %v3415_v6 = vadd.f32 %v3412_v4, %v3401_v3 }
0x1333   :  { %v3417_v7 = vadd.f32 3.0, %v3415_v6 }
0x1335   :  { %v3419_v9 = vmax.f32 %v3417_v7, 0.0 }
0x1337   :  { %v3421_v23 = vmin.f32 %v3419_v9, 6.0 }
0x1339   :  { %v3423_v11 = vmul.f32 %v3421_v23, %v3415_v6 }
0x133b   :  { %v3425_v12 = vmul.f32 0.16666667, %v3423_v11 }
0x133d   :  { %v14528_v16 = vadd.f32 %v3425_v12, %v14294_v14  ;;  %v3428_v14 = vld [vmem:[#allocation10] sm:$0xff] }
0x133e   :  { %10228 = vmatprep.mubr.msk.f32.mxu0 %vm1772_vm1, %v3428_v14  ;;  %v3524_v14 = vld [vmem:[#allocation13 + $0x8] sm:$0xff] }
0x133f   :  { %3636 = vrot.lane.b32.xlu0 %v14528_v16, %s13404_s21  ;;  %3626 = vrot.lane.b32.xlu1 %v14528_v16, %s13405_s13 }
0x1340   :  { %10224 = vmatprep.subr.mxu0 %v14528_v16 }
0x1341   :  { %10225 = vmatpush3.msra.mxu0 %v14528_v16 }
0x1342   :  { %10226 = vmatprep.subr.mxu0 %v14535_v18 }
0x1343   :  { %10227 = vmatpush3.msra.mxu0 %v14535_v18  ;;  %3634 = vrot.lane.b32.xlu0 %v14535_v18, %s13404_s21 }
0x1344   :  { %3624 = vrot.lane.b32.xlu1 %v14535_v18, %s13405_s13  ;;  %10229 = vmatmul.mubr.msk.f32.vlgmr.msra.gmra.mxu0 %vm1772_vm1, %v3429_v20  ;;  %v3778_v20 = vld [vmem:[#allocation17 + $0x8] sm:$0xff] }
0x1345   :  { %10250 = vmatprep.mubr.msk.f32.mxu0 %vm2049_vm5, %v3618_v31 }
0x13b1   :  { %v3637_v19 = vpop.permute.xlu0 %3636  ;;  %v3627_v17 = vpop.permute.xlu1 %3626 }
0x13b2   :  { %v14556_v27 = vsel %vm1983_vm3, 0.0, %v3637_v19  ;;  %v14566_v30 = vsel %vm1983_vm3, 0.0, %v3627_v17  ;;  %v3775_v19 = vld [vmem:[#allocation19] sm:$0xff]  ;;  %v3777_v17 = vld [vmem:[#allocation17] sm:$0xff] }
0x13b3   :  { %v3643_v29 = vsel %vm1986_vm4, %v14556_v27, 0.0  ;;  %v3633_v32 = vsel %vm1986_vm4, %v14566_v30, 0.0 }
0x13b5   :  { %v3635_v21 = vpop.permute.xlu0 %3634 }
0x13b6   :  { %v14548_v22 = vsel %vm1983_vm3, 0.0, %v3635_v21  ;;  %v3625_v24 = vpop.permute.xlu1 %3624  ;;  %v4090_v21 = vld [vmem:[#allocation26] sm:$0xff] }
0x13b7   :  { %v14551_v25 = vsel %vm1983_vm3, 0.0, %v3625_v24  ;;  %v3642_v26 = vsel %vm1986_vm4, %v14548_v22, 0.0 }
0x13b8   :  { %3676 = vrot.lane.b32.xlu0 %v3642_v26, %s13406_s12  ;;  %v3632_v28 = vsel %vm1986_vm4, %v14551_v25, 0.0 }
0x13b9   :  { %3670 = vrot.lane.b32.xlu1 %v3632_v28, %s13407_s28 }
0x13bc   :  { %3678 = vrot.lane.b32.xlu0 %v3643_v29, %s13406_s12 }
0x13bd   :  { %3656 = vrot.lane.b32.xlu1 %v3632_v28, %s13409_s30 }
0x13c0   :  { %3664 = vrot.lane.b32.xlu0 %v3643_v29, %s13408_s4 }
0x13c1   :  { %3672 = vrot.lane.b32.xlu1 %v3633_v32, %s13407_s28 }
0x13c4   :  { %3662 = vrot.lane.b32.xlu0 %v3642_v26, %s13408_s4 }
0x13c5   :  { %3658 = vrot.lane.b32.xlu1 %v3633_v32, %s13409_s30 }
0x13c8   :  { %3646 = vrot.lane.b32.xlu0 %v3642_v26, %s13403_s20 }
0x13c9   :  { %3648 = vrot.lane.b32.xlu1 %v3643_v29, %s13403_s20 }
0x13cc   :  { %3686 = vperm.xlu0 %10999, %v3620_v33  }
0x13cd   :  { %3691 = vperm.xlu1 %11000, %v3621_v34  }
0x1404   :  { %v10230_v52 = vpop.f32.mrf.mxu0 }
0x1406   :  { %v3514_v53 = vpop.f32.mrf.mxu0 }
0x142a   :  { %v3677_v35 = vpop.permute.xlu0 %3676 }
0x142b   :  { %v3671_v36 = vpop.permute.xlu1 %3670 }
0x142c   :  { %v3682_v43 = vsel %vm1772_vm1, %v3671_v36, %v3677_v35 }
0x142e   :  { %v3679_v37 = vpop.permute.xlu0 %3678 }
0x142f   :  { %v3657_v38 = vpop.permute.xlu1 %3656 }
0x1432   :  { %v3665_v39 = vpop.permute.xlu0 %3664 }
0x1433   :  { %v3673_v40 = vpop.permute.xlu1 %3672 }
0x1434   :  { %v3683_v41 = vsel %vm1772_vm1, %v3673_v40, %v3679_v37 }
0x1435   :  { %10238 = vmatprep.subr.mxu0 %v3683_v41 }
0x1436   :  { %10239 = vmatpush3.msra.mxu0 %v3683_v41  ;;  %v3663_v42 = vpop.permute.xlu0 %3662  ;;  %v3776_v41 = vld [vmem:[#allocation19 + $0x8] sm:$0xff] }
0x1437   :  { %v3659_v44 = vpop.permute.xlu1 %3658  ;;  %10240 = vmatprep.subr.mxu0 %v3682_v43  ;;  %v3668_v46 = vsel %vm1772_vm1, %v3657_v38, %v3663_v42 }
0x1438   :  { %10241 = vmatpush3.msra.mxu0 %v3682_v43  ;;  %v3669_v45 = vsel %vm1772_vm1, %v3659_v44, %v3665_v39 }
0x1439   :  { %10242 = vmatprep.subr.mxu0 %v3669_v45 }
0x143a   :  { %10243 = vmatpush3.msra.mxu0 %v3669_v45  ;;  %v3647_v47 = vpop.permute.xlu0 %3646 }
0x143b   :  { %v3649_v48 = vpop.permute.xlu1 %3648  ;;  %10244 = vmatprep.subr.mxu0 %v3668_v46  ;;  %v3652_v50 = vsel %vm1772_vm1, %v3632_v28, %v3647_v47 }
0x143c   :  { %10245 = vmatpush3.msra.mxu0 %v3668_v46  ;;  %v3653_v49 = vsel %vm1772_vm1, %v3633_v32, %v3649_v48 }
0x143d   :  { %10246 = vmatprep.subr.mxu0 %v3653_v49 }
0x143e   :  { %10247 = vmatpush3.msra.mxu0 %v3653_v49 }
0x143f   :  { %10248 = vmatprep.subr.mxu0 %v3652_v50 }
0x1440   :  { %10249 = vmatpush3.msra.mxu0 %v3652_v50 }
0x1441   :  { %10251 = vmatmul.mubr.msk.f32.vlgmr.msra.gmra.mxu0 %vm2049_vm5, %v3619_v51  ;;  %v4089_v51 = vld [vmem:[#allocation28] sm:$0xff] }
0x1447   :  { %v3687_v58 = vpop.permute.xlu0 %3686 }
0x1448   :  { %v3692_v54 = vpop.permute.xlu1 %3691 }
0x1501   :  { %v10252_v55 = vpop.f32.mrf.mxu0 }
0x1502   :  { %v3772_v56 = vadd.f32 %v10252_v55, %v3692_v54 }
0x1503   :  { %v3766_v57 = vpop.f32.mrf.mxu0 }
0x1504   :  { %3793 = vrot.lane.b32.xlu0 %v3772_v56, %s13404_s21  ;;  %3783 = vrot.lane.b32.xlu1 %v3772_v56, %s13405_s13  ;;  %v3767_v59 = vadd.f32 %v3766_v57, %v3687_v58 }
0x1508   :  { %3791 = vrot.lane.b32.xlu0 %v3767_v59, %s13404_s21  ;;  %3781 = vrot.lane.b32.xlu1 %v3767_v59, %s13405_s13 }
0x150c   :  { %3434 = vperm.xlu0 %10999, %v3430_v60   ;;  %3439 = vperm.xlu1 %11000, %v3431_v61  }
0x1576   :  { %v3794_v63 = vpop.permute.xlu0 %3793  ;;  %v3784_v0 = vpop.permute.xlu1 %3783 }
0x1577   :  { %v3798_v1 = vsel %vm1983_vm3, 0.0, %v3794_v63  ;;  %v3788_v2 = vsel %vm1983_vm3, 0.0, %v3784_v0 }
0x1578   :  { %v3800_v3 = vsel %vm1986_vm4, %v3798_v1, 0.0  ;;  %v14594_v4 = vsel %vm1986_vm4, %v3788_v2, 0.0 }
0x1579   :  { %3835 = vrot.lane.b32.xlu0 %v3800_v3, %s13406_s12  ;;  %3829 = vrot.lane.b32.xlu1 %v14594_v4, %s13407_s28 }
0x157a   :  { %v3792_v5 = vpop.permute.xlu0 %3791  ;;  %v3782_v6 = vpop.permute.xlu1 %3781 }
0x157b   :  { %v3797_v7 = vsel %vm1983_vm3, 0.0, %v3792_v5  ;;  %v3787_v8 = vsel %vm1983_vm3, 0.0, %v3782_v6 }
0x157c   :  { %v3799_v9 = vsel %vm1986_vm4, %v3797_v7, 0.0  ;;  %v3789_v23 = vsel %vm1986_vm4, %v3787_v8, 0.0 }
0x157d   :  { %3821 = vrot.lane.b32.xlu0 %v3800_v3, %s13408_s4  ;;  %3815 = vrot.lane.b32.xlu1 %v14594_v4, %s13409_s30 }
0x1581   :  { %3833 = vrot.lane.b32.xlu0 %v3799_v9, %s13406_s12  ;;  %3827 = vrot.lane.b32.xlu1 %v3789_v23, %s13407_s28 }
0x1585   :  { %3819 = vrot.lane.b32.xlu0 %v3799_v9, %s13408_s4  ;;  %3813 = vrot.lane.b32.xlu1 %v3789_v23, %s13409_s30 }
0x1587   :  { %v3435_v10 = vpop.permute.xlu0 %3434  ;;  %v3440_v11 = vpop.permute.xlu1 %3439 }
0x1588   :  { %v3520_v12 = vadd.f32 %v10230_v52, %v3440_v11  ;;  %v3515_v15 = vadd.f32 %v3514_v53, %v3435_v10  ;;  %v3932_v10 = vld [vmem:[#allocation22] sm:$0xff] }
0x1589   :  { %3803 = vrot.lane.b32.xlu0 %v3799_v9, %s13403_s20  ;;  %3805 = vrot.lane.b32.xlu1 %v3800_v3, %s13403_s20 }
0x158a   :  { %10231 = vmatprep.subr.mxu1 %v3520_v12  ;;  %10280 = vmatprep.mubr.msk.f32.mxu0 %vm2049_vm5, %v3932_v10 }
0x158b   :  { %10232 = vmatpush3.msra.mxu1 %v3520_v12 }
0x158c   :  { %10233 = vmatprep.subr.mxu1 %v3515_v15 }
0x158d   :  { %4111 = vrot.lane.b32.xlu0 %v14556_v27, %s13408_s4  ;;  %4105 = vrot.lane.b32.xlu1 %v14566_v30, %s13409_s30 }
0x158e   :  { %10234 = vmatpush3.msra.mxu1 %v3515_v15 }
0x158f   :  { %10236 = vmatmul.mubr.msk.f32.vlgmr.msra.gmra.mxu1 %vm1772_vm1, %v3524_v14 }
0x1590   :  { %10265 = vmatprep.mubr.msk.f32.mxu1 %vm2049_vm5, %v3775_v19 }
0x1591   :  { %4109 = vrot.lane.b32.xlu0 %v14548_v22, %s13408_s4  ;;  %4103 = vrot.lane.b32.xlu1 %v14551_v25, %s13409_s30 }
0x1595   :  { %4093 = vrot.lane.b32.xlu0 %v14548_v22, %s13403_s20  ;;  %4095 = vrot.lane.b32.xlu1 %v14556_v27, %s13403_s20 }
0x1599   :  { %3843 = vperm.xlu0 %10999, %v3777_v17   ;;  %3848 = vperm.xlu1 %11000, %v3778_v20   ;;  %v4198_v17 = vld [vmem:[#allocation29] sm:$0xff]  ;;  %v4301_v20 = vld [vmem:[#allocation32] sm:$0xff] }
0x159d   :  { %4119 = vperm.xlu1 %11000, %v4090_v21  }
0x15eb   :  { %v3836_v24 = vpop.permute.xlu0 %3835  ;;  %v3830_v26 = vpop.permute.xlu1 %3829 }
0x15ec   :  { %v3840_v28 = vsel %vm1772_vm1, %v3830_v26, %v3836_v24 }
0x15ed   :  { %10253 = vmatprep.subr.mxu1 %v3840_v28 }
0x15ee   :  { %10254 = vmatpush3.msra.mxu1 %v3840_v28 }
0x15ef   :  { %v3822_v29 = vpop.permute.xlu0 %3821  ;;  %v3816_v31 = vpop.permute.xlu1 %3815 }
0x15f0   :  { %v3826_v27 = vsel %vm1772_vm1, %v3816_v31, %v3822_v29 }
0x15f3   :  { %v3834_v32 = vpop.permute.xlu0 %3833  ;;  %v3828_v33 = vpop.permute.xlu1 %3827 }
0x15f4   :  { %v3839_v22 = vsel %vm1772_vm1, %v3828_v33, %v3834_v32 }
0x15f5   :  { %10255 = vmatprep.subr.mxu1 %v3839_v22 }
0x15f6   :  { %10256 = vmatpush3.msra.mxu1 %v3839_v22 }
0x15f7   :  { %v3820_v34 = vpop.permute.xlu0 %3819  ;;  %10257 = vmatprep.subr.mxu1 %v3826_v27  ;;  %v3814_v35 = vpop.permute.xlu1 %3813 }
0x15f8   :  { %10258 = vmatpush3.msra.mxu1 %v3826_v27  ;;  %v3825_v36 = vsel %vm1772_vm1, %v3814_v35, %v3820_v34 }
0x15f9   :  { %10259 = vmatprep.subr.mxu1 %v3825_v36 }
0x15fa   :  { %10260 = vmatpush3.msra.mxu1 %v3825_v36 }
0x15fb   :  { %v3804_v37 = vpop.permute.xlu0 %3803  ;;  %v3806_v38 = vpop.permute.xlu1 %3805 }
0x15fc   :  { %v3810_v39 = vsel %vm1772_vm1, %v14594_v4, %v3806_v38  ;;  %v3809_v40 = vsel %vm1772_vm1, %v3789_v23, %v3804_v37 }
0x15fd   :  { %10261 = vmatprep.subr.mxu1 %v3810_v39 }
0x15fe   :  { %10262 = vmatpush3.msra.mxu1 %v3810_v39 }
0x15ff   :  { %v4112_v42 = vpop.permute.xlu0 %4111  ;;  %10263 = vmatprep.subr.mxu1 %v3809_v40  ;;  %v4106_v43 = vpop.permute.xlu1 %4105 }
0x1600   :  { %v14634_v44 = vsel %vm1772_vm1, %v4106_v43, %v4112_v42  ;;  %10264 = vmatpush3.msra.mxu1 %v3809_v40  ;;  %v3933_v43 = vld [vmem:[#allocation22 + $0x8] sm:$0xff] }
0x1601   :  { %10266 = vmatmul.mubr.msk.f32.vlgmr.msra.gmra.mxu1 %vm2049_vm5, %v3776_v41  ;;  %10283 = vmatprep.subr.mxu1 %v13410_v13 }
0x1602   :  { %10284 = vmatpush3.msra.mxu1 %v14634_v44  ;;  %10291 = vmatprep.mubr.msk.f32.mxu1 %vm13411_vm6, %v13410_v13 }
0x1603   :  { %v4110_v45 = vpop.permute.xlu0 %4109  ;;  %v4104_v46 = vpop.permute.xlu1 %4103  ;;  %10285 = vmatprep.subr.mxu1 %v13410_v13 }
0x1604   :  { %v14643_v47 = vsel %vm1772_vm1, %v4104_v46, %v4110_v45  ;;  %v4197_v46 = vld [vmem:[#allocation31] sm:$0xff] }
0x1605   :  { %10286 = vmatpush3.msra.mxu1 %v14643_v47 }
0x1606   :  { %10287 = vmatprep.subr.mxu1 %v13410_v13 }
0x1607   :  { %v4094_v48 = vpop.permute.xlu0 %4093  ;;  %v4096_v49 = vpop.permute.xlu1 %4095 }
0x1608   :  { %v14649_v50 = vsel %vm1772_vm1, %v14566_v30, %v4096_v49  ;;  %v14654_v52 = vsel %vm1772_vm1, %v14551_v25, %v4094_v48  ;;  %v4300_v49 = vld [vmem:[#allocation34] sm:$0xff] }
0x1609   :  { %10288 = vmatpush3.msra.mxu1 %v14649_v50 }
0x160a   :  { %10289 = vmatprep.subr.mxu1 %v13410_v13 }
0x160b   :  { %10290 = vmatpush3.msra.mxu1 %v14654_v52 }
0x160c   :  { %10292 = vmatmul.mubr.msk.f32.vlgmr.msra.gmra.mxu1 %vm4122_vm11, %v4089_v51  ;;  %10294 = vmatprep.subr.mxu1 %v13410_v13 }
0x160d   :  { %10298 = vmatprep.mubr.msk.f32.mxu1 %vm13411_vm6, %v13410_v13 }
0x1614   :  { %v3849_v54 = vpop.permute.xlu1 %3848  ;;  %v3844_v57 = vpop.permute.xlu0 %3843 }
0x1618   :  { %v4120_v59 = vpop.permute.xlu1 %4119 }
0x164f   :  { %v14662_v30 = vpop.f32.mrf.mxu1 }
0x1651   :  { %v14664_v53 = vpop.f32.mrf.mxu1 }
0x16c1   :  { %v10267_v55 = vpop.f32.mrf.mxu1 }
0x16c2   :  { %v3929_v56 = vadd.f32 %v10267_v55, %v3849_v54 }
0x16c3   :  { %v3923_v25 = vpop.f32.mrf.mxu1 }
0x16c4   :  { %3950 = vrot.lane.b32.xlu1 %v3929_v56, %s13404_s21  ;;  %3940 = vrot.lane.b32.xlu0 %v3929_v56, %s13405_s13  ;;  %v3924_v58 = vadd.f32 %v3923_v25, %v3844_v57 }
0x16c8   :  { %3948 = vrot.lane.b32.xlu1 %v3924_v58, %s13404_s21  ;;  %3938 = vrot.lane.b32.xlu0 %v3924_v58, %s13405_s13 }
0x16cc   :  { %v4192_v60 = vpop.f32.mrf.mxu1 }
0x16cd   :  { %v4193_v61 = vadd.f32 %v4192_v60, %v4120_v59 }
0x16ce   :  { %v10293_v62 = vpop.f32.mrf.mxu1 }
0x16cf   :  { %v4196_v63 = vmax.f32 %v4193_v61, 0.0 }
0x16d1   :  { %4204 = vrot.lane.b32.xlu1 %v4196_v63, %s13404_s21  ;;  %4200 = vrot.lane.b32.xlu0 %v4196_v63, %s13405_s13 }
0x1736   :  { %v3941_v0 = vpop.permute.xlu0 %3940  ;;  %v3951_v1 = vpop.permute.xlu1 %3950 }
0x1737   :  { %v3945_v2 = vsel %vm1983_vm3, 0.0, %v3941_v0  ;;  %v3955_v3 = vsel %vm1983_vm3, 0.0, %v3951_v1 }
0x1738   :  { %v3947_v4 = vsel %vm1986_vm4, %v3945_v2, 0.0  ;;  %v3957_v5 = vsel %vm1986_vm4, %v3955_v3, 0.0 }
0x1739   :  { %3986 = vrot.lane.b32.xlu0 %v3947_v4, %s13407_s28  ;;  %3992 = vrot.lane.b32.xlu1 %v3957_v5, %s13406_s12 }
0x173a   :  { %v3949_v6 = vpop.permute.xlu1 %3948  ;;  %v3939_v8 = vpop.permute.xlu0 %3938 }
0x173b   :  { %v3954_v7 = vsel %vm1983_vm3, 0.0, %v3949_v6  ;;  %v3944_v23 = vsel %vm1983_vm3, 0.0, %v3939_v8 }
0x173c   :  { %v3956_v9 = vsel %vm1986_vm4, %v3954_v7, 0.0  ;;  %v3946_v11 = vsel %vm1986_vm4, %v3944_v23, 0.0  ;;  %v4382_v23 = vld [vmem:[#allocation37] sm:$0xf] }
0x173d   :  { %3972 = vrot.lane.b32.xlu0 %v3947_v4, %s13409_s30  ;;  %3978 = vrot.lane.b32.xlu1 %v3957_v5, %s13408_s4 }
0x1741   :  { %3962 = vrot.lane.b32.xlu0 %v3957_v5, %s13403_s20  ;;  %3990 = vrot.lane.b32.xlu1 %v3956_v9, %s13406_s12  ;;  %v4383_v5 = vld [vmem:[#allocation35] sm:$0xf] }
0x1743   :  { %v4201_v12 = vpop.permute.xlu0 %4200  ;;  %v4205_v15 = vpop.permute.xlu1 %4204 }
0x1744   :  { %v4203_v14 = vsel %vm1983_vm3, 0.0, %v4201_v12  ;;  %v4207_v19 = vsel %vm1983_vm3, 0.0, %v4205_v15 }
0x1745   :  { %3984 = vrot.lane.b32.xlu0 %v3946_v11, %s13407_s28  ;;  %3976 = vrot.lane.b32.xlu1 %v3956_v9, %s13408_s4 }
0x1749   :  { %3970 = vrot.lane.b32.xlu0 %v3946_v11, %s13409_s30  ;;  %3960 = vrot.lane.b32.xlu1 %v3956_v9, %s13403_s20 }
0x174d   :  { %4214 = vrot.lane.b32.xlu0 %v4203_v14, %s13409_s30  ;;  %4217 = vrot.lane.b32.xlu1 %v4207_v19, %s13408_s4 }
0x1751   :  { %4209 = vrot.lane.b32.xlu0 %v4207_v19, %s13403_s20  ;;  %4223 = vperm.xlu1 %11000, %v4198_v17  }
0x1755   :  { %4304 = vperm.xlu0 %10999, %v4301_v20  }
0x17ab   :  { %v3987_v21 = vpop.permute.xlu0 %3986  ;;  %v3993_v24 = vpop.permute.xlu1 %3992 }
0x17ac   :  { %v3997_v26 = vsel %vm1772_vm1, %v3987_v21, %v3993_v24 }
0x17ad   :  { %10268 = vmatprep.subr.mxu0 %v3997_v26 }
0x17ae   :  { %10269 = vmatpush3.msra.mxu0 %v3997_v26  ;;  %v4850_v26 = vld [vmem:[#allocation47] sm:$0xff] }
0x17af   :  { %v3973_v28 = vpop.permute.xlu0 %3972  ;;  %v3979_v29 = vpop.permute.xlu1 %3978 }
0x17b0   :  { %v3983_v34 = vsel %vm1772_vm1, %v3973_v28, %v3979_v29 }
0x17b3   :  { %v3963_v31 = vpop.permute.xlu0 %3962  ;;  %v3991_v32 = vpop.permute.xlu1 %3990 }
0x17b4   :  { %v3967_v38 = vsel %vm1772_vm1, %v3947_v4, %v3963_v31  ;;  %v4486_v31 = vld [vmem:[#allocation40 + $0x4] sm:$0xf] }
0x17b7   :  { %v3985_v33 = vpop.permute.xlu0 %3984  ;;  %v3977_v22 = vpop.permute.xlu1 %3976 }
0x17b8   :  { %v3996_v27 = vsel %vm1772_vm1, %v3985_v33, %v3991_v32 }
0x17b9   :  { %10270 = vmatprep.subr.mxu0 %v3996_v27 }
0x17ba   :  { %10271 = vmatpush3.msra.mxu0 %v3996_v27  ;;  %v4669_v27 = vld [vmem:[#allocation43] sm:$0xf] }
0x17bb   :  { %v3971_v35 = vpop.permute.xlu0 %3970  ;;  %10272 = vmatprep.subr.mxu0 %v3983_v34  ;;  %v3961_v36 = vpop.permute.xlu1 %3960 }
0x17bc   :  { %10273 = vmatpush3.msra.mxu0 %v3983_v34  ;;  %v3982_v37 = vsel %vm1772_vm1, %v3971_v35, %v3977_v22  ;;  %v3966_v42 = vsel %vm1772_vm1, %v3946_v11, %v3961_v36  ;;  %v4485_v22 = vld [vmem:[#allocation40] sm:$0xf]  ;;  %v4849_v35 = vld [vmem:[#allocation49] sm:$0xff] }
0x17bd   :  { %10274 = vmatprep.subr.mxu0 %v3982_v37 }
0x17be   :  { %10275 = vmatpush3.msra.mxu0 %v3982_v37 }
0x17bf   :  { %v4215_v39 = vpop.permute.xlu0 %4214  ;;  %10276 = vmatprep.subr.mxu0 %v3967_v38  ;;  %v4218_v40 = vpop.permute.xlu1 %4217 }
0x17c0   :  { %v4220_v41 = vsel %vm1772_vm1, %v4215_v39, %v4218_v40  ;;  %10277 = vmatpush3.msra.mxu0 %v3967_v38 }
0x17c1   :  { %10278 = vmatprep.subr.mxu0 %v3966_v42  ;;  %10295 = vmatpush3.msra.mxu1 %v4220_v41 }
0x17c2   :  { %10279 = vmatpush3.msra.mxu0 %v3966_v42  ;;  %10296 = vmatprep.subr.mxu1 %v13410_v13 }
0x17c3   :  { %v4210_v45 = vpop.permute.xlu0 %4209  ;;  %10281 = vmatmul.mubr.msk.f32.vlgmr.msra.gmra.mxu0 %vm2049_vm5, %v3933_v43  ;;  %10301 = vmatprep.subr.mxu0 %v13410_v13 }
0x17c4   :  { %v4212_v48 = vsel %vm1772_vm1, %v4203_v14, %v4210_v45  ;;  %10302 = vmatpush3.msra.mxu0 %v14528_v16  ;;  %10305 = vmatprep.mubr.msk.f32.mxu0 %vm13411_vm6, %v13410_v13 }
0x17c5   :  { %10297 = vmatpush3.msra.mxu1 %v4212_v48  ;;  %10303 = vmatprep.subr.mxu0 %v13410_v13  ;;  %v4751_v48 = vld [vmem:[#allocation25] sm:$0xff] }
0x17c6   :  { %10299 = vmatmul.mubr.msk.f32.vlgmr.msra.gmra.mxu1 %vm1772_vm1, %v4197_v46  ;;  %10304 = vmatpush3.msra.mxu0 %v14535_v18  ;;  %v4487_v46 = vld [vmem:[#allocation38] sm:$0xf] }
0x17c7   :  { %10306 = vmatmul.mubr.msk.f32.vlgmr.msra.gmra.mxu0 %vm1772_vm1, %v4300_v49  ;;  %10308 = vmatprep.subr.mxu1 %v13410_v13 }
0x17c8   :  { %10312 = vmatprep.mubr.msk.f32.mxu1 %vm13411_vm6, %v13410_v13  ;;  %10315 = vmatprep.subr.mxu0 %v13410_v13 }
0x17c9   :  { %10317 = vmatprep.mubr.msk.f32.mxu0 %vm13411_vm6, %v13410_v13 }
0x17cc   :  { %v4224_v55 = vpop.permute.xlu1 %4223 }
0x17d0   :  { %v4305_v25 = vpop.permute.xlu0 %4304 }
0x1883   :  { %v14720_v51 = vpop.f32.mrf.mxu0 }
0x1885   :  { %v14722_v54 = vpop.f32.mrf.mxu0 }
0x1886   :  { %v4295_v56 = vpop.f32.mrf.mxu1 }
0x1887   :  { %v4296_v57 = vadd.f32 %v4295_v56, %v4224_v55  ;;  %v4376_v58 = vpop.f32.mrf.mxu0 }
0x1888   :  { %v4377_v59 = vadd.f32 %v4376_v58, %v4305_v25  ;;  %v10300_v60 = vpop.f32.mrf.mxu1  ;;  %v5034_v58 = vld [vmem:[#allocation53] sm:$0xff] }
0x1889   :  { %v4299_v61 = vmax.f32 %v4296_v57, 0.0  ;;  %v10307_v62 = vpop.f32.mrf.mxu0  ;;  %v4931_v57 = vld [vmem:[#allocation50] sm:$0xff] }
0x188b   :  { %v4380_v63 = vadd.f32 %v4377_v59, %v4299_v61 }
0x188d   :  { %v4381_v0 = vmax.f32 %v4380_v63, 0.0 }
0x188f   :  { %4389 = vrot.lane.b32.xlu0 %v4381_v0, %s13412_s17  ;;  %4385 = vrot.lane.b32.xlu1 %v4381_v0, %s13348_s2 }
0x1901   :  { %v4390_v1 = vpop.permute.xlu0 %4389  ;;  %v4386_v2 = vpop.permute.xlu1 %4385 }
0x1902   :  { %v4392_v3 = vsel %vm2857_vm9, 0.0, %v4390_v1  ;;  %v4388_v4 = vsel %vm2857_vm9, 0.0, %v4386_v2  ;;  %v4752_v2 = vld [vmem:[#allocation25 + $0x8] sm:$0xff] }
0x1903   :  { %4402 = vrot.lane.b32.xlu0 %v4392_v3, %s13406_s12  ;;  %4399 = vrot.lane.b32.xlu1 %v4388_v4, %s13407_s28 }
0x1907   :  { %4408 = vperm.xlu0 %10999, %v4383_v5   ;;  %4394 = vrot.lane.b32.xlu1 %v4392_v3, %s13403_s20 }
0x1975   :  { %v4403_v6 = vpop.permute.xlu0 %4402  ;;  %v4400_v7 = vpop.permute.xlu1 %4399 }
0x1976   :  { %v4405_v8 = vsel %vm1772_vm1, %v4400_v7, %v4403_v6  ;;  %v4930_v7 = vld [vmem:[#allocation52] sm:$0xff] }
0x1977   :  { %10309 = vmatpush3.msra.mxu1 %v4405_v8 }
0x1978   :  { %10310 = vmatprep.subr.mxu1 %v13410_v13 }
0x1979   :  { %v4395_v9 = vpop.permute.xlu1 %4394 }
0x197a   :  { %v4397_v10 = vsel %vm1772_vm1, %v4388_v4, %v4395_v9  ;;  %v5033_v9 = vld [vmem:[#allocation55] sm:$0xff] }
0x197b   :  { %10311 = vmatpush3.msra.mxu1 %v4397_v10 }
0x197c   :  { %10313 = vmatmul.mubr.msk.f32.vlgmr.msra.gmra.mxu1 %vm1772_vm1, %v4382_v23  ;;  %10320 = vmatprep.subr.mxu1 %v13410_v13 }
0x197d   :  { %10322 = vmatprep.mubr.msk.f32.mxu1 %vm13411_vm6, %v13410_v13 }
0x1982   :  { %v4409_v11 = vpop.permute.xlu0 %4408 }
0x1a3c   :  { %v4480_v12 = vpop.f32.mrf.mxu1 }
0x1a3d   :  { %v4481_v15 = vadd.f32 %v4480_v12, %v4409_v11 }
0x1a3e   :  { %v10314_v14 = vpop.f32.mrf.mxu1 }
0x1a3f   :  { %v4484_v19 = vmax.f32 %v4481_v15, 0.0 }
0x1a41   :  { %4493 = vrot.lane.b32.xlu0 %v4484_v19, %s13412_s17  ;;  %4489 = vrot.lane.b32.xlu1 %v4484_v19, %s13348_s2 }
0x1ab3   :  { %v4494_v17 = vpop.permute.xlu0 %4493  ;;  %v4490_v20 = vpop.permute.xlu1 %4489 }
0x1ab4   :  { %v4496_v21 = vsel %vm2857_vm9, 0.0, %v4494_v17  ;;  %v4492_v24 = vsel %vm2857_vm9, 0.0, %v4490_v20 }
0x1ab5   :  { %4506 = vrot.lane.b32.xlu0 %v4496_v21, %s13406_s12  ;;  %4503 = vrot.lane.b32.xlu1 %v4492_v24, %s13407_s28 }
0x1ab9   :  { %4853 = vperm.xlu0 %10999, %v4850_v26   ;;  %4498 = vrot.lane.b32.xlu1 %v4496_v21, %s13403_s20 }
0x1b27   :  { %v4507_v28 = vpop.permute.xlu0 %4506  ;;  %v4504_v29 = vpop.permute.xlu1 %4503 }
0x1b28   :  { %v4509_v32 = vsel %vm1772_vm1, %v4504_v29, %v4507_v28 }
0x1b29   :  { %10316 = vmatpush3.msk.msra.mxu0 %vm1795_vm2, %v4509_v32 }
0x1b2a   :  { %10318 = vmatmul.mubr.msk.f32.vlgmr.msra.gmra.mxu0 %vm1788_vm0, %v4486_v31  ;;  %10325 = vmatprep.subr.mxu0 %v13410_v13 }
0x1b2b   :  { %10326 = vmatpush3.msra.mxu0 %v4381_v0  ;;  %v4499_v33 = vpop.permute.xlu1 %4498  ;;  %10327 = vmatprep.mubr.msk.f32.mxu0 %vm13411_vm6, %v13410_v13 }
0x1b2c   :  { %v4501_v34 = vsel %vm1772_vm1, %v4492_v24, %v4499_v33  ;;  %10335 = vmatprep.subr.mxu0 %v13410_v13 }
0x1b2d   :  { %10321 = vmatpush3.msk.msra.mxu1 %vm1795_vm2, %v4501_v34 }
0x1b2e   :  { %10323 = vmatmul.mubr.msk.f32.vlgmr.msra.gmra.mxu1 %vm1788_vm0, %v4485_v22  ;;  %10328 = vmatmul.mubr.msk.f32.vlgmr.msra.gmra.mxu0 %vm2774_vm8, %v4669_v27  ;;  %v5116_v22 = vld [vmem:[#allocation56] sm:$0xf] }
0x1b2f   :  { %10336 = vmatpush3.msra.mxu0 %v14634_v44  ;;  %10343 = vmatprep.mubr.msk.f32.mxu0 %vm13411_vm6, %v13410_v13 }
0x1b30   :  { %10337 = vmatprep.subr.mxu0 %v13410_v13  ;;  %10332 = vmatprep.mubr.msk.f32.mxu1 %vm1788_vm0, %v4751_v48 }
0x1b31   :  { %10338 = vmatpush3.msra.mxu0 %v14643_v47 }
0x1b32   :  { %10339 = vmatprep.subr.mxu0 %v13410_v13 }
0x1b33   :  { %10340 = vmatpush3.msra.mxu0 %v14649_v50 }
0x1b34   :  { %10341 = vmatprep.subr.mxu0 %v13410_v13  ;;  %v4854_v50 = vpop.permute.xlu0 %4853 }
0x1b35   :  { %10342 = vmatpush3.msra.mxu0 %v14654_v52  ;;  %v4670_v52 = vld [vmem:[#allocation41] sm:$0xf] }
0x1b36   :  { %10344 = vmatmul.mubr.msk.f32.vlgmr.msra.gmra.mxu0 %vm4122_vm11, %v4849_v35  ;;  %10360 = vmatprep.subr.mxu0 %v13410_v13 }
0x1b37   :  { %10364 = vmatprep.mubr.msk.f32.mxu0 %vm13411_vm6, %v13410_v13 }
0x1bea   :  { %v4582_v44 = vpop.f32.mrf.mxu0 }
0x1bec   :  { %v10319_v36 = vpop.f32.mrf.mxu0 }
0x1bed   :  { %v5115_v36 = vld [vmem:[#allocation58] sm:$0xf] }
0x1bee   :  { %v4658_v37 = vpop.f32.mrf.mxu1  ;;  %v4745_v47 = vpop.f32.mrf.mxu0 }
0x1bef   :  { %v4659_v38 = vadd.f32 %v4658_v37, %v4582_v44 }
0x1bf0   :  { %v10329_v39 = vpop.f32.mrf.mxu0  ;;  %v10324_v40 = vpop.f32.mrf.mxu1 }
0x1bf6   :  { %v4925_v41 = vpop.f32.mrf.mxu0 }
0x1bf7   :  { %v4926_v42 = vadd.f32 %v4925_v41, %v4854_v50 }
0x1bf8   :  { %v10345_v43 = vpop.f32.mrf.mxu0 }
0x1bf9   :  { %v4929_v45 = vmax.f32 %v4926_v42, 0.0 }
0x1bfb   :  { %4937 = vrot.lane.b32.xlu0 %v4929_v45, %s13404_s21  ;;  %4933 = vrot.lane.b32.xlu1 %v4929_v45, %s13405_s13 }
0x1bff   :  { %4673 = vperm.xlu0 %10999, %v4670_v52   ;;  %4664 = vperm.xlu1 %11000, %v4487_v46   ;;  %v5220_v52 = vld [vmem:[#allocation59] sm:$0xf]  ;;  %v5403_v46 = vld [vmem:[#allocation62] sm:$0xf] }
0x1c6d   :  { %v4938_v49 = vpop.permute.xlu0 %4937  ;;  %v4934_v55 = vpop.permute.xlu1 %4933 }
0x1c6e   :  { %v4940_v56 = vsel %vm1983_vm3, 0.0, %v4938_v49  ;;  %v4936_v25 = vsel %vm1983_vm3, 0.0, %v4934_v55  ;;  %v5218_v49 = vld [vmem:[#allocation61] sm:$0xf] }
0x1c6f   :  { %4950 = vrot.lane.b32.xlu0 %v4940_v56, %s13408_s4  ;;  %4947 = vrot.lane.b32.xlu1 %v4936_v25, %s13409_s30 }
0x1c73   :  { %4956 = vperm.xlu0 %10999, %v4931_v57   ;;  %4942 = vrot.lane.b32.xlu1 %v4940_v56, %s13403_s20  ;;  %v5219_v57 = vld [vmem:[#allocation61 + $0x4] sm:$0xf] }
0x1c77   :  { %5037 = vperm.xlu1 %11000, %v5034_v58  }
0x1c7a   :  { %v4674_v59 = vpop.permute.xlu0 %4673  ;;  %v4665_v60 = vpop.permute.xlu1 %4664 }
0x1c7b   :  { %v4667_v61 = vadd.f32 %v4665_v60, %v4659_v38  ;;  %v4746_v62 = vadd.f32 %v4745_v47, %v4674_v59  ;;  %v5402_v59 = vld [vmem:[#allocation64] sm:$0xf] }
0x1c7d   :  { %v4668_v63 = vmax.f32 %v4667_v61, 0.0 }
0x1c7f   :  { %v4749_v0 = vadd.f32 %v4746_v62, %v4668_v63 }
0x1c81   :  { %v4750_v1 = vmax.f32 %v4749_v0, 0.0 }
0x1c83   :  { %10330 = vmatprep.subr.msk.mxu1 %vm1795_vm2, %v4750_v1 }
0x1c84   :  { %10331 = vmatpush3.msk.msra.mxu1 %vm1795_vm2, %v4750_v1 }
0x1c85   :  { %10333 = vmatmul.mubr.msk.f32.vlgmr.msra.gmra.mxu1 %vm1788_vm0, %v4752_v2  ;;  %10346 = vmatprep.subr.mxu1 %v13410_v13 }
0x1c86   :  { %10350 = vmatprep.mubr.msk.f32.mxu1 %vm13411_vm6, %v13410_v13 }
0x1ce1   :  { %v4951_v3 = vpop.permute.xlu0 %4950  ;;  %v4948_v4 = vpop.permute.xlu1 %4947 }
0x1ce2   :  { %v4953_v5 = vsel %vm1772_vm1, %v4948_v4, %v4951_v3 }
0x1ce3   :  { %10347 = vmatpush3.msra.mxu1 %v4953_v5 }
0x1ce4   :  { %10348 = vmatprep.subr.mxu1 %v13410_v13 }
0x1ce5   :  { %v4943_v6 = vpop.permute.xlu1 %4942 }
0x1ce6   :  { %v4945_v8 = vsel %vm1772_vm1, %v4936_v25, %v4943_v6 }
0x1ce7   :  { %10349 = vmatpush3.msra.mxu1 %v4945_v8 }
0x1ce8   :  { %10351 = vmatmul.mubr.msk.f32.vlgmr.msra.gmra.mxu1 %vm1772_vm1, %v4930_v7  ;;  %10353 = vmatprep.subr.mxu1 %v13410_v13 }
0x1ce9   :  { %10354 = vmatpush3.msra.mxu1 %v14528_v16  ;;  %10357 = vmatprep.mubr.msk.f32.mxu1 %vm13411_vm6, %v13410_v13 }
0x1cea   :  { %10355 = vmatprep.subr.mxu1 %v13410_v13 }
0x1ceb   :  { %10356 = vmatpush3.msra.mxu1 %v14535_v18 }
0x1cec   :  { %10358 = vmatmul.mubr.msk.f32.vlgmr.msra.gmra.mxu1 %vm1772_vm1, %v5033_v9  ;;  %10367 = vmatprep.subr.mxu1 %v13410_v13 }
0x1ced   :  { %10369 = vmatprep.mubr.msk.f32.mxu1 %vm13411_vm6, %v13410_v13 }
0x1cee   :  { %v4957_v11 = vpop.permute.xlu0 %4956 }
0x1cf2   :  { %v5038_v19 = vpop.permute.xlu1 %5037 }
0x1d45   :  { %v14797_v23 = vpop.f32.mrf.mxu1 }
0x1d47   :  { %v14799_v10 = vpop.f32.mrf.mxu1 }
0x1da8   :  { %v5028_v12 = vpop.f32.mrf.mxu1 }
0x1da9   :  { %v5029_v15 = vadd.f32 %v5028_v12, %v4957_v11 }
0x1daa   :  { %v10352_v14 = vpop.f32.mrf.mxu1 }
0x1dab   :  { %v5032_v20 = vmax.f32 %v5029_v15, 0.0 }
0x1dac   :  { %v5109_v17 = vpop.f32.mrf.mxu1 }
0x1dad   :  { %v5110_v21 = vadd.f32 %v5109_v17, %v5038_v19  ;;  %v5486_v19 = vld [vmem:[#allocation65] sm:$0x3] }
0x1dae   :  { %v10359_v24 = vpop.f32.mrf.mxu1 }
0x1daf   :  { %v5113_v26 = vadd.f32 %v5110_v21, %v5032_v20  ;;  %v5484_v20 = vld [vmem:[#allocation67] sm:$0x3] }
0x1db1   :  { %v5114_v28 = vmax.f32 %v5113_v26, 0.0 }
0x1db3   :  { %5122 = vrot.lane.b32.xlu1 %v5114_v28, %s13412_s17  ;;  %5118 = vrot.lane.b32.xlu0 %v5114_v28, %s13348_s2 }
0x1e25   :  { %v5123_v29 = vpop.permute.xlu1 %5122  ;;  %v5119_v31 = vpop.permute.xlu0 %5118 }
0x1e26   :  { %v5125_v32 = vsel %vm2857_vm9, 0.0, %v5123_v29  ;;  %v5121_v33 = vsel %vm2857_vm9, 0.0, %v5119_v31 }
0x1e27   :  { %5135 = vrot.lane.b32.xlu1 %v5125_v32, %s13406_s12  ;;  %5132 = vrot.lane.b32.xlu0 %v5121_v33, %s13407_s28 }
0x1e2b   :  { %5141 = vperm.xlu1 %11000, %v5116_v22   ;;  %5127 = vrot.lane.b32.xlu0 %v5125_v32, %s13403_s20 }
0x1e99   :  { %v5136_v27 = vpop.permute.xlu1 %5135  ;;  %v5133_v34 = vpop.permute.xlu0 %5132 }
0x1e9a   :  { %v5138_v35 = vsel %vm1772_vm1, %v5133_v34, %v5136_v27 }
0x1e9b   :  { %10361 = vmatpush3.msra.mxu0 %v5138_v35 }
0x1e9c   :  { %10362 = vmatprep.subr.mxu0 %v13410_v13 }
0x1e9d   :  { %v5128_v44 = vpop.permute.xlu0 %5127 }
0x1e9e   :  { %v5130_v37 = vsel %vm1772_vm1, %v5121_v33, %v5128_v44 }
0x1e9f   :  { %10363 = vmatpush3.msra.mxu0 %v5130_v37 }
0x1ea0   :  { %10365 = vmatmul.mubr.msk.f32.vlgmr.msra.gmra.mxu0 %vm1772_vm1, %v5115_v36  ;;  %10372 = vmatprep.subr.mxu0 %v13410_v13 }
0x1ea1   :  { %10374 = vmatprep.mubr.msk.f32.mxu0 %vm13411_vm6, %v13410_v13 }
0x1ea6   :  { %v5142_v47 = vpop.permute.xlu1 %5141 }
0x1f60   :  { %v5213_v38 = vpop.f32.mrf.mxu0 }
0x1f61   :  { %v5214_v39 = vadd.f32 %v5213_v38, %v5142_v47 }
0x1f62   :  { %v10366_v40 = vpop.f32.mrf.mxu0 }
0x1f63   :  { %v5217_v50 = vmax.f32 %v5214_v39, 0.0  ;;  %v5670_v39 = vld [vmem:[#allocation68] sm:$0x3]  ;;  %v5853_v40 = vld [vmem:[#allocation71] sm:$0x3] }
0x1f65   :  { %5226 = vrot.lane.b32.xlu1 %v5217_v50, %s13412_s17  ;;  %5222 = vrot.lane.b32.xlu0 %v5217_v50, %s13348_s2  ;;  %v5939_v50 = vld [vmem:[#allocation44 + $0x8] sm:$0xff] }
0x1fd7   :  { %v5227_v41 = vpop.permute.xlu1 %5226  ;;  %v5223_v42 = vpop.permute.xlu0 %5222 }
0x1fd8   :  { %v5229_v43 = vsel %vm2857_vm9, 0.0, %v5227_v41  ;;  %v5225_v45 = vsel %vm2857_vm9, 0.0, %v5223_v42  ;;  %v5938_v41 = vld [vmem:[#allocation44] sm:$0xff] }
0x1fd9   :  { %5231 = vrot.lane.b32.xlu0 %v5229_v43, %s13403_s20  ;;  %5236 = vrot.lane.b32.xlu1 %v5225_v45, %s13407_s28  ;;  %v4754_v42 = vld [vmem:[#allocation23 + $0x8] sm:$0xff] }
0x1fdd   :  { %5239 = vrot.lane.b32.xlu0 %v5229_v43, %s13406_s12  ;;  %5397 = vperm.xlu1 %11000, %v5220_v52   ;;  %v4753_v43 = vld [vmem:[#allocation23] sm:$0xff] }
0x1fde   :  { %v3934_v52 = vld [vmem:[#allocation20] sm:$0xff] }
0x1fe1   :  { %5406 = vperm.xlu0 %10999, %v5403_v46   ;;  %v3526_v46 = vld [vmem:[#allocation11 + $0x8] sm:$0xff] }
0x204b   :  { %v5232_v48 = vpop.permute.xlu0 %5231  ;;  %v5237_v56 = vpop.permute.xlu1 %5236 }
0x204c   :  { %v5234_v55 = vsel %vm1772_vm1, %v5225_v45, %v5232_v48  ;;  %v3935_v45 = vld [vmem:[#allocation20 + $0x8] sm:$0xff]  ;;  %v3525_v48 = vld [vmem:[#allocation11] sm:$0xff] }
0x204d   :  { %10373 = vmatpush3.msk.msra.mxu0 %vm1795_vm2, %v5234_v55  ;;  %v6064_v55 = vld [vmem:[#allocation74 + $0x70] sm:$0xff] }
0x204e   :  { %10375 = vmatmul.mubr.msk.f32.vlgmr.msra.gmra.mxu0 %vm1788_vm0, %v5218_v49  ;;  %10382 = vmatprep.subr.mxu0 %v13410_v13  ;;  %v6065_v49 = vld [vmem:[#allocation74 + $0x78] sm:$0xff] }
0x204f   :  { %v5240_v25 = vpop.permute.xlu0 %5239  ;;  %10384 = vmatprep.mubr.msk.f32.mxu0 %vm13411_vm6, %v13410_v13 }
0x2050   :  { %v5242_v58 = vsel %vm1772_vm1, %v5237_v56, %v5240_v25  ;;  %v6063_v56 = vld [vmem:[#allocation74 + $0x68] sm:$0xff]  ;;  %v6062_v25 = vld [vmem:[#allocation74 + $0x60] sm:$0xff] }
0x2051   :  { %10368 = vmatpush3.msk.msra.mxu1 %vm1795_vm2, %v5242_v58  ;;  %v6060_v58 = vld [vmem:[#allocation74 + $0x50] sm:$0xff] }
0x2052   :  { %10370 = vmatmul.mubr.msk.f32.vlgmr.msra.gmra.mxu1 %vm1788_vm0, %v5219_v57  ;;  %10377 = vmatprep.subr.mxu1 %v13410_v13  ;;  %v6061_v57 = vld [vmem:[#allocation74 + $0x58] sm:$0xff] }
0x2053   :  { %10378 = vmatpush3.msra.mxu1 %v5114_v28  ;;  %10379 = vmatprep.mubr.msk.f32.mxu1 %vm13411_vm6, %v13410_v13  ;;  %v5485_v28 = vld [vmem:[#allocation67 + $0x2] sm:$0x3] }
0x2054   :  { %10387 = vmatprep.subr.mxu1 %v13410_v13 }
0x2056   :  { %10380 = vmatmul.mubr.msk.f32.vlgmr.msra.gmra.mxu1 %vm2774_vm8, %v5402_v59  ;;  %v6059_v59 = vld [vmem:[#allocation74 + $0x48] sm:$0xff] }
0x2057   :  { %10389 = vmatprep.mubr.msk.f32.mxu1 %vm13411_vm6, %v13410_v13 }
0x2058   :  { %v5398_v0 = vpop.permute.xlu1 %5397 }
0x205c   :  { %v5407_v3 = vpop.permute.xlu0 %5406 }
0x210e   :  { %v5391_v60 = vpop.f32.mrf.mxu0 }
0x2110   :  { %v10376_v61 = vpop.f32.mrf.mxu0 }
0x2111   :  { %v6057_v61 = vld [vmem:[#allocation74 + $0x38] sm:$0xff] }
0x2112   :  { %v5315_v62 = vpop.f32.mrf.mxu1 }
0x2113   :  { %v5392_v63 = vadd.f32 %v5391_v60, %v5315_v62  ;;  %v6058_v60 = vld [vmem:[#allocation74 + $0x40] sm:$0xff]  ;;  %v6056_v62 = vld [vmem:[#allocation74 + $0x30] sm:$0xff] }
0x2114   :  { %v10371_v1 = vpop.f32.mrf.mxu1 }
0x2115   :  { %v5400_v2 = vadd.f32 %v5398_v0, %v5392_v63  ;;  %v6055_v63 = vld [vmem:[#allocation74 + $0x28] sm:$0xff]  ;;  %v6054_v0 = vld [vmem:[#allocation74 + $0x20] sm:$0xff]  ;;  %v6053_v1 = vld [vmem:[#allocation74 + $0x18] sm:$0xff] }
0x2116   :  { %v5478_v4 = vpop.f32.mrf.mxu1 }
0x2117   :  { %v5401_v5 = vmax.f32 %v5400_v2, 0.0  ;;  %v5479_v6 = vadd.f32 %v5478_v4, %v5407_v3  ;;  %v6052_v2 = vld [vmem:[#allocation74 + $0x10] sm:$0xff]  ;;  %v6051_v3 = vld [vmem:[#allocation74 + $0x8] sm:$0xff]  ;;  %v6050_v4 = vld [vmem:[#allocation74] sm:$0xff] }
0x2118   :  { %v10381_v7 = vpop.f32.mrf.mxu1 }
0x2119   :  { %v5482_v8 = vadd.f32 %v5479_v6, %v5401_v5  ;;  %v6343_v5 = vld [vmem:[#allocation77 + $0x8] sm:$0xff]  ;;  %v6342_v6 = vld [vmem:[#allocation77] sm:$0xff] }
0x211b   :  { %v14838_v9 = vmax.f32 %v5482_v8, 0.0  ;;  %v5668_v8 = vld [vmem:[#allocation70] sm:$0x3] }
0x211d   :  { %5492 = vrot.lane.b32.xlu0 %v14838_v9, %s13413_s23  ;;  %5488 = vrot.lane.b32.xlu1 %v14838_v9, %s13300_s1 }
0x218f   :  { %v5493_v11 = vpop.permute.xlu0 %5492  ;;  %v5489_v12 = vpop.permute.xlu1 %5488 }
0x2190   :  { %v5495_v15 = vsel %vm1788_vm0, 0.0, %v5493_v11  ;;  %v5491_v14 = vsel %vm1788_vm0, 0.0, %v5489_v12 }
0x2191   :  { %5497 = vrot.lane.b32.xlu1 %v5495_v15, %s13403_s20  ;;  %5502 = vrot.lane.b32.xlu0 %v5491_v14, %s13414_s26 }
0x2195   :  { %5505 = vrot.lane.b32.xlu1 %v5495_v15, %s13415_s6  ;;  %5663 = vperm.xlu0 %10999, %v5486_v19  }
0x2203   :  { %v5498_v17 = vpop.permute.xlu1 %5497  ;;  %v5503_v24 = vpop.permute.xlu0 %5502 }
0x2204   :  { %v5500_v21 = vsel %vm1772_vm1, %v5491_v14, %v5498_v17  ;;  %v5669_v14 = vld [vmem:[#allocation70 + $0x2] sm:$0x3]  ;;  %v5852_v17 = vld [vmem:[#allocation73] sm:$0x3] }
0x2205   :  { %10388 = vmatpush3.msk.msra.mxu1 %vm1795_vm2, %v5500_v21 }
0x2206   :  { %10390 = vmatmul.mubr.msk.f32.vlgmr.msra.gmra.mxu1 %vm1788_vm0, %v5484_v20  ;;  %10397 = vmatprep.subr.mxu1 %v13410_v13  ;;  %v5936_v20 = vld [vmem:[#allocation46] sm:$0xff] }
0x2207   :  { %v5506_v26 = vpop.permute.xlu1 %5505  ;;  %10399 = vmatprep.mubr.msk.f32.mxu1 %vm13411_vm6, %v13410_v13 }
0x2208   :  { %v5508_v29 = vsel %vm1772_vm1, %v5503_v24, %v5506_v26 }
0x2209   :  { %10383 = vmatpush3.msk.msra.mxu0 %vm1795_vm2, %v5508_v29 }
0x220a   :  { %10385 = vmatmul.mubr.msk.f32.vlgmr.msra.gmra.mxu0 %vm1788_vm0, %v5485_v28  ;;  %10392 = vmatprep.subr.mxu0 %v13410_v13 }
0x220b   :  { %10394 = vmatprep.mubr.msk.f32.mxu0 %vm13411_vm6, %v13410_v13 }
0x2210   :  { %v5664_v27 = vpop.permute.xlu0 %5663 }
0x22c6   :  { %v5657_v31 = vpop.f32.mrf.mxu1 }
0x22c8   :  { %v10391_v32 = vpop.f32.mrf.mxu1 }
0x22ca   :  { %v5581_v33 = vpop.f32.mrf.mxu0 }
0x22cb   :  { %v5658_v22 = vadd.f32 %v5657_v31, %v5581_v33 }
0x22cc   :  { %v10386_v34 = vpop.f32.mrf.mxu0 }
0x22cd   :  { %v5666_v35 = vadd.f32 %v5664_v27, %v5658_v22 }
0x22cf   :  { %v5667_v44 = vmax.f32 %v5666_v35, 0.0 }
0x22d1   :  { %5676 = vrot.lane.b32.xlu0 %v5667_v44, %s13413_s23  ;;  %5672 = vrot.lane.b32.xlu1 %v5667_v44, %s13300_s1 }
0x2343   :  { %v5677_v36 = vpop.permute.xlu0 %5676  ;;  %v5673_v37 = vpop.permute.xlu1 %5672 }
0x2344   :  { %v5679_v47 = vsel %vm1788_vm0, 0.0, %v5677_v36  ;;  %v14865_v38 = vsel %vm1788_vm0, 0.0, %v5673_v37  ;;  %v5937_v36 = vld [vmem:[#allocation46 + $0x8] sm:$0xff] }
0x2345   :  { %5681 = vrot.lane.b32.xlu1 %v5679_v47, %s13403_s20  ;;  %5686 = vrot.lane.b32.xlu0 %v14865_v38, %s13414_s26  ;;  %v6034_v37 = vld [vmem:[#allocation76] sm:$0xff] }
0x2349   :  { %5689 = vrot.lane.b32.xlu1 %v5679_v47, %s13415_s6  ;;  %5847 = vperm.xlu0 %10999, %v5670_v39  }
0x234d   :  { %5856 = vperm.xlu1 %11000, %v5853_v40   ;;  %5947 = vperm.xlu0 %10999, %v5939_v50  }
0x2351   :  { %5942 = vperm.xlu1 %11000, %v5938_v41   ;;  %4762 = vperm.xlu0 %10999, %v4754_v42  }
0x2355   :  { %4757 = vperm.xlu1 %11000, %v4753_v43   ;;  %4005 = vperm.xlu0 %10999, %v3935_v45  }
0x2359   :  { %4000 = vperm.xlu1 %11000, %v3934_v52   ;;  %3534 = vperm.xlu0 %10999, %v3526_v46  }
0x235d   :  { %3529 = vperm.xlu1 %11000, %v3525_v48   ;;  %6143 = vperm.xlu0 %10999, %v6065_v49  }
0x2361   :  { %6138 = vperm.xlu1 %11000, %v6064_v55   ;;  %6133 = vperm.xlu0 %10999, %v6063_v56  }
0x2365   :  { %6128 = vperm.xlu1 %11000, %v6062_v25   ;;  %6123 = vperm.xlu0 %10999, %v6061_v57  }
0x2369   :  { %6118 = vperm.xlu1 %11000, %v6060_v58   ;;  %6113 = vperm.xlu0 %10999, %v6059_v59   ;;  %v6036_v58 = vld [vmem:[#allocation76 + $0x10] sm:$0xff] }
0x236a   :  { %v6040_v59 = vld [vmem:[#allocation76 + $0x30] sm:$0xff] }
0x236d   :  { %6108 = vperm.xlu1 %11000, %v6058_v60   ;;  %6103 = vperm.xlu0 %10999, %v6057_v61   ;;  %v6042_v60 = vld [vmem:[#allocation76 + $0x40] sm:$0xff]  ;;  %v6043_v61 = vld [vmem:[#allocation76 + $0x48] sm:$0xff] }
0x2371   :  { %6098 = vperm.xlu1 %11000, %v6056_v62   ;;  %6093 = vperm.xlu0 %10999, %v6055_v63   ;;  %v6044_v62 = vld [vmem:[#allocation76 + $0x50] sm:$0xff]  ;;  %v6045_v63 = vld [vmem:[#allocation76 + $0x58] sm:$0xff] }
0x2375   :  { %6088 = vperm.xlu1 %11000, %v6054_v0   ;;  %6083 = vperm.xlu0 %10999, %v6053_v1   ;;  %v6046_v0 = vld [vmem:[#allocation76 + $0x60] sm:$0xff]  ;;  %v6047_v1 = vld [vmem:[#allocation76 + $0x68] sm:$0xff] }
0x2379   :  { %6078 = vperm.xlu1 %11000, %v6052_v2   ;;  %6073 = vperm.xlu0 %10999, %v6051_v3   ;;  %v6048_v2 = vld [vmem:[#allocation76 + $0x70] sm:$0xff]  ;;  %v6049_v3 = vld [vmem:[#allocation76 + $0x78] sm:$0xff] }
0x237d   :  { %6068 = vperm.xlu1 %11000, %v6050_v4   ;;  %6351 = vperm.xlu0 %10999, %v6343_v5   ;;  %v6340_v4 = vld [vmem:[#allocation79] sm:$0xff] }
0x2381   :  { %6346 = vperm.xlu1 %11000, %v6342_v6  }
0x23b7   :  { %v5682_v7 = vpop.permute.xlu1 %5681  ;;  %v5687_v12 = vpop.permute.xlu0 %5686 }
0x23b8   :  { %v5684_v11 = vsel %vm1772_vm1, %v14865_v38, %v5682_v7 }
0x23b9   :  { %10398 = vmatpush3.msk.msra.mxu1 %vm3063_vm10, %v5684_v11 }
0x23ba   :  { %10400 = vmatmul.mubr.msk.f32.vlgmr.msra.gmra.mxu1 %vm2857_vm9, %v5668_v8 }
0x23bb   :  { %v5690_v15 = vpop.permute.xlu1 %5689  ;;  %10409 = vmatprep.mubr.msk.f32.mxu1 %vm2857_vm9, %v5936_v20 }
0x23bc   :  { %v5692_v19 = vsel %vm1772_vm1, %v5687_v12, %v5690_v15 }
0x23bd   :  { %10393 = vmatpush3.msk.msra.mxu0 %vm3063_vm10, %v5692_v19 }
0x23be   :  { %10395 = vmatmul.mubr.msk.f32.vlgmr.msra.gmra.mxu0 %vm2857_vm9, %v5669_v14  ;;  %10402 = vmatprep.subr.mxu0 %v13410_v13 }
0x23bf   :  { %10403 = vmatpush3.msk.msra.mxu0 %vm1795_vm2, %v14838_v9  ;;  %10404 = vmatprep.mubr.msk.f32.mxu0 %vm13411_vm6, %v13410_v13 }
0x23c2   :  { %10405 = vmatmul.mubr.msk.f32.vlgmr.msra.gmra.mxu0 %vm1788_vm0, %v5852_v17 }
0x23c3   :  { %10428 = vmatprep.mubr.msk.f32.mxu0 %vm6146_vm12, %v6034_v37 }
0x23c4   :  { %v5848_v29 = vpop.permute.xlu0 %5847 }
0x23c8   :  { %v5857_v33 = vpop.permute.xlu1 %5856  ;;  %v5948_v47 = vpop.permute.xlu0 %5947 }
0x23cc   :  { %v5943_v38 = vpop.permute.xlu1 %5942  ;;  %v4763_v39 = vpop.permute.xlu0 %4762 }
0x23cd   :  { %v4846_v52 = vadd.f32 %v14797_v23, %v4763_v39 }
0x23d0   :  { %v4758_v40 = vpop.permute.xlu1 %4757  ;;  %v4006_v45 = vpop.permute.xlu0 %4005 }
0x23d1   :  { %v4841_v48 = vadd.f32 %v14799_v10, %v4758_v40  ;;  %v4086_v49 = vadd.f32 %v14720_v51, %v4006_v45  ;;  %v6035_v10 = vld [vmem:[#allocation76 + $0x8] sm:$0xff]  ;;  %v6037_v51 = vld [vmem:[#allocation76 + $0x18] sm:$0xff] }
0x23d4   :  { %v4001_v46 = vpop.permute.xlu1 %4000  ;;  %v3535_v55 = vpop.permute.xlu0 %3534 }
0x23d5   :  { %v4081_v56 = vadd.f32 %v14722_v54, %v4001_v46  ;;  %v3615_v57 = vadd.f32 %v14662_v30, %v3535_v55  ;;  %v6038_v54 = vld [vmem:[#allocation76 + $0x20] sm:$0xff]  ;;  %v6039_v30 = vld [vmem:[#allocation76 + $0x28] sm:$0xff] }
0x23d8   :  { %v3530_v25 = vpop.permute.xlu1 %3529  ;;  %v6144_v14 = vpop.permute.xlu0 %6143 }
0x23d9   :  { %v3610_v23 = vadd.f32 %v14664_v53, %v3530_v25  ;;  %v6041_v53 = vld [vmem:[#allocation76 + $0x38] sm:$0xff] }
0x23dc   :  { %v6139_v17 = vpop.permute.xlu1 %6138 }
0x247a   :  { %v5841_v21 = vpop.f32.mrf.mxu1 }
0x247c   :  { %v10401_v24 = vpop.f32.mrf.mxu1 }
0x247d   :  { %v6134_v24 = vpop.permute.xlu0 %6133 }
0x247e   :  { %v5765_v26 = vpop.f32.mrf.mxu0 }
0x247f   :  { %v5842_v28 = vadd.f32 %v5841_v21, %v5765_v26 }
0x2480   :  { %v10396_v31 = vpop.f32.mrf.mxu0 }
0x2481   :  { %v5850_v32 = vadd.f32 %v5848_v29, %v5842_v28  ;;  %v6129_v28 = vpop.permute.xlu1 %6128 }
0x2482   :  { %v5930_v22 = vpop.f32.mrf.mxu0 }
0x2483   :  { %v5851_v27 = vmax.f32 %v5850_v32, 0.0  ;;  %v5931_v9 = vadd.f32 %v5930_v22, %v5857_v33  ;;  %v6124_v32 = vpop.permute.xlu0 %6123 }
0x2484   :  { %v10406_v34 = vpop.f32.mrf.mxu0 }
0x2485   :  { %v5934_v35 = vadd.f32 %v5931_v9, %v5851_v27  ;;  %v6119_v22 = vpop.permute.xlu1 %6118 }
0x2487   :  { %v5935_v44 = vmax.f32 %v5934_v35, 0.0 }
0x2489   :  { %10407 = vmatprep.subr.msk.mxu1 %vm3063_vm10, %v5935_v44  ;;  %v6109_v37 = vpop.permute.xlu1 %6108 }
0x248a   :  { %10408 = vmatpush3.msk.msra.mxu1 %vm3063_vm10, %v5935_v44  ;;  %v6114_v44 = vpop.permute.xlu0 %6113 }
0x248b   :  { %10410 = vmatmul.mubr.msk.f32.vlgmr.msra.gmra.mxu1 %vm2857_vm9, %v5937_v36 }
0x248c   :  { %10484 = vmatprep.mubr.f32.mxu1 %v6340_v4 }
0x248e   :  { %v6104_v39 = vpop.permute.xlu0 %6103 }
0x254b   :  { %v10411_v50 = vpop.f32.mrf.mxu1 }
0x254c   :  { %v6031_v41 = vadd.f32 %v10411_v50, %v5948_v47  ;;  %v6099_v50 = vpop.permute.xlu1 %6098 }
0x254d   :  { %v6025_v42 = vpop.f32.mrf.mxu1 }
0x254e   :  { %v6026_v43 = vadd.f32 %v6025_v42, %v5943_v38  ;;  %10412 = vmatprep.subr.mxu0 %v6031_v41 }
0x254f   :  { %10413 = vmatpush3.msra.mxu0 %v6031_v41 }
0x2550   :  { %10414 = vmatprep.subr.mxu0 %v6026_v43 }
0x2551   :  { %10415 = vmatpush3.msra.mxu0 %v6026_v43  ;;  %v6094_v43 = vpop.permute.xlu0 %6093 }
0x2552   :  { %10416 = vmatprep.subr.mxu0 %v4846_v52 }
0x2553   :  { %10417 = vmatpush3.msra.mxu0 %v4846_v52  ;;  %v6089_v52 = vpop.permute.xlu1 %6088 }
0x2554   :  { %10418 = vmatprep.subr.mxu0 %v4841_v48 }
0x2555   :  { %10419 = vmatpush3.msra.mxu0 %v4841_v48 }
0x2556   :  { %10420 = vmatprep.subr.mxu0 %v4086_v49 }
0x2557   :  { %10421 = vmatpush3.msra.mxu0 %v4086_v49  ;;  %v6084_v49 = vpop.permute.xlu0 %6083 }
0x2558   :  { %10422 = vmatprep.subr.mxu0 %v4081_v56 }
0x2559   :  { %10423 = vmatpush3.msra.mxu0 %v4081_v56  ;;  %v6079_v56 = vpop.permute.xlu1 %6078 }
0x255a   :  { %10424 = vmatprep.subr.mxu0 %v3615_v57 }
0x255b   :  { %10425 = vmatpush3.msra.mxu0 %v3615_v57 }
0x255c   :  { %10426 = vmatprep.subr.mxu0 %v3610_v23 }
0x255d   :  { %10427 = vmatpush3.msra.mxu0 %v3610_v23  ;;  %v6074_v23 = vpop.permute.xlu0 %6073 }
0x255e   :  { %10429 = vmatmul.mubr.msk.f32.vlgmr.msra.gmra.mxu0 %vm6146_vm12, %v6035_v10 }
0x255f   :  { %10431 = vmatprep.mubr.msk.f32.mxu0 %vm6146_vm12, %v6036_v58  ;;  %v6069_v58 = vpop.permute.xlu1 %6068 }
0x2562   :  { %10432 = vmatmul.mubr.msk.f32.gmra.mxu0 %vm6146_vm12, %v6037_v51 }
0x2563   :  { %10434 = vmatprep.mubr.msk.f32.mxu0 %vm6146_vm12, %v6038_v54  ;;  %v6341_v54 = vld [vmem:[#allocation79 + $0x8] sm:$0xff] }
0x2566   :  { %10435 = vmatmul.mubr.msk.f32.gmra.mxu0 %vm6146_vm12, %v6039_v30  ;;  %v6352_v30 = vpop.permute.xlu0 %6351 }
0x2567   :  { %10437 = vmatprep.mubr.msk.f32.mxu0 %vm6146_vm12, %v6040_v59 }
0x256a   :  { %10438 = vmatmul.mubr.msk.f32.gmra.mxu0 %vm6146_vm12, %v6041_v53 }
0x256b   :  { %10440 = vmatprep.mubr.msk.f32.mxu0 %vm6146_vm12, %v6042_v60  ;;  %v6347_v60 = vpop.permute.xlu1 %6346 }
0x256e   :  { %10441 = vmatmul.mubr.msk.f32.gmra.mxu0 %vm6146_vm12, %v6043_v61 }
0x256f   :  { %10443 = vmatprep.mubr.msk.f32.mxu0 %vm6146_vm12, %v6044_v62 }
0x2572   :  { %10444 = vmatmul.mubr.msk.f32.gmra.mxu0 %vm6146_vm12, %v6045_v63 }
0x2573   :  { %10446 = vmatprep.mubr.msk.f32.mxu0 %vm6146_vm12, %v6046_v0 }
0x2576   :  { %10447 = vmatmul.mubr.msk.f32.gmra.mxu0 %vm6146_vm12, %v6047_v1 }
0x2577   :  { %10449 = vmatprep.mubr.msk.f32.mxu0 %vm6146_vm12, %v6048_v2 }
0x257a   :  { %10450 = vmatmul.mubr.msk.f32.gmra.mxu0 %vm6146_vm12, %v6049_v3 }
0x261e   :  { %v14910_v5 = vpop.f32.mrf.mxu0 }
0x261f   :  { %v6267_v10 = vadd.f32 %v14910_v5, %v6074_v23  ;;  %v6443_v23 = vld [vmem:[#allocation80] sm:$0xff] }
0x2620   :  { %v14912_v6 = vpop.f32.mrf.mxu0 }
0x2621   :  { %v6262_v51 = vadd.f32 %v14912_v6, %v6069_v58  ;;  %v6536_v58 = vld [vmem:[#allocation85] sm:$0xff] }
0x2622   :  { %v10433_v7 = vpop.f32.mrf.mxu0 }
0x2623   :  { %v6277_v25 = vadd.f32 %v10433_v7, %v6084_v49 }
0x2624   :  { %v14914_v8 = vpop.f32.mrf.mxu0 }
0x2625   :  { %v6272_v57 = vadd.f32 %v14914_v8, %v6079_v56 }
0x2626   :  { %v10436_v11 = vpop.f32.mrf.mxu0 }
0x2627   :  { %v6287_v48 = vadd.f32 %v10436_v11, %v6094_v43 }
0x2628   :  { %v6281_v12 = vpop.f32.mrf.mxu0 }
0x2629   :  { %v6282_v55 = vadd.f32 %v6281_v12, %v6089_v52 }
0x262a   :  { %v10439_v15 = vpop.f32.mrf.mxu0 }
0x262b   :  { %v6297_v45 = vadd.f32 %v10439_v15, %v6104_v39 }
0x262c   :  { %v6291_v19 = vpop.f32.mrf.mxu0 }
0x262d   :  { %v6292_v46 = vadd.f32 %v6291_v19, %v6099_v50 }
0x262e   :  { %v10442_v20 = vpop.f32.mrf.mxu0 }
0x262f   :  { %v6307_v41 = vadd.f32 %v10442_v20, %v6114_v44 }
0x2630   :  { %v6301_v21 = vpop.f32.mrf.mxu0 }
0x2631   :  { %v6302_v42 = vadd.f32 %v6301_v21, %v6109_v37 }
0x2632   :  { %v10445_v26 = vpop.f32.mrf.mxu0 }
0x2633   :  { %v6317_v38 = vadd.f32 %v10445_v26, %v6124_v32  ;;  %v6441_v32 = vld [vmem:[#allocation82] sm:$0xff] }
0x2634   :  { %v6311_v29 = vpop.f32.mrf.mxu0 }
0x2635   :  { %v6312_v40 = vadd.f32 %v6311_v29, %v6119_v22  ;;  %v6633_v22 = vld [vmem:[#allocation86] sm:$0xff] }
0x2636   :  { %v10448_v31 = vpop.f32.mrf.mxu0 }
0x2637   :  { %v6327_v36 = vadd.f32 %v10448_v31, %v6134_v24  ;;  %v6631_v31 = vld [vmem:[#allocation88] sm:$0xff] }
0x2638   :  { %v6321_v33 = vpop.f32.mrf.mxu0  ;;  %10513 = vmatprep.mubr.msk.f32.mxu0 %vm2049_vm5, %v6631_v31 }
0x2639   :  { %v6322_v47 = vadd.f32 %v6321_v33, %v6129_v28  ;;  %v6442_v33 = vld [vmem:[#allocation82 + $0x8] sm:$0xff] }
0x263a   :  { %v10451_v27 = vpop.f32.mrf.mxu0 }
0x263b   :  { %v6337_v9 = vadd.f32 %v10451_v27, %v6144_v14  ;;  %v6634_v27 = vld [vmem:[#allocation86 + $0x8] sm:$0xff] }
0x263c   :  { %v6331_v34 = vpop.f32.mrf.mxu0 }
0x263d   :  { %v6332_v35 = vadd.f32 %v6331_v34, %v6139_v17  ;;  %10452 = vmatprep.subr.mxu1 %v6337_v9 }
0x263e   :  { %10453 = vmatpush3.msra.mxu1 %v6337_v9 }
0x263f   :  { %10454 = vmatprep.subr.mxu1 %v6332_v35 }
0x2640   :  { %10455 = vmatpush3.msra.mxu1 %v6332_v35 }
0x2641   :  { %10456 = vmatprep.subr.mxu1 %v6327_v36 }
0x2642   :  { %10457 = vmatpush3.msra.mxu1 %v6327_v36 }
0x2643   :  { %10458 = vmatprep.subr.mxu1 %v6322_v47 }
0x2644   :  { %10459 = vmatpush3.msra.mxu1 %v6322_v47 }
0x2645   :  { %10460 = vmatprep.subr.mxu1 %v6317_v38 }
0x2646   :  { %10461 = vmatpush3.msra.mxu1 %v6317_v38 }
0x2647   :  { %10462 = vmatprep.subr.mxu1 %v6312_v40 }
0x2648   :  { %10463 = vmatpush3.msra.mxu1 %v6312_v40 }
0x2649   :  { %10464 = vmatprep.subr.mxu1 %v6307_v41 }
0x264a   :  { %10465 = vmatpush3.msra.mxu1 %v6307_v41 }
0x264b   :  { %10466 = vmatprep.subr.mxu1 %v6302_v42 }
0x264c   :  { %10467 = vmatpush3.msra.mxu1 %v6302_v42 }
0x264d   :  { %10468 = vmatprep.subr.mxu1 %v6297_v45 }
0x264e   :  { %10469 = vmatpush3.msra.mxu1 %v6297_v45 }
0x264f   :  { %10470 = vmatprep.subr.mxu1 %v6292_v46 }
0x2650   :  { %10471 = vmatpush3.msra.mxu1 %v6292_v46  ;;  %v6632_v46 = vld [vmem:[#allocation88 + $0x8] sm:$0xff] }
0x2651   :  { %10472 = vmatprep.subr.mxu1 %v6287_v48 }
0x2652   :  { %10473 = vmatpush3.msra.mxu1 %v6287_v48 }
0x2653   :  { %10474 = vmatprep.subr.mxu1 %v6282_v55 }
0x2654   :  { %10475 = vmatpush3.msra.mxu1 %v6282_v55 }
0x2655   :  { %10476 = vmatprep.subr.mxu1 %v6277_v25 }
0x2656   :  { %10477 = vmatpush3.msra.mxu1 %v6277_v25 }
0x2657   :  { %10478 = vmatprep.subr.mxu1 %v6272_v57 }
0x2658   :  { %10479 = vmatpush3.msra.mxu1 %v6272_v57 }
0x2659   :  { %10480 = vmatprep.subr.mxu1 %v6267_v10 }
0x265a   :  { %10481 = vmatpush3.msra.mxu1 %v6267_v10  ;;  %v6444_v10 = vld [vmem:[#allocation80 + $0x8] sm:$0xff] }
0x265b   :  { %10482 = vmatprep.subr.mxu1 %v6262_v51 }
0x265c   :  { %10483 = vmatpush3.msra.mxu1 %v6262_v51 }
0x265d   :  { %10485 = vmatmul.mubr.f32.vlgmr.msra.gmra.mxu1 %v6341_v54 }
0x265e   :  { %10491 = vmatprep.mubr.msk.f32.mxu1 %vm1772_vm1, %v6441_v32 }
0x271d   :  { %v10486_v59 = vpop.f32.mrf.mxu1 }
0x271e   :  { %v6426_v53 = vadd.f32 %v10486_v59, %v6352_v30 }
0x271f   :  { %v6420_v61 = vpop.f32.mrf.mxu1 }
0x2720   :  { %v6430_v62 = vadd.f32 3.0, %v6426_v53  ;;  %v6421_v63 = vadd.f32 %v6420_v61, %v6347_v60 }
0x2722   :  { %v6432_v0 = vmax.f32 %v6430_v62, 0.0  ;;  %v6429_v1 = vadd.f32 3.0, %v6421_v63 }
0x2724   :  { %v6434_v2 = vmin.f32 %v6432_v0, 6.0  ;;  %v6431_v3 = vmax.f32 %v6429_v1, 0.0 }
0x2726   :  { %v6436_v4 = vmul.f32 %v6434_v2, %v6426_v53  ;;  %v6433_v5 = vmin.f32 %v6431_v3, 6.0 }
0x2728   :  { %v6438_v6 = vmul.f32 0.16666667, %v6436_v4  ;;  %v6435_v7 = vmul.f32 %v6433_v5, %v6421_v63 }
0x272a   :  { %v14920_v8 = vadd.f32 %v6438_v6, %v14528_v16  ;;  %v6437_v11 = vmul.f32 0.16666667, %v6435_v7 }
0x272c   :  { %v14923_v12 = vadd.f32 %v6437_v11, %v14535_v18  ;;  %6649 = vrot.lane.b32.xlu1 %v14920_v8, %s13404_s21  ;;  %6639 = vrot.lane.b32.xlu0 %v14920_v8, %s13405_s13 }
0x272d   :  { %10487 = vmatprep.subr.mxu1 %v14920_v8 }
0x272e   :  { %10488 = vmatpush3.msra.mxu1 %v14920_v8 }
0x272f   :  { %10489 = vmatprep.subr.mxu1 %v14923_v12 }
0x2730   :  { %10490 = vmatpush3.msra.mxu1 %v14923_v12  ;;  %6647 = vrot.lane.b32.xlu1 %v14923_v12, %s13404_s21 }
0x2731   :  { %6637 = vrot.lane.b32.xlu0 %v14923_v12, %s13405_s13  ;;  %10492 = vmatmul.mubr.msk.f32.vlgmr.msra.gmra.mxu1 %vm1772_vm1, %v6442_v33 }
0x2732   :  { %10498 = vmatprep.mubr.msk.f32.mxu1 %vm1772_vm1, %v6536_v58 }
0x279e   :  { %v6650_v16 = vpop.permute.xlu1 %6649  ;;  %v6640_v18 = vpop.permute.xlu0 %6639 }
0x279f   :  { %v14938_v15 = vsel %vm1983_vm3, 0.0, %v6650_v16  ;;  %v14941_v14 = vsel %vm1983_vm3, 0.0, %v6640_v18  ;;  %v6537_v16 = vld [vmem:[#allocation85 + $0x8] sm:$0xff]  ;;  %v6788_v18 = vld [vmem:[#allocation91] sm:$0xff] }
0x27a0   :  { %v6656_v19 = vsel %vm1986_vm4, %v14938_v15, 0.0  ;;  %v6646_v17 = vsel %vm1986_vm4, %v14941_v14, 0.0 }
0x27a1   :  { %6691 = vrot.lane.b32.xlu1 %v6656_v19, %s13406_s12  ;;  %6685 = vrot.lane.b32.xlu0 %v6646_v17, %s13407_s28 }
0x27a2   :  { %v6648_v20 = vpop.permute.xlu1 %6647 }
0x27a3   :  { %v6638_v21 = vpop.permute.xlu0 %6637  ;;  %v14950_v24 = vsel %vm1983_vm3, 0.0, %v6648_v20  ;;  %v7103_v20 = vld [vmem:[#allocation98] sm:$0xff] }
0x27a4   :  { %v14953_v26 = vsel %vm1983_vm3, 0.0, %v6638_v21  ;;  %v6655_v28 = vsel %vm1986_vm4, %v14950_v24, 0.0 }
0x27a5   :  { %6677 = vrot.lane.b32.xlu1 %v6656_v19, %s13408_s4  ;;  %6671 = vrot.lane.b32.xlu0 %v6646_v17, %s13409_s30  ;;  %v6645_v29 = vsel %vm1986_vm4, %v14953_v26, 0.0 }
0x27a9   :  { %6689 = vrot.lane.b32.xlu1 %v6655_v28, %s13406_s12  ;;  %6683 = vrot.lane.b32.xlu0 %v6645_v29, %s13407_s28 }
0x27ad   :  { %6675 = vrot.lane.b32.xlu1 %v6655_v28, %s13408_s4  ;;  %6669 = vrot.lane.b32.xlu0 %v6645_v29, %s13409_s30 }
0x27b1   :  { %6659 = vrot.lane.b32.xlu1 %v6655_v28, %s13403_s20  ;;  %6661 = vrot.lane.b32.xlu0 %v6656_v19, %s13403_s20  ;;  %v6790_v19 = vld [vmem:[#allocation89] sm:$0xff] }
0x27b5   :  { %6699 = vperm.xlu1 %11000, %v6633_v22   ;;  %6704 = vperm.xlu0 %10999, %v6634_v27  }
0x27f1   :  { %v10493_v3 = vpop.f32.mrf.mxu1 }
0x27f3   :  { %v6527_v4 = vpop.f32.mrf.mxu1 }
0x2813   :  { %v6692_v9 = vpop.permute.xlu1 %6691  ;;  %v6686_v34 = vpop.permute.xlu0 %6685 }
0x2814   :  { %v6696_v35 = vsel %vm1772_vm1, %v6686_v34, %v6692_v9 }
0x2815   :  { %10501 = vmatprep.subr.mxu0 %v6696_v35 }
0x2816   :  { %10502 = vmatpush3.msra.mxu0 %v6696_v35 }
0x2817   :  { %v6678_v44 = vpop.permute.xlu1 %6677  ;;  %v6672_v36 = vpop.permute.xlu0 %6671 }
0x2818   :  { %v6682_v39 = vsel %vm1772_vm1, %v6672_v36, %v6678_v44 }
0x281b   :  { %v6690_v37 = vpop.permute.xlu1 %6689  ;;  %v6684_v47 = vpop.permute.xlu0 %6683 }
0x281c   :  { %v6695_v38 = vsel %vm1772_vm1, %v6684_v47, %v6690_v37  ;;  %v6789_v47 = vld [vmem:[#allocation91 + $0x8] sm:$0xff] }
0x281d   :  { %10503 = vmatprep.subr.mxu0 %v6695_v38 }
0x281e   :  { %10504 = vmatpush3.msra.mxu0 %v6695_v38 }
0x281f   :  { %v6676_v40 = vpop.permute.xlu1 %6675  ;;  %10505 = vmatprep.subr.mxu0 %v6682_v39  ;;  %v6670_v50 = vpop.permute.xlu0 %6669 }
0x2820   :  { %10506 = vmatpush3.msra.mxu0 %v6682_v39  ;;  %v6681_v41 = vsel %vm1772_vm1, %v6670_v50, %v6676_v40 }
0x2821   :  { %10507 = vmatprep.subr.mxu0 %v6681_v41 }
0x2822   :  { %10508 = vmatpush3.msra.mxu0 %v6681_v41 }
0x2823   :  { %v6660_v42 = vpop.permute.xlu1 %6659  ;;  %v6662_v43 = vpop.permute.xlu0 %6661 }
0x2824   :  { %v6666_v45 = vsel %vm1772_vm1, %v6646_v17, %v6662_v43  ;;  %v6665_v52 = vsel %vm1772_vm1, %v6645_v29, %v6660_v42  ;;  %v6791_v17 = vld [vmem:[#allocation89 + $0x8] sm:$0xff] }
0x2825   :  { %10509 = vmatprep.subr.mxu0 %v6666_v45 }
0x2826   :  { %10510 = vmatpush3.msra.mxu0 %v6666_v45 }
0x2827   :  { %10511 = vmatprep.subr.mxu0 %v6665_v52 }
0x2828   :  { %10512 = vmatpush3.msra.mxu0 %v6665_v52 }
0x2829   :  { %10514 = vmatmul.mubr.msk.f32.vlgmr.msra.gmra.mxu0 %vm2049_vm5, %v6632_v46  ;;  %v7102_v46 = vld [vmem:[#allocation100] sm:$0xff] }
0x2830   :  { %v6705_v48 = vpop.permute.xlu0 %6704  ;;  %v6700_v25 = vpop.permute.xlu1 %6699 }
0x28e9   :  { %v10515_v49 = vpop.f32.mrf.mxu0 }
0x28ea   :  { %v6785_v55 = vadd.f32 %v10515_v49, %v6705_v48 }
0x28eb   :  { %v6779_v56 = vpop.f32.mrf.mxu0 }
0x28ec   :  { %6806 = vrot.lane.b32.xlu1 %v6785_v55, %s13404_s21  ;;  %6796 = vrot.lane.b32.xlu0 %v6785_v55, %s13405_s13  ;;  %v6780_v57 = vadd.f32 %v6779_v56, %v6700_v25 }
0x28f0   :  { %6804 = vrot.lane.b32.xlu1 %v6780_v57, %s13404_s21  ;;  %6794 = vrot.lane.b32.xlu0 %v6780_v57, %s13405_s13 }
0x28f4   :  { %6447 = vperm.xlu1 %11000, %v6443_v23   ;;  %6452 = vperm.xlu0 %10999, %v6444_v10  }
0x295e   :  { %v6807_v51 = vpop.permute.xlu1 %6806  ;;  %v6797_v54 = vpop.permute.xlu0 %6796 }
0x295f   :  { %v6811_v30 = vsel %vm1983_vm3, 0.0, %v6807_v51  ;;  %v6801_v59 = vsel %vm1983_vm3, 0.0, %v6797_v54 }
0x2960   :  { %v6813_v53 = vsel %vm1986_vm4, %v6811_v30, 0.0  ;;  %v14986_v60 = vsel %vm1986_vm4, %v6801_v59, 0.0 }
0x2961   :  { %6848 = vrot.lane.b32.xlu1 %v6813_v53, %s13406_s12  ;;  %6842 = vrot.lane.b32.xlu0 %v14986_v60, %s13407_s28 }
0x2962   :  { %v6805_v61 = vpop.permute.xlu1 %6804  ;;  %v6795_v62 = vpop.permute.xlu0 %6794 }
0x2963   :  { %v6810_v63 = vsel %vm1983_vm3, 0.0, %v6805_v61  ;;  %v6800_v0 = vsel %vm1983_vm3, 0.0, %v6795_v62 }
0x2964   :  { %v6812_v1 = vsel %vm1986_vm4, %v6810_v63, 0.0  ;;  %v6802_v2 = vsel %vm1986_vm4, %v6800_v0, 0.0 }
0x2965   :  { %6834 = vrot.lane.b32.xlu1 %v6813_v53, %s13408_s4  ;;  %6828 = vrot.lane.b32.xlu0 %v14986_v60, %s13409_s30 }
0x2969   :  { %6846 = vrot.lane.b32.xlu1 %v6812_v1, %s13406_s12  ;;  %6840 = vrot.lane.b32.xlu0 %v6802_v2, %s13407_s28 }
0x296d   :  { %6832 = vrot.lane.b32.xlu1 %v6812_v1, %s13408_s4  ;;  %6826 = vrot.lane.b32.xlu0 %v6802_v2, %s13409_s30 }
0x296f   :  { %v6448_v5 = vpop.permute.xlu1 %6447  ;;  %v6453_v6 = vpop.permute.xlu0 %6452 }
0x2970   :  { %v6533_v7 = vadd.f32 %v10493_v3, %v6453_v6  ;;  %v6528_v11 = vadd.f32 %v6527_v4, %v6448_v5 }
0x2971   :  { %6816 = vrot.lane.b32.xlu1 %v6812_v1, %s13403_s20  ;;  %6818 = vrot.lane.b32.xlu0 %v6813_v53, %s13403_s20 }
0x2972   :  { %10494 = vmatprep.subr.mxu1 %v6533_v7 }
0x2973   :  { %10495 = vmatpush3.msra.mxu1 %v6533_v7  ;;  %v6945_v7 = vld [vmem:[#allocation94] sm:$0xff] }
0x2974   :  { %10496 = vmatprep.subr.mxu1 %v6528_v11  ;;  %10543 = vmatprep.mubr.msk.f32.mxu0 %vm2049_vm5, %v6945_v7 }
0x2975   :  { %7124 = vrot.lane.b32.xlu1 %v14938_v15, %s13408_s4  ;;  %7118 = vrot.lane.b32.xlu0 %v14941_v14, %s13409_s30 }
0x2976   :  { %10497 = vmatpush3.msra.mxu1 %v6528_v11 }
0x2977   :  { %10499 = vmatmul.mubr.msk.f32.vlgmr.msra.gmra.mxu1 %vm1772_vm1, %v6537_v16 }
0x2978   :  { %10528 = vmatprep.mubr.msk.f32.mxu1 %vm2049_vm5, %v6788_v18 }
0x2979   :  { %7122 = vrot.lane.b32.xlu1 %v14950_v24, %s13408_s4  ;;  %7116 = vrot.lane.b32.xlu0 %v14953_v26, %s13409_s30 }
0x297d   :  { %7106 = vrot.lane.b32.xlu1 %v14950_v24, %s13403_s20  ;;  %7108 = vrot.lane.b32.xlu0 %v14938_v15, %s13403_s20 }
0x2981   :  { %6856 = vperm.xlu1 %11000, %v6790_v19   ;;  %6861 = vperm.xlu0 %10999, %v6791_v17  }
0x2985   :  { %7132 = vperm.xlu0 %10999, %v7103_v20   ;;  %v7210_v20 = vld [vmem:[#allocation101] sm:$0xff] }
0x29d3   :  { %v6849_v21 = vpop.permute.xlu1 %6848  ;;  %v6843_v28 = vpop.permute.xlu0 %6842 }
0x29d4   :  { %v6853_v29 = vsel %vm1772_vm1, %v6843_v28, %v6849_v21  ;;  %v7313_v28 = vld [vmem:[#allocation104] sm:$0xff] }
0x29d5   :  { %10516 = vmatprep.subr.mxu1 %v6853_v29 }
0x29d6   :  { %10517 = vmatpush3.msra.mxu1 %v6853_v29 }
0x29d7   :  { %v6835_v31 = vpop.permute.xlu1 %6834  ;;  %v6829_v32 = vpop.permute.xlu0 %6828 }
0x29d8   :  { %v6839_v15 = vsel %vm1772_vm1, %v6829_v32, %v6835_v31 }
0x29db   :  { %v6847_v33 = vpop.permute.xlu1 %6846  ;;  %v6841_v22 = vpop.permute.xlu0 %6840 }
0x29dc   :  { %v6852_v24 = vsel %vm1772_vm1, %v6841_v22, %v6847_v33 }
0x29dd   :  { %10518 = vmatprep.subr.mxu1 %v6852_v24 }
0x29de   :  { %10519 = vmatpush3.msra.mxu1 %v6852_v24 }
0x29df   :  { %v6833_v27 = vpop.permute.xlu1 %6832  ;;  %v6827_v9 = vpop.permute.xlu0 %6826  ;;  %10520 = vmatprep.subr.mxu1 %v6839_v15 }
0x29e0   :  { %10521 = vmatpush3.msra.mxu1 %v6839_v15  ;;  %v6838_v34 = vsel %vm1772_vm1, %v6827_v9, %v6833_v27 }
0x29e1   :  { %10522 = vmatprep.subr.mxu1 %v6838_v34 }
0x29e2   :  { %10523 = vmatpush3.msra.mxu1 %v6838_v34 }
0x29e3   :  { %v6817_v35 = vpop.permute.xlu1 %6816  ;;  %v6819_v44 = vpop.permute.xlu0 %6818 }
0x29e4   :  { %v6823_v36 = vsel %vm1772_vm1, %v14986_v60, %v6819_v44  ;;  %v6822_v37 = vsel %vm1772_vm1, %v6802_v2, %v6817_v35 }
0x29e5   :  { %10524 = vmatprep.subr.mxu1 %v6823_v36 }
0x29e6   :  { %10525 = vmatpush3.msra.mxu1 %v6823_v36 }
0x29e7   :  { %v7125_v38 = vpop.permute.xlu1 %7124  ;;  %v7119_v39 = vpop.permute.xlu0 %7118  ;;  %10526 = vmatprep.subr.mxu1 %v6822_v37 }
0x29e8   :  { %v15026_v40 = vsel %vm1772_vm1, %v7119_v39, %v7125_v38  ;;  %10527 = vmatpush3.msra.mxu1 %v6822_v37  ;;  %v6946_v39 = vld [vmem:[#allocation94 + $0x8] sm:$0xff] }
0x29e9   :  { %10529 = vmatmul.mubr.msk.f32.vlgmr.msra.gmra.mxu1 %vm2049_vm5, %v6789_v47  ;;  %10546 = vmatprep.subr.mxu1 %v13410_v13 }
0x29ea   :  { %10547 = vmatpush3.msra.mxu1 %v15026_v40  ;;  %10554 = vmatprep.mubr.msk.f32.mxu1 %vm13411_vm6, %v13410_v13 }
0x29eb   :  { %v7123_v50 = vpop.permute.xlu1 %7122  ;;  %v7117_v41 = vpop.permute.xlu0 %7116  ;;  %10548 = vmatprep.subr.mxu1 %v13410_v13 }
0x29ec   :  { %v15035_v42 = vsel %vm1772_vm1, %v7117_v41, %v7123_v50 }
0x29ed   :  { %10549 = vmatpush3.msra.mxu1 %v15035_v42 }
0x29ee   :  { %10550 = vmatprep.subr.mxu1 %v13410_v13 }
0x29ef   :  { %v7107_v43 = vpop.permute.xlu1 %7106  ;;  %v7109_v45 = vpop.permute.xlu0 %7108 }
0x29f0   :  { %v15041_v52 = vsel %vm1772_vm1, %v14941_v14, %v7109_v45  ;;  %v15046_v48 = vsel %vm1772_vm1, %v14953_v26, %v7107_v43  ;;  %v7312_v14 = vld [vmem:[#allocation106] sm:$0xff] }
0x29f1   :  { %10551 = vmatpush3.msra.mxu1 %v15041_v52 }
0x29f2   :  { %10552 = vmatprep.subr.mxu1 %v13410_v13 }
0x29f3   :  { %10553 = vmatpush3.msra.mxu1 %v15046_v48 }
0x29f4   :  { %10555 = vmatmul.mubr.msk.f32.vlgmr.msra.gmra.mxu1 %vm4122_vm11, %v7102_v46  ;;  %10564 = vmatprep.subr.mxu1 %v13410_v13  ;;  %v7209_v46 = vld [vmem:[#allocation103] sm:$0xff] }
0x29f5   :  { %10565 = vmatpush3.msra.mxu1 %v14920_v8  ;;  %10568 = vmatprep.mubr.msk.f32.mxu1 %vm13411_vm6, %v13410_v13 }
0x29f6   :  { %10566 = vmatprep.subr.mxu1 %v13410_v13 }
0x29f7   :  { %10567 = vmatpush3.msra.mxu1 %v14923_v12 }
0x29f8   :  { %10578 = vmatprep.subr.mxu1 %v13410_v13  ;;  %10569 = vmatmul.mubr.msk.f32.vlgmr.msra.gmra.mxu1 %vm1772_vm1, %v7312_v14 }
0x29f9   :  { %10580 = vmatprep.mubr.msk.f32.mxu1 %vm13411_vm6, %v13410_v13 }
0x29fc   :  { %v6862_v55 = vpop.permute.xlu0 %6861  ;;  %v6857_v23 = vpop.permute.xlu1 %6856 }
0x2a00   :  { %v7133_v58 = vpop.permute.xlu0 %7132 }
0x2a37   :  { %v15061_v26 = vpop.f32.mrf.mxu1 }
0x2a39   :  { %v15063_v49 = vpop.f32.mrf.mxu1 }
0x2aa9   :  { %v10530_v56 = vpop.f32.mrf.mxu1 }
0x2aaa   :  { %v6942_v25 = vadd.f32 %v10530_v56, %v6862_v55 }
0x2aab   :  { %v6936_v57 = vpop.f32.mrf.mxu1 }
0x2aac   :  { %6963 = vrot.lane.b32.xlu0 %v6942_v25, %s13404_s21  ;;  %6953 = vrot.lane.b32.xlu1 %v6942_v25, %s13405_s13  ;;  %v6937_v10 = vadd.f32 %v6936_v57, %v6857_v23 }
0x2ab0   :  { %6961 = vrot.lane.b32.xlu0 %v6937_v10, %s13404_s21  ;;  %6951 = vrot.lane.b32.xlu1 %v6937_v10, %s13405_s13 }
0x2ab4   :  { %v7204_v51 = vpop.f32.mrf.mxu1 }
0x2ab5   :  { %v7205_v54 = vadd.f32 %v7204_v51, %v7133_v58 }
0x2ab6   :  { %v10556_v30 = vpop.f32.mrf.mxu1 }
0x2ab7   :  { %v7208_v59 = vmax.f32 %v7205_v54, 0.0 }
0x2ab8   :  { %v7388_v17 = vpop.f32.mrf.mxu1 }
0x2ab9   :  { %7216 = vrot.lane.b32.xlu0 %v7208_v59, %s13404_s21  ;;  %7212 = vrot.lane.b32.xlu1 %v7208_v59, %s13405_s13 }
0x2aba   :  { %v10570_v21 = vpop.f32.mrf.mxu1 }
0x2b1e   :  { %v6964_v53 = vpop.permute.xlu0 %6963  ;;  %v6954_v60 = vpop.permute.xlu1 %6953 }
0x2b1f   :  { %v6968_v61 = vsel %vm1983_vm3, 0.0, %v6964_v53  ;;  %v6958_v62 = vsel %vm1983_vm3, 0.0, %v6954_v60 }
0x2b20   :  { %v6970_v63 = vsel %vm1986_vm4, %v6968_v61, 0.0  ;;  %v6960_v0 = vsel %vm1986_vm4, %v6958_v62, 0.0 }
0x2b21   :  { %7005 = vrot.lane.b32.xlu0 %v6970_v63, %s13406_s12  ;;  %6999 = vrot.lane.b32.xlu1 %v6960_v0, %s13407_s28 }
0x2b22   :  { %v6962_v1 = vpop.permute.xlu0 %6961  ;;  %v6952_v2 = vpop.permute.xlu1 %6951 }
0x2b23   :  { %v6967_v3 = vsel %vm1983_vm3, 0.0, %v6962_v1  ;;  %v6957_v4 = vsel %vm1983_vm3, 0.0, %v6952_v2 }
0x2b24   :  { %v6969_v5 = vsel %vm1986_vm4, %v6967_v3, 0.0  ;;  %v6959_v6 = vsel %vm1986_vm4, %v6957_v4, 0.0  ;;  %v7394_v4 = vld [vmem:[#allocation109] sm:$0xf] }
0x2b25   :  { %6991 = vrot.lane.b32.xlu0 %v6970_v63, %s13408_s4  ;;  %6985 = vrot.lane.b32.xlu1 %v6960_v0, %s13409_s30 }
0x2b29   :  { %7003 = vrot.lane.b32.xlu0 %v6969_v5, %s13406_s12  ;;  %6997 = vrot.lane.b32.xlu1 %v6959_v6, %s13407_s28 }
0x2b2b   :  { %v7217_v11 = vpop.permute.xlu0 %7216  ;;  %v7213_v16 = vpop.permute.xlu1 %7212 }
0x2b2c   :  { %v7219_v18 = vsel %vm1983_vm3, 0.0, %v7217_v11  ;;  %v7215_v19 = vsel %vm1983_vm3, 0.0, %v7213_v16 }
0x2b2d   :  { %6989 = vrot.lane.b32.xlu0 %v6969_v5, %s13408_s4  ;;  %6983 = vrot.lane.b32.xlu1 %v6959_v6, %s13409_s30 }
0x2b31   :  { %6973 = vrot.lane.b32.xlu0 %v6969_v5, %s13403_s20  ;;  %6975 = vrot.lane.b32.xlu1 %v6970_v63, %s13403_s20  ;;  %v7395_v63 = vld [vmem:[#allocation107] sm:$0xf] }
0x2b35   :  { %7229 = vrot.lane.b32.xlu0 %v7219_v18, %s13408_s4  ;;  %7226 = vrot.lane.b32.xlu1 %v7215_v19, %s13409_s30 }
0x2b39   :  { %7235 = vperm.xlu0 %10999, %v7210_v20   ;;  %7221 = vrot.lane.b32.xlu1 %v7219_v18, %s13403_s20 }
0x2b3d   :  { %7316 = vperm.xlu1 %11000, %v7313_v28   ;;  %v7862_v28 = vld [vmem:[#allocation118] sm:$0xff] }
0x2b93   :  { %v7006_v29 = vpop.permute.xlu0 %7005  ;;  %v7000_v31 = vpop.permute.xlu1 %6999 }
0x2b94   :  { %v7010_v32 = vsel %vm1772_vm1, %v7000_v31, %v7006_v29 }
0x2b95   :  { %10531 = vmatprep.subr.mxu0 %v7010_v32 }
0x2b96   :  { %10532 = vmatpush3.msra.mxu0 %v7010_v32  ;;  %v7498_v32 = vld [vmem:[#allocation112 + $0x4] sm:$0xf] }
0x2b97   :  { %v6992_v33 = vpop.permute.xlu0 %6991  ;;  %v6986_v22 = vpop.permute.xlu1 %6985 }
0x2b98   :  { %v6996_v9 = vsel %vm1772_vm1, %v6986_v22, %v6992_v33 }
0x2b9b   :  { %v7004_v24 = vpop.permute.xlu0 %7003  ;;  %v6998_v15 = vpop.permute.xlu1 %6997 }
0x2b9c   :  { %v7009_v27 = vsel %vm1772_vm1, %v6998_v15, %v7004_v24  ;;  %v7681_v24 = vld [vmem:[#allocation115] sm:$0xf]  ;;  %v7497_v15 = vld [vmem:[#allocation112] sm:$0xf] }
0x2b9d   :  { %10533 = vmatprep.subr.mxu0 %v7009_v27 }
0x2b9e   :  { %10534 = vmatpush3.msra.mxu0 %v7009_v27 }
0x2b9f   :  { %v6990_v34 = vpop.permute.xlu0 %6989  ;;  %10535 = vmatprep.subr.mxu0 %v6996_v9  ;;  %v6984_v35 = vpop.permute.xlu1 %6983 }
0x2ba0   :  { %10536 = vmatpush3.msra.mxu0 %v6996_v9  ;;  %v6995_v44 = vsel %vm1772_vm1, %v6984_v35, %v6990_v34  ;;  %v7861_v9 = vld [vmem:[#allocation119] sm:$0xff] }
0x2ba1   :  { %10537 = vmatprep.subr.mxu0 %v6995_v44 }
0x2ba2   :  { %10538 = vmatpush3.msra.mxu0 %v6995_v44 }
0x2ba3   :  { %v6974_v36 = vpop.permute.xlu0 %6973  ;;  %v6976_v37 = vpop.permute.xlu1 %6975 }
0x2ba4   :  { %v6980_v47 = vsel %vm1772_vm1, %v6960_v0, %v6976_v37  ;;  %v6979_v38 = vsel %vm1772_vm1, %v6959_v6, %v6974_v36 }
0x2ba5   :  { %10539 = vmatprep.subr.mxu0 %v6980_v47 }
0x2ba6   :  { %10540 = vmatpush3.msra.mxu0 %v6980_v47 }
0x2ba7   :  { %v7230_v50 = vpop.permute.xlu0 %7229  ;;  %10541 = vmatprep.subr.mxu0 %v6979_v38  ;;  %v7227_v41 = vpop.permute.xlu1 %7226 }
0x2ba8   :  { %v7232_v43 = vsel %vm1772_vm1, %v7227_v41, %v7230_v50  ;;  %10542 = vmatpush3.msra.mxu0 %v6979_v38  ;;  %v7499_v41 = vld [vmem:[#allocation110] sm:$0xf] }
0x2ba9   :  { %10557 = vmatprep.subr.mxu0 %v13410_v13  ;;  %10544 = vmatmul.mubr.msk.f32.vlgmr.msra.gmra.mxu0 %vm2049_vm5, %v6946_v39 }
0x2baa   :  { %10558 = vmatpush3.msra.mxu0 %v7232_v43  ;;  %10561 = vmatprep.mubr.msk.f32.mxu0 %vm13411_vm6, %v13410_v13  ;;  %v7763_v43 = vld [vmem:[#allocation97] sm:$0xff] }
0x2bab   :  { %v7222_v45 = vpop.permute.xlu1 %7221  ;;  %10559 = vmatprep.subr.mxu0 %v13410_v13 }
0x2bac   :  { %v7224_v14 = vsel %vm1772_vm1, %v7215_v19, %v7222_v45 }
0x2bad   :  { %10560 = vmatpush3.msra.mxu0 %v7224_v14 }
0x2bae   :  { %10562 = vmatmul.mubr.msk.f32.vlgmr.msra.gmra.mxu0 %vm1772_vm1, %v7209_v46  ;;  %10571 = vmatprep.subr.mxu0 %v13410_v13 }
0x2baf   :  { %10575 = vmatprep.mubr.msk.f32.mxu0 %vm13411_vm6, %v13410_v13 }
0x2bb4   :  { %v7236_v25 = vpop.permute.xlu0 %7235 }
0x2bb8   :  { %v7317_v57 = vpop.permute.xlu1 %7316 }
0x2bb9   :  { %v7389_v51 = vadd.f32 %v7388_v17, %v7317_v57  ;;  %v7943_v57 = vld [vmem:[#allocation121] sm:$0xff] }
0x2c69   :  { %v15112_v55 = vpop.f32.mrf.mxu0 }
0x2c6b   :  { %v15114_v56 = vpop.f32.mrf.mxu0 }
0x2c6e   :  { %v7307_v23 = vpop.f32.mrf.mxu0 }
0x2c6f   :  { %v7308_v10 = vadd.f32 %v7307_v23, %v7236_v25  ;;  %v8046_v23 = vld [vmem:[#allocation124] sm:$0xff] }
0x2c70   :  { %v10563_v58 = vpop.f32.mrf.mxu0 }
0x2c71   :  { %v7311_v54 = vmax.f32 %v7308_v10, 0.0 }
0x2c73   :  { %v7392_v30 = vadd.f32 %v7389_v51, %v7311_v54 }
0x2c75   :  { %v7393_v59 = vmax.f32 %v7392_v30, 0.0 }
0x2c77   :  { %7401 = vrot.lane.b32.xlu1 %v7393_v59, %s13412_s17  ;;  %7397 = vrot.lane.b32.xlu0 %v7393_v59, %s13348_s2 }
0x2ce9   :  { %v7402_v53 = vpop.permute.xlu1 %7401  ;;  %v7398_v60 = vpop.permute.xlu0 %7397 }
0x2cea   :  { %v7404_v61 = vsel %vm2857_vm9, 0.0, %v7402_v53  ;;  %v7400_v62 = vsel %vm2857_vm9, 0.0, %v7398_v60  ;;  %v7764_v60 = vld [vmem:[#allocation97 + $0x8] sm:$0xff] }
0x2ceb   :  { %7414 = vrot.lane.b32.xlu1 %v7404_v61, %s13406_s12  ;;  %7411 = vrot.lane.b32.xlu0 %v7400_v62, %s13407_s28 }
0x2cef   :  { %7420 = vperm.xlu1 %11000, %v7395_v63   ;;  %7406 = vrot.lane.b32.xlu0 %v7404_v61, %s13403_s20 }
0x2d5d   :  { %v7415_v0 = vpop.permute.xlu1 %7414  ;;  %v7412_v1 = vpop.permute.xlu0 %7411 }
0x2d5e   :  { %v7417_v2 = vsel %vm1772_vm1, %v7412_v1, %v7415_v0  ;;  %v7942_v1 = vld [vmem:[#allocation122] sm:$0xff] }
0x2d5f   :  { %10572 = vmatpush3.msra.mxu0 %v7417_v2 }
0x2d60   :  { %10573 = vmatprep.subr.mxu0 %v13410_v13 }
0x2d61   :  { %v7407_v3 = vpop.permute.xlu0 %7406 }
0x2d62   :  { %v7409_v5 = vsel %vm1772_vm1, %v7400_v62, %v7407_v3  ;;  %v8045_v3 = vld [vmem:[#allocation125] sm:$0xff] }
0x2d63   :  { %10574 = vmatpush3.msra.mxu0 %v7409_v5 }
0x2d64   :  { %10576 = vmatmul.mubr.msk.f32.vlgmr.msra.gmra.mxu0 %vm1772_vm1, %v7394_v4  ;;  %10583 = vmatprep.subr.mxu0 %v13410_v13 }
0x2d65   :  { %10585 = vmatprep.mubr.msk.f32.mxu0 %vm13411_vm6, %v13410_v13 }
0x2d6a   :  { %v7421_v6 = vpop.permute.xlu1 %7420 }
0x2e24   :  { %v7492_v7 = vpop.f32.mrf.mxu0 }
0x2e25   :  { %v7493_v11 = vadd.f32 %v7492_v7, %v7421_v6 }
0x2e26   :  { %v10577_v16 = vpop.f32.mrf.mxu0 }
0x2e27   :  { %v7496_v18 = vmax.f32 %v7493_v11, 0.0 }
0x2e29   :  { %7505 = vrot.lane.b32.xlu1 %v7496_v18, %s13412_s17  ;;  %7501 = vrot.lane.b32.xlu0 %v7496_v18, %s13348_s2 }
0x2e9b   :  { %v7506_v19 = vpop.permute.xlu1 %7505  ;;  %v7502_v17 = vpop.permute.xlu0 %7501 }
0x2e9c   :  { %v7508_v20 = vsel %vm2857_vm9, 0.0, %v7506_v19  ;;  %v7504_v21 = vsel %vm2857_vm9, 0.0, %v7502_v17 }
0x2e9d   :  { %7518 = vrot.lane.b32.xlu1 %v7508_v20, %s13406_s12  ;;  %7515 = vrot.lane.b32.xlu0 %v7504_v21, %s13407_s28 }
0x2ea1   :  { %7865 = vperm.xlu1 %11000, %v7862_v28   ;;  %7510 = vrot.lane.b32.xlu0 %v7508_v20, %s13403_s20 }
0x2f0f   :  { %v7519_v29 = vpop.permute.xlu1 %7518  ;;  %v7516_v31 = vpop.permute.xlu0 %7515 }
0x2f10   :  { %v7521_v33 = vsel %vm1772_vm1, %v7516_v31, %v7519_v29 }
0x2f11   :  { %10579 = vmatpush3.msk.msra.mxu1 %vm1795_vm2, %v7521_v33 }
0x2f12   :  { %10581 = vmatmul.mubr.msk.f32.vlgmr.msra.gmra.mxu1 %vm1788_vm0, %v7498_v32  ;;  %10588 = vmatprep.subr.mxu1 %v13410_v13 }
0x2f13   :  { %10589 = vmatpush3.msra.mxu1 %v7393_v59  ;;  %v7511_v22 = vpop.permute.xlu0 %7510  ;;  %10590 = vmatprep.mubr.msk.f32.mxu1 %vm13411_vm6, %v13410_v13 }
0x2f14   :  { %v7513_v27 = vsel %vm1772_vm1, %v7504_v21, %v7511_v22  ;;  %10598 = vmatprep.subr.mxu1 %v13410_v13 }
0x2f15   :  { %10584 = vmatpush3.msk.msra.mxu0 %vm1795_vm2, %v7513_v27 }
0x2f16   :  { %10591 = vmatmul.mubr.msk.f32.vlgmr.msra.gmra.mxu1 %vm2774_vm8, %v7681_v24  ;;  %10586 = vmatmul.mubr.msk.f32.vlgmr.msra.gmra.mxu0 %vm1788_vm0, %v7497_v15  ;;  %v8128_v24 = vld [vmem:[#allocation127] sm:$0xf] }
0x2f17   :  { %10599 = vmatpush3.msra.mxu1 %v15026_v40  ;;  %10606 = vmatprep.mubr.msk.f32.mxu1 %vm13411_vm6, %v13410_v13 }
0x2f18   :  { %10600 = vmatprep.subr.mxu1 %v13410_v13  ;;  %10595 = vmatprep.mubr.msk.f32.mxu0 %vm1788_vm0, %v7763_v43 }
0x2f19   :  { %10601 = vmatpush3.msra.mxu1 %v15035_v42 }
0x2f1a   :  { %10602 = vmatprep.subr.mxu1 %v13410_v13 }
0x2f1b   :  { %10603 = vmatpush3.msra.mxu1 %v15041_v52 }
0x2f1c   :  { %10604 = vmatprep.subr.mxu1 %v13410_v13  ;;  %v7866_v52 = vpop.permute.xlu1 %7865 }
0x2f1d   :  { %10605 = vmatpush3.msra.mxu1 %v15046_v48  ;;  %v7682_v48 = vld [vmem:[#allocation113] sm:$0xf] }
0x2f1e   :  { %10607 = vmatmul.mubr.msk.f32.vlgmr.msra.gmra.mxu1 %vm4122_vm11, %v7861_v9  ;;  %10623 = vmatprep.subr.mxu1 %v13410_v13 }
0x2f1f   :  { %10627 = vmatprep.mubr.msk.f32.mxu1 %vm13411_vm6, %v13410_v13 }
0x2fd2   :  { %v7594_v40 = vpop.f32.mrf.mxu1 }
0x2fd4   :  { %v10582_v34 = vpop.f32.mrf.mxu1 }
0x2fd5   :  { %v8127_v34 = vld [vmem:[#allocation128] sm:$0xf] }
0x2fd6   :  { %v7757_v35 = vpop.f32.mrf.mxu1  ;;  %v7670_v42 = vpop.f32.mrf.mxu0 }
0x2fd7   :  { %v7671_v44 = vadd.f32 %v7670_v42, %v7594_v40 }
0x2fd8   :  { %v10592_v36 = vpop.f32.mrf.mxu1  ;;  %v10587_v37 = vpop.f32.mrf.mxu0 }
0x2fde   :  { %v7937_v47 = vpop.f32.mrf.mxu1 }
0x2fdf   :  { %v7938_v38 = vadd.f32 %v7937_v47, %v7866_v52 }
0x2fe0   :  { %v10608_v39 = vpop.f32.mrf.mxu1 }
0x2fe1   :  { %v7941_v50 = vmax.f32 %v7938_v38, 0.0 }
0x2fe3   :  { %7949 = vrot.lane.b32.xlu1 %v7941_v50, %s13404_s21  ;;  %7945 = vrot.lane.b32.xlu0 %v7941_v50, %s13405_s13  ;;  %s15569_s21 = sld [smem:[#allocation294_spill]]  ;;  %s13416_s13 = smov 112  }
0x2fe7   :  { %7685 = vperm.xlu1 %11000, %v7682_v48   ;;  %7676 = vperm.xlu0 %10999, %v7499_v41   ;;  %v8232_v48 = vld [vmem:[#allocation130] sm:$0xf]  ;;  %v8415_v41 = vld [vmem:[#allocation133] sm:$0xf] }
0x3055   :  { %v7950_v45 = vpop.permute.xlu1 %7949  ;;  %v7946_v46 = vpop.permute.xlu0 %7945 }
0x3056   :  { %v7952_v14 = vsel %vm1983_vm3, 0.0, %v7950_v45  ;;  %v7948_v25 = vsel %vm1983_vm3, 0.0, %v7946_v46  ;;  %v8230_v45 = vld [vmem:[#allocation131] sm:$0xf] }
0x3057   :  { %7962 = vrot.lane.b32.xlu1 %v7952_v14, %s13408_s4  ;;  %7959 = vrot.lane.b32.xlu0 %v7948_v25, %s13409_s30 }
0x305b   :  { %7968 = vperm.xlu1 %11000, %v7943_v57   ;;  %7954 = vrot.lane.b32.xlu0 %v7952_v14, %s13403_s20  ;;  %v8231_v57 = vld [vmem:[#allocation131 + $0x4] sm:$0xf] }
0x305f   :  { %8049 = vperm.xlu0 %10999, %v8046_v23  }
0x3062   :  { %v7686_v10 = vpop.permute.xlu1 %7685  ;;  %v7677_v58 = vpop.permute.xlu0 %7676 }
0x3063   :  { %v7679_v51 = vadd.f32 %v7677_v58, %v7671_v44  ;;  %v7758_v54 = vadd.f32 %v7757_v35, %v7686_v10  ;;  %v8414_v10 = vld [vmem:[#allocation134] sm:$0xf] }
0x3065   :  { %v7680_v30 = vmax.f32 %v7679_v51, 0.0 }
0x3067   :  { %v7761_v59 = vadd.f32 %v7758_v54, %v7680_v30 }
0x3069   :  { %v7762_v53 = vmax.f32 %v7761_v59, 0.0 }
0x306b   :  { %10593 = vmatprep.subr.msk.mxu0 %vm1795_vm2, %v7762_v53 }
0x306c   :  { %10594 = vmatpush3.msk.msra.mxu0 %vm1795_vm2, %v7762_v53 }
0x306d   :  { %10609 = vmatprep.subr.mxu0 %v13410_v13  ;;  %10596 = vmatmul.mubr.msk.f32.vlgmr.msra.gmra.mxu0 %vm1788_vm0, %v7764_v60 }
0x306e   :  { %10613 = vmatprep.mubr.msk.f32.mxu0 %vm13411_vm6, %v13410_v13 }
0x30c9   :  { %v7963_v61 = vpop.permute.xlu1 %7962  ;;  %v7960_v62 = vpop.permute.xlu0 %7959 }
0x30ca   :  { %v7965_v63 = vsel %vm1772_vm1, %v7960_v62, %v7963_v61 }
0x30cb   :  { %10610 = vmatpush3.msra.mxu0 %v7965_v63 }
0x30cc   :  { %10611 = vmatprep.subr.mxu0 %v13410_v13 }
0x30cd   :  { %v7955_v0 = vpop.permute.xlu0 %7954 }
0x30ce   :  { %v7957_v2 = vsel %vm1772_vm1, %v7948_v25, %v7955_v0 }
0x30cf   :  { %10612 = vmatpush3.msra.mxu0 %v7957_v2 }
0x30d0   :  { %10614 = vmatmul.mubr.msk.f32.vlgmr.msra.gmra.mxu0 %vm1772_vm1, %v7942_v1  ;;  %10616 = vmatprep.subr.mxu0 %v13410_v13 }
0x30d1   :  { %10617 = vmatpush3.msra.mxu0 %v14920_v8  ;;  %10620 = vmatprep.mubr.msk.f32.mxu0 %vm13411_vm6, %v13410_v13 }
0x30d2   :  { %10618 = vmatprep.subr.mxu0 %v13410_v13 }
0x30d3   :  { %10619 = vmatpush3.msra.mxu0 %v14923_v12 }
0x30d4   :  { %10621 = vmatmul.mubr.msk.f32.vlgmr.msra.gmra.mxu0 %vm1772_vm1, %v8045_v3  ;;  %10630 = vmatprep.subr.mxu0 %v13410_v13 }
0x30d5   :  { %10632 = vmatprep.mubr.msk.f32.mxu0 %vm13411_vm6, %v13410_v13 }
0x30d6   :  { %v7969_v6 = vpop.permute.xlu1 %7968 }
0x30da   :  { %v8050_v18 = vpop.permute.xlu0 %8049 }
0x312d   :  { %v15189_v4 = vpop.f32.mrf.mxu0 }
0x312f   :  { %v15191_v5 = vpop.f32.mrf.mxu0 }
0x3190   :  { %v8040_v7 = vpop.f32.mrf.mxu0 }
0x3191   :  { %v8041_v11 = vadd.f32 %v8040_v7, %v7969_v6 }
0x3192   :  { %v10615_v16 = vpop.f32.mrf.mxu0 }
0x3193   :  { %v8044_v17 = vmax.f32 %v8041_v11, 0.0 }
0x3194   :  { %v8121_v19 = vpop.f32.mrf.mxu0 }
0x3195   :  { %v8122_v20 = vadd.f32 %v8121_v19, %v8050_v18  ;;  %v8498_v18 = vld [vmem:[#allocation136] sm:$0x3] }
0x3196   :  { %v10622_v21 = vpop.f32.mrf.mxu0 }
0x3197   :  { %v8125_v28 = vadd.f32 %v8122_v20, %v8044_v17  ;;  %v8496_v17 = vld [vmem:[#allocation137] sm:$0x3] }
0x3199   :  { %v8126_v29 = vmax.f32 %v8125_v28, 0.0 }
0x319b   :  { %8134 = vrot.lane.b32.xlu0 %v8126_v29, %s13412_s17  ;;  %8130 = vrot.lane.b32.xlu1 %v8126_v29, %s13348_s2 }
0x320d   :  { %v8135_v31 = vpop.permute.xlu0 %8134  ;;  %v8131_v32 = vpop.permute.xlu1 %8130 }
0x320e   :  { %v8137_v33 = vsel %vm2857_vm9, 0.0, %v8135_v31  ;;  %v8133_v22 = vsel %vm2857_vm9, 0.0, %v8131_v32 }
0x320f   :  { %8147 = vrot.lane.b32.xlu0 %v8137_v33, %s13406_s12  ;;  %8144 = vrot.lane.b32.xlu1 %v8133_v22, %s13407_s28 }
0x3213   :  { %8153 = vperm.xlu0 %10999, %v8128_v24   ;;  %8139 = vrot.lane.b32.xlu1 %v8137_v33, %s13403_s20 }
0x3281   :  { %v8148_v15 = vpop.permute.xlu0 %8147  ;;  %v8145_v27 = vpop.permute.xlu1 %8144 }
0x3282   :  { %v8150_v9 = vsel %vm1772_vm1, %v8145_v27, %v8148_v15 }
0x3283   :  { %10624 = vmatpush3.msra.mxu1 %v8150_v9 }
0x3284   :  { %10625 = vmatprep.subr.mxu1 %v13410_v13 }
0x3285   :  { %v8140_v40 = vpop.permute.xlu1 %8139 }
0x3286   :  { %v8142_v35 = vsel %vm1772_vm1, %v8133_v22, %v8140_v40 }
0x3287   :  { %10626 = vmatpush3.msra.mxu1 %v8142_v35 }
0x3288   :  { %10628 = vmatmul.mubr.msk.f32.vlgmr.msra.gmra.mxu1 %vm1772_vm1, %v8127_v34  ;;  %10635 = vmatprep.subr.mxu1 %v13410_v13 }
0x3289   :  { %10637 = vmatprep.mubr.msk.f32.mxu1 %vm13411_vm6, %v13410_v13 }
0x328e   :  { %v8154_v42 = vpop.permute.xlu0 %8153 }
0x3348   :  { %v8225_v44 = vpop.f32.mrf.mxu1 }
0x3349   :  { %v8226_v36 = vadd.f32 %v8225_v44, %v8154_v42 }
0x334a   :  { %v10629_v37 = vpop.f32.mrf.mxu1 }
0x334b   :  { %v8229_v52 = vmax.f32 %v8226_v36, 0.0  ;;  %v8682_v36 = vld [vmem:[#allocation139] sm:$0x3]  ;;  %v8865_v37 = vld [vmem:[#allocation142] sm:$0x3] }
0x334d   :  { %8238 = vrot.lane.b32.xlu0 %v8229_v52, %s13412_s17  ;;  %8234 = vrot.lane.b32.xlu1 %v8229_v52, %s13348_s2  ;;  %v8951_v52 = vld [vmem:[#allocation116 + $0x8] sm:$0xff]  ;;  %s15567_s2 = sld [smem:[#allocation272_spill]] }
0x33bf   :  { %v8239_v47 = vpop.permute.xlu0 %8238  ;;  %v8235_v38 = vpop.permute.xlu1 %8234 }
0x33c0   :  { %v8241_v39 = vsel %vm2857_vm9, 0.0, %v8239_v47  ;;  %v8237_v50 = vsel %vm2857_vm9, 0.0, %v8235_v38  ;;  %v8950_v47 = vld [vmem:[#allocation116] sm:$0xff] }
0x33c1   :  { %8243 = vrot.lane.b32.xlu1 %v8241_v39, %s13403_s20  ;;  %8248 = vrot.lane.b32.xlu0 %v8237_v50, %s13407_s28  ;;  %v7766_v38 = vld [vmem:[#allocation95 + $0x8] sm:$0xff] }
0x33c5   :  { %8251 = vrot.lane.b32.xlu1 %v8241_v39, %s13406_s12  ;;  %8409 = vperm.xlu0 %10999, %v8232_v48   ;;  %v7765_v39 = vld [vmem:[#allocation95] sm:$0xff]  ;;  %s13417_s12 = smov [#allocation155]  }
0x33c6   :  { %v6947_v48 = vld [vmem:[#allocation92] sm:$0xff]  ;;  %s9470_s28 = sshll.u32 %s13417_s12, 4  ;;  %s9471_s28 = int_to_ptr.vmem [resolvable:$true] %s9470_s28 }
0x33c7   :  { %s13041_s4 = scalar_lea.vmem %s9471_s28, 512  ;;  %p13046_p7 = scmp.lt.s32.totalorder %s9471_s28, %s9471_s28 }
0x33c8   :  { %p13042_p6 = scmp.ne.s32.totalorder %s9471_s28, %s13041_s4  ;;  %p13047_p8 = scmp.lt.s32.totalorder %s13041_s4, %s13041_s4 }
0x33c9   :  { %8418 = vperm.xlu1 %11000, %v8415_v41   ;;  %v6539_v41 = vld [vmem:[#allocation83 + $0x8] sm:$0xff] }
0x33ca   :  { %p13048_p9 = por %p13047_p8, %p13046_p7 }
0x33cc   :  { %p13049_p10 = pnand %p13048_p9, %p13042_p6 }
0x3433   :  { %v8244_v43 = vpop.permute.xlu1 %8243  ;;  %v8249_v14 = vpop.permute.xlu0 %8248 }
0x3434   :  { %v8246_v46 = vsel %vm1772_vm1, %v8237_v50, %v8244_v43  ;;  %v6948_v50 = vld [vmem:[#allocation92 + $0x8] sm:$0xff]  ;;  %v6538_v43 = vld [vmem:[#allocation83] sm:$0xff] }
0x3435   :  { %10636 = vmatpush3.msk.msra.mxu1 %vm1795_vm2, %v8246_v46  ;;  %v9076_v46 = vld [vmem:[#allocation145 + $0x70] sm:$0xff] }
0x3436   :  { %10638 = vmatmul.mubr.msk.f32.vlgmr.msra.gmra.mxu1 %vm1788_vm0, %v8230_v45  ;;  %10645 = vmatprep.subr.mxu1 %v13410_v13  ;;  %v9077_v45 = vld [vmem:[#allocation145 + $0x78] sm:$0xff] }
0x3437   :  { %v8252_v25 = vpop.permute.xlu1 %8251  ;;  %10647 = vmatprep.mubr.msk.f32.mxu1 %vm13411_vm6, %v13410_v13 }
0x3438   :  { %v8254_v23 = vsel %vm1772_vm1, %v8249_v14, %v8252_v25  ;;  %v9075_v14 = vld [vmem:[#allocation145 + $0x68] sm:$0xff]  ;;  %v9074_v25 = vld [vmem:[#allocation145 + $0x60] sm:$0xff] }
0x3439   :  { %10631 = vmatpush3.msk.msra.mxu0 %vm1795_vm2, %v8254_v23  ;;  %v9072_v23 = vld [vmem:[#allocation145 + $0x50] sm:$0xff] }
0x343a   :  { %10633 = vmatmul.mubr.msk.f32.vlgmr.msra.gmra.mxu0 %vm1788_vm0, %v8231_v57  ;;  %10640 = vmatprep.subr.mxu0 %v13410_v13  ;;  %v9073_v57 = vld [vmem:[#allocation145 + $0x58] sm:$0xff] }
0x343b   :  { %10641 = vmatpush3.msra.mxu0 %v8126_v29  ;;  %10642 = vmatprep.mubr.msk.f32.mxu0 %vm13411_vm6, %v13410_v13  ;;  %v8497_v29 = vld [vmem:[#allocation137 + $0x2] sm:$0x3] }
0x343c   :  { %10650 = vmatprep.subr.mxu0 %v13410_v13 }
0x343e   :  { %10643 = vmatmul.mubr.msk.f32.vlgmr.msra.gmra.mxu0 %vm2774_vm8, %v8414_v10  ;;  %v9071_v10 = vld [vmem:[#allocation145 + $0x48] sm:$0xff] }
0x343f   :  { %10652 = vmatprep.mubr.msk.f32.mxu0 %vm13411_vm6, %v13410_v13 }
0x3440   :  { %v8410_v59 = vpop.permute.xlu0 %8409 }
0x3444   :  { %v8419_v61 = vpop.permute.xlu1 %8418 }
0x34f6   :  { %v8403_v58 = vpop.f32.mrf.mxu1 }
0x34f8   :  { %v10639_v51 = vpop.f32.mrf.mxu1 }
0x34f9   :  { %v9069_v51 = vld [vmem:[#allocation145 + $0x38] sm:$0xff] }
0x34fa   :  { %v8327_v54 = vpop.f32.mrf.mxu0 }
0x34fb   :  { %v8404_v30 = vadd.f32 %v8403_v58, %v8327_v54  ;;  %v9070_v58 = vld [vmem:[#allocation145 + $0x40] sm:$0xff]  ;;  %v9068_v54 = vld [vmem:[#allocation145 + $0x30] sm:$0xff] }
0x34fc   :  { %v10634_v53 = vpop.f32.mrf.mxu0 }
0x34fd   :  { %v8412_v60 = vadd.f32 %v8410_v59, %v8404_v30  ;;  %v9067_v30 = vld [vmem:[#allocation145 + $0x28] sm:$0xff]  ;;  %v9066_v59 = vld [vmem:[#allocation145 + $0x20] sm:$0xff]  ;;  %v9065_v53 = vld [vmem:[#allocation145 + $0x18] sm:$0xff] }
0x34fe   :  { %v8490_v62 = vpop.f32.mrf.mxu0 }
0x34ff   :  { %v8413_v63 = vmax.f32 %v8412_v60, 0.0  ;;  %v8491_v0 = vadd.f32 %v8490_v62, %v8419_v61  ;;  %v9064_v60 = vld [vmem:[#allocation145 + $0x10] sm:$0xff]  ;;  %v9063_v61 = vld [vmem:[#allocation145 + $0x8] sm:$0xff]  ;;  %v9062_v62 = vld [vmem:[#allocation145] sm:$0xff] }
0x3500   :  { %v10644_v1 = vpop.f32.mrf.mxu0 }
0x3501   :  { %v8494_v2 = vadd.f32 %v8491_v0, %v8413_v63 }
0x3503   :  { %v15230_v3 = vmax.f32 %v8494_v2, 0.0  ;;  %v8680_v2 = vld [vmem:[#allocation140] sm:$0x3] }
0x3505   :  { %8504 = vrot.lane.b32.xlu1 %v15230_v3, %s13413_s23  ;;  %8500 = vrot.lane.b32.xlu0 %v15230_v3, %s13300_s1 }
0x3577   :  { %v8505_v6 = vpop.permute.xlu1 %8504  ;;  %v8501_v7 = vpop.permute.xlu0 %8500 }
0x3578   :  { %v8507_v11 = vsel %vm1788_vm0, 0.0, %v8505_v6  ;;  %v8503_v16 = vsel %vm1788_vm0, 0.0, %v8501_v7 }
0x3579   :  { %8509 = vrot.lane.b32.xlu0 %v8507_v11, %s13403_s20  ;;  %8514 = vrot.lane.b32.xlu1 %v8503_v16, %s13414_s26 }
0x357d   :  { %8517 = vrot.lane.b32.xlu0 %v8507_v11, %s13415_s6  ;;  %8675 = vperm.xlu1 %11000, %v8498_v18  }
0x35eb   :  { %v8510_v19 = vpop.permute.xlu0 %8509  ;;  %v8515_v21 = vpop.permute.xlu1 %8514 }
0x35ec   :  { %v8512_v20 = vsel %vm1772_vm1, %v8503_v16, %v8510_v19  ;;  %v8681_v16 = vld [vmem:[#allocation140 + $0x2] sm:$0x3]  ;;  %v8864_v19 = vld [vmem:[#allocation143] sm:$0x3] }
0x35ed   :  { %10651 = vmatpush3.msk.msra.mxu0 %vm1795_vm2, %v8512_v20 }
0x35ee   :  { %10653 = vmatmul.mubr.msk.f32.vlgmr.msra.gmra.mxu0 %vm1788_vm0, %v8496_v17  ;;  %10660 = vmatprep.subr.mxu0 %v13410_v13  ;;  %v8948_v17 = vld [vmem:[%s15567_s2] sm:$0xff] }
0x35ef   :  { %v8518_v28 = vpop.permute.xlu0 %8517  ;;  %10662 = vmatprep.mubr.msk.f32.mxu0 %vm13411_vm6, %v13410_v13 }
0x35f0   :  { %v8520_v31 = vsel %vm1772_vm1, %v8515_v21, %v8518_v28 }
0x35f1   :  { %10646 = vmatpush3.msk.msra.mxu1 %vm1795_vm2, %v8520_v31 }
0x35f2   :  { %10648 = vmatmul.mubr.msk.f32.vlgmr.msra.gmra.mxu1 %vm1788_vm0, %v8497_v29  ;;  %10655 = vmatprep.subr.mxu1 %v13410_v13 }
0x35f3   :  { %10657 = vmatprep.mubr.msk.f32.mxu1 %vm13411_vm6, %v13410_v13 }
0x35f8   :  { %v8676_v15 = vpop.permute.xlu1 %8675 }
0x36ae   :  { %v8669_v32 = vpop.f32.mrf.mxu0 }
0x36b0   :  { %v10654_v33 = vpop.f32.mrf.mxu0 }
0x36b2   :  { %v8593_v22 = vpop.f32.mrf.mxu1 }
0x36b3   :  { %v8670_v24 = vadd.f32 %v8669_v32, %v8593_v22 }
0x36b4   :  { %v10649_v27 = vpop.f32.mrf.mxu1 }
0x36b5   :  { %v8678_v9 = vadd.f32 %v8676_v15, %v8670_v24 }
0x36b7   :  { %v8679_v40 = vmax.f32 %v8678_v9, 0.0 }
0x36b9   :  { %8688 = vrot.lane.b32.xlu1 %v8679_v40, %s13413_s23  ;;  %8684 = vrot.lane.b32.xlu0 %v8679_v40, %s13300_s1  ;;  %s15566_s1 = sld [smem:[#allocation293_spill]]  ;;  %v8949_v40 = vld [vmem:[%s15567_s2 + $0x8] sm:$0xff] }
0x36bf   :  { %v9353_v63 = vld [vmem:[%s15566_s1] sm:$0xff]  ;;  %v9354_v0 = vld [vmem:[%s15566_s1 + $0x8] sm:$0xff] }
0x372b   :  { %v8689_v34 = vpop.permute.xlu1 %8688  ;;  %v8685_v35 = vpop.permute.xlu0 %8684 }
0x372c   :  { %v8691_v42 = vsel %vm1788_vm0, 0.0, %v8689_v34  ;;  %v15257_v44 = vsel %vm1788_vm0, 0.0, %v8685_v35 }
0x372d   :  { %8693 = vrot.lane.b32.xlu0 %v8691_v42, %s13403_s20  ;;  %8698 = vrot.lane.b32.xlu1 %v15257_v44, %s13414_s26  ;;  %s15568_s20 = sld [smem:[#allocation292_spill]] }
0x3731   :  { %8701 = vrot.lane.b32.xlu0 %v8691_v42, %s13415_s6  ;;  %8859 = vperm.xlu1 %11000, %v8682_v36  }
0x3733   :  { %v9046_v34 = vld [vmem:[%s15568_s20] sm:$0xff] }
0x3735   :  { %8868 = vperm.xlu0 %10999, %v8865_v37   ;;  %8959 = vperm.xlu1 %11000, %v8951_v52  }
0x3739   :  { %8954 = vperm.xlu0 %10999, %v8950_v47   ;;  %7774 = vperm.xlu1 %11000, %v7766_v38  }
0x373d   :  { %7769 = vperm.xlu0 %10999, %v7765_v39   ;;  %7018 = vperm.xlu1 %11000, %v6948_v50  }
0x3741   :  { %7013 = vperm.xlu0 %10999, %v6947_v48   ;;  %6547 = vperm.xlu1 %11000, %v6539_v41  }
0x3745   :  { %6542 = vperm.xlu0 %10999, %v6538_v43   ;;  %9155 = vperm.xlu1 %11000, %v9077_v45  }
0x3749   :  { %9150 = vperm.xlu0 %10999, %v9076_v46   ;;  %9145 = vperm.xlu1 %11000, %v9075_v14  }
0x374d   :  { %9140 = vperm.xlu0 %10999, %v9074_v25   ;;  %9135 = vperm.xlu1 %11000, %v9073_v57   ;;  %v9050_v25 = vld [vmem:[%s15568_s20 + $0x20] sm:$0xff]  ;;  %v9052_v57 = vld [vmem:[%s15568_s20 + $0x30] sm:$0xff] }
0x3751   :  { %9130 = vperm.xlu0 %10999, %v9072_v23   ;;  %9125 = vperm.xlu1 %11000, %v9071_v10   ;;  %v9053_v23 = vld [vmem:[%s15568_s20 + $0x38] sm:$0xff]  ;;  %v9054_v10 = vld [vmem:[%s15568_s20 + $0x40] sm:$0xff] }
0x3755   :  { %9120 = vperm.xlu0 %10999, %v9070_v58   ;;  %9115 = vperm.xlu1 %11000, %v9069_v51   ;;  %v9055_v58 = vld [vmem:[%s15568_s20 + $0x48] sm:$0xff]  ;;  %v9056_v51 = vld [vmem:[%s15568_s20 + $0x50] sm:$0xff] }
0x3759   :  { %9110 = vperm.xlu0 %10999, %v9068_v54   ;;  %9105 = vperm.xlu1 %11000, %v9067_v30   ;;  %v9057_v54 = vld [vmem:[%s15568_s20 + $0x58] sm:$0xff]  ;;  %v9058_v30 = vld [vmem:[%s15568_s20 + $0x60] sm:$0xff] }
0x375d   :  { %9100 = vperm.xlu0 %10999, %v9066_v59   ;;  %9095 = vperm.xlu1 %11000, %v9065_v53   ;;  %v9059_v59 = vld [vmem:[%s15568_s20 + $0x68] sm:$0xff]  ;;  %v9060_v53 = vld [vmem:[%s15568_s20 + $0x70] sm:$0xff] }
0x3761   :  { %9090 = vperm.xlu0 %10999, %v9064_v60   ;;  %9085 = vperm.xlu1 %11000, %v9063_v61   ;;  %v9061_v60 = vld [vmem:[%s15568_s20 + $0x78] sm:$0xff]  ;;  %v9351_v61 = vld [vmem:[%s15569_s21] sm:$0xff] }
0x3765   :  { %9080 = vperm.xlu0 %10999, %v9062_v62   ;;  %9357 = vperm.xlu1 %11000, %v9353_v63  }
0x3769   :  { %9362 = vperm.xlu0 %10999, %v9354_v0  }
0x379f   :  { %v8694_v1 = vpop.permute.xlu0 %8693  ;;  %v8699_v7 = vpop.permute.xlu1 %8698 }
0x37a0   :  { %v8696_v6 = vsel %vm1772_vm1, %v15257_v44, %v8694_v1 }
0x37a1   :  { %10661 = vmatpush3.msk.msra.mxu0 %vm3063_vm10, %v8696_v6 }
0x37a2   :  { %10663 = vmatmul.mubr.msk.f32.vlgmr.msra.gmra.mxu0 %vm2857_vm9, %v8680_v2 }
0x37a3   :  { %v8702_v11 = vpop.permute.xlu0 %8701  ;;  %10672 = vmatprep.mubr.msk.f32.mxu0 %vm2857_vm9, %v8948_v17 }
0x37a4   :  { %v8704_v18 = vsel %vm1772_vm1, %v8699_v7, %v8702_v11 }
0x37a5   :  { %10656 = vmatpush3.msk.msra.mxu1 %vm3063_vm10, %v8704_v18 }
0x37a6   :  { %10658 = vmatmul.mubr.msk.f32.vlgmr.msra.gmra.mxu1 %vm2857_vm9, %v8681_v16  ;;  %10665 = vmatprep.subr.mxu1 %v13410_v13 }
0x37a7   :  { %10666 = vmatpush3.msk.msra.mxu1 %vm1795_vm2, %v15230_v3  ;;  %10667 = vmatprep.mubr.msk.f32.mxu1 %vm13411_vm6, %v13410_v13 }
0x37aa   :  { %10668 = vmatmul.mubr.msk.f32.vlgmr.msra.gmra.mxu1 %vm1788_vm0, %v8864_v19 }
0x37ab   :  { %10691 = vmatprep.mubr.msk.f32.mxu1 %vm6146_vm12, %v9046_v34 }
0x37ac   :  { %v8860_v31 = vpop.permute.xlu1 %8859 }
0x37b0   :  { %v8869_v22 = vpop.permute.xlu0 %8868  ;;  %v8960_v35 = vpop.permute.xlu1 %8959 }
0x37b4   :  { %v8955_v42 = vpop.permute.xlu0 %8954  ;;  %v7775_v44 = vpop.permute.xlu1 %7774 }
0x37b5   :  { %v7858_v50 = vadd.f32 %v15189_v4, %v7775_v44 }
0x37b8   :  { %v7770_v36 = vpop.permute.xlu0 %7769  ;;  %v7019_v39 = vpop.permute.xlu1 %7018 }
0x37b9   :  { %v7853_v41 = vadd.f32 %v15191_v5, %v7770_v36  ;;  %v7099_v43 = vadd.f32 %v15112_v55, %v7019_v39  ;;  %v9047_v55 = vld [vmem:[%s15568_s20 + $0x8] sm:$0xff] }
0x37bc   :  { %v7014_v48 = vpop.permute.xlu0 %7013  ;;  %v6548_v45 = vpop.permute.xlu1 %6547 }
0x37bd   :  { %v7094_v46 = vadd.f32 %v15114_v56, %v7014_v48  ;;  %v6628_v14 = vadd.f32 %v15061_v26, %v6548_v45  ;;  %v9048_v56 = vld [vmem:[%s15568_s20 + $0x10] sm:$0xff]  ;;  %v9049_v26 = vld [vmem:[%s15568_s20 + $0x18] sm:$0xff] }
0x37c0   :  { %v6543_v4 = vpop.permute.xlu0 %6542  ;;  %v9156_v11 = vpop.permute.xlu1 %9155 }
0x37c1   :  { %v6623_v5 = vadd.f32 %v15063_v49, %v6543_v4  ;;  %v9051_v49 = vld [vmem:[%s15568_s20 + $0x28] sm:$0xff] }
0x37c4   :  { %v9151_v18 = vpop.permute.xlu0 %9150 }
0x3862   :  { %v8853_v20 = vpop.f32.mrf.mxu0 }
0x3864   :  { %v10664_v21 = vpop.f32.mrf.mxu0 }
0x3866   :  { %v8777_v28 = vpop.f32.mrf.mxu1 }
0x3867   :  { %v8854_v29 = vadd.f32 %v8853_v20, %v8777_v28  ;;  %v9146_v20 = vpop.permute.xlu1 %9145  ;;  %v9141_v28 = vpop.permute.xlu0 %9140 }
0x3868   :  { %v10659_v32 = vpop.f32.mrf.mxu1 }
0x3869   :  { %v8862_v33 = vadd.f32 %v8860_v31, %v8854_v29 }
0x386a   :  { %v8942_v3 = vpop.f32.mrf.mxu1 }
0x386b   :  { %v8863_v24 = vmax.f32 %v8862_v33, 0.0  ;;  %v8943_v15 = vadd.f32 %v8942_v3, %v8869_v22  ;;  %v9136_v32 = vpop.permute.xlu1 %9135  ;;  %v9131_v22 = vpop.permute.xlu0 %9130 }
0x386c   :  { %v10669_v13 = vpop.f32.mrf.mxu1 }
0x386d   :  { %v8946_v27 = vadd.f32 %v8943_v15, %v8863_v24 }
0x386f   :  { %v8947_v9 = vmax.f32 %v8946_v27, 0.0  ;;  %v9126_v27 = vpop.permute.xlu1 %9125 }
0x3871   :  { %10670 = vmatprep.subr.msk.mxu0 %vm3063_vm10, %v8947_v9 }
0x3872   :  { %10671 = vmatpush3.msk.msra.mxu0 %vm3063_vm10, %v8947_v9 }
0x3873   :  { %10673 = vmatmul.mubr.msk.f32.vlgmr.msra.gmra.mxu0 %vm2857_vm9, %v8949_v40  ;;  %v9121_v40 = vpop.permute.xlu0 %9120 }
0x3874   :  { %10747 = vmatprep.mubr.f32.mxu0 %v9351_v61 }
0x3877   :  { %v9111_v36 = vpop.permute.xlu0 %9110 }
0x387b   :  { %v9101_v39 = vpop.permute.xlu0 %9100 }
0x387f   :  { %v9091_v45 = vpop.permute.xlu0 %9090 }
0x3933   :  { %v10674_v37 = vpop.f32.mrf.mxu0 }
0x3934   :  { %v9043_v52 = vadd.f32 %v10674_v37, %v8960_v35 }
0x3935   :  { %v9037_v47 = vpop.f32.mrf.mxu0 }
0x3936   :  { %v9038_v38 = vadd.f32 %v9037_v47, %v8955_v42  ;;  %10675 = vmatprep.subr.mxu1 %v9043_v52  ;;  %v9116_v42 = vpop.permute.xlu1 %9115 }
0x3937   :  { %10676 = vmatpush3.msra.mxu1 %v9043_v52 }
0x3938   :  { %10677 = vmatprep.subr.mxu1 %v9038_v38 }
0x3939   :  { %10678 = vmatpush3.msra.mxu1 %v9038_v38 }
0x393a   :  { %10679 = vmatprep.subr.mxu1 %v7858_v50  ;;  %v9106_v47 = vpop.permute.xlu1 %9105 }
0x393b   :  { %10680 = vmatpush3.msra.mxu1 %v7858_v50 }
0x393c   :  { %10681 = vmatprep.subr.mxu1 %v7853_v41 }
0x393d   :  { %10682 = vmatpush3.msra.mxu1 %v7853_v41 }
0x393e   :  { %10683 = vmatprep.subr.mxu1 %v7099_v43  ;;  %v9096_v41 = vpop.permute.xlu1 %9095 }
0x393f   :  { %10684 = vmatpush3.msra.mxu1 %v7099_v43 }
0x3940   :  { %10685 = vmatprep.subr.mxu1 %v7094_v46 }
0x3941   :  { %10686 = vmatpush3.msra.mxu1 %v7094_v46 }
0x3942   :  { %10687 = vmatprep.subr.mxu1 %v6628_v14 }
0x3943   :  { %10688 = vmatpush3.msra.mxu1 %v6628_v14  ;;  %v9086_v14 = vpop.permute.xlu1 %9085 }
0x3944   :  { %10689 = vmatprep.subr.mxu1 %v6623_v5 }
0x3945   :  { %10690 = vmatpush3.msra.mxu1 %v6623_v5 }
0x3946   :  { %10692 = vmatmul.mubr.msk.f32.vlgmr.msra.gmra.mxu1 %vm6146_vm12, %v9047_v55  ;;  %v9081_v55 = vpop.permute.xlu0 %9080 }
0x3947   :  { %10694 = vmatprep.mubr.msk.f32.mxu1 %vm6146_vm12, %v9048_v56 }
0x394a   :  { %10695 = vmatmul.mubr.msk.f32.gmra.mxu1 %vm6146_vm12, %v9049_v26  ;;  %v9352_v26 = vld [vmem:[%s15569_s21 + $0x8] sm:$0xff] }
0x394b   :  { %10697 = vmatprep.mubr.msk.f32.mxu1 %vm6146_vm12, %v9050_v25  ;;  %v9363_v25 = vpop.permute.xlu0 %9362 }
0x394e   :  { %10698 = vmatmul.mubr.msk.f32.gmra.mxu1 %vm6146_vm12, %v9051_v49 }
0x394f   :  { %10700 = vmatprep.mubr.msk.f32.mxu1 %vm6146_vm12, %v9052_v57 }
0x3952   :  { %10701 = vmatmul.mubr.msk.f32.gmra.mxu1 %vm6146_vm12, %v9053_v23  ;;  %v9358_v23 = vpop.permute.xlu1 %9357 }
0x3953   :  { %10703 = vmatprep.mubr.msk.f32.mxu1 %vm6146_vm12, %v9054_v10 }
0x3956   :  { %10704 = vmatmul.mubr.msk.f32.gmra.mxu1 %vm6146_vm12, %v9055_v58 }
0x3957   :  { %10706 = vmatprep.mubr.msk.f32.mxu1 %vm6146_vm12, %v9056_v51 }
0x395a   :  { %10707 = vmatmul.mubr.msk.f32.gmra.mxu1 %vm6146_vm12, %v9057_v54 }
0x395b   :  { %10709 = vmatprep.mubr.msk.f32.mxu1 %vm6146_vm12, %v9058_v30 }
0x395e   :  { %10710 = vmatmul.mubr.msk.f32.gmra.mxu1 %vm6146_vm12, %v9059_v59 }
0x395f   :  { %10712 = vmatprep.mubr.msk.f32.mxu1 %vm6146_vm12, %v9060_v53 }
0x3962   :  { %10713 = vmatmul.mubr.msk.f32.gmra.mxu1 %vm6146_vm12, %v9061_v60 }
0x3a06   :  { %v15323_v62 = vpop.f32.mrf.mxu1 }
0x3a07   :  { %v9278_v5 = vadd.f32 %v15323_v62, %v9086_v14 }
0x3a08   :  { %v15325_v63 = vpop.f32.mrf.mxu1 }
0x3a09   :  { %v9273_v56 = vadd.f32 %v15325_v63, %v9081_v55 }
0x3a0a   :  { %v10696_v0 = vpop.f32.mrf.mxu1 }
0x3a0b   :  { %v9288_v46 = vadd.f32 %v10696_v0, %v9096_v41 }
0x3a0c   :  { %v15327_v1 = vpop.f32.mrf.mxu1 }
0x3a0d   :  { %v9283_v4 = vadd.f32 %v15327_v1, %v9091_v45 }
0x3a0e   :  { %v10699_v2 = vpop.f32.mrf.mxu1 }
0x3a0f   :  { %v9298_v48 = vadd.f32 %v10699_v2, %v9106_v47 }
0x3a10   :  { %v9292_v6 = vpop.f32.mrf.mxu1 }
0x3a11   :  { %v9293_v43 = vadd.f32 %v9292_v6, %v9101_v39 }
0x3a12   :  { %v10702_v7 = vpop.f32.mrf.mxu1 }
0x3a13   :  { %v9308_v38 = vadd.f32 %v10702_v7, %v9116_v42 }
0x3a14   :  { %v9302_v16 = vpop.f32.mrf.mxu1 }
0x3a15   :  { %v9303_v50 = vadd.f32 %v9302_v16, %v9111_v36 }
0x3a16   :  { %v10705_v19 = vpop.f32.mrf.mxu1 }
0x3a17   :  { %v9318_v37 = vadd.f32 %v10705_v19, %v9126_v27 }
0x3a18   :  { %v9312_v17 = vpop.f32.mrf.mxu1 }
0x3a19   :  { %v9313_v52 = vadd.f32 %v9312_v17, %v9121_v40 }
0x3a1a   :  { %v10708_v21 = vpop.f32.mrf.mxu1 }
0x3a1b   :  { %v9328_v35 = vadd.f32 %v10708_v21, %v9136_v32 }
0x3a1c   :  { %v9322_v29 = vpop.f32.mrf.mxu1 }
0x3a1d   :  { %v9323_v44 = vadd.f32 %v9322_v29, %v9131_v22 }
0x3a1e   :  { %v10711_v31 = vpop.f32.mrf.mxu1 }
0x3a1f   :  { %v9338_v9 = vadd.f32 %v10711_v31, %v9146_v20 }
0x3a20   :  { %v9332_v33 = vpop.f32.mrf.mxu1 }
0x3a21   :  { %v9333_v34 = vadd.f32 %v9332_v33, %v9141_v28 }
0x3a22   :  { %v10714_v3 = vpop.f32.mrf.mxu1 }
0x3a23   :  { %v9348_v24 = vadd.f32 %v10714_v3, %v9156_v11 }
0x3a24   :  { %v9342_v15 = vpop.f32.mrf.mxu1 }
0x3a25   :  { %v9343_v13 = vadd.f32 %v9342_v15, %v9151_v18  ;;  %10715 = vmatprep.subr.mxu0 %v9348_v24 }
0x3a26   :  { %10716 = vmatpush3.msra.mxu0 %v9348_v24 }
0x3a27   :  { %10717 = vmatprep.subr.mxu0 %v9343_v13 }
0x3a28   :  { %10718 = vmatpush3.msra.mxu0 %v9343_v13 }
0x3a29   :  { %10719 = vmatprep.subr.mxu0 %v9338_v9 }
0x3a2a   :  { %10720 = vmatpush3.msra.mxu0 %v9338_v9 }
0x3a2b   :  { %10721 = vmatprep.subr.mxu0 %v9333_v34 }
0x3a2c   :  { %10722 = vmatpush3.msra.mxu0 %v9333_v34 }
0x3a2d   :  { %10723 = vmatprep.subr.mxu0 %v9328_v35 }
0x3a2e   :  { %10724 = vmatpush3.msra.mxu0 %v9328_v35 }
0x3a2f   :  { %10725 = vmatprep.subr.mxu0 %v9323_v44 }
0x3a30   :  { %10726 = vmatpush3.msra.mxu0 %v9323_v44 }
0x3a31   :  { %10727 = vmatprep.subr.mxu0 %v9318_v37 }
0x3a32   :  { %10728 = vmatpush3.msra.mxu0 %v9318_v37 }
0x3a33   :  { %10729 = vmatprep.subr.mxu0 %v9313_v52 }
0x3a34   :  { %10730 = vmatpush3.msra.mxu0 %v9313_v52 }
0x3a35   :  { %10731 = vmatprep.subr.mxu0 %v9308_v38 }
0x3a36   :  { %10732 = vmatpush3.msra.mxu0 %v9308_v38 }
0x3a37   :  { %10733 = vmatprep.subr.mxu0 %v9303_v50 }
0x3a38   :  { %10734 = vmatpush3.msra.mxu0 %v9303_v50 }
0x3a39   :  { %10735 = vmatprep.subr.mxu0 %v9298_v48 }
0x3a3a   :  { %10736 = vmatpush3.msra.mxu0 %v9298_v48 }
0x3a3b   :  { %10737 = vmatprep.subr.mxu0 %v9293_v43 }
0x3a3c   :  { %10738 = vmatpush3.msra.mxu0 %v9293_v43 }
0x3a3d   :  { %10739 = vmatprep.subr.mxu0 %v9288_v46 }
0x3a3e   :  { %10740 = vmatpush3.msra.mxu0 %v9288_v46 }
0x3a3f   :  { %10741 = vmatprep.subr.mxu0 %v9283_v4 }
0x3a40   :  { %10742 = vmatpush3.msra.mxu0 %v9283_v4 }
0x3a41   :  { %10743 = vmatprep.subr.mxu0 %v9278_v5 }
0x3a42   :  { %10744 = vmatpush3.msra.mxu0 %v9278_v5 }
0x3a43   :  { %10745 = vmatprep.subr.mxu0 %v9273_v56 }
0x3a44   :  { %10746 = vmatpush3.msra.mxu0 %v9273_v56 }
0x3a45   :  { %10748 = vmatmul.mubr.f32.vlgmr.msra.gmra.mxu0 %v9352_v26 }
0x3b05   :  { %v10749_v49 = vpop.f32.mrf.mxu0 }
0x3b06   :  { %v9437_v57 = vadd.f32 %v10749_v49, %v9363_v25 }
0x3b07   :  { %v9431_v10 = vpop.f32.mrf.mxu0 }
0x3b08   :  { %v9441_v58 = vadd.f32 3.0, %v9437_v57  ;;  %v9432_v51 = vadd.f32 %v9431_v10, %v9358_v23 }
0x3b0a   :  { %v9443_v54 = vmax.f32 %v9441_v58, 0.0  ;;  %v9440_v30 = vadd.f32 3.0, %v9432_v51 }
0x3b0c   :  { %v9445_v59 = vmin.f32 %v9443_v54, 6.0  ;;  %v9442_v53 = vmax.f32 %v9440_v30, 0.0 }
0x3b0e   :  { %v9447_v60 = vmul.f32 %v9445_v59, %v9437_v57  ;;  %v9444_v61 = vmin.f32 %v9442_v53, 6.0 }
0x3b10   :  { %v9449_v62 = vmul.f32 0.16666667, %v9447_v60  ;;  %v9446_v63 = vmul.f32 %v9444_v61, %v9432_v51 }
0x3b12   :  { %v9451_v0 = vadd.f32 %v9449_v62, %v14920_v8  ;;  %v9448_v1 = vmul.f32 0.16666667, %v9446_v63 }
0x3b14   :  { %9453 = vst.msk [vmem:[#allocation155 + $0x8] sm:$0xff] %vm1772_vm1, %v9451_v0  ;;  %v9450_v2 = vadd.f32 %v9448_v1, %v14923_v12  ;;  %9458 = vrot.lane.b32.xlu0 %v9451_v0, %s13416_s13 }
0x3b16   :  { %9452 = vst.msk [vmem:[#allocation155] sm:$0xff] %vm1772_vm1, %v9450_v2  ;;  %9456 = vrot.lane.b32.xlu1 %v9450_v2, %s13416_s13 }
0x3b86   :  { %v9459_v6 = vpop.permute.xlu0 %9458 }
0x3b87   :  { %9464 = vst.msk [vmem:[#allocation155 + $0x18] sm:$0xff] %vm1772_vm1, %v9459_v6 }
0x3b88   :  { %v9457_v7 = vpop.permute.xlu1 %9456 }
0x3b89   :  { %9463 = vst.msk [vmem:[#allocation155 + $0x10] sm:$0xff] %vm1772_vm1, %v9457_v7 }
0x3b8a   :  { %13052 = shalt.err (!%p13049_p10)
}
0x3b8b   :  { %9476 = dma.vmem_to_hbm [thread:$0]  %s9471_s28, 512, %s14051_s29, [#allocation4], %s13295_s11, %s13295_s11, %s13296_s15  }
0x3b8c   :  { %13167 = dma.done.wait [#allocation4], 512  }
0x3b8d   :  { %13168 = vsyncadd [#allocation4], 4294966784 }
0x3b8e   :  { %9480 = vsyncpa [#allocation3], 1 }
0x3b8f   :  { %9481 = vsyncpa [#allocation6], 1 }
0x3b90   :  { %9482 = vsyncpa [#allocation9], 1 }
0x3b91   :  { %9483 = vsyncpa [#allocation12], 1 }
0x3b92   :  { %9484 = vsyncpa [#allocation15], 1 }
0x3b93   :  { %9485 = vsyncpa [#allocation18], 1 }
0x3b94   :  { %9486 = vsyncpa [#allocation21], 1 }
0x3b95   :  { %9487 = vsyncpa [#allocation24], 1 }
0x3b96   :  { %9488 = vsyncpa [#allocation27], 1 }
0x3b97   :  { %9489 = vsyncpa [#allocation30], 1 }
0x3b98   :  { %9490 = vsyncpa [#allocation33], 1 }
0x3b99   :  { %9491 = vsyncpa [#allocation36], 1 }
0x3b9a   :  { %9492 = vsyncpa [#allocation39], 1 }
0x3b9b   :  { %9493 = vsyncpa [#allocation42], 1 }
0x3b9c   :  { %9494 = vsyncpa [#allocation45], 1 }
0x3b9d   :  { %9495 = vsyncpa [#allocation48], 1 }
0x3b9e   :  { %9496 = vsyncpa [#allocation51], 1 }
0x3b9f   :  { %9497 = vsyncpa [#allocation54], 1 }
0x3ba0   :  { %9498 = vsyncpa [#allocation57], 1 }
0x3ba1   :  { %9499 = vsyncpa [#allocation60], 1 }
0x3ba2   :  { %9500 = vsyncpa [#allocation63], 1 }
0x3ba3   :  { %9501 = vsyncpa [#allocation66], 1 }
0x3ba4   :  { %9502 = vsyncpa [#allocation69], 1 }
0x3ba5   :  { %9503 = vsyncpa [#allocation72], 1 }
0x3ba6   :  { %9504 = vsyncpa [#allocation75], 1 }
0x3ba7   :  { %9505 = vsyncpa [#allocation78], 1 }
0x3ba8   :  { %9506 = vsyncpa [#allocation81], 1 }
0x3ba9   :  { %9507 = vsyncpa [#allocation84], 1 }
0x3baa   :  { %9508 = vsyncpa [#allocation87], 1 }
0x3bab   :  { %9509 = vsyncpa [#allocation90], 1 }
0x3bac   :  { %9510 = vsyncpa [#allocation93], 1 }
0x3bad   :  { %9511 = vsyncpa [#allocation96], 1 }
0x3bae   :  { %9512 = vsyncpa [#allocation99], 1 }
0x3baf   :  { %9513 = vsyncpa [#allocation102], 1 }
0x3bb0   :  { %9514 = vsyncpa [#allocation105], 1 }
0x3bb1   :  { %9515 = vsyncpa [#allocation108], 1 }
0x3bb2   :  { %9516 = vsyncpa [#allocation111], 1 }
0x3bb3   :  { %9517 = vsyncpa [#allocation114], 1 }
0x3bb4   :  { %9518 = vsyncpa [#allocation117], 1 }
0x3bb5   :  { %9519 = vsyncpa [#allocation120], 1 }
0x3bb6   :  { %9520 = vsyncpa [#allocation123], 1 }
0x3bb7   :  { %9521 = vsyncpa [#allocation126], 1 }
0x3bb8   :  { %9522 = vsyncpa [#allocation129], 1 }
0x3bb9   :  { %9523 = vsyncpa [#allocation132], 1 }
0x3bba   :  { %9524 = vsyncpa [#allocation135], 1 }
0x3bbb   :  { %9525 = vsyncpa [#allocation138], 1 }
0x3bbc   :  { %9526 = vsyncpa [#allocation141], 1 }
0x3bbd   :  { %9527 = vsyncpa [#allocation144], 1 }
0x3bbe   :  { %9528 = vsyncpa [#allocation147], 1 }
0x3bbf   :  { %9529 = vsyncpa [#allocation150], 1 }
0x3bc0   :  { %9530 = vsyncpa [#allocation4], 1 }

</bundles_post_ra>
